<compile_context>
chip_gen: v6e
topology: v6e:2x2x1
jax: 0.10.0
libtpu: 0.0.40
codegen_flags: <defaults>
</compile_context>

<pallas_src>
import numpy as np
import jax
import jax.numpy as jnp
from jax.experimental import pallas as pl
from jax.experimental.pallas import tpu as pltpu

LANE = 128


def _round_up(x, m):
    return (x + m - 1) // m * m


# ----------------------------- Pallas kernel ------------------------------ #
def _conv_norm_act_kernel(p_ref, w_ref, memb_ref, membt_ref, o_ref):
    """Grid = (N_tiles,).  One fused conv-GEMM + NormActivation epilogue per voxel tile."""
    # conv as a single deep GEMM: [tile_n, K^3*Cin] @ [K^3*Cin, Cout_pad] -> f32
    y = jnp.dot(p_ref[...], w_ref[...], preferred_element_type=jnp.float32)
    # per-irrep 'component' squared norms via membership matmul (1/dim folded into memb columns)
    sq = jnp.dot(y * y, memb_ref[...], preferred_element_type=jnp.float32)      # [tile_n, G_pad]
    norm = jnp.sqrt(sq)
    gate = jax.nn.sigmoid(norm)                      # swish(norm)/norm == sigmoid(norm)
    scale = jnp.dot(gate, membt_ref[...], preferred_element_type=jnp.float32)   # [tile_n, Cout_pad]
    o_ref[...] = (y * scale).astype(o_ref.dtype)


# ------------------------------ JAX glue ---------------------------------- #
def _extract_patches(x, K):
    """'same'-padded shifted windows folded into the channel axis: [B*D*H*W, K^3*C].

    Channel ordering is (kd, kh, kw, c) row-major, matching w.reshape(K^3*Cin, Cout)."""
    B, D, H, W, C = x.shape
    p = K // 2
    xp = jnp.pad(x, ((0, 0), (p, p), (p, p), (p, p), (0, 0)))
    cols = []
    for kd in range(K):
        for kh in range(K):
            for kw in range(K):
                cols.append(jax.lax.slice(xp, (0, kd, kh, kw, 0),
                                          (B, kd + D, kh + H, kw + W, C)))
    return jnp.concatenate(cols, axis=-1).reshape(B * D * H * W, K * K * K * C)


def conv_norm_act(x, layer, tile_n=256):
    """x: [B, D, H, W, Cin] f32 -> [B, D, H, W, Cout] f32 (one fused ConvBlock)."""
    B, D, H, W, Cin = x.shape
    K = layer["K"]
    Cout = layer["cout"]
    wk = layer["wk"]            # [K^3*Cin, Cout_pad]  bf16
    memb = layer["memb"]        # [Cout_pad, G_pad]    f32 (1/dim folded in)
    membt = layer["membt"]      # [G_pad, Cout_pad]    f32
    KC, Cout_pad = wk.shape
    G_pad = memb.shape[1]

    N = B * D * H * W
    patches = _extract_patches(x, K).astype(jnp.bfloat16)          # [N, K^3*Cin]

    tile_n = min(tile_n, N)
    N_pad = _round_up(N, tile_n)
    if N_pad != N:
        patches = jnp.pad(patches, ((0, N_pad - N), (0, 0)))

    out = pl.pallas_call(
        _conv_norm_act_kernel,
        out_shape=jax.ShapeDtypeStruct((N_pad, Cout_pad), jnp.float32),
        grid_spec=pltpu.PrefetchScalarGridSpec(
            num_scalar_prefetch=0,
            grid=(N_pad // tile_n,),
            in_specs=[
                pl.BlockSpec((tile_n, KC), lambda n: (n, 0)),       # voxel tile of patches
                pl.BlockSpec((KC, Cout_pad), lambda n: (0, 0)),     # full weight, resident
                pl.BlockSpec((Cout_pad, G_pad), lambda n: (0, 0)),  # membership (scaled)
                pl.BlockSpec((G_pad, Cout_pad), lambda n: (0, 0)),  # membership^T
            ],
            out_specs=pl.BlockSpec((tile_n, Cout_pad), lambda n: (n, 0)),
        ),
        compiler_params=pltpu.CompilerParams(
            dimension_semantics=("parallel",)),
    )(patches, wk, memb, membt)

    return out[:N, :Cout].reshape(B, D, H, W, Cout)


# --------------------------- parameter setup ------------------------------ #
def _irrep_dims(mult_copies, lmax):
    # channel layout of `Rs * mult_copies` with Rs = [0, 1, ..., lmax]
    return [2 * l + 1 for _ in range(mult_copies) for l in range(lmax + 1)]


def _group_matrices(dims, cout_pad, g_pad):
    memb = np.zeros((cout_pad, g_pad), np.float32)
    membt = np.zeros((g_pad, cout_pad), np.float32)
    c = 0
    for g, d in enumerate(dims):
        memb[c:c + d, g] = 1.0 / d       # 'component' normalization folded in
        membt[g, c:c + d] = 1.0
        c += d
    return jnp.asarray(memb), jnp.asarray(membt)


def init_decode_params(key, size, mult, lmax, out_channels):
    mults = [mult // 8, mult // 4, mult // 2, mult]
    layers = []
    in_c = sum(_irrep_dims(mults[0], lmax))
    for i in range(4):
        if i < 3:
            out_dims = _irrep_dims(mults[i + 1], lmax)   # Rs * (next multiplicity)
        else:
            out_dims = [1] * out_channels                # Rs_out = [(out_channels, 0)]
        out_c = sum(out_dims)
        cout_pad = _round_up(out_c, LANE)
        g_pad = _round_up(len(out_dims), LANE)

        key, wkey = jax.random.split(key)
        w = jax.random.normal(wkey, (size, size, size, in_c, out_c), jnp.float32)
        w = w / np.sqrt(size ** 3 * in_c)
        wk = jnp.zeros((size ** 3 * in_c, cout_pad), jnp.float32)
        wk = wk.at[:, :out_c].set(w.reshape(size ** 3 * in_c, out_c))

        memb, membt = _group_matrices(out_dims, cout_pad, g_pad)
        layers.append(dict(K=size, cout=out_c,
                           wk=wk.astype(jnp.bfloat16),   # bf16 MXU operand; epilogue stays f32
                           memb=memb, membt=membt))
        in_c = out_c
    return layers


def make_decode(params):
    def fwd(x):
        for p in params:
            x = conv_norm_act(x, p)
        return x
    return jax.jit(fwd)


# --------------------------------- main ----------------------------------- #
if __name__ == "__main__":
    size, mult, lmax, out_channels = 3, 16, 1, 11
    B, S = 2, 8
    c_in = (mult // 8) * (lmax + 1) ** 2                 # 8 input channels
    x = jax.random.normal(jax.random.PRNGKey(0), (B, S, S, S, c_in), jnp.float32)
    params = init_decode_params(jax.random.PRNGKey(1), size, mult, lmax, out_channels)

    decode = make_decode(params)
    y = decode(x)
    jax.block_until_ready(y)
    assert y.shape == (B, S, S, S, out_channels), y.shape
    assert bool(jnp.all(jnp.isfinite(y)))
    print("KERNEL_OK")
</pallas_src>

<mosaic_0001>
module attributes {stable_mosaic.version = 11 : i64} {
  func.func @_conv_norm_act_kernel(%arg0: i32, %arg1: memref<256x216xbf16, #tpu.memory_space<vmem>>, %arg2: memref<216x128xbf16, #tpu.memory_space<vmem>>, %arg3: memref<128x128xf32, #tpu.memory_space<vmem>>, %arg4: memref<128x128xf32, #tpu.memory_space<vmem>>, %arg5: memref<256x128xf32, #tpu.memory_space<vmem>>) attributes {dimension_semantics = [#tpu.dimension_semantics<parallel>], iteration_bounds = array<i64: 4>, scalar_prefetch = 0 : i64, scratch_operands = 0 : i64, tpu.core_type = #tpu.core_type<tc>, window_params = [{transform_indices = @transform_0, window_bounds = array<i64: 256, 216>}, {pipeline_mode = #tpu.pipeline_mode<synchronous>, transform_indices = @transform_1, window_bounds = array<i64: 216, 128>}, {pipeline_mode = #tpu.pipeline_mode<synchronous>, transform_indices = @transform_2, window_bounds = array<i64: 128, 128>}, {pipeline_mode = #tpu.pipeline_mode<synchronous>, transform_indices = @transform_3, window_bounds = array<i64: 128, 128>}, {transform_indices = @transform_4, window_bounds = array<i64: 256, 128>}]} {
    %c0 = arith.constant 0 : index
    %c0_0 = arith.constant 0 : index
    %0 = vector.load %arg1[%c0, %c0_0] : memref<256x216xbf16, #tpu.memory_space<vmem>>, vector<256x216xbf16>
    %c0_1 = arith.constant 0 : index
    %c0_2 = arith.constant 0 : index
    %1 = vector.load %arg2[%c0_1, %c0_2] : memref<216x128xbf16, #tpu.memory_space<vmem>>, vector<216x128xbf16>
    %cst = arith.constant dense<0.000000e+00> : vector<256x128xf32>
    %2 = tpu.matmul %0, %1, %cst {dimension_numbers = #tpu.dot_dimension_numbers<[1], [0], [0], [1], [0, 0, 1, 1], [], []>} : vector<256x216xbf16>, vector<216x128xbf16>, vector<256x128xf32> -> vector<256x128xf32>
    %3 = arith.mulf %2, %2 : vector<256x128xf32>
    %c0_3 = arith.constant 0 : index
    %c0_4 = arith.constant 0 : index
    %4 = vector.load %arg3[%c0_3, %c0_4] : memref<128x128xf32, #tpu.memory_space<vmem>>, vector<128x128xf32>
    %cst_5 = arith.constant dense<0.000000e+00> : vector<256x128xf32>
    %5 = tpu.matmul %3, %4, %cst_5 {dimension_numbers = #tpu.dot_dimension_numbers<[1], [0], [0], [1], [0, 0, 1, 1], [], []>} : vector<256x128xf32>, vector<128x128xf32>, vector<256x128xf32> -> vector<256x128xf32>
    %6 = math.sqrt %5 : vector<256x128xf32>
    %7 = arith.negf %6 : vector<256x128xf32>
    %8 = math.exp %7 : vector<256x128xf32>
    %cst_6 = arith.constant 1.000000e+00 : f32
    %9 = vector.broadcast %cst_6 : f32 to vector<256x128xf32>
    %10 = arith.addf %9, %8 : vector<256x128xf32>
    %11 = arith.divf %9, %10 : vector<256x128xf32>
    %c0_7 = arith.constant 0 : index
    %c0_8 = arith.constant 0 : index
    %12 = vector.load %arg4[%c0_7, %c0_8] : memref<128x128xf32, #tpu.memory_space<vmem>>, vector<128x128xf32>
    %cst_9 = arith.constant dense<0.000000e+00> : vector<256x128xf32>
    %13 = tpu.matmul %11, %12, %cst_9 {dimension_numbers = #tpu.dot_dimension_numbers<[1], [0], [0], [1], [0, 0, 1, 1], [], []>} : vector<256x128xf32>, vector<128x128xf32>, vector<256x128xf32> -> vector<256x128xf32>
    %14 = arith.mulf %2, %13 : vector<256x128xf32>
    %c0_10 = arith.constant 0 : index
    %c0_11 = arith.constant 0 : index
    %15 = vector.load %arg5[%c0_10, %c0_11] : memref<256x128xf32, #tpu.memory_space<vmem>>, vector<256x128xf32>
    tpu.vector_store %arg5[%c0_10, %c0_11], %14 {strides = array<i32>} : memref<256x128xf32, #tpu.memory_space<vmem>>, vector<256x128xf32>,
    return
  }
  func.func @transform_0(%arg0: i32) -> (i32, i32) {
    %c0_i32 = arith.constant 0 : i32
    %c0_i32_0 = arith.constant 0 : i32
    return %arg0, %c0_i32 : i32, i32
  }
  func.func @transform_1(%arg0: i32) -> (i32, i32) {
    %c0_i32 = arith.constant 0 : i32
    %c0_i32_0 = arith.constant 0 : i32
    %c0_i32_1 = arith.constant 0 : i32
    return %c0_i32, %c0_i32_0 : i32, i32
  }
  func.func @transform_2(%arg0: i32) -> (i32, i32) {
    %c0_i32 = arith.constant 0 : i32
    %c0_i32_0 = arith.constant 0 : i32
    %c0_i32_1 = arith.constant 0 : i32
    return %c0_i32, %c0_i32_0 : i32, i32
  }
  func.func @transform_3(%arg0: i32) -> (i32, i32) {
    %c0_i32 = arith.constant 0 : i32
    %c0_i32_0 = arith.constant 0 : i32
    %c0_i32_1 = arith.constant 0 : i32
    return %c0_i32, %c0_i32_0 : i32, i32
  }
  func.func @transform_4(%arg0: i32) -> (i32, i32) {
    %c0_i32 = arith.constant 0 : i32
    %c0_i32_0 = arith.constant 0 : i32
    return %arg0, %c0_i32 : i32, i32
  }
}

module attributes {stable_mosaic.version = 11 : i64} {
  func.func @_conv_norm_act_kernel(%arg0: i32, %arg1: memref<256x432xbf16, #tpu.memory_space<vmem>>, %arg2: memref<432x128xbf16, #tpu.memory_space<vmem>>, %arg3: memref<128x128xf32, #tpu.memory_space<vmem>>, %arg4: memref<128x128xf32, #tpu.memory_space<vmem>>, %arg5: memref<256x128xf32, #tpu.memory_space<vmem>>) attributes {dimension_semantics = [#tpu.dimension_semantics<parallel>], iteration_bounds = array<i64: 4>, scalar_prefetch = 0 : i64, scratch_operands = 0 : i64, tpu.core_type = #tpu.core_type<tc>, window_params = [{transform_indices = @transform_0, window_bounds = array<i64: 256, 432>}, {pipeline_mode = #tpu.pipeline_mode<synchronous>, transform_indices = @transform_1, window_bounds = array<i64: 432, 128>}, {pipeline_mode = #tpu.pipeline_mode<synchronous>, transform_indices = @transform_2, window_bounds = array<i64: 128, 128>}, {pipeline_mode = #tpu.pipeline_mode<synchronous>, transform_indices = @transform_3, window_bounds = array<i64: 128, 128>}, {transform_indices = @transform_4, window_bounds = array<i64: 256, 128>}]} {
    %c0 = arith.constant 0 : index
    %c0_0 = arith.constant 0 : index
    %0 = vector.load %arg1[%c0, %c0_0] : memref<256x432xbf16, #tpu.memory_space<vmem>>, vector<256x432xbf16>
    %c0_1 = arith.constant 0 : index
    %c0_2 = arith.constant 0 : index
    %1 = vector.load %arg2[%c0_1, %c0_2] : memref<432x128xbf16, #tpu.memory_space<vmem>>, vector<432x128xbf16>
    %cst = arith.constant dense<0.000000e+00> : vector<256x128xf32>
    %2 = tpu.matmul %0, %1, %cst {dimension_numbers = #tpu.dot_dimension_numbers<[1], [0], [0], [1], [0, 0, 1, 1], [], []>} : vector<256x432xbf16>, vector<432x128xbf16>, vector<256x128xf32> -> vector<256x128xf32>
    %3 = arith.mulf %2, %2 : vector<256x128xf32>
    %c0_3 = arith.constant 0 : index
    %c0_4 = arith.constant 0 : index
    %4 = vector.load %arg3[%c0_3, %c0_4] : memref<128x128xf32, #tpu.memory_space<vmem>>, vector<128x128xf32>
    %cst_5 = arith.constant dense<0.000000e+00> : vector<256x128xf32>
    %5 = tpu.matmul %3, %4, %cst_5 {dimension_numbers = #tpu.dot_dimension_numbers<[1], [0], [0], [1], [0, 0, 1, 1], [], []>} : vector<256x128xf32>, vector<128x128xf32>, vector<256x128xf32> -> vector<256x128xf32>
    %6 = math.sqrt %5 : vector<256x128xf32>
    %7 = arith.negf %6 : vector<256x128xf32>
    %8 = math.exp %7 : vector<256x128xf32>
    %cst_6 = arith.constant 1.000000e+00 : f32
    %9 = vector.broadcast %cst_6 : f32 to vector<256x128xf32>
    %10 = arith.addf %9, %8 : vector<256x128xf32>
    %11 = arith.divf %9, %10 : vector<256x128xf32>
    %c0_7 = arith.constant 0 : index
    %c0_8 = arith.constant 0 : index
    %12 = vector.load %arg4[%c0_7, %c0_8] : memref<128x128xf32, #tpu.memory_space<vmem>>, vector<128x128xf32>
    %cst_9 = arith.constant dense<0.000000e+00> : vector<256x128xf32>
    %13 = tpu.matmul %11, %12, %cst_9 {dimension_numbers = #tpu.dot_dimension_numbers<[1], [0], [0], [1], [0, 0, 1, 1], [], []>} : vector<256x128xf32>, vector<128x128xf32>, vector<256x128xf32> -> vector<256x128xf32>
    %14 = arith.mulf %2, %13 : vector<256x128xf32>
    %c0_10 = arith.constant 0 : index
    %c0_11 = arith.constant 0 : index
    %15 = vector.load %arg5[%c0_10, %c0_11] : memref<256x128xf32, #tpu.memory_space<vmem>>, vector<256x128xf32>
    tpu.vector_store %arg5[%c0_10, %c0_11], %14 {strides = array<i32>} : memref<256x128xf32, #tpu.memory_space<vmem>>, vector<256x128xf32>,
    return
  }
  func.func @transform_0(%arg0: i32) -> (i32, i32) {
    %c0_i32 = arith.constant 0 : i32
    %c0_i32_0 = arith.constant 0 : i32
    return %arg0, %c0_i32 : i32, i32
  }
  func.func @transform_1(%arg0: i32) -> (i32, i32) {
    %c0_i32 = arith.constant 0 : i32
    %c0_i32_0 = arith.constant 0 : i32
    %c0_i32_1 = arith.constant 0 : i32
    return %c0_i32, %c0_i32_0 : i32, i32
  }
  func.func @transform_2(%arg0: i32) -> (i32, i32) {
    %c0_i32 = arith.constant 0 : i32
    %c0_i32_0 = arith.constant 0 : i32
    %c0_i32_1 = arith.constant 0 : i32
    return %c0_i32, %c0_i32_0 : i32, i32
  }
  func.func @transform_3(%arg0: i32) -> (i32, i32) {
    %c0_i32 = arith.constant 0 : i32
    %c0_i32_0 = arith.constant 0 : i32
    %c0_i32_1 = arith.constant 0 : i32
    return %c0_i32, %c0_i32_0 : i32, i32
  }
  func.func @transform_4(%arg0: i32) -> (i32, i32) {
    %c0_i32 = arith.constant 0 : i32
    %c0_i32_0 = arith.constant 0 : i32
    return %arg0, %c0_i32 : i32, i32
  }
}

module attributes {stable_mosaic.version = 11 : i64} {
  func.func @_conv_norm_act_kernel(%arg0: i32, %arg1: memref<256x864xbf16, #tpu.memory_space<vmem>>, %arg2: memref<864x128xbf16, #tpu.memory_space<vmem>>, %arg3: memref<128x128xf32, #tpu.memory_space<vmem>>, %arg4: memref<128x128xf32, #tpu.memory_space<vmem>>, %arg5: memref<256x128xf32, #tpu.memory_space<vmem>>) attributes {dimension_semantics = [#tpu.dimension_semantics<parallel>], iteration_bounds = array<i64: 4>, scalar_prefetch = 0 : i64, scratch_operands = 0 : i64, tpu.core_type = #tpu.core_type<tc>, window_params = [{transform_indices = @transform_0, window_bounds = array<i64: 256, 864>}, {pipeline_mode = #tpu.pipeline_mode<synchronous>, transform_indices = @transform_1, window_bounds = array<i64: 864, 128>}, {pipeline_mode = #tpu.pipeline_mode<synchronous>, transform_indices = @transform_2, window_bounds = array<i64: 128, 128>}, {pipeline_mode = #tpu.pipeline_mode<synchronous>, transform_indices = @transform_3, window_bounds = array<i64: 128, 128>}, {transform_indices = @transform_4, window_bounds = array<i64: 256, 128>}]} {
    %c0 = arith.constant 0 : index
    %c0_0 = arith.constant 0 : index
    %0 = vector.load %arg1[%c0, %c0_0] : memref<256x864xbf16, #tpu.memory_space<vmem>>, vector<256x864xbf16>
    %c0_1 = arith.constant 0 : index
    %c0_2 = arith.constant 0 : index
    %1 = vector.load %arg2[%c0_1, %c0_2] : memref<864x128xbf16, #tpu.memory_space<vmem>>, vector<864x128xbf16>
    %cst = arith.constant dense<0.000000e+00> : vector<256x128xf32>
    %2 = tpu.matmul %0, %1, %cst {dimension_numbers = #tpu.dot_dimension_numbers<[1], [0], [0], [1], [0, 0, 1, 1], [], []>} : vector<256x864xbf16>, vector<864x128xbf16>, vector<256x128xf32> -> vector<256x128xf32>
    %3 = arith.mulf %2, %2 : vector<256x128xf32>
    %c0_3 = arith.constant 0 : index
    %c0_4 = arith.constant 0 : index
    %4 = vector.load %arg3[%c0_3, %c0_4] : memref<128x128xf32, #tpu.memory_space<vmem>>, vector<128x128xf32>
    %cst_5 = arith.constant dense<0.000000e+00> : vector<256x128xf32>
    %5 = tpu.matmul %3, %4, %cst_5 {dimension_numbers = #tpu.dot_dimension_numbers<[1], [0], [0], [1], [0, 0, 1, 1], [], []>} : vector<256x128xf32>, vector<128x128xf32>, vector<256x128xf32> -> vector<256x128xf32>
    %6 = math.sqrt %5 : vector<256x128xf32>
    %7 = arith.negf %6 : vector<256x128xf32>
    %8 = math.exp %7 : vector<256x128xf32>
    %cst_6 = arith.constant 1.000000e+00 : f32
    %9 = vector.broadcast %cst_6 : f32 to vector<256x128xf32>
    %10 = arith.addf %9, %8 : vector<256x128xf32>
    %11 = arith.divf %9, %10 : vector<256x128xf32>
    %c0_7 = arith.constant 0 : index
    %c0_8 = arith.constant 0 : index
    %12 = vector.load %arg4[%c0_7, %c0_8] : memref<128x128xf32, #tpu.memory_space<vmem>>, vector<128x128xf32>
    %cst_9 = arith.constant dense<0.000000e+00> : vector<256x128xf32>
    %13 = tpu.matmul %11, %12, %cst_9 {dimension_numbers = #tpu.dot_dimension_numbers<[1], [0], [0], [1], [0, 0, 1, 1], [], []>} : vector<256x128xf32>, vector<128x128xf32>, vector<256x128xf32> -> vector<256x128xf32>
    %14 = arith.mulf %2, %13 : vector<256x128xf32>
    %c0_10 = arith.constant 0 : index
    %c0_11 = arith.constant 0 : index
    %15 = vector.load %arg5[%c0_10, %c0_11] : memref<256x128xf32, #tpu.memory_space<vmem>>, vector<256x128xf32>
    tpu.vector_store %arg5[%c0_10, %c0_11], %14 {strides = array<i32>} : memref<256x128xf32, #tpu.memory_space<vmem>>, vector<256x128xf32>,
    return
  }
  func.func @transform_0(%arg0: i32) -> (i32, i32) {
    %c0_i32 = arith.constant 0 : i32
    %c0_i32_0 = arith.constant 0 : i32
    return %arg0, %c0_i32 : i32, i32
  }
  func.func @transform_1(%arg0: i32) -> (i32, i32) {
    %c0_i32 = arith.constant 0 : i32
    %c0_i32_0 = arith.constant 0 : i32
    %c0_i32_1 = arith.constant 0 : i32
    return %c0_i32, %c0_i32_0 : i32, i32
  }
  func.func @transform_2(%arg0: i32) -> (i32, i32) {
    %c0_i32 = arith.constant 0 : i32
    %c0_i32_0 = arith.constant 0 : i32
    %c0_i32_1 = arith.constant 0 : i32
    return %c0_i32, %c0_i32_0 : i32, i32
  }
  func.func @transform_3(%arg0: i32) -> (i32, i32) {
    %c0_i32 = arith.constant 0 : i32
    %c0_i32_0 = arith.constant 0 : i32
    %c0_i32_1 = arith.constant 0 : i32
    return %c0_i32, %c0_i32_0 : i32, i32
  }
  func.func @transform_4(%arg0: i32) -> (i32, i32) {
    %c0_i32 = arith.constant 0 : i32
    %c0_i32_0 = arith.constant 0 : i32
    return %arg0, %c0_i32 : i32, i32
  }
}

module attributes {stable_mosaic.version = 11 : i64} {
  func.func @_conv_norm_act_kernel(%arg0: i32, %arg1: memref<256x1728xbf16, #tpu.memory_space<vmem>>, %arg2: memref<1728x128xbf16, #tpu.memory_space<vmem>>, %arg3: memref<128x128xf32, #tpu.memory_space<vmem>>, %arg4: memref<128x128xf32, #tpu.memory_space<vmem>>, %arg5: memref<256x128xf32, #tpu.memory_space<vmem>>) attributes {dimension_semantics = [#tpu.dimension_semantics<parallel>], iteration_bounds = array<i64: 4>, scalar_prefetch = 0 : i64, scratch_operands = 0 : i64, tpu.core_type = #tpu.core_type<tc>, window_params = [{transform_indices = @transform_0, window_bounds = array<i64: 256, 1728>}, {pipeline_mode = #tpu.pipeline_mode<synchronous>, transform_indices = @transform_1, window_bounds = array<i64: 1728, 128>}, {pipeline_mode = #tpu.pipeline_mode<synchronous>, transform_indices = @transform_2, window_bounds = array<i64: 128, 128>}, {pipeline_mode = #tpu.pipeline_mode<synchronous>, transform_indices = @transform_3, window_bounds = array<i64: 128, 128>}, {transform_indices = @transform_4, window_bounds = array<i64: 256, 128>}]} {
    %c0 = arith.constant 0 : index
    %c0_0 = arith.constant 0 : index
    %0 = vector.load %arg1[%c0, %c0_0] : memref<256x1728xbf16, #tpu.memory_space<vmem>>, vector<256x1728xbf16>
    %c0_1 = arith.constant 0 : index
    %c0_2 = arith.constant 0 : index
    %1 = vector.load %arg2[%c0_1, %c0_2] : memref<1728x128xbf16, #tpu.memory_space<vmem>>, vector<1728x128xbf16>
    %cst = arith.constant dense<0.000000e+00> : vector<256x128xf32>
    %2 = tpu.matmul %0, %1, %cst {dimension_numbers = #tpu.dot_dimension_numbers<[1], [0], [0], [1], [0, 0, 1, 1], [], []>} : vector<256x1728xbf16>, vector<1728x128xbf16>, vector<256x128xf32> -> vector<256x128xf32>
    %3 = arith.mulf %2, %2 : vector<256x128xf32>
    %c0_3 = arith.constant 0 : index
    %c0_4 = arith.constant 0 : index
    %4 = vector.load %arg3[%c0_3, %c0_4] : memref<128x128xf32, #tpu.memory_space<vmem>>, vector<128x128xf32>
    %cst_5 = arith.constant dense<0.000000e+00> : vector<256x128xf32>
    %5 = tpu.matmul %3, %4, %cst_5 {dimension_numbers = #tpu.dot_dimension_numbers<[1], [0], [0], [1], [0, 0, 1, 1], [], []>} : vector<256x128xf32>, vector<128x128xf32>, vector<256x128xf32> -> vector<256x128xf32>
    %6 = math.sqrt %5 : vector<256x128xf32>
    %7 = arith.negf %6 : vector<256x128xf32>
    %8 = math.exp %7 : vector<256x128xf32>
    %cst_6 = arith.constant 1.000000e+00 : f32
    %9 = vector.broadcast %cst_6 : f32 to vector<256x128xf32>
    %10 = arith.addf %9, %8 : vector<256x128xf32>
    %11 = arith.divf %9, %10 : vector<256x128xf32>
    %c0_7 = arith.constant 0 : index
    %c0_8 = arith.constant 0 : index
    %12 = vector.load %arg4[%c0_7, %c0_8] : memref<128x128xf32, #tpu.memory_space<vmem>>, vector<128x128xf32>
    %cst_9 = arith.constant dense<0.000000e+00> : vector<256x128xf32>
    %13 = tpu.matmul %11, %12, %cst_9 {dimension_numbers = #tpu.dot_dimension_numbers<[1], [0], [0], [1], [0, 0, 1, 1], [], []>} : vector<256x128xf32>, vector<128x128xf32>, vector<256x128xf32> -> vector<256x128xf32>
    %14 = arith.mulf %2, %13 : vector<256x128xf32>
    %c0_10 = arith.constant 0 : index
    %c0_11 = arith.constant 0 : index
    %15 = vector.load %arg5[%c0_10, %c0_11] : memref<256x128xf32, #tpu.memory_space<vmem>>, vector<256x128xf32>
    tpu.vector_store %arg5[%c0_10, %c0_11], %14 {strides = array<i32>} : memref<256x128xf32, #tpu.memory_space<vmem>>, vector<256x128xf32>,
    return
  }
  func.func @transform_0(%arg0: i32) -> (i32, i32) {
    %c0_i32 = arith.constant 0 : i32
    %c0_i32_0 = arith.constant 0 : i32
    return %arg0, %c0_i32 : i32, i32
  }
  func.func @transform_1(%arg0: i32) -> (i32, i32) {
    %c0_i32 = arith.constant 0 : i32
    %c0_i32_0 = arith.constant 0 : i32
    %c0_i32_1 = arith.constant 0 : i32
    return %c0_i32, %c0_i32_0 : i32, i32
  }
  func.func @transform_2(%arg0: i32) -> (i32, i32) {
    %c0_i32 = arith.constant 0 : i32
    %c0_i32_0 = arith.constant 0 : i32
    %c0_i32_1 = arith.constant 0 : i32
    return %c0_i32, %c0_i32_0 : i32, i32
  }
  func.func @transform_3(%arg0: i32) -> (i32, i32) {
    %c0_i32 = arith.constant 0 : i32
    %c0_i32_0 = arith.constant 0 : i32
    %c0_i32_1 = arith.constant 0 : i32
    return %c0_i32, %c0_i32_0 : i32, i32
  }
  func.func @transform_4(%arg0: i32) -> (i32, i32) {
    %c0_i32 = arith.constant 0 : i32
    %c0_i32_0 = arith.constant 0 : i32
    return %arg0, %c0_i32 : i32, i32
  }
}

</mosaic_0001>

<bundles_post_ra>
// kernel: fwd.4
= control target key start
LH: loop header
LB: loop body
LE: loop exit
PB: predicated region body
PF: predicated region fallthrough
CT: control target
= control target key end

     0   :  { %s2413_s15 = smov 0   ;;  %s3011_s0 = inlined_call_operand.vmem [shape: bf16[1024,216], index: 0, kind: input, shape index: {}]   ;;  %s3012_s1 = inlined_call_operand.vmem [shape: bf16[216,128], index: 1, kind: input, shape index: {}]   ;;  %s3013_s2 = inlined_call_operand.vmem [shape: f32[128,128], index: 2, kind: input, shape index: {}]   ;;  %s3014_s3 = inlined_call_operand.vmem [shape: f32[128,128], index: 3, kind: input, shape index: {}]   ;;  %s3015_s4 = inlined_call_operand.vmem [shape: f32[1024,128], index: 4, kind: output, shape index: {}]  }
   0x1 LB: > { %s1753_s16 = sadd.s32 4294967295, %s2385_s15   ;;  %p1757_p0 = scmp.ge.s32.totalorder %s2385_s15, 1  ;;  %s2385_s15 = sphi %s2413_s15, %s14_s15  }
   0x2   : > { %p164_p1 = scmp.lt.s32.totalorder %s2385_s15, 5 }
   0x4   : > { %p165_p2 = pnand %p1757_p0, %p164_p1 }
   0x5   : > { %s1758_s21 = sshll.u32 (!%p165_p2), %s1753_s16, 5 }
   0x6   : > { %168 = sbr.rel (%p165_p2) target bundleno = 832 (0x340), region = 36  ;;  %p192_p3 = scmp.lt.s32.totalorder (!%p165_p2), %s1758_s21, 127 }
   0xb   : > { %v2125_v0 = vld [vmem:[%s3012_s1 + $0x38] sm:$0xff]   ;;  %v2387_v1 = vmov 0   ;;  %v2126_v2 = vld [vmem:[%s3012_s1 + $0x30] sm:$0xff]   ;;  %s3017_s21 = smov (!%p192_p3, %s1758_s21), 127  ;;  %v2127_v3 = vld [vmem:[%s3012_s1 + $0x28] sm:$0xff]   ;;  %vm489_vm0 = vcmask 719872  }
   0xc   : > { %542 = vmatprep.subr.bf16.mxu0 %v2387_v1  ;;  %s1859_s24 = sshll.u32 %s3017_s21, 3  ;;  %v2128_v4 = vld [vmem:[%s3012_s1 + $0x20] sm:$0xff]   ;;  %v2129_v5 = vld [vmem:[%s3012_s1 + $0x18] sm:$0xff]   ;;  %v2130_v7 = vld [vmem:[%s3012_s1 + $0x10] sm:$0xff]   ;;  %vm538_vm1 = vcmask 1043456  }
   0xd   : > { %543 = vmatpush1.bf16.msra.mxu0 %v2125_v0  ;;  %s2441_s29 = scalar_lea.vmem %s3011_s0, %s1859_s24  ;;  %v2131_v8 = vld [vmem:[%s3012_s1 + $0x8] sm:$0xff]   ;;  %v2132_v9 = vld [vmem:[%s3012_s1] sm:$0xff]   ;;  %v2135_v13 = vld [vmem:[%s3012_s1 + $0x58] sm:$0xff]   ;;  %s2942_s25 = scalar_lea.vmem %s3015_s4, %s1859_s24 }
   0xe   : > { %544 = vmatprep.subr.bf16.mxu0 %v2387_v1  ;;  %v2141_v6 = vld [vmem:[%s2441_s29 + $0x4] ss:$8 sps:$4 sm:$0xff]   ;;  %v2133_v10 = vld [vmem:[%s3012_s1 + $0x68] ss:$0 sps:$4 sm:$0xff]   ;;  %v2136_v14 = vld [vmem:[%s3012_s1 + $0x50] sm:$0xff]  }
   0xf   : > { %1809 = vmatprep.mubr.msk.bf16.mxu0 %vm489_vm0, %v2141_v6  ;;  %v540_v11 = vsel %vm538_vm1, %v2133_v10, 0  ;;  %v2134_v12 = vld [vmem:[%s3012_s1 + $0x60] sm:$0xff]   ;;  %v2137_v15 = vld [vmem:[%s3012_s1 + $0x48] sm:$0xff]   ;;  %v750_v16 = vld [vmem:[%s3013_s2 + $0x78] sm:$0xff] }
  0x10   : > { %v749_v17 = vld [vmem:[%s3013_s2 + $0x70] sm:$0xff]  ;;  %v2138_v18 = vld [vmem:[%s3012_s1 + $0x40] sm:$0xff]   ;;  %1956 = vmatprep.subr.mxu1 %v750_v16  ;;  %v748_v19 = vld [vmem:[%s3013_s2 + $0x68] sm:$0xff] }
  0x11   : > { %545 = vmatpush1.bf16.msra.mxu0 %v2126_v2  ;;  %1957 = vmatpush3.msra.mxu1 %v750_v16  ;;  %v2139_v20 = vld [vmem:[%s2441_s29] ss:$8 sps:$4 sm:$0xff]   ;;  %v2142_v22 = vld [vmem:[%s2441_s29 + $0x14] ss:$8 sps:$4 sm:$0xff]   ;;  %v2144_v26 = vld [vmem:[%s2441_s29 + $0x10] ss:$8 sps:$4 sm:$0xff]  }
  0x12   : > { %546 = vmatprep.subr.bf16.mxu0 %v2387_v1  ;;  %1958 = vmatprep.subr.mxu1 %v749_v17  ;;  %v747_v21 = vld [vmem:[%s3013_s2 + $0x60] sm:$0xff]  ;;  %v746_v23 = vld [vmem:[%s3013_s2 + $0x58] sm:$0xff]  ;;  %v745_v24 = vld [vmem:[%s3013_s2 + $0x50] sm:$0xff] }
  0x13   : > { %1959 = vmatpush3.msra.mxu1 %v749_v17  ;;  %v744_v25 = vld [vmem:[%s3013_s2 + $0x48] sm:$0xff]  ;;  %v743_v27 = vld [vmem:[%s3013_s2 + $0x40] sm:$0xff]  ;;  %v742_v29 = vld [vmem:[%s3013_s2 + $0x38] sm:$0xff] }
  0x14   : > { %1960 = vmatprep.subr.mxu1 %v748_v19  ;;  %v2145_v28 = vld [vmem:[%s2441_s29 + $0x24] ss:$8 sps:$4 sm:$0xff]   ;;  %v741_v30 = vld [vmem:[%s3013_s2 + $0x30] sm:$0xff]  ;;  %v2147_v32 = vld [vmem:[%s2441_s29 + $0x20] ss:$8 sps:$4 sm:$0xff]  }
  0x15   : > { %547 = vmatpush1.bf16.msra.mxu0 %v2127_v3  ;;  %1961 = vmatpush3.msra.mxu1 %v748_v19  ;;  %v740_v31 = vld [vmem:[%s3013_s2 + $0x28] sm:$0xff]  ;;  %v739_v33 = vld [vmem:[%s3013_s2 + $0x20] sm:$0xff]  ;;  %v2148_v34 = vld [vmem:[%s2441_s29 + $0x34] ss:$8 sps:$4 sm:$0xff]  }
  0x16   : > { %548 = vmatprep.subr.bf16.mxu0 %v2387_v1  ;;  %1962 = vmatprep.subr.mxu1 %v747_v21  ;;  %v738_v35 = vld [vmem:[%s3013_s2 + $0x18] sm:$0xff]  ;;  %v2151_v37 = vld [vmem:[%s2441_s29 + $0x44] ss:$8 sps:$4 sm:$0xff]   ;;  %v2153_v38 = vld [vmem:[%s2441_s29 + $0x40] ss:$8 sps:$4 sm:$0xff]  }
  0x17   : > { %1963 = vmatpush3.msra.mxu1 %v747_v21  ;;  %v2150_v36 = vld [vmem:[%s2441_s29 + $0x30] ss:$8 sps:$4 sm:$0xff]   ;;  %v2154_v39 = vld [vmem:[%s2441_s29 + $0x54] ss:$8 sps:$4 sm:$0xff]   ;;  %v2157_v41 = vld [vmem:[%s2441_s29 + $0x64] ss:$8 sps:$4 sm:$0xff]  }
  0x18   : > { %1964 = vmatprep.subr.mxu1 %v746_v23  ;;  %v2156_v40 = vld [vmem:[%s2441_s29 + $0x50] ss:$8 sps:$4 sm:$0xff]   ;;  %v2159_v42 = vld [vmem:[%s2441_s29 + $0x60] ss:$8 sps:$4 sm:$0xff]   ;;  %v2160_v43 = vld [vmem:[%s2441_s29 + $0x74] ss:$8 sps:$4 sm:$0xff]  }
  0x19   : > { %549 = vmatpush1.bf16.msra.mxu0 %v2128_v4  ;;  %1965 = vmatpush3.msra.mxu1 %v746_v23  ;;  %v2162_v44 = vld [vmem:[%s2441_s29 + $0x70] ss:$8 sps:$4 sm:$0xff]   ;;  %v2163_v45 = vld [vmem:[%s2441_s29 + $0x84] ss:$8 sps:$4 sm:$0xff]   ;;  %v2165_v46 = vld [vmem:[%s2441_s29 + $0x80] ss:$8 sps:$4 sm:$0xff]  }
  0x1a   : > { %550 = vmatprep.subr.bf16.mxu0 %v2387_v1  ;;  %1966 = vmatprep.subr.mxu1 %v745_v24  ;;  %v2166_v47 = vld [vmem:[%s2441_s29 + $0x94] ss:$8 sps:$4 sm:$0xff]   ;;  %v736_v49 = vld [vmem:[%s3013_s2 + $0x8] sm:$0xff]  ;;  %v2168_v50 = vld [vmem:[%s2441_s29 + $0x90] ss:$8 sps:$4 sm:$0xff]  }
  0x1b   : > { %1967 = vmatpush3.msra.mxu1 %v745_v24  ;;  %v737_v48 = vld [vmem:[%s3013_s2 + $0x10] sm:$0xff]  ;;  %v735_v51 = vld [vmem:[%s3013_s2] sm:$0xff] }
  0x1c   : > { %1968 = vmatprep.subr.mxu1 %v744_v25  ;;  %v2169_v52 = vld [vmem:[%s2441_s29 + $0xa4] ss:$8 sps:$4 sm:$0xff]   ;;  %v2171_v53 = vld [vmem:[%s2441_s29 + $0xa0] ss:$8 sps:$4 sm:$0xff]   ;;  %v2172_v54 = vld [vmem:[%s2441_s29 + $0xb4] ss:$8 sps:$4 sm:$0xff]  }
  0x1d   : > { %551 = vmatpush1.bf16.msra.mxu0 %v2129_v5  ;;  %1969 = vmatpush3.msra.mxu1 %v744_v25  ;;  %v2174_v55 = vld [vmem:[%s2441_s29 + $0xb0] ss:$8 sps:$4 sm:$0xff]   ;;  %v2175_v56 = vld [vmem:[%s2441_s29 + $0xc4] ss:$8 sps:$4 sm:$0xff]   ;;  %v2177_v57 = vld [vmem:[%s2441_s29 + $0xc0] ss:$8 sps:$4 sm:$0xff]  }
  0x1e   : > { %552 = vmatprep.subr.bf16.mxu0 %v2387_v1  ;;  %1970 = vmatprep.subr.mxu1 %v743_v27  ;;  %v2178_v58 = vld [vmem:[%s2441_s29 + $0xd4] ss:$8 sps:$4 sm:$0xff]   ;;  %v2180_v59 = vld [vmem:[%s2441_s29 + $0xd0] ss:$8 sps:$4 sm:$0xff]   ;;  %v2181_v60 = vld [vmem:[%s2441_s29 + $0xe4] ss:$8 sps:$4 sm:$0xff]  }
  0x1f   : > { %1971 = vmatpush3.msra.mxu1 %v743_v27  ;;  %v2183_v61 = vld [vmem:[%s2441_s29 + $0xe0] ss:$8 sps:$4 sm:$0xff]   ;;  %v2184_v62 = vld [vmem:[%s2441_s29 + $0xf4] ss:$8 sps:$4 sm:$0xff]   ;;  %v2186_v63 = vld [vmem:[%s2441_s29 + $0xf0] ss:$8 sps:$4 sm:$0xff]  }
  0x20   : > { %1972 = vmatprep.subr.mxu1 %v742_v29 }
  0x21   : > { %553 = vmatpush1.bf16.msra.mxu0 %v2130_v7  ;;  %1973 = vmatpush3.msra.mxu1 %v742_v29 }
  0x22   : > { %554 = vmatprep.subr.bf16.mxu0 %v2387_v1  ;;  %1974 = vmatprep.subr.mxu1 %v741_v30 }
  0x23   : > { %1975 = vmatpush3.msra.mxu1 %v741_v30 }
  0x24   : > { %1976 = vmatprep.subr.mxu1 %v740_v31 }
  0x25   : > { %555 = vmatpush1.bf16.msra.mxu0 %v2131_v8  ;;  %1977 = vmatpush3.msra.mxu1 %v740_v31 }
  0x26   : > { %556 = vmatprep.subr.bf16.mxu0 %v2387_v1  ;;  %1978 = vmatprep.subr.mxu1 %v739_v33 }
  0x27   : > { %1979 = vmatpush3.msra.mxu1 %v739_v33 }
  0x28   : > { %1980 = vmatprep.subr.mxu1 %v738_v35 }
  0x29   : > { %557 = vmatpush1.bf16.msra.mxu0 %v2132_v9  ;;  %1981 = vmatpush3.msra.mxu1 %v738_v35 }
  0x2a   : > { %562 = vmatprep.subr.bf16.mxu0 %v2387_v1  ;;  %1982 = vmatprep.subr.mxu1 %v737_v48 }
  0x2b   : > { %1983 = vmatpush3.msra.mxu1 %v737_v48 }
  0x2c   : > { %1984 = vmatprep.subr.mxu1 %v736_v49 }
  0x2d   : > { %563 = vmatpush2.bf16.msra.mxu0 %v540_v11  ;;  %1985 = vmatpush3.msra.mxu1 %v736_v49 }
  0x2e   : > { %564 = vmatprep.subr.bf16.mxu0 %v2387_v1  ;;  %1986 = vmatprep.subr.mxu1 %v735_v51 }
  0x2f   : > { %1987 = vmatpush3.msra.mxu1 %v735_v51 }
  0x31   : > { %565 = vmatpush2.bf16.msra.mxu0 %v2134_v12 }
  0x32   : > { %566 = vmatprep.subr.bf16.mxu0 %v2387_v1 }
  0x35   : > { %567 = vmatpush2.bf16.msra.mxu0 %v2135_v13 }
  0x36   : > { %568 = vmatprep.subr.bf16.mxu0 %v2387_v1 }
  0x39   : > { %569 = vmatpush2.bf16.msra.mxu0 %v2136_v14 }
  0x3a   : > { %570 = vmatprep.subr.bf16.mxu0 %v2387_v1 }
  0x3d   : > { %571 = vmatpush2.bf16.msra.mxu0 %v2137_v15 }
  0x3e   : > { %572 = vmatprep.subr.bf16.mxu0 %v2387_v1 }
  0x41   : > { %573 = vmatpush2.bf16.msra.mxu0 %v2138_v18 }
  0x44   : > { %575 = vmatmul.mubr.bf16.vlgmr.msra.gmra.mxu0 %v2139_v20 }
  0x45   : > { %1810 = vmatprep.mubr.msk.bf16.mxu0 %vm489_vm0, %v2142_v22 }
  0x4c   : > { %583 = vmatmul.mubr.bf16.gmra.mxu0 %v2144_v26 }
  0x4d   : > { %1811 = vmatprep.mubr.msk.bf16.mxu0 %vm489_vm0, %v2145_v28 }
  0x54   : > { %591 = vmatmul.mubr.bf16.gmra.mxu0 %v2147_v32 }
  0x55   : > { %1812 = vmatprep.mubr.msk.bf16.mxu0 %vm489_vm0, %v2148_v34 }
  0x5c   : > { %599 = vmatmul.mubr.bf16.gmra.mxu0 %v2150_v36 }
  0x5d   : > { %1813 = vmatprep.mubr.msk.bf16.mxu0 %vm489_vm0, %v2151_v37 }
  0x64   : > { %607 = vmatmul.mubr.bf16.gmra.mxu0 %v2153_v38 }
  0x65   : > { %1814 = vmatprep.mubr.msk.bf16.mxu0 %vm489_vm0, %v2154_v39 }
  0x6c   : > { %615 = vmatmul.mubr.bf16.gmra.mxu0 %v2156_v40 }
  0x6d   : > { %1815 = vmatprep.mubr.msk.bf16.mxu0 %vm489_vm0, %v2157_v41 }
  0x74   : > { %623 = vmatmul.mubr.bf16.gmra.mxu0 %v2159_v42 }
  0x75   : > { %1816 = vmatprep.mubr.msk.bf16.mxu0 %vm489_vm0, %v2160_v43 }
  0x7c   : > { %631 = vmatmul.mubr.bf16.gmra.mxu0 %v2162_v44 }
  0x7d   : > { %1817 = vmatprep.mubr.msk.bf16.mxu0 %vm489_vm0, %v2163_v45 }
  0x84   : > { %639 = vmatmul.mubr.bf16.gmra.mxu0 %v2165_v46 }
  0x85   : > { %1818 = vmatprep.mubr.msk.bf16.mxu0 %vm489_vm0, %v2166_v47 }
  0x8c   : > { %647 = vmatmul.mubr.bf16.gmra.mxu0 %v2168_v50 }
  0x8d   : > { %1819 = vmatprep.mubr.msk.bf16.mxu0 %vm489_vm0, %v2169_v52 }
  0x94   : > { %655 = vmatmul.mubr.bf16.gmra.mxu0 %v2171_v53 }
  0x95   : > { %1820 = vmatprep.mubr.msk.bf16.mxu0 %vm489_vm0, %v2172_v54 }
  0x9c   : > { %663 = vmatmul.mubr.bf16.gmra.mxu0 %v2174_v55 }
  0x9d   : > { %1821 = vmatprep.mubr.msk.bf16.mxu0 %vm489_vm0, %v2175_v56 }
  0xa4   : > { %671 = vmatmul.mubr.bf16.gmra.mxu0 %v2177_v57 }
  0xa5   : > { %1822 = vmatprep.mubr.msk.bf16.mxu0 %vm489_vm0, %v2178_v58 }
  0xac   : > { %679 = vmatmul.mubr.bf16.gmra.mxu0 %v2180_v59 }
  0xad   : > { %1823 = vmatprep.mubr.msk.bf16.mxu0 %vm489_vm0, %v2181_v60 }
  0xb4   : > { %687 = vmatmul.mubr.bf16.gmra.mxu0 %v2183_v61 }
  0xb5   : > { %1824 = vmatprep.mubr.msk.bf16.mxu0 %vm489_vm0, %v2184_v62 }
  0xbc   : > { %695 = vmatmul.mubr.bf16.gmra.mxu0 %v2186_v63 }
 0x104   : > { %v2569_v0 = vpop.f32.mrf.mxu0 }
 0x105   : > { %v703_v1 = vmul.f32 %v2569_v0, %v2569_v0 }
 0x106   : > { %v578_v2 = vpop.f32.mrf.mxu0 }
 0x107   : > { %1988 = vmatprep.mubr.f32.mxu1 %v703_v1 }
 0x108   : > { %v2573_v3 = vpop.f32.mrf.mxu0 }
 0x109   : > { %v704_v4 = vmul.f32 %v2573_v3, %v2573_v3 }
 0x10a   : > { %v581_v5 = vpop.f32.mrf.mxu0 }
 0x10b   : > { %1989 = vmatmul.mubr.f32.vlgmr.msra.gmra.mxu1 %v704_v4 }
 0x10c   : > { %v2577_v6 = vpop.f32.mrf.mxu0 }
 0x10d   : > { %v705_v7 = vmul.f32 %v2577_v6, %v2577_v6 }
 0x10e   : > { %v586_v8 = vpop.f32.mrf.mxu0 }
 0x10f   : > { %1991 = vmatprep.mubr.f32.mxu1 %v705_v7 }
 0x110   : > { %v2581_v9 = vpop.f32.mrf.mxu0 }
 0x111   : > { %v706_v10 = vmul.f32 %v2581_v9, %v2581_v9 }
 0x112   : > { %v589_v11 = vpop.f32.mrf.mxu0 }
 0x113   : > { %1992 = vmatmul.mubr.f32.gmra.mxu1 %v706_v10  ;;  %v1407_v11 = vld [vmem:[%s3014_s3 + $0x78] sm:$0xff] }
 0x114   : > { %v2585_v12 = vpop.f32.mrf.mxu0  ;;  %2036 = vmatprep.subr.mxu1 %v1407_v11 }
 0x115   : > { %v707_v13 = vmul.f32 %v2585_v12, %v2585_v12  ;;  %2037 = vmatpush3.msra.mxu1 %v1407_v11 }
 0x116   : > { %v594_v14 = vpop.f32.mrf.mxu0 }
 0x117   : > { %1994 = vmatprep.mubr.f32.mxu1 %v707_v13  ;;  %v1406_v14 = vld [vmem:[%s3014_s3 + $0x70] sm:$0xff] }
 0x118   : > { %v2589_v15 = vpop.f32.mrf.mxu0  ;;  %2038 = vmatprep.subr.mxu1 %v1406_v14 }
 0x119   : > { %v708_v16 = vmul.f32 %v2589_v15, %v2589_v15  ;;  %2039 = vmatpush3.msra.mxu1 %v1406_v14 }
 0x11a   : > { %v597_v17 = vpop.f32.mrf.mxu0 }
 0x11b   : > { %1995 = vmatmul.mubr.f32.gmra.mxu1 %v708_v16 }
 0x11c   : > { %v2593_v18 = vpop.f32.mrf.mxu0 }
 0x11d   : > { %v709_v19 = vmul.f32 %v2593_v18, %v2593_v18 }
 0x11e   : > { %v602_v20 = vpop.f32.mrf.mxu0 }
 0x11f   : > { %1997 = vmatprep.mubr.f32.mxu1 %v709_v19  ;;  %v1405_v19 = vld [vmem:[%s3014_s3 + $0x68] sm:$0xff] }
 0x120   : > { %v2597_v21 = vpop.f32.mrf.mxu0  ;;  %2040 = vmatprep.subr.mxu1 %v1405_v19 }
 0x121   : > { %v710_v22 = vmul.f32 %v2597_v21, %v2597_v21  ;;  %2041 = vmatpush3.msra.mxu1 %v1405_v19 }
 0x122   : > { %v605_v23 = vpop.f32.mrf.mxu0 }
 0x123   : > { %1998 = vmatmul.mubr.f32.gmra.mxu1 %v710_v22  ;;  %v1404_v22 = vld [vmem:[%s3014_s3 + $0x60] sm:$0xff] }
 0x124   : > { %v2601_v24 = vpop.f32.mrf.mxu0  ;;  %2042 = vmatprep.subr.mxu1 %v1404_v22 }
 0x125   : > { %v711_v25 = vmul.f32 %v2601_v24, %v2601_v24  ;;  %2043 = vmatpush3.msra.mxu1 %v1404_v22 }
 0x126   : > { %v610_v26 = vpop.f32.mrf.mxu0 }
 0x127   : > { %2000 = vmatprep.mubr.f32.mxu1 %v711_v25  ;;  %v1403_v26 = vld [vmem:[%s3014_s3 + $0x58] sm:$0xff] }
 0x128   : > { %v2605_v27 = vpop.f32.mrf.mxu0  ;;  %2044 = vmatprep.subr.mxu1 %v1403_v26 }
 0x129   : > { %v712_v28 = vmul.f32 %v2605_v27, %v2605_v27  ;;  %2045 = vmatpush3.msra.mxu1 %v1403_v26 }
 0x12a   : > { %v613_v29 = vpop.f32.mrf.mxu0 }
 0x12b   : > { %2001 = vmatmul.mubr.f32.gmra.mxu1 %v712_v28  ;;  %v1402_v29 = vld [vmem:[%s3014_s3 + $0x50] sm:$0xff] }
 0x12c   : > { %v2609_v30 = vpop.f32.mrf.mxu0  ;;  %2046 = vmatprep.subr.mxu1 %v1402_v29 }
 0x12d   : > { %v713_v31 = vmul.f32 %v2609_v30, %v2609_v30  ;;  %2047 = vmatpush3.msra.mxu1 %v1402_v29 }
 0x12e   : > { %v618_v32 = vpop.f32.mrf.mxu0 }
 0x12f   : > { %2003 = vmatprep.mubr.f32.mxu1 %v713_v31 }
 0x130   : > { %v2613_v33 = vpop.f32.mrf.mxu0 }
 0x131   : > { %v714_v34 = vmul.f32 %v2613_v33, %v2613_v33 }
 0x132   : > { %v621_v35 = vpop.f32.mrf.mxu0 }
 0x133   : > { %2004 = vmatmul.mubr.f32.gmra.mxu1 %v714_v34  ;;  %v1401_v34 = vld [vmem:[%s3014_s3 + $0x48] sm:$0xff] }
 0x134   : > { %v2617_v36 = vpop.f32.mrf.mxu0  ;;  %2048 = vmatprep.subr.mxu1 %v1401_v34 }
 0x135   : > { %v715_v37 = vmul.f32 %v2617_v36, %v2617_v36  ;;  %2049 = vmatpush3.msra.mxu1 %v1401_v34 }
 0x136   : > { %v626_v38 = vpop.f32.mrf.mxu0 }
 0x137   : > { %2006 = vmatprep.mubr.f32.mxu1 %v715_v37  ;;  %v1400_v37 = vld [vmem:[%s3014_s3 + $0x40] sm:$0xff] }
 0x138   : > { %v2621_v39 = vpop.f32.mrf.mxu0  ;;  %2050 = vmatprep.subr.mxu1 %v1400_v37 }
 0x139   : > { %v716_v40 = vmul.f32 %v2621_v39, %v2621_v39  ;;  %2051 = vmatpush3.msra.mxu1 %v1400_v37 }
 0x13a   : > { %v629_v41 = vpop.f32.mrf.mxu0 }
 0x13b   : > { %2007 = vmatmul.mubr.f32.gmra.mxu1 %v716_v40  ;;  %v1399_v41 = vld [vmem:[%s3014_s3 + $0x38] sm:$0xff] }
 0x13c   : > { %v2625_v42 = vpop.f32.mrf.mxu0  ;;  %2052 = vmatprep.subr.mxu1 %v1399_v41 }
 0x13d   : > { %v717_v43 = vmul.f32 %v2625_v42, %v2625_v42  ;;  %2053 = vmatpush3.msra.mxu1 %v1399_v41 }
 0x13e   : > { %v634_v44 = vpop.f32.mrf.mxu0 }
 0x13f   : > { %2009 = vmatprep.mubr.f32.mxu1 %v717_v43  ;;  %v1398_v44 = vld [vmem:[%s3014_s3 + $0x30] sm:$0xff] }
 0x140   : > { %v2629_v45 = vpop.f32.mrf.mxu0  ;;  %2054 = vmatprep.subr.mxu1 %v1398_v44 }
 0x141   : > { %v718_v46 = vmul.f32 %v2629_v45, %v2629_v45  ;;  %2055 = vmatpush3.msra.mxu1 %v1398_v44 }
 0x142   : > { %v637_v47 = vpop.f32.mrf.mxu0 }
 0x143   : > { %2010 = vmatmul.mubr.f32.gmra.mxu1 %v718_v46 }
 0x144   : > { %v2633_v48 = vpop.f32.mrf.mxu0 }
 0x145   : > { %v719_v49 = vmul.f32 %v2633_v48, %v2633_v48 }
 0x146   : > { %v642_v50 = vpop.f32.mrf.mxu0 }
 0x147   : > { %2012 = vmatprep.mubr.f32.mxu1 %v719_v49  ;;  %v1397_v49 = vld [vmem:[%s3014_s3 + $0x28] sm:$0xff] }
 0x148   : > { %v2637_v51 = vpop.f32.mrf.mxu0  ;;  %2056 = vmatprep.subr.mxu1 %v1397_v49 }
 0x149   : > { %v720_v52 = vmul.f32 %v2637_v51, %v2637_v51  ;;  %2057 = vmatpush3.msra.mxu1 %v1397_v49 }
 0x14a   : > { %v645_v53 = vpop.f32.mrf.mxu0 }
 0x14b   : > { %2013 = vmatmul.mubr.f32.gmra.mxu1 %v720_v52  ;;  %v1396_v52 = vld [vmem:[%s3014_s3 + $0x20] sm:$0xff] }
 0x14c   : > { %v2641_v54 = vpop.f32.mrf.mxu0  ;;  %2058 = vmatprep.subr.mxu1 %v1396_v52 }
 0x14d   : > { %v721_v55 = vmul.f32 %v2641_v54, %v2641_v54  ;;  %2059 = vmatpush3.msra.mxu1 %v1396_v52 }
 0x14e   : > { %v650_v56 = vpop.f32.mrf.mxu0 }
 0x14f   : > { %2015 = vmatprep.mubr.f32.mxu1 %v721_v55  ;;  %v1395_v56 = vld [vmem:[%s3014_s3 + $0x18] sm:$0xff] }
 0x150   : > { %v2645_v57 = vpop.f32.mrf.mxu0  ;;  %2060 = vmatprep.subr.mxu1 %v1395_v56 }
 0x151   : > { %v722_v58 = vmul.f32 %v2645_v57, %v2645_v57  ;;  %2061 = vmatpush3.msra.mxu1 %v1395_v56 }
 0x152   : > { %v653_v59 = vpop.f32.mrf.mxu0 }
 0x153   : > { %2016 = vmatmul.mubr.f32.gmra.mxu1 %v722_v58  ;;  %v1394_v59 = vld [vmem:[%s3014_s3 + $0x10] sm:$0xff] }
 0x154   : > { %v2649_v60 = vpop.f32.mrf.mxu0  ;;  %2062 = vmatprep.subr.mxu1 %v1394_v59 }
 0x155   : > { %v723_v61 = vmul.f32 %v2649_v60, %v2649_v60  ;;  %2063 = vmatpush3.msra.mxu1 %v1394_v59 }
 0x156   : > { %v658_v62 = vpop.f32.mrf.mxu0 }
 0x157   : > { %2018 = vmatprep.mubr.f32.mxu1 %v723_v61 }
 0x158   : > { %v2653_v63 = vpop.f32.mrf.mxu0 }
 0x159   : > { %v724_v1 = vmul.f32 %v2653_v63, %v2653_v63 }
 0x15a   : > { %v661_v2 = vpop.f32.mrf.mxu0 }
 0x15b   : > { %2019 = vmatmul.mubr.f32.gmra.mxu1 %v724_v1  ;;  %v1393_v1 = vld [vmem:[%s3014_s3 + $0x8] sm:$0xff] }
 0x15c   : > { %v2657_v4 = vpop.f32.mrf.mxu0  ;;  %2064 = vmatprep.subr.mxu1 %v1393_v1 }
 0x15d   : > { %v725_v5 = vmul.f32 %v2657_v4, %v2657_v4  ;;  %2065 = vmatpush3.msra.mxu1 %v1393_v1 }
 0x15e   : > { %v666_v7 = vpop.f32.mrf.mxu0 }
 0x15f   : > { %2021 = vmatprep.mubr.f32.mxu1 %v725_v5  ;;  %v1392_v5 = vld [vmem:[%s3014_s3] sm:$0xff] }
 0x160   : > { %v2661_v8 = vpop.f32.mrf.mxu0  ;;  %2066 = vmatprep.subr.mxu1 %v1392_v5 }
 0x161   : > { %v726_v10 = vmul.f32 %v2661_v8, %v2661_v8  ;;  %2067 = vmatpush3.msra.mxu1 %v1392_v5 }
 0x162   : > { %v669_v13 = vpop.f32.mrf.mxu0 }
 0x163   : > { %2022 = vmatmul.mubr.f32.gmra.mxu1 %v726_v10 }
 0x164   : > { %v2671_v16 = vpop.f32.mrf.mxu0 }
 0x165   : > { %v727_v17 = vmul.f32 %v2671_v16, %v2671_v16 }
 0x166   : > { %v674_v20 = vpop.f32.mrf.mxu0 }
 0x167   : > { %2024 = vmatprep.mubr.f32.mxu1 %v727_v17 }
 0x168   : > { %v2681_v23 = vpop.f32.mrf.mxu0 }
 0x169   : > { %v728_v25 = vmul.f32 %v2681_v23, %v2681_v23 }
 0x16a   : > { %v677_v28 = vpop.f32.mrf.mxu0 }
 0x16b   : > { %2025 = vmatmul.mubr.f32.gmra.mxu1 %v728_v25 }
 0x16c   : > { %v2691_v31 = vpop.f32.mrf.mxu0 }
 0x16d   : > { %v729_v32 = vmul.f32 %v2691_v31, %v2691_v31 }
 0x16e   : > { %v682_v35 = vpop.f32.mrf.mxu0 }
 0x16f   : > { %2027 = vmatprep.mubr.f32.mxu1 %v729_v32 }
 0x170   : > { %v2701_v38 = vpop.f32.mrf.mxu0 }
 0x171   : > { %v730_v40 = vmul.f32 %v2701_v38, %v2701_v38 }
 0x172   : > { %v685_v43 = vpop.f32.mrf.mxu0 }
 0x173   : > { %2028 = vmatmul.mubr.f32.gmra.mxu1 %v730_v40 }
 0x174   : > { %v2711_v46 = vpop.f32.mrf.mxu0 }
 0x175   : > { %v731_v47 = vmul.f32 %v2711_v46, %v2711_v46 }
 0x176   : > { %v690_v50 = vpop.f32.mrf.mxu0 }
 0x177   : > { %2030 = vmatprep.mubr.f32.mxu1 %v731_v47 }
 0x178   : > { %v2721_v53 = vpop.f32.mrf.mxu0 }
 0x179   : > { %v732_v55 = vmul.f32 %v2721_v53, %v2721_v53 }
 0x17a   : > { %v693_v58 = vpop.f32.mrf.mxu0 }
 0x17b   : > { %2031 = vmatmul.mubr.f32.gmra.mxu1 %v732_v55 }
 0x17c   : > { %v2731_v61 = vpop.f32.mrf.mxu0 }
 0x17d   : > { %v733_v62 = vmul.f32 %v2731_v61, %v2731_v61 }
 0x17e   : > { %v698_v2 = vpop.f32.mrf.mxu0 }
 0x17f   : > { %2033 = vmatprep.mubr.f32.mxu1 %v733_v62 }
 0x180   : > { %v2741_v7 = vpop.f32.mrf.mxu0 }
 0x181   : > { %v734_v10 = vmul.f32 %v2741_v7, %v2741_v7 }
 0x182   : > { %v701_v11 = vpop.f32.mrf.mxu0 }
 0x183   : > { %2034 = vmatmul.mubr.f32.gmra.mxu1 %v734_v10 }
 0x1cb   : > { %v1990_v13 = vpop.f32.mrf.mxu1 }
 0x1cc   : > { %2187 = vrsqrt.f32 %v1990_v13  ;;  %vm985_vm2 = vcmp.eq.f32.partialorder %v1990_v13, inf  ;;  %v988_v26 = vand.u32 2147483648, %v1990_v13  ;;  %vm987_vm3 = vcmp.eq.f32.partialorder %v1990_v13, 0.0 }
 0x1cd   : > { %v817_v14 = vpop.f32.mrf.mxu1 }
 0x1ce   : > { %2189 = vrsqrt.f32 %v817_v14  ;;  %vm978_vm4 = vcmp.eq.f32.partialorder %v817_v14, inf  ;;  %v981_v35 = vand.u32 2147483648, %v817_v14  ;;  %vm980_vm5 = vcmp.eq.f32.partialorder %v817_v14, 0.0 }
 0x1d3   : > { %v1993_v17 = vpop.f32.mrf.mxu1 }
 0x1d4   : > { %2191 = vrsqrt.f32 %v1993_v17  ;;  %vm999_vm6 = vcmp.eq.f32.partialorder %v1993_v17, inf  ;;  %v1002_v52 = vand.u32 2147483648, %v1993_v17  ;;  %vm1001_vm7 = vcmp.eq.f32.partialorder %v1993_v17, 0.0 }
 0x1d5   : > { %v827_v19 = vpop.f32.mrf.mxu1 }
 0x1d6   : > { %2193 = vrsqrt.f32 %v827_v19  ;;  %vm992_vm8 = vcmp.eq.f32.partialorder %v827_v19, inf  ;;  %v995_v62 = vand.u32 2147483648, %v827_v19  ;;  %vm994_vm9 = vcmp.eq.f32.partialorder %v827_v19, 0.0 }
 0x1d9   : > { %v2188_v20 = vpop.eup %2187 }
 0x1da   : > { %v984_v22 = vmul.f32 %v2188_v20, %v1990_v13 }
 0x1db   : > { %v2190_v25 = vpop.eup %2189  ;;  %v1996_v28 = vpop.f32.mrf.mxu1 }
 0x1dc   : > { %v986_v29 = vsel %vm985_vm2, %v1990_v13, %v984_v22  ;;  %v977_v32 = vmul.f32 %v2190_v25, %v817_v14  ;;  %2195 = vrsqrt.f32 %v1996_v28  ;;  %vm1013_vm10 = vcmp.eq.f32.partialorder %v1996_v28, inf }
 0x1dd   : > { %v989_v34 = vsel %vm987_vm3, %v988_v26, %v986_v29  ;;  %v837_v37 = vpop.f32.mrf.mxu1  ;;  %v1016_v22 = vand.u32 2147483648, %v1996_v28  ;;  %vm1015_vm11 = vcmp.eq.f32.partialorder %v1996_v28, 0.0 }
 0x1de   : > { %v1826_v40 = vmul.f32 -1.442695, %v989_v34  ;;  %v979_v41 = vsel %vm978_vm4, %v817_v14, %v977_v32  ;;  %2197 = vrsqrt.f32 %v837_v37  ;;  %vm1006_vm12 = vcmp.eq.f32.partialorder %v837_v37, inf }
 0x1df   : > { %v982_v43 = vsel %vm980_vm5, %v981_v35, %v979_v41  ;;  %vm1008_vm13 = vcmp.eq.f32.partialorder %v837_v37, 0.0 }
 0x1e0   : > { %2199 = vpow2.f32 %v1826_v40  ;;  %v1825_v44 = vmul.f32 -1.442695, %v982_v43 }
 0x1e1   : > { %v2192_v47 = vpop.eup %2191 }
 0x1e2   : > { %2201 = vpow2.f32 %v1825_v44  ;;  %v998_v49 = vmul.f32 %v2192_v47, %v1993_v17 }
 0x1e3   : > { %v2194_v50 = vpop.eup %2193  ;;  %v1999_v55 = vpop.f32.mrf.mxu1 }
 0x1e4   : > { %v1000_v56 = vsel %vm999_vm6, %v1993_v17, %v998_v49  ;;  %v991_v58 = vmul.f32 %v2194_v50, %v827_v19  ;;  %2203 = vrsqrt.f32 %v1999_v55  ;;  %vm1027_vm14 = vcmp.eq.f32.partialorder %v1999_v55, inf }
 0x1e5   : > { %v1003_v59 = vsel %vm1001_vm7, %v1002_v52, %v1000_v56  ;;  %v847_v1 = vpop.f32.mrf.mxu1  ;;  %v1030_v56 = vand.u32 2147483648, %v1999_v55  ;;  %vm1029_vm15 = vcmp.eq.f32.partialorder %v1999_v55, 0.0 }
 0x1e6   : > { %v1828_v2 = vmul.f32 -1.442695, %v1003_v59  ;;  %v993_v5 = vsel %vm992_vm8, %v827_v19, %v991_v58  ;;  %2205 = vrsqrt.f32 %v847_v1  ;;  %v1009_v19 = vand.u32 2147483648, %v837_v37 }
 0x1e7   : > { %v996_v10 = vsel %vm994_vm9, %v995_v62, %v993_v5  ;;  %vm1020_vm0 = vcmp.eq.f32.partialorder %v847_v1, inf  ;;  %vm1022_vm1 = vcmp.eq.f32.partialorder %v847_v1, 0.0  ;;  %v1023_v5 = vand.u32 2147483648, %v847_v1 }
 0x1e8   : > { %2207 = vpow2.f32 %v1828_v2  ;;  %v1827_v11 = vmul.f32 -1.442695, %v996_v10 }
 0x1e9   : > { %v2196_v13 = vpop.eup %2195 }
 0x1ea   : > { %2209 = vpow2.f32 %v1827_v11  ;;  %v1012_v14 = vmul.f32 %v2196_v13, %v1996_v28 }
 0x1eb   : > { %v2198_v20 = vpop.eup %2197  ;;  %v2745_v17 = vpop.f32.mrf.mxu1 }
 0x1ec   : > { %v1014_v25 = vsel %vm1013_vm10, %v1996_v28, %v1012_v14  ;;  %v1005_v26 = vmul.f32 %v2198_v20, %v837_v37  ;;  %2211 = vrsqrt.f32 %v2745_v17  ;;  %vm1041_vm2 = vcmp.eq.f32.partialorder %v2745_v17, inf }
 0x1ed   : > { %v2200_v29 = vpop.eup %2199  ;;  %v1017_v32 = vsel %vm1015_vm11, %v1016_v22, %v1014_v25  ;;  %v2748_v34 = vpop.f32.mrf.mxu1  ;;  %vm1043_vm3 = vcmp.eq.f32.partialorder %v2745_v17, 0.0 }
 0x1ee   : > { %v1297_v35 = vadd.f32 1.0, %v2200_v29  ;;  %v1830_v40 = vmul.f32 -1.442695, %v1017_v32  ;;  %v1007_v41 = vsel %vm1006_vm12, %v837_v37, %v1005_v26  ;;  %2213 = vrsqrt.f32 %v2748_v34 }
 0x1ef   : > { %v2202_v43 = vpop.eup %2201  ;;  %v1010_v44 = vsel %vm1008_vm13, %v1009_v19, %v1007_v41  ;;  %v1044_v19 = vand.u32 2147483648, %v2745_v17  ;;  %vm1034_vm4 = vcmp.eq.f32.partialorder %v2748_v34, inf  ;;  %vm1036_vm5 = vcmp.eq.f32.partialorder %v2748_v34, 0.0 }
 0x1f0   : > { %2215 = vrcp.f32 %v1297_v35  ;;  %v1296_v47 = vadd.f32 1.0, %v2202_v43  ;;  %v1829_v28 = vmul.f32 -1.442695, %v1010_v44  ;;  %v1037_v44 = vand.u32 2147483648, %v2748_v34 }
 0x1f1   : > { %v2204_v49 = vpop.eup %2203  ;;  %2217 = vpow2.f32 %v1830_v40 }
 0x1f2   : > { %2219 = vrcp.f32 %v1296_v47  ;;  %v1026_v50 = vmul.f32 %v2204_v49, %v1999_v55 }
 0x1f3   : > { %v2206_v52 = vpop.eup %2205  ;;  %2221 = vpow2.f32 %v1829_v28  ;;  %v2751_v58 = vpop.f32.mrf.mxu1 }
 0x1f4   : > { %v1028_v59 = vsel %vm1027_vm14, %v1999_v55, %v1026_v50  ;;  %v1019_v37 = vmul.f32 %v2206_v52, %v847_v1  ;;  %2223 = vrsqrt.f32 %v2751_v58  ;;  %vm1055_vm6 = vcmp.eq.f32.partialorder %v2751_v58, inf }
 0x1f5   : > { %v2208_v62 = vpop.eup %2207  ;;  %v1031_v2 = vsel %vm1029_vm15, %v1030_v56, %v1028_v59  ;;  %v2754_v10 = vpop.f32.mrf.mxu1  ;;  %vm1057_vm7 = vcmp.eq.f32.partialorder %v2751_v58, 0.0 }
 0x1f6   : > { %v1299_v11 = vadd.f32 1.0, %v2208_v62  ;;  %v1832_v13 = vmul.f32 -1.442695, %v1031_v2  ;;  %v1021_v14 = vsel %vm1020_vm0, %v847_v1, %v1019_v37  ;;  %2225 = vrsqrt.f32 %v2754_v10 }
 0x1f7   : > { %v2210_v20 = vpop.eup %2209  ;;  %v1024_v22 = vsel %vm1022_vm1, %v1023_v5, %v1021_v14  ;;  %vm1048_vm8 = vcmp.eq.f32.partialorder %v2754_v10, inf  ;;  %vm1050_vm9 = vcmp.eq.f32.partialorder %v2754_v10, 0.0 }
 0x1f8   : > { %2227 = vrcp.f32 %v1299_v11  ;;  %v1298_v25 = vadd.f32 1.0, %v2210_v20  ;;  %v1831_v55 = vmul.f32 -1.442695, %v1024_v22 }
 0x1f9   : > { %v2212_v26 = vpop.eup %2211  ;;  %2229 = vpow2.f32 %v1832_v13 }
 0x1fa   : > { %2231 = vrcp.f32 %v1298_v25  ;;  %v1040_v29 = vmul.f32 %v2212_v26, %v2745_v17 }
 0x1fb   : > { %v2214_v32 = vpop.eup %2213  ;;  %2233 = vpow2.f32 %v1831_v55  ;;  %v2760_v35 = vpop.f32.mrf.mxu1  ;;  %v1051_v55 = vand.u32 2147483648, %v2754_v10 }
 0x1fc   : > { %v1042_v1 = vsel %vm1041_vm2, %v2745_v17, %v1040_v29  ;;  %v1033_v40 = vmul.f32 %v2214_v32, %v2748_v34  ;;  %2235 = vrsqrt.f32 %v2760_v35  ;;  %vm1069_vm10 = vcmp.eq.f32.partialorder %v2760_v35, inf }
 0x1fd   : > { %v2216_v41 = vpop.eup %2215  ;;  %v1045_v43 = vsel %vm1043_vm3, %v1044_v19, %v1042_v1  ;;  %v2768_v47 = vpop.f32.mrf.mxu1  ;;  %vm1071_vm11 = vcmp.eq.f32.partialorder %v2760_v35, 0.0 }
 0x1fe   : > { %v2218_v28 = vpop.eup %2217  ;;  %v1834_v49 = vmul.f32 -1.442695, %v1045_v43  ;;  %v1035_v50 = vsel %vm1034_vm4, %v2748_v34, %v1033_v40  ;;  %2237 = vrsqrt.f32 %v2768_v47  ;;  %v1058_v34 = vand.u32 2147483648, %v2751_v58 }
 0x1ff   : > { %v2220_v17 = vpop.eup %2219  ;;  %v1301_v52 = vadd.f32 1.0, %v2218_v28  ;;  %v1038_v56 = vsel %vm1036_vm5, %v1037_v44, %v1035_v50  ;;  %vm1062_vm12 = vcmp.eq.f32.partialorder %v2768_v47, inf  ;;  %vm1064_vm13 = vcmp.eq.f32.partialorder %v2768_v47, 0.0 }
 0x200   : > { %v2222_v59 = vpop.eup %2221  ;;  %2239 = vpow2.f32 %v1834_v49  ;;  %v1833_v37 = vmul.f32 -1.442695, %v1038_v56  ;;  %2068 = vmatprep.mubr.f32.mxu1 %v2220_v17 }
 0x201   : > { %v2224_v62 = vpop.eup %2223  ;;  %2241 = vrcp.f32 %v1301_v52  ;;  %v1300_v2 = vadd.f32 1.0, %v2222_v59  ;;  %2069 = vmatmul.mubr.f32.vlgmr.msra.gmra.mxu1 %v2216_v41 }
 0x202   : > { %2243 = vpow2.f32 %v1833_v37  ;;  %v1054_v5 = vmul.f32 %v2224_v62, %v2751_v58  ;;  %v1065_v62 = vand.u32 2147483648, %v2768_v47 }
 0x203   : > { %v2226_v11 = vpop.eup %2225  ;;  %2245 = vrcp.f32 %v1300_v2  ;;  %v2776_v13 = vpop.f32.mrf.mxu1 }
 0x204   : > { %v1056_v14 = vsel %vm1055_vm6, %v2751_v58, %v1054_v5  ;;  %v1047_v20 = vmul.f32 %v2226_v11, %v2754_v10  ;;  %2247 = vrsqrt.f32 %v2776_v13  ;;  %vm1083_vm14 = vcmp.eq.f32.partialorder %v2776_v13, inf }
 0x205   : > { %v2228_v22 = vpop.eup %2227  ;;  %v1059_v25 = vsel %vm1057_vm7, %v1058_v34, %v1056_v14  ;;  %v2784_v26 = vpop.f32.mrf.mxu1  ;;  %vm1085_vm15 = vcmp.eq.f32.partialorder %v2776_v13, 0.0 }
 0x206   : > { %v2230_v29 = vpop.eup %2229  ;;  %v1836_v32 = vmul.f32 -1.442695, %v1059_v25  ;;  %v1049_v19 = vsel %vm1048_vm8, %v2754_v10, %v1047_v20  ;;  %2249 = vrsqrt.f32 %v2784_v26  ;;  %v1072_v10 = vand.u32 2147483648, %v2760_v35 }
 0x207   : > { %v2232_v58 = vpop.eup %2231  ;;  %v1303_v1 = vadd.f32 1.0, %v2230_v29  ;;  %v1052_v40 = vsel %vm1050_vm9, %v1051_v55, %v1049_v19  ;;  %vm1076_vm0 = vcmp.eq.f32.partialorder %v2784_v26, inf  ;;  %vm1078_vm1 = vcmp.eq.f32.partialorder %v2784_v26, 0.0 }
 0x208   : > { %v2234_v41 = vpop.eup %2233  ;;  %2251 = vpow2.f32 %v1836_v32  ;;  %v1835_v43 = vmul.f32 -1.442695, %v1052_v40  ;;  %2071 = vmatprep.mubr.f32.mxu1 %v2232_v58 }
 0x209   : > { %v2236_v44 = vpop.eup %2235  ;;  %2253 = vrcp.f32 %v1303_v1  ;;  %v1302_v28 = vadd.f32 1.0, %v2234_v41  ;;  %2072 = vmatmul.mubr.f32.gmra.mxu1 %v2228_v22 }
 0x20a   : > { %2255 = vpow2.f32 %v1835_v43  ;;  %v1068_v49 = vmul.f32 %v2236_v44, %v2760_v35  ;;  %v1079_v44 = vand.u32 2147483648, %v2784_v26 }
 0x20b   : > { %v2238_v50 = vpop.eup %2237  ;;  %2257 = vrcp.f32 %v1302_v28  ;;  %v2792_v17 = vpop.f32.mrf.mxu1 }
 0x20c   : > { %v1070_v52 = vsel %vm1069_vm10, %v2760_v35, %v1068_v49  ;;  %v1061_v56 = vmul.f32 %v2238_v50, %v2768_v47  ;;  %2259 = vrsqrt.f32 %v2792_v17  ;;  %vm1097_vm2 = vcmp.eq.f32.partialorder %v2792_v17, inf }
 0x20d   : > { %v2240_v59 = vpop.eup %2239  ;;  %v1073_v37 = vsel %vm1071_vm11, %v1072_v10, %v1070_v52  ;;  %v2801_v2 = vpop.f32.mrf.mxu1  ;;  %vm1099_vm3 = vcmp.eq.f32.partialorder %v2792_v17, 0.0 }
 0x20e   : > { %v2242_v5 = vpop.eup %2241  ;;  %v1305_v11 = vadd.f32 1.0, %v2240_v59  ;;  %v1838_v34 = vmul.f32 -1.442695, %v1073_v37  ;;  %v1063_v14 = vsel %vm1062_vm12, %v2768_v47, %v1061_v56  ;;  %2261 = vrsqrt.f32 %v2801_v2 }
 0x20f   : > { %v2244_v35 = vpop.eup %2243  ;;  %v1066_v20 = vsel %vm1064_vm13, %v1065_v62, %v1063_v14  ;;  %v1086_v47 = vand.u32 2147483648, %v2776_v13  ;;  %vm1090_vm4 = vcmp.eq.f32.partialorder %v2801_v2, inf  ;;  %vm1092_vm5 = vcmp.eq.f32.partialorder %v2801_v2, 0.0 }
 0x210   : > { %v2246_v22 = vpop.eup %2245  ;;  %2263 = vrcp.f32 %v1305_v11  ;;  %v1304_v25 = vadd.f32 1.0, %v2244_v35  ;;  %v1837_v55 = vmul.f32 -1.442695, %v1066_v20 }
 0x211   : > { %v2248_v29 = vpop.eup %2247  ;;  %2265 = vpow2.f32 %v1838_v34  ;;  %2074 = vmatprep.mubr.f32.mxu1 %v2246_v22 }
 0x212   : > { %2267 = vrcp.f32 %v1304_v25  ;;  %v1082_v32 = vmul.f32 %v2248_v29, %v2776_v13  ;;  %2075 = vmatmul.mubr.f32.gmra.mxu1 %v2242_v5 }
 0x213   : > { %v2250_v19 = vpop.eup %2249  ;;  %2269 = vpow2.f32 %v1837_v55  ;;  %v2808_v58 = vpop.f32.mrf.mxu1  ;;  %v1093_v55 = vand.u32 2147483648, %v2801_v2 }
 0x214   : > { %v1084_v1 = vsel %vm1083_vm14, %v2776_v13, %v1082_v32  ;;  %v1075_v40 = vmul.f32 %v2250_v19, %v2784_v26  ;;  %2271 = vrsqrt.f32 %v2808_v58  ;;  %vm1111_vm6 = vcmp.eq.f32.partialorder %v2808_v58, inf }
 0x215   : > { %v2252_v41 = vpop.eup %2251  ;;  %v1087_v43 = vsel %vm1085_vm15, %v1086_v47, %v1084_v1  ;;  %v2817_v28 = vpop.f32.mrf.mxu1  ;;  %vm1113_vm7 = vcmp.eq.f32.partialorder %v2808_v58, 0.0 }
 0x216   : > { %v2254_v49 = vpop.eup %2253  ;;  %v1307_v50 = vadd.f32 1.0, %v2252_v41  ;;  %v1840_v10 = vmul.f32 -1.442695, %v1087_v43  ;;  %v1077_v52 = vsel %vm1076_vm0, %v2784_v26, %v1075_v40  ;;  %2273 = vrsqrt.f32 %v2817_v28 }
 0x217   : > { %v2256_v13 = vpop.eup %2255  ;;  %v1080_v56 = vsel %vm1078_vm1, %v1079_v44, %v1077_v52  ;;  %v1100_v26 = vand.u32 2147483648, %v2792_v17  ;;  %vm1104_vm8 = vcmp.eq.f32.partialorder %v2817_v28, inf  ;;  %vm1106_vm9 = vcmp.eq.f32.partialorder %v2817_v28, 0.0 }
 0x218   : > { %v2258_v59 = vpop.eup %2257  ;;  %2275 = vrcp.f32 %v1307_v50  ;;  %v1306_v37 = vadd.f32 1.0, %v2256_v13  ;;  %v1839_v62 = vmul.f32 -1.442695, %v1080_v56 }
 0x219   : > { %v2260_v5 = vpop.eup %2259  ;;  %2277 = vpow2.f32 %v1840_v10  ;;  %2077 = vmatprep.mubr.f32.mxu1 %v2258_v59 }
 0x21a   : > { %2279 = vrcp.f32 %v1306_v37  ;;  %v1096_v11 = vmul.f32 %v2260_v5, %v2792_v17  ;;  %2078 = vmatmul.mubr.f32.gmra.mxu1 %v2254_v49 }
 0x21b   : > { %v2262_v34 = vpop.eup %2261  ;;  %2281 = vpow2.f32 %v1839_v62  ;;  %v2824_v14 = vpop.f32.mrf.mxu1  ;;  %v1107_v62 = vand.u32 2147483648, %v2817_v28 }
 0x21c   : > { %v1098_v35 = vsel %vm1097_vm2, %v2792_v17, %v1096_v11  ;;  %v1089_v20 = vmul.f32 %v2262_v34, %v2801_v2  ;;  %2283 = vrsqrt.f32 %v2824_v14  ;;  %vm1125_vm10 = vcmp.eq.f32.partialorder %v2824_v14, inf }
 0x21d   : > { %v2264_v22 = vpop.eup %2263  ;;  %v1101_v25 = vsel %vm1099_vm3, %v1100_v26, %v1098_v35  ;;  %v2832_v29 = vpop.f32.mrf.mxu1  ;;  %vm1127_vm11 = vcmp.eq.f32.partialorder %v2824_v14, 0.0 }
 0x21e   : > { %v2266_v32 = vpop.eup %2265  ;;  %v1842_v19 = vmul.f32 -1.442695, %v1101_v25  ;;  %v1091_v47 = vsel %vm1090_vm4, %v2801_v2, %v1089_v20  ;;  %2285 = vrsqrt.f32 %v2832_v29  ;;  %v1114_v2 = vand.u32 2147483648, %v2808_v58 }
 0x21f   : > { %v2268_v17 = vpop.eup %2267  ;;  %v1309_v1 = vadd.f32 1.0, %v2266_v32  ;;  %v1094_v40 = vsel %vm1092_vm5, %v1093_v55, %v1091_v47  ;;  %vm1118_vm12 = vcmp.eq.f32.partialorder %v2832_v29, inf  ;;  %vm1120_vm13 = vcmp.eq.f32.partialorder %v2832_v29, 0.0 }
 0x220   : > { %v2270_v41 = vpop.eup %2269  ;;  %2287 = vpow2.f32 %v1842_v19  ;;  %v1841_v43 = vmul.f32 -1.442695, %v1094_v40  ;;  %2080 = vmatprep.mubr.f32.mxu1 %v2268_v17 }
 0x221   : > { %v2272_v44 = vpop.eup %2271  ;;  %2289 = vrcp.f32 %v1309_v1  ;;  %v1308_v49 = vadd.f32 1.0, %v2270_v41  ;;  %2081 = vmatmul.mubr.f32.gmra.mxu1 %v2264_v22 }
 0x222   : > { %2291 = vpow2.f32 %v1841_v43  ;;  %v1110_v50 = vmul.f32 %v2272_v44, %v2808_v58  ;;  %v1121_v44 = vand.u32 2147483648, %v2832_v29 }
 0x223   : > { %v2274_v10 = vpop.eup %2273  ;;  %2293 = vrcp.f32 %v1308_v49  ;;  %v2840_v52 = vpop.f32.mrf.mxu1 }
 0x224   : > { %v1112_v13 = vsel %vm1111_vm6, %v2808_v58, %v1110_v50  ;;  %v1103_v56 = vmul.f32 %v2274_v10, %v2817_v28  ;;  %2295 = vrsqrt.f32 %v2840_v52  ;;  %vm1139_vm14 = vcmp.eq.f32.partialorder %v2840_v52, inf }
 0x225   : > { %v2276_v59 = vpop.eup %2275  ;;  %v1115_v37 = vsel %vm1113_vm7, %v1114_v2, %v1112_v13  ;;  %v2848_v5 = vpop.f32.mrf.mxu1  ;;  %vm1141_vm15 = vcmp.eq.f32.partialorder %v2840_v52, 0.0 }
 0x226   : > { %v2278_v11 = vpop.eup %2277  ;;  %v1844_v34 = vmul.f32 -1.442695, %v1115_v37  ;;  %v1105_v26 = vsel %vm1104_vm8, %v2817_v28, %v1103_v56  ;;  %2297 = vrsqrt.f32 %v2848_v5  ;;  %v1128_v28 = vand.u32 2147483648, %v2824_v14 }
 0x227   : > { %v2280_v58 = vpop.eup %2279  ;;  %v1311_v35 = vadd.f32 1.0, %v2278_v11  ;;  %v1108_v20 = vsel %vm1106_vm9, %v1107_v62, %v1105_v26  ;;  %vm1132_vm0 = vcmp.eq.f32.partialorder %v2848_v5, inf  ;;  %vm1134_vm1 = vcmp.eq.f32.partialorder %v2848_v5, 0.0 }
 0x228   : > { %v2282_v22 = vpop.eup %2281  ;;  %2299 = vpow2.f32 %v1844_v34  ;;  %v1843_v25 = vmul.f32 -1.442695, %v1108_v20  ;;  %2083 = vmatprep.mubr.f32.mxu1 %v2280_v58 }
 0x229   : > { %v2284_v55 = vpop.eup %2283  ;;  %2301 = vrcp.f32 %v1311_v35  ;;  %v1310_v32 = vadd.f32 1.0, %v2282_v22  ;;  %2084 = vmatmul.mubr.f32.gmra.mxu1 %v2276_v59 }
 0x22a   : > { %2303 = vpow2.f32 %v1843_v25  ;;  %v1124_v19 = vmul.f32 %v2284_v55, %v2824_v14  ;;  %v1135_v55 = vand.u32 2147483648, %v2848_v5 }
 0x22b   : > { %v2286_v47 = vpop.eup %2285  ;;  %2305 = vrcp.f32 %v1310_v32  ;;  %v2856_v17 = vpop.f32.mrf.mxu1 }
 0x22c   : > { %v1126_v1 = vsel %vm1125_vm10, %v2824_v14, %v1124_v19  ;;  %v1117_v40 = vmul.f32 %v2286_v47, %v2832_v29  ;;  %2307 = vrsqrt.f32 %v2856_v17  ;;  %vm1153_vm2 = vcmp.eq.f32.partialorder %v2856_v17, inf }
 0x22d   : > { %v2288_v41 = vpop.eup %2287  ;;  %v1129_v43 = vsel %vm1127_vm11, %v1128_v28, %v1126_v1  ;;  %v2865_v49 = vpop.f32.mrf.mxu1  ;;  %vm1155_vm3 = vcmp.eq.f32.partialorder %v2856_v17, 0.0 }
 0x22e   : > { %v2290_v50 = vpop.eup %2289  ;;  %v1313_v10 = vadd.f32 1.0, %v2288_v41  ;;  %v1846_v2 = vmul.f32 -1.442695, %v1129_v43  ;;  %v1119_v13 = vsel %vm1118_vm12, %v2832_v29, %v1117_v40  ;;  %2309 = vrsqrt.f32 %v2865_v49 }
 0x22f   : > { %v2292_v14 = vpop.eup %2291  ;;  %v1122_v56 = vsel %vm1120_vm13, %v1121_v44, %v1119_v13  ;;  %v1142_v29 = vand.u32 2147483648, %v2840_v52  ;;  %vm1146_vm4 = vcmp.eq.f32.partialorder %v2865_v49, inf  ;;  %vm1148_vm5 = vcmp.eq.f32.partialorder %v2865_v49, 0.0 }
 0x230   : > { %v2294_v59 = vpop.eup %2293  ;;  %2311 = vrcp.f32 %v1313_v10  ;;  %v1312_v37 = vadd.f32 1.0, %v2292_v14  ;;  %v1845_v62 = vmul.f32 -1.442695, %v1122_v56 }
 0x231   : > { %v2296_v11 = vpop.eup %2295  ;;  %2313 = vpow2.f32 %v1846_v2  ;;  %2086 = vmatprep.mubr.f32.mxu1 %v2294_v59 }
 0x232   : > { %2315 = vrcp.f32 %v1312_v37  ;;  %v1138_v34 = vmul.f32 %v2296_v11, %v2840_v52  ;;  %2087 = vmatmul.mubr.f32.gmra.mxu1 %v2290_v50 }
 0x233   : > { %v2298_v26 = vpop.eup %2297  ;;  %2317 = vpow2.f32 %v1845_v62  ;;  %v2872_v58 = vpop.f32.mrf.mxu1  ;;  %v1149_v62 = vand.u32 2147483648, %v2865_v49 }
 0x234   : > { %v1140_v35 = vsel %vm1139_vm14, %v2840_v52, %v1138_v34  ;;  %v1131_v20 = vmul.f32 %v2298_v26, %v2848_v5  ;;  %2319 = vrsqrt.f32 %v2872_v58  ;;  %vm1167_vm6 = vcmp.eq.f32.partialorder %v2872_v58, inf }
 0x235   : > { %v2300_v22 = vpop.eup %2299  ;;  %v1143_v25 = vsel %vm1141_vm15, %v1142_v29, %v1140_v35  ;;  %v2881_v32 = vpop.f32.mrf.mxu1  ;;  %vm1169_vm7 = vcmp.eq.f32.partialorder %v2872_v58, 0.0 }
 0x236   : > { %v2302_v19 = vpop.eup %2301  ;;  %v1315_v47 = vadd.f32 1.0, %v2300_v22  ;;  %v1848_v28 = vmul.f32 -1.442695, %v1143_v25  ;;  %v1133_v1 = vsel %vm1132_vm0, %v2848_v5, %v1131_v20  ;;  %2321 = vrsqrt.f32 %v2881_v32 }
 0x237   : > { %v2304_v52 = vpop.eup %2303  ;;  %v1136_v40 = vsel %vm1134_vm1, %v1135_v55, %v1133_v1  ;;  %v1156_v5 = vand.u32 2147483648, %v2856_v17  ;;  %vm1160_vm8 = vcmp.eq.f32.partialorder %v2881_v32, inf  ;;  %vm1162_vm9 = vcmp.eq.f32.partialorder %v2881_v32, 0.0 }
 0x238   : > { %v2306_v41 = vpop.eup %2305  ;;  %2323 = vrcp.f32 %v1315_v47  ;;  %v1314_v43 = vadd.f32 1.0, %v2304_v52  ;;  %v1847_v44 = vmul.f32 -1.442695, %v1136_v40 }
 0x239   : > { %v2308_v50 = vpop.eup %2307  ;;  %2325 = vpow2.f32 %v1848_v28  ;;  %2089 = vmatprep.mubr.f32.mxu1 %v2306_v41 }
 0x23a   : > { %2327 = vrcp.f32 %v1314_v43  ;;  %v1152_v10 = vmul.f32 %v2308_v50, %v2856_v17  ;;  %2090 = vmatmul.mubr.f32.gmra.mxu1 %v2302_v19 }
 0x23b   : > { %v2310_v2 = vpop.eup %2309  ;;  %2329 = vpow2.f32 %v1847_v44  ;;  %v2888_v13 = vpop.f32.mrf.mxu1  ;;  %v1163_v44 = vand.u32 2147483648, %v2881_v32 }
 0x23c   : > { %v1154_v14 = vsel %vm1153_vm2, %v2856_v17, %v1152_v10  ;;  %v1145_v56 = vmul.f32 %v2310_v2, %v2865_v49  ;;  %2331 = vrsqrt.f32 %v2888_v13  ;;  %vm1181_vm10 = vcmp.eq.f32.partialorder %v2888_v13, inf }
 0x23d   : > { %v2312_v59 = vpop.eup %2311  ;;  %v1157_v37 = vsel %vm1155_vm3, %v1156_v5, %v1154_v14  ;;  %v2896_v11 = vpop.f32.mrf.mxu1  ;;  %vm1183_vm11 = vcmp.eq.f32.partialorder %v2888_v13, 0.0 }
 0x23e   : > { %v2314_v34 = vpop.eup %2313  ;;  %v1850_v26 = vmul.f32 -1.442695, %v1157_v37  ;;  %v1147_v29 = vsel %vm1146_vm4, %v2865_v49, %v1145_v56  ;;  %2333 = vrsqrt.f32 %v2896_v11  ;;  %v1170_v49 = vand.u32 2147483648, %v2872_v58 }
 0x23f   : > { %v2316_v17 = vpop.eup %2315  ;;  %v1317_v35 = vadd.f32 1.0, %v2314_v34  ;;  %v1150_v20 = vsel %vm1148_vm5, %v1149_v62, %v1147_v29  ;;  %vm1174_vm12 = vcmp.eq.f32.partialorder %v2896_v11, inf  ;;  %vm1176_vm13 = vcmp.eq.f32.partialorder %v2896_v11, 0.0 }
 0x240   : > { %v2318_v22 = vpop.eup %2317  ;;  %2335 = vpow2.f32 %v1850_v26  ;;  %v1849_v25 = vmul.f32 -1.442695, %v1150_v20  ;;  %2092 = vmatprep.mubr.f32.mxu1 %v2316_v17 }
 0x241   : > { %v2320_v55 = vpop.eup %2319  ;;  %2337 = vrcp.f32 %v1317_v35  ;;  %v1316_v19 = vadd.f32 1.0, %v2318_v22  ;;  %2093 = vmatmul.mubr.f32.gmra.mxu1 %v2312_v59 }
 0x242   : > { %2339 = vpow2.f32 %v1849_v25  ;;  %v1166_v47 = vmul.f32 %v2320_v55, %v2872_v58  ;;  %v1177_v25 = vand.u32 2147483648, %v2896_v11 }
 0x243   : > { %v2322_v28 = vpop.eup %2321  ;;  %2341 = vrcp.f32 %v1316_v19  ;;  %v2904_v1 = vpop.f32.mrf.mxu1 }
 0x244   : > { %v1168_v52 = vsel %vm1167_vm6, %v2872_v58, %v1166_v47  ;;  %v1159_v40 = vmul.f32 %v2322_v28, %v2881_v32  ;;  %2343 = vrsqrt.f32 %v2904_v1  ;;  %vm1195_vm14 = vcmp.eq.f32.partialorder %v2904_v1, inf }
 0x245   : > { %v2324_v41 = vpop.eup %2323  ;;  %v1171_v43 = vsel %vm1169_vm7, %v1170_v49, %v1168_v52  ;;  %v2912_v50 = vpop.f32.mrf.mxu1  ;;  %vm1197_vm15 = vcmp.eq.f32.partialorder %v2904_v1, 0.0 }
 0x246   : > { %v2326_v10 = vpop.eup %2325  ;;  %v1852_v2 = vmul.f32 -1.442695, %v1171_v43  ;;  %v1161_v5 = vsel %vm1160_vm8, %v2881_v32, %v1159_v40  ;;  %2345 = vrsqrt.f32 %v2912_v50  ;;  %v1184_v32 = vand.u32 2147483648, %v2888_v13 }
 0x247   : > { %v2328_v58 = vpop.eup %2327  ;;  %v1164_v14 = vsel %vm1162_vm9, %v1163_v44, %v1161_v5  ;;  %v1319_v59 = vadd.f32 1.0, %v2326_v10  ;;  %vm1188_vm0 = vcmp.eq.f32.partialorder %v2912_v50, inf  ;;  %vm1190_vm1 = vcmp.eq.f32.partialorder %v2912_v50, 0.0 }
 0x248   : > { %v2330_v56 = vpop.eup %2329  ;;  %2347 = vpow2.f32 %v1852_v2  ;;  %v1851_v37 = vmul.f32 -1.442695, %v1164_v14  ;;  %2095 = vmatprep.mubr.f32.mxu1 %v2328_v58  ;;  %v1198_v2 = vand.u32 2147483648, %v2904_v1 }
 0x249   : > { %v2332_v62 = vpop.eup %2331  ;;  %v1318_v34 = vadd.f32 1.0, %v2330_v56  ;;  %2096 = vmatmul.mubr.f32.gmra.mxu1 %v2324_v41  ;;  %v1191_v56 = vand.u32 2147483648, %v2912_v50 }
 0x24a   : > { %2349 = vpow2.f32 %v1851_v37  ;;  %v1180_v26 = vmul.f32 %v2332_v62, %v2888_v13 }
 0x24b   : > { %v2334_v29 = vpop.eup %2333  ;;  %2351 = vrcp.f32 %v1318_v34 }
 0x24c   : > { %2353 = vrcp.f32 %v1319_v59  ;;  %v1182_v17 = vsel %vm1181_vm10, %v2888_v13, %v1180_v26  ;;  %v1173_v35 = vmul.f32 %v2334_v29, %v2896_v11 }
 0x24d   : > { %v2336_v20 = vpop.eup %2335  ;;  %v1185_v22 = vsel %vm1183_vm11, %v1184_v32, %v1182_v17 }
 0x24e   : > { %v2338_v55 = vpop.eup %2337  ;;  %v1321_v19 = vadd.f32 1.0, %v2336_v20  ;;  %v1854_v47 = vmul.f32 -1.442695, %v1185_v22  ;;  %v1175_v28 = vsel %vm1174_vm12, %v2896_v11, %v1173_v35 }
 0x24f   : > { %v2340_v49 = vpop.eup %2339  ;;  %v1178_v52 = vsel %vm1176_vm13, %v1177_v25, %v1175_v28 }
 0x250   : > { %v2342_v40 = vpop.eup %2341  ;;  %2355 = vrcp.f32 %v1321_v19  ;;  %v1320_v13 = vadd.f32 1.0, %v2340_v49  ;;  %v1853_v41 = vmul.f32 -1.442695, %v1178_v52 }
 0x251   : > { %v2344_v43 = vpop.eup %2343  ;;  %2357 = vpow2.f32 %v1854_v47  ;;  %2098 = vmatprep.mubr.f32.mxu1 %v2342_v40 }
 0x252   : > { %2359 = vrcp.f32 %v1320_v13  ;;  %v1194_v44 = vmul.f32 %v2344_v43, %v2904_v1  ;;  %2099 = vmatmul.mubr.f32.gmra.mxu1 %v2338_v55 }
 0x253   : > { %v2346_v10 = vpop.eup %2345  ;;  %2361 = vpow2.f32 %v1853_v41 }
 0x254   : > { %v1196_v11 = vsel %vm1195_vm14, %v2904_v1, %v1194_v44  ;;  %v1187_v5 = vmul.f32 %v2346_v10, %v2912_v50 }
 0x255   : > { %v2348_v58 = vpop.eup %2347  ;;  %v1199_v14 = vsel %vm1197_vm15, %v1198_v2, %v1196_v11 }
 0x256   : > { %v1323_v59 = vadd.f32 1.0, %v2348_v58  ;;  %v1856_v37 = vmul.f32 -1.442695, %v1199_v14  ;;  %v1189_v62 = vsel %vm1188_vm0, %v2912_v50, %v1187_v5 }
 0x257   : > { %v2350_v34 = vpop.eup %2349  ;;  %v1192_v26 = vsel %vm1190_vm1, %v1191_v56, %v1189_v62 }
 0x258   : > { %v2352_v29 = vpop.eup %2351  ;;  %2363 = vrcp.f32 %v1323_v59  ;;  %v1322_v32 = vadd.f32 1.0, %v2350_v34  ;;  %v1855_v1 = vmul.f32 -1.442695, %v1192_v26 }
 0x259   : > { %v2354_v17 = vpop.eup %2353  ;;  %2365 = vpow2.f32 %v1856_v37  ;;  %2101 = vmatprep.mubr.f32.mxu1 %v2352_v29 }
 0x25a   : > { %2367 = vrcp.f32 %v1322_v32  ;;  %2102 = vmatmul.mubr.f32.gmra.mxu1 %v2354_v17 }
 0x25b   : > { %2369 = vpow2.f32 %v1855_v1 }
 0x25d   : > { %v2356_v35 = vpop.eup %2355 }
 0x25e   : > { %v2358_v20 = vpop.eup %2357 }
 0x25f   : > { %v2360_v22 = vpop.eup %2359  ;;  %v1325_v55 = vadd.f32 1.0, %v2358_v20 }
 0x260   : > { %v2362_v25 = vpop.eup %2361  ;;  %2104 = vmatprep.mubr.f32.mxu1 %v2360_v22 }
 0x261   : > { %v1324_v19 = vadd.f32 1.0, %v2362_v25  ;;  %2105 = vmatmul.mubr.f32.gmra.mxu1 %v2356_v35 }
 0x263   : > { %2371 = vrcp.f32 %v1324_v19 }
 0x264   : > { %2373 = vrcp.f32 %v1325_v55 }
 0x265   : > { %v2364_v50 = vpop.eup %2363 }
 0x266   : > { %v2366_v47 = vpop.eup %2365 }
 0x267   : > { %v2368_v28 = vpop.eup %2367  ;;  %v1327_v52 = vadd.f32 1.0, %v2366_v47 }
 0x268   : > { %v2370_v49 = vpop.eup %2369  ;;  %2107 = vmatprep.mubr.f32.mxu1 %v2368_v28 }
 0x269   : > { %v1326_v40 = vadd.f32 1.0, %v2370_v49  ;;  %2108 = vmatmul.mubr.f32.gmra.mxu1 %v2364_v50 }
 0x26b   : > { %2375 = vrcp.f32 %v1326_v40 }
 0x26c   : > { %2377 = vrcp.f32 %v1327_v52 }
 0x270   : > { %v2372_v13 = vpop.eup %2371 }
 0x271   : > { %v2374_v41 = vpop.eup %2373  ;;  %2110 = vmatprep.mubr.f32.mxu1 %v2372_v13 }
 0x272   : > { %2111 = vmatmul.mubr.f32.gmra.mxu1 %v2374_v41 }
 0x278   : > { %v2376_v43 = vpop.eup %2375 }
 0x279   : > { %v2378_v44 = vpop.eup %2377  ;;  %2113 = vmatprep.mubr.f32.mxu1 %v2376_v43 }
 0x27a   : > { %2114 = vmatmul.mubr.f32.gmra.mxu1 %v2378_v44 }
 0x2c1   : > { %v2070_v10 = vpop.f32.mrf.mxu1 }
 0x2c2   : > { %v1634_v2 = vmul.f32 %v2070_v10, %v2573_v3 }
 0x2c3   : > { %v1474_v11 = vpop.f32.mrf.mxu1 }
 0x2c4   : > { %1666 = vst [vmem:[%s2942_s25 + $0x8] sm:$0xff] %v1634_v2  ;;  %v1633_v5 = vmul.f32 %v1474_v11, %v2569_v0 }
 0x2c6   : > { %1665 = vst [vmem:[%s2942_s25] sm:$0xff] %v1633_v5 }
 0x2c9   : > { %v2073_v58 = vpop.f32.mrf.mxu1 }
 0x2ca   : > { %v1636_v14 = vmul.f32 %v2073_v58, %v2581_v9 }
 0x2cb   : > { %v1484_v56 = vpop.f32.mrf.mxu1 }
 0x2cc   : > { %1668 = vst [vmem:[%s2942_s25 + $0x18] sm:$0xff] %v1636_v14  ;;  %v1635_v59 = vmul.f32 %v1484_v56, %v2577_v6 }
 0x2ce   : > { %1667 = vst [vmem:[%s2942_s25 + $0x10] sm:$0xff] %v1635_v59 }
 0x2d2   : > { %v2076_v37 = vpop.f32.mrf.mxu1 }
 0x2d3   : > { %v1638_v3 = vmul.f32 %v2076_v37, %v2589_v15 }
 0x2d4   : > { %v1494_v62 = vpop.f32.mrf.mxu1 }
 0x2d5   : > { %1670 = vst [vmem:[%s2942_s25 + $0x28] sm:$0xff] %v1638_v3  ;;  %v1637_v0 = vmul.f32 %v1494_v62, %v2585_v12 }
 0x2d7   : > { %1669 = vst [vmem:[%s2942_s25 + $0x20] sm:$0xff] %v1637_v0 }
 0x2da   : > { %v2079_v34 = vpop.f32.mrf.mxu1 }
 0x2db   : > { %v1640_v9 = vmul.f32 %v2079_v34, %v2597_v21 }
 0x2dc   : > { %v1504_v26 = vpop.f32.mrf.mxu1 }
 0x2dd   : > { %1672 = vst [vmem:[%s2942_s25 + $0x38] sm:$0xff] %v1640_v9  ;;  %v1639_v6 = vmul.f32 %v1504_v26, %v2593_v18 }
 0x2df   : > { %1671 = vst [vmem:[%s2942_s25 + $0x30] sm:$0xff] %v1639_v6 }
 0x2e1   : > { %v2082_v29 = vpop.f32.mrf.mxu1 }
 0x2e2   : > { %v1642_v15 = vmul.f32 %v2082_v29, %v2605_v27 }
 0x2e3   : > { %v1514_v32 = vpop.f32.mrf.mxu1 }
 0x2e4   : > { %1674 = vst [vmem:[%s2942_s25 + $0x48] sm:$0xff] %v1642_v15  ;;  %v1641_v12 = vmul.f32 %v1514_v32, %v2601_v24 }
 0x2e6   : > { %1673 = vst [vmem:[%s2942_s25 + $0x40] sm:$0xff] %v1641_v12 }
 0x2e9   : > { %v2085_v1 = vpop.f32.mrf.mxu1 }
 0x2ea   : > { %v1644_v21 = vmul.f32 %v2085_v1, %v2613_v33 }
 0x2eb   : > { %v1524_v17 = vpop.f32.mrf.mxu1 }
 0x2ec   : > { %1676 = vst [vmem:[%s2942_s25 + $0x58] sm:$0xff] %v1644_v21  ;;  %v1643_v18 = vmul.f32 %v1524_v17, %v2609_v30 }
 0x2ee   : > { %1675 = vst [vmem:[%s2942_s25 + $0x50] sm:$0xff] %v1643_v18 }
 0x2f2   : > { %v2088_v35 = vpop.f32.mrf.mxu1 }
 0x2f3   : > { %v1646_v27 = vmul.f32 %v2088_v35, %v2621_v39 }
 0x2f4   : > { %v1534_v20 = vpop.f32.mrf.mxu1 }
 0x2f5   : > { %1678 = vst [vmem:[%s2942_s25 + $0x68] sm:$0xff] %v1646_v27  ;;  %v1645_v24 = vmul.f32 %v1534_v20, %v2617_v36 }
 0x2f7   : > { %1677 = vst [vmem:[%s2942_s25 + $0x60] sm:$0xff] %v1645_v24 }
 0x2fa   : > { %v2091_v22 = vpop.f32.mrf.mxu1 }
 0x2fb   : > { %v1648_v33 = vmul.f32 %v2091_v22, %v2629_v45 }
 0x2fc   : > { %v1544_v25 = vpop.f32.mrf.mxu1 }
 0x2fd   : > { %1680 = vst [vmem:[%s2942_s25 + $0x78] sm:$0xff] %v1648_v33  ;;  %v1647_v30 = vmul.f32 %v1544_v25, %v2625_v42 }
 0x2ff   : > { %1679 = vst [vmem:[%s2942_s25 + $0x70] sm:$0xff] %v1647_v30 }
 0x301   : > { %v2094_v55 = vpop.f32.mrf.mxu1 }
 0x302   : > { %v1650_v39 = vmul.f32 %v2094_v55, %v2637_v51 }
 0x303   : > { %v1554_v19 = vpop.f32.mrf.mxu1 }
 0x304   : > { %1682 = vst [vmem:[%s2942_s25 + $0x88] sm:$0xff] %v1650_v39  ;;  %v1649_v36 = vmul.f32 %v1554_v19, %v2633_v48 }
 0x306   : > { %1681 = vst [vmem:[%s2942_s25 + $0x80] sm:$0xff] %v1649_v36 }
 0x309   : > { %v2097_v50 = vpop.f32.mrf.mxu1 }
 0x30a   : > { %v1652_v45 = vmul.f32 %v2097_v50, %v2645_v57 }
 0x30b   : > { %v1564_v47 = vpop.f32.mrf.mxu1 }
 0x30c   : > { %1684 = vst [vmem:[%s2942_s25 + $0x98] sm:$0xff] %v1652_v45  ;;  %v1651_v42 = vmul.f32 %v1564_v47, %v2641_v54 }
 0x30e   : > { %1683 = vst [vmem:[%s2942_s25 + $0x90] sm:$0xff] %v1651_v42 }
 0x312   : > { %v2100_v28 = vpop.f32.mrf.mxu1 }
 0x313   : > { %v1654_v51 = vmul.f32 %v2100_v28, %v2653_v63 }
 0x314   : > { %v1574_v49 = vpop.f32.mrf.mxu1 }
 0x315   : > { %1686 = vst [vmem:[%s2942_s25 + $0xa8] sm:$0xff] %v1654_v51  ;;  %v1653_v48 = vmul.f32 %v1574_v49, %v2649_v60 }
 0x317   : > { %1685 = vst [vmem:[%s2942_s25 + $0xa0] sm:$0xff] %v1653_v48 }
 0x31a   : > { %v2103_v52 = vpop.f32.mrf.mxu1 }
 0x31b   : > { %v1656_v57 = vmul.f32 %v2103_v52, %v2661_v8 }
 0x31c   : > { %v1584_v40 = vpop.f32.mrf.mxu1 }
 0x31d   : > { %1688 = vst [vmem:[%s2942_s25 + $0xb8] sm:$0xff] %v1656_v57  ;;  %v1655_v54 = vmul.f32 %v1584_v40, %v2657_v4 }
 0x31f   : > { %1687 = vst [vmem:[%s2942_s25 + $0xb0] sm:$0xff] %v1655_v54 }
 0x321   : > { %v2106_v13 = vpop.f32.mrf.mxu1 }
 0x322   : > { %v1658_v63 = vmul.f32 %v2106_v13, %v2681_v23 }
 0x323   : > { %v1594_v41 = vpop.f32.mrf.mxu1 }
 0x324   : > { %1690 = vst [vmem:[%s2942_s25 + $0xc8] sm:$0xff] %v1658_v63  ;;  %v1657_v60 = vmul.f32 %v1594_v41, %v2671_v16 }
 0x326   : > { %1689 = vst [vmem:[%s2942_s25 + $0xc0] sm:$0xff] %v1657_v60 }
 0x329   : > { %v2109_v43 = vpop.f32.mrf.mxu1 }
 0x32a   : > { %v1660_v8 = vmul.f32 %v2109_v43, %v2701_v38 }
 0x32b   : > { %v1604_v44 = vpop.f32.mrf.mxu1 }
 0x32c   : > { %1692 = vst [vmem:[%s2942_s25 + $0xd8] sm:$0xff] %v1660_v8  ;;  %v1659_v4 = vmul.f32 %v1604_v44, %v2691_v31 }
 0x32e   : > { %1691 = vst [vmem:[%s2942_s25 + $0xd0] sm:$0xff] %v1659_v4 }
 0x332   : > { %v2112_v10 = vpop.f32.mrf.mxu1 }
 0x333   : > { %v1662_v2 = vmul.f32 %v2112_v10, %v2721_v53 }
 0x334   : > { %v1614_v23 = vpop.f32.mrf.mxu1 }
 0x335   : > { %1694 = vst [vmem:[%s2942_s25 + $0xe8] sm:$0xff] %v1662_v2  ;;  %v1661_v11 = vmul.f32 %v1614_v23, %v2711_v46 }
 0x337   : > { %1693 = vst [vmem:[%s2942_s25 + $0xe0] sm:$0xff] %v1661_v11 }
 0x33a   : > { %v2115_v16 = vpop.f32.mrf.mxu1 }
 0x33b   : > { %v1664_v5 = vmul.f32 %v2115_v16, %v2741_v7 }
 0x33c   : > { %v1624_v58 = vpop.f32.mrf.mxu1 }
 0x33d   : > { %1696 = vst [vmem:[%s2942_s25 + $0xf8] sm:$0xff] %v1664_v5  ;;  %v1663_v38 = vmul.f32 %v1624_v58, %v2731_v61 }
 0x33f   : > { %1695 = vst [vmem:[%s2942_s25 + $0xf0] sm:$0xff] %v1663_v38 }
 0x340 PF: > { %s14_s15 = sadd.s32 1, %s2385_s15  }
 0x341   : > { %p11_p4 = scmp.ge.s32.totalorder %s14_s15, 6  }
 0x343   :  { %13 = sbr.rel (!%p11_p4) target bundleno = 1 (0x1), region = 66 }

// kernel: fwd.5
= control target key start
LH: loop header
LB: loop body
LE: loop exit
PB: predicated region body
PF: predicated region fallthrough
CT: control target
= control target key end

     0   :  { %s3120_s15 = smov 0   ;;  %s3797_s0 = inlined_call_operand.vmem [shape: bf16[1024,432], index: 0, kind: input, shape index: {}]   ;;  %s3798_s1 = inlined_call_operand.vmem [shape: bf16[432,128], index: 1, kind: input, shape index: {}]   ;;  %s3799_s2 = inlined_call_operand.vmem [shape: f32[128,128], index: 2, kind: input, shape index: {}]   ;;  %s3800_s3 = inlined_call_operand.vmem [shape: f32[128,128], index: 3, kind: input, shape index: {}]   ;;  %s3801_s4 = inlined_call_operand.vmem [shape: f32[1024,128], index: 4, kind: output, shape index: {}]  }
   0x1 LB: > { %s2210_s16 = sadd.s32 4294967295, %s3092_s15   ;;  %p2214_p0 = scmp.ge.s32.totalorder %s3092_s15, 1  ;;  %s3092_s15 = sphi %s3120_s15, %s14_s15  }
   0x2   : > { %p164_p1 = scmp.lt.s32.totalorder %s3092_s15, 5 }
   0x4   : > { %p165_p2 = pnand %p2214_p0, %p164_p1 }
   0x5   : > { %s2215_s9 = sshll.u32 (!%p165_p2), %s2210_s16, 5 }
   0x6   : > { %168 = sbr.rel (%p165_p2) target bundleno = 822 (0x336), region = 36  ;;  %p192_p3 = scmp.lt.s32.totalorder (!%p165_p2), %s2215_s9, 127 }
   0xb   : > { %v2771_v0 = vld [vmem:[%s3798_s1 + $0xb8] sm:$0xff]   ;;  %v3094_v1 = vmov 0   ;;  %v2774_v4 = vld [vmem:[%s3798_s1 + $0xb0] sm:$0xff]   ;;  %v2777_v7 = vld [vmem:[%s3798_s1 + $0xa8] sm:$0xff]   ;;  %s3803_s9 = smov (!%p192_p3, %s2215_s9), 127  ;;  %vm789_vm0 = vcmask 392192  }
   0xc   : > { %999 = vmatprep.subr.bf16.mxu1 %v3094_v1  ;;  %v2772_v2 = vld [vmem:[%s3798_s1 + $0x78] sm:$0xff]   ;;  %v2775_v5 = vld [vmem:[%s3798_s1 + $0x70] sm:$0xff]   ;;  %v2778_v8 = vld [vmem:[%s3798_s1 + $0x68] sm:$0xff]   ;;  %s2361_s27 = sshll.u32 %s3803_s9, 4  ;;  %s2219_s20 = sshll.u32 %s3803_s9, 3 }
   0xd   : > { %1000 = vmatpush1.bf16.msra.mxu1 %v2771_v0  ;;  %v2773_v3 = vld [vmem:[%s3798_s1 + $0x38] sm:$0xff]   ;;  %2362 = vmatprep.subr.bf16.mxu0 %v2772_v2  ;;  %v2776_v6 = vld [vmem:[%s3798_s1 + $0x30] sm:$0xff]   ;;  %v2779_v9 = vld [vmem:[%s3798_s1 + $0x28] sm:$0xff]   ;;  %s3200_s11 = scalar_lea.vmem %s3797_s0, %s2361_s27  ;;  %s3728_s23 = scalar_lea.vmem %s3801_s4, %s2219_s20 }
   0xe   : > { %1001 = vmatprep.subr.bf16.mxu1 %v3094_v1  ;;  %2363 = vmatpush3.bf16.msra.mxu0 %v2773_v3  ;;  %v2780_v10 = vld [vmem:[%s3798_s1 + $0xa0] sm:$0xff]   ;;  %v2784_v13 = vld [vmem:[%s3798_s1 + $0x58] sm:$0xff]   ;;  %v2787_v16 = vld [vmem:[%s3798_s1 + $0x50] sm:$0xff]  }
   0xf   : > { %2364 = vmatprep.subr.bf16.mxu0 %v2775_v5  ;;  %v2781_v11 = vld [vmem:[%s3798_s1 + $0x60] sm:$0xff]   ;;  %v2783_v14 = vld [vmem:[%s3798_s1 + $0x98] sm:$0xff]   ;;  %v2786_v17 = vld [vmem:[%s3798_s1 + $0x90] sm:$0xff]  }
  0x10   : > { %v2782_v12 = vld [vmem:[%s3798_s1 + $0x20] sm:$0xff]   ;;  %v2785_v15 = vld [vmem:[%s3798_s1 + $0x18] sm:$0xff]   ;;  %v2788_v18 = vld [vmem:[%s3798_s1 + $0x10] sm:$0xff]  }
  0x11   : > { %1002 = vmatpush1.bf16.msra.mxu1 %v2774_v4  ;;  %v2790_v19 = vld [vmem:[%s3798_s1 + $0x48] sm:$0xff]   ;;  %v2793_v22 = vld [vmem:[%s3798_s1 + $0x40] sm:$0xff]   ;;  %v2798_v26 = vld [vmem:[%s3798_s1 + $0xd0] sm:$0xff]  }
  0x12   : > { %1003 = vmatprep.subr.bf16.mxu1 %v3094_v1  ;;  %2365 = vmatpush3.bf16.msra.mxu0 %v2776_v6  ;;  %v2789_v20 = vld [vmem:[%s3798_s1 + $0x88] sm:$0xff]   ;;  %v2797_v23 = vld [vmem:[%s3200_s11 + $0x4] ss:$16 sps:$4 sm:$0xff]   ;;  %v2795_v28 = vld [vmem:[%s3200_s11] ss:$16 sps:$4 sm:$0xff]  }
  0x13   : > { %2366 = vmatprep.subr.bf16.mxu0 %v2778_v8  ;;  %v2791_v21 = vld [vmem:[%s3798_s1 + $0x8] sm:$0xff]   ;;  %v2792_v24 = vld [vmem:[%s3798_s1 + $0x80] sm:$0xff]   ;;  %870 = vmatprep.mubr.bf16.mxu0 %v2797_v23  ;;  %v1207_v48 = vld [vmem:[%s3799_s2 + $0x78] sm:$0xff] }
  0x14   : > { %v2794_v25 = vld [vmem:[%s3798_s1] sm:$0xff]   ;;  %v2806_v27 = vld [vmem:[%s3200_s11 + $0xc] ss:$16 sps:$4 sm:$0xff]   ;;  %v2804_v34 = vld [vmem:[%s3200_s11 + $0x8] ss:$16 sps:$4 sm:$0xff]  }
  0x15   : > { %1004 = vmatpush1.bf16.msra.mxu1 %v2777_v7  ;;  %v2800_v29 = vld [vmem:[%s3200_s11 + $0x24] ss:$16 sps:$4 sm:$0xff]   ;;  %2311 = vmatprep.mubr.msk.bf16.mxu1 %vm789_vm0, %v2806_v27  ;;  %v2799_v30 = vld [vmem:[%s3798_s1 + $0xc8] sm:$0xff]   ;;  %v2803_v32 = vld [vmem:[%s3200_s11 + $0x20] ss:$16 sps:$4 sm:$0xff]  }
  0x16   : > { %1005 = vmatprep.subr.bf16.mxu1 %v3094_v1  ;;  %2367 = vmatpush3.bf16.msra.mxu0 %v2779_v9  ;;  %v2802_v31 = vld [vmem:[%s3798_s1 + $0xc0] sm:$0xff]   ;;  %v2810_v35 = vld [vmem:[%s3200_s11 + $0x2c] ss:$16 sps:$4 sm:$0xff]   ;;  %v2812_v38 = vld [vmem:[%s3200_s11 + $0x28] ss:$16 sps:$4 sm:$0xff]  }
  0x17   : > { %2368 = vmatprep.subr.bf16.mxu0 %v2781_v11  ;;  %v2807_v33 = vld [vmem:[%s3200_s11 + $0x44] ss:$16 sps:$4 sm:$0xff]   ;;  %v2809_v36 = vld [vmem:[%s3200_s11 + $0x40] ss:$16 sps:$4 sm:$0xff]   ;;  %v2816_v39 = vld [vmem:[%s3200_s11 + $0x4c] ss:$16 sps:$4 sm:$0xff]  }
  0x18   : > { %v2813_v37 = vld [vmem:[%s3200_s11 + $0x64] ss:$16 sps:$4 sm:$0xff]   ;;  %v2815_v40 = vld [vmem:[%s3200_s11 + $0x60] ss:$16 sps:$4 sm:$0xff]   ;;  %v2818_v42 = vld [vmem:[%s3200_s11 + $0x48] ss:$16 sps:$4 sm:$0xff]  }
  0x19   : > { %1006 = vmatpush1.bf16.msra.mxu1 %v2780_v10  ;;  %v2819_v41 = vld [vmem:[%s3200_s11 + $0x84] ss:$16 sps:$4 sm:$0xff]   ;;  %v2822_v43 = vld [vmem:[%s3200_s11 + $0x6c] ss:$16 sps:$4 sm:$0xff]   ;;  %v2821_v44 = vld [vmem:[%s3200_s11 + $0x80] ss:$16 sps:$4 sm:$0xff]  }
  0x1a   : > { %1007 = vmatprep.subr.bf16.mxu1 %v3094_v1  ;;  %2369 = vmatpush3.bf16.msra.mxu0 %v2782_v12  ;;  %v2825_v45 = vld [vmem:[%s3200_s11 + $0xa4] ss:$16 sps:$4 sm:$0xff]   ;;  %v2824_v46 = vld [vmem:[%s3200_s11 + $0x68] ss:$16 sps:$4 sm:$0xff]   ;;  %v2828_v47 = vld [vmem:[%s3200_s11 + $0x8c] ss:$16 sps:$4 sm:$0xff]  }
  0x1b   : > { %2370 = vmatprep.subr.bf16.mxu0 %v2784_v13  ;;  %v1206_v49 = vld [vmem:[%s3799_s2 + $0x70] sm:$0xff]  ;;  %v1205_v51 = vld [vmem:[%s3799_s2 + $0x68] sm:$0xff]  ;;  %v1204_v55 = vld [vmem:[%s3799_s2 + $0x60] sm:$0xff] }
  0x1c   : > { %v2827_v50 = vld [vmem:[%s3200_s11 + $0xa0] ss:$16 sps:$4 sm:$0xff]   ;;  %v2831_v52 = vld [vmem:[%s3200_s11 + $0xc4] ss:$16 sps:$4 sm:$0xff]   ;;  %v2830_v53 = vld [vmem:[%s3200_s11 + $0x88] ss:$16 sps:$4 sm:$0xff]  }
  0x1d   : > { %1008 = vmatpush1.bf16.msra.mxu1 %v2783_v14  ;;  %v2834_v54 = vld [vmem:[%s3200_s11 + $0xac] ss:$16 sps:$4 sm:$0xff]   ;;  %v1202_v57 = vld [vmem:[%s3799_s2 + $0x50] sm:$0xff]  ;;  %v2836_v61 = vld [vmem:[%s3200_s11 + $0xa8] ss:$16 sps:$4 sm:$0xff]  }
  0x1e   : > { %1009 = vmatprep.subr.bf16.mxu1 %v3094_v1  ;;  %2371 = vmatpush3.bf16.msra.mxu0 %v2785_v15  ;;  %v1203_v56 = vld [vmem:[%s3799_s2 + $0x58] sm:$0xff]  ;;  %v2833_v58 = vld [vmem:[%s3200_s11 + $0xc0] ss:$16 sps:$4 sm:$0xff]   ;;  %v2837_v59 = vld [vmem:[%s3200_s11 + $0xe4] ss:$16 sps:$4 sm:$0xff]  }
  0x1f   : > { %2372 = vmatprep.subr.bf16.mxu0 %v2787_v16  ;;  %v1201_v60 = vld [vmem:[%s3799_s2 + $0x48] sm:$0xff]  ;;  %v2839_v63 = vld [vmem:[%s3200_s11 + $0xe0] ss:$16 sps:$4 sm:$0xff]   ;;  %v2843_v0 = vld [vmem:[%s3200_s11 + $0x104] ss:$16 sps:$4 sm:$0xff]  }
  0x20   : > { %v2840_v62 = vld [vmem:[%s3200_s11 + $0xcc] ss:$16 sps:$4 sm:$0xff]   ;;  %v2845_v3 = vld [vmem:[%s3200_s11 + $0x100] ss:$16 sps:$4 sm:$0xff]   ;;  %v2849_v4 = vld [vmem:[%s3200_s11 + $0x124] ss:$16 sps:$4 sm:$0xff]  }
  0x21   : > { %1010 = vmatpush1.bf16.msra.mxu1 %v2786_v17  ;;  %v2846_v2 = vld [vmem:[%s3200_s11 + $0xec] ss:$16 sps:$4 sm:$0xff]   ;;  %v2848_v5 = vld [vmem:[%s3200_s11 + $0xe8] ss:$16 sps:$4 sm:$0xff]   ;;  %v1200_v7 = vld [vmem:[%s3799_s2 + $0x40] sm:$0xff] }
  0x22   : > { %1011 = vmatprep.subr.bf16.mxu1 %v3094_v1  ;;  %2373 = vmatpush3.bf16.msra.mxu0 %v2788_v18  ;;  %v2852_v6 = vld [vmem:[%s3200_s11 + $0x10c] ss:$16 sps:$4 sm:$0xff]   ;;  %v2851_v9 = vld [vmem:[%s3200_s11 + $0x120] ss:$16 sps:$4 sm:$0xff]   ;;  %v2855_v11 = vld [vmem:[%s3200_s11 + $0x144] ss:$16 sps:$4 sm:$0xff]  }
  0x23   : > { %2374 = vmatprep.subr.bf16.mxu0 %v2790_v19  ;;  %v1199_v8 = vld [vmem:[%s3799_s2 + $0x38] sm:$0xff]  ;;  %v1198_v10 = vld [vmem:[%s3799_s2 + $0x30] sm:$0xff]  ;;  %v1197_v13 = vld [vmem:[%s3799_s2 + $0x28] sm:$0xff] }
  0x24   : > { %v2854_v12 = vld [vmem:[%s3200_s11 + $0x108] ss:$16 sps:$4 sm:$0xff]   ;;  %v2858_v14 = vld [vmem:[%s3200_s11 + $0x12c] ss:$16 sps:$4 sm:$0xff]   ;;  %v1196_v15 = vld [vmem:[%s3799_s2 + $0x20] sm:$0xff] }
  0x25   : > { %1012 = vmatpush1.bf16.msra.mxu1 %v2789_v20  ;;  %v1195_v16 = vld [vmem:[%s3799_s2 + $0x18] sm:$0xff]  ;;  %v2857_v17 = vld [vmem:[%s3200_s11 + $0x140] ss:$16 sps:$4 sm:$0xff]   ;;  %v2861_v19 = vld [vmem:[%s3200_s11 + $0x164] ss:$16 sps:$4 sm:$0xff]  }
  0x26   : > { %1013 = vmatprep.subr.bf16.mxu1 %v3094_v1  ;;  %2375 = vmatpush3.bf16.msra.mxu0 %v2791_v21  ;;  %v1194_v18 = vld [vmem:[%s3799_s2 + $0x10] sm:$0xff]  ;;  %v2860_v20 = vld [vmem:[%s3200_s11 + $0x128] ss:$16 sps:$4 sm:$0xff]   ;;  %v1192_v23 = vld [vmem:[%s3799_s2] sm:$0xff] }
  0x27   : > { %2376 = vmatprep.subr.bf16.mxu0 %v2793_v22  ;;  %v1193_v21 = vld [vmem:[%s3799_s2 + $0x8] sm:$0xff] }
  0x28   : > { %v2864_v22 = vld [vmem:[%s3200_s11 + $0x14c] ss:$16 sps:$4 sm:$0xff]  }
  0x29   : > { %1014 = vmatpush1.bf16.msra.mxu1 %v2792_v24  ;;  %v2863_v24 = vld [vmem:[%s3200_s11 + $0x160] ss:$16 sps:$4 sm:$0xff]   ;;  %v2870_v27 = vld [vmem:[%s3200_s11 + $0x16c] ss:$16 sps:$4 sm:$0xff]  }
  0x2a   : > { %1025 = vmatprep.subr.bf16.mxu1 %v3094_v1  ;;  %2377 = vmatpush3.bf16.msra.mxu0 %v2794_v25  ;;  %v2867_v25 = vld [vmem:[%s3200_s11 + $0x184] ss:$16 sps:$4 sm:$0xff]  }
  0x2b   : > { %2570 = vmatprep.subr.mxu0 %v1207_v48 }
  0x2d   : > { %1026 = vmatpush2.bf16.msra.mxu1 %v2798_v26  ;;  %871 = vmatmul.mubr.bf16.vlgmr.msra.gmra.mxu0 %v2795_v28  ;;  %v2866_v26 = vld [vmem:[%s3200_s11 + $0x148] ss:$16 sps:$4 sm:$0xff]   ;;  %v2869_v28 = vld [vmem:[%s3200_s11 + $0x180] ss:$16 sps:$4 sm:$0xff]  }
  0x2e   : > { %1027 = vmatprep.subr.bf16.mxu1 %v3094_v1  ;;  %878 = vmatprep.mubr.bf16.mxu0 %v2800_v29  ;;  %v2873_v29 = vld [vmem:[%s3200_s11 + $0x1a4] ss:$16 sps:$4 sm:$0xff]  }
  0x2f   : > { %2571 = vmatpush3.msra.mxu0 %v1207_v48 }
  0x30   : > { %2572 = vmatprep.subr.mxu0 %v1206_v49 }
  0x31   : > { %1028 = vmatpush2.bf16.msra.mxu1 %v2799_v30  ;;  %2573 = vmatpush3.msra.mxu0 %v1206_v49  ;;  %v2872_v30 = vld [vmem:[%s3200_s11 + $0x168] ss:$16 sps:$4 sm:$0xff]  }
  0x32   : > { %1029 = vmatprep.subr.bf16.mxu1 %v3094_v1  ;;  %2574 = vmatprep.subr.mxu0 %v1205_v51  ;;  %v2842_v1 = vld [vmem:[%s3200_s11 + $0xc8] ss:$16 sps:$4 sm:$0xff]  }
  0x33   : > { %2575 = vmatpush3.msra.mxu0 %v1205_v51 }
  0x34   : > { %2576 = vmatprep.subr.mxu0 %v1204_v55 }
  0x35   : > { %1030 = vmatpush2.bf16.msra.mxu1 %v2802_v31  ;;  %879 = vmatmul.mubr.bf16.gmra.mxu0 %v2803_v32  ;;  %v2876_v31 = vld [vmem:[%s3200_s11 + $0x18c] ss:$16 sps:$4 sm:$0xff]   ;;  %v2875_v32 = vld [vmem:[%s3200_s11 + $0x1a0] ss:$16 sps:$4 sm:$0xff]  }
  0x36   : > { %886 = vmatprep.mubr.bf16.mxu0 %v2807_v33  ;;  %2577 = vmatpush3.msra.mxu0 %v1204_v55  ;;  %v2879_v33 = vld [vmem:[%s3200_s11 + $0x1c4] ss:$16 sps:$4 sm:$0xff]  }
  0x37   : > { %2578 = vmatprep.subr.mxu0 %v1203_v56 }
  0x38   : > { %1032 = vmatmul.mubr.bf16.vlgmr.msra.gmra.mxu1 %v2804_v34  ;;  %2579 = vmatpush3.msra.mxu0 %v1203_v56  ;;  %v2878_v34 = vld [vmem:[%s3200_s11 + $0x188] ss:$16 sps:$4 sm:$0xff]  }
  0x39   : > { %2312 = vmatprep.mubr.msk.bf16.mxu1 %vm789_vm0, %v2810_v35  ;;  %2580 = vmatprep.subr.mxu0 %v1202_v57  ;;  %v2882_v35 = vld [vmem:[%s3200_s11 + $0x1ac] ss:$16 sps:$4 sm:$0xff]  }
  0x3a   : > { %2581 = vmatpush3.msra.mxu0 %v1202_v57 }
  0x3b   : > { %2582 = vmatprep.subr.mxu0 %v1201_v60 }
  0x3c   : > { %2583 = vmatpush3.msra.mxu0 %v1201_v60 }
  0x3d   : > { %887 = vmatmul.mubr.bf16.gmra.mxu0 %v2809_v36  ;;  %2584 = vmatprep.subr.mxu0 %v1200_v7  ;;  %v2881_v36 = vld [vmem:[%s3200_s11 + $0x1c0] ss:$16 sps:$4 sm:$0xff]  }
  0x3e   : > { %894 = vmatprep.mubr.bf16.mxu0 %v2813_v37  ;;  %2585 = vmatpush3.msra.mxu0 %v1200_v7  ;;  %v2885_v37 = vld [vmem:[%s3200_s11 + $0x1e4] ss:$16 sps:$4 sm:$0xff]  }
  0x3f   : > { %2586 = vmatprep.subr.mxu0 %v1199_v8 }
  0x40   : > { %1040 = vmatmul.mubr.bf16.gmra.mxu1 %v2812_v38  ;;  %2587 = vmatpush3.msra.mxu0 %v1199_v8  ;;  %v2884_v38 = vld [vmem:[%s3200_s11 + $0x1a8] ss:$16 sps:$4 sm:$0xff]  }
  0x41   : > { %2313 = vmatprep.mubr.msk.bf16.mxu1 %vm789_vm0, %v2816_v39  ;;  %2588 = vmatprep.subr.mxu0 %v1198_v10  ;;  %v2888_v39 = vld [vmem:[%s3200_s11 + $0x1cc] ss:$16 sps:$4 sm:$0xff]  }
  0x42   : > { %2589 = vmatpush3.msra.mxu0 %v1198_v10 }
  0x43   : > { %2590 = vmatprep.subr.mxu0 %v1197_v13 }
  0x44   : > { %2591 = vmatpush3.msra.mxu0 %v1197_v13 }
  0x45   : > { %895 = vmatmul.mubr.bf16.gmra.mxu0 %v2815_v40  ;;  %2592 = vmatprep.subr.mxu0 %v1196_v15  ;;  %v2887_v40 = vld [vmem:[%s3200_s11 + $0x1e0] ss:$16 sps:$4 sm:$0xff]  }
  0x46   : > { %902 = vmatprep.mubr.bf16.mxu0 %v2819_v41  ;;  %2593 = vmatpush3.msra.mxu0 %v1196_v15  ;;  %v2890_v41 = vld [vmem:[%s3200_s11 + $0x1c8] ss:$16 sps:$4 sm:$0xff]  }
  0x47   : > { %2594 = vmatprep.subr.mxu0 %v1195_v16 }
  0x48   : > { %1048 = vmatmul.mubr.bf16.gmra.mxu1 %v2818_v42  ;;  %2595 = vmatpush3.msra.mxu0 %v1195_v16  ;;  %v2891_v42 = vld [vmem:[%s3200_s11 + $0x1ec] ss:$16 sps:$4 sm:$0xff]  }
  0x49   : > { %2314 = vmatprep.mubr.msk.bf16.mxu1 %vm789_vm0, %v2822_v43  ;;  %2596 = vmatprep.subr.mxu0 %v1194_v18  ;;  %v2893_v43 = vld [vmem:[%s3200_s11 + $0x1e8] ss:$16 sps:$4 sm:$0xff]  }
  0x4a   : > { %2597 = vmatpush3.msra.mxu0 %v1194_v18 }
  0x4b   : > { %2598 = vmatprep.subr.mxu0 %v1193_v21 }
  0x4c   : > { %2599 = vmatpush3.msra.mxu0 %v1193_v21 }
  0x4d   : > { %903 = vmatmul.mubr.bf16.gmra.mxu0 %v2821_v44  ;;  %2600 = vmatprep.subr.mxu0 %v1192_v23 }
  0x4e   : > { %910 = vmatprep.mubr.bf16.mxu0 %v2825_v45  ;;  %2601 = vmatpush3.msra.mxu0 %v1192_v23 }
  0x50   : > { %1056 = vmatmul.mubr.bf16.gmra.mxu1 %v2824_v46 }
  0x51   : > { %2315 = vmatprep.mubr.msk.bf16.mxu1 %vm789_vm0, %v2828_v47 }
  0x55   : > { %911 = vmatmul.mubr.bf16.gmra.mxu0 %v2827_v50 }
  0x56   : > { %918 = vmatprep.mubr.bf16.mxu0 %v2831_v52 }
  0x58   : > { %1064 = vmatmul.mubr.bf16.gmra.mxu1 %v2830_v53  ;;  %v1864_v53 = vld [vmem:[%s3800_s3 + $0x78] sm:$0xff] }
  0x59   : > { %2316 = vmatprep.mubr.msk.bf16.mxu1 %vm789_vm0, %v2834_v54  ;;  %2730 = vmatprep.subr.mxu1 %v1864_v53 }
  0x5a   : > { %2650 = vmatprep.subr.mxu0 %v1864_v53  ;;  %2746 = vmatpush3.msra.mxu1 %v1864_v53 }
  0x5d   : > { %919 = vmatmul.mubr.bf16.gmra.mxu0 %v2833_v58  ;;  %v1863_v58 = vld [vmem:[%s3800_s3 + $0x70] sm:$0xff] }
  0x5e   : > { %926 = vmatprep.mubr.bf16.mxu0 %v2837_v59  ;;  %2731 = vmatprep.subr.mxu1 %v1863_v58 }
  0x5f   : > { %2747 = vmatpush3.msra.mxu1 %v1863_v58 }
  0x60   : > { %1072 = vmatmul.mubr.bf16.gmra.mxu1 %v2836_v61 }
  0x61   : > { %2317 = vmatprep.mubr.msk.bf16.mxu1 %vm789_vm0, %v2840_v62 }
  0x65   : > { %927 = vmatmul.mubr.bf16.gmra.mxu0 %v2839_v63 }
  0x66   : > { %934 = vmatprep.mubr.bf16.mxu0 %v2843_v0 }
  0x68   : > { %1080 = vmatmul.mubr.bf16.gmra.mxu1 %v2842_v1 }
  0x69   : > { %2318 = vmatprep.mubr.msk.bf16.mxu1 %vm789_vm0, %v2846_v2 }
  0x6d   : > { %935 = vmatmul.mubr.bf16.gmra.mxu0 %v2845_v3 }
  0x6e   : > { %942 = vmatprep.mubr.bf16.mxu0 %v2849_v4 }
  0x70   : > { %1088 = vmatmul.mubr.bf16.gmra.mxu1 %v2848_v5 }
  0x71   : > { %2319 = vmatprep.mubr.msk.bf16.mxu1 %vm789_vm0, %v2852_v6 }
  0x75   : > { %943 = vmatmul.mubr.bf16.gmra.mxu0 %v2851_v9 }
  0x76   : > { %950 = vmatprep.mubr.bf16.mxu0 %v2855_v11 }
  0x78   : > { %1096 = vmatmul.mubr.bf16.gmra.mxu1 %v2854_v12 }
  0x79   : > { %2320 = vmatprep.mubr.msk.bf16.mxu1 %vm789_vm0, %v2858_v14 }
  0x7d   : > { %951 = vmatmul.mubr.bf16.gmra.mxu0 %v2857_v17 }
  0x7e   : > { %958 = vmatprep.mubr.bf16.mxu0 %v2861_v19 }
  0x80   : > { %1104 = vmatmul.mubr.bf16.gmra.mxu1 %v2860_v20 }
  0x81   : > { %2321 = vmatprep.mubr.msk.bf16.mxu1 %vm789_vm0, %v2864_v22 }
  0x85   : > { %959 = vmatmul.mubr.bf16.gmra.mxu0 %v2863_v24 }
  0x86   : > { %966 = vmatprep.mubr.bf16.mxu0 %v2867_v25 }
  0x88   : > { %1112 = vmatmul.mubr.bf16.gmra.mxu1 %v2866_v26 }
  0x89   : > { %2322 = vmatprep.mubr.msk.bf16.mxu1 %vm789_vm0, %v2870_v27 }
  0x8d   : > { %967 = vmatmul.mubr.bf16.gmra.mxu0 %v2869_v28 }
  0x8e   : > { %974 = vmatprep.mubr.bf16.mxu0 %v2873_v29 }
  0x90   : > { %1120 = vmatmul.mubr.bf16.gmra.mxu1 %v2872_v30 }
  0x91   : > { %2323 = vmatprep.mubr.msk.bf16.mxu1 %vm789_vm0, %v2876_v31 }
  0x95   : > { %975 = vmatmul.mubr.bf16.gmra.mxu0 %v2875_v32 }
  0x96   : > { %982 = vmatprep.mubr.bf16.mxu0 %v2879_v33 }
  0x98   : > { %1128 = vmatmul.mubr.bf16.gmra.mxu1 %v2878_v34 }
  0x99   : > { %2324 = vmatprep.mubr.msk.bf16.mxu1 %vm789_vm0, %v2882_v35 }
  0x9d   : > { %983 = vmatmul.mubr.bf16.gmra.mxu0 %v2881_v36 }
  0x9e   : > { %990 = vmatprep.mubr.bf16.mxu0 %v2885_v37 }
  0xa0   : > { %1136 = vmatmul.mubr.bf16.gmra.mxu1 %v2884_v38 }
  0xa1   : > { %2325 = vmatprep.mubr.msk.bf16.mxu1 %vm789_vm0, %v2888_v39 }
  0xa5   : > { %991 = vmatmul.mubr.bf16.gmra.mxu0 %v2887_v40 }
  0xa8   : > { %1144 = vmatmul.mubr.bf16.gmra.mxu1 %v2890_v41 }
  0xa9   : > { %2326 = vmatprep.mubr.msk.bf16.mxu1 %vm789_vm0, %v2891_v42 }
  0xb0   : > { %1152 = vmatmul.mubr.bf16.gmra.mxu1 %v2893_v43 }
  0xed   : > { %v2378_v44 = vpop.f32.mrf.mxu0 }
  0xef   : > { %v2379_v45 = vpop.f32.mrf.mxu0 }
  0xf0   : > { %v2380_v49 = vadd.f32 %v2379_v45, %v2378_v44 }
  0xf1   : > { %v2381_v46 = vpop.f32.mrf.mxu0 }
  0xf3   : > { %v2382_v47 = vpop.f32.mrf.mxu0 }
  0xf4   : > { %v2383_v56 = vadd.f32 %v2382_v47, %v2381_v46 }
  0xf5   : > { %v2384_v48 = vpop.f32.mrf.mxu0 }
  0xf7   : > { %v2385_v50 = vpop.f32.mrf.mxu0 }
  0xf8   : > { %v1033_v51 = vpop.f32.mrf.mxu1  ;;  %v2386_v0 = vadd.f32 %v2385_v50, %v2384_v48 }
  0xf9   : > { %v3356_v52 = vadd.f32 %v2380_v49, %v1033_v51  ;;  %v2387_v54 = vpop.f32.mrf.mxu0 }
  0xfa   : > { %v1035_v55 = vpop.f32.mrf.mxu1 }
  0xfb   : > { %v1160_v57 = vmul.f32 %v3356_v52, %v3356_v52  ;;  %v2388_v59 = vpop.f32.mrf.mxu0 }
  0xfc   : > { %v1036_v60 = vpop.f32.mrf.mxu1  ;;  %v2389_v7 = vadd.f32 %v2388_v59, %v2387_v54 }
  0xfd   : > { %v3366_v61 = vadd.f32 %v2383_v56, %v1036_v60  ;;  %2602 = vmatprep.mubr.f32.mxu0 %v1160_v57  ;;  %v2390_v62 = vpop.f32.mrf.mxu0 }
  0xfe   : > { %v1038_v63 = vpop.f32.mrf.mxu1 }
  0xff   : > { %v1161_v1 = vmul.f32 %v3366_v61, %v3366_v61  ;;  %v2391_v2 = vpop.f32.mrf.mxu0 }
 0x100   : > { %v1041_v3 = vpop.f32.mrf.mxu1  ;;  %v2392_v14 = vadd.f32 %v2391_v2, %v2390_v62 }
 0x101   : > { %v3370_v4 = vadd.f32 %v2386_v0, %v1041_v3  ;;  %2603 = vmatmul.mubr.f32.vlgmr.msra.gmra.mxu0 %v1161_v1  ;;  %v2393_v5 = vpop.f32.mrf.mxu0 }
 0x102   : > { %v1043_v6 = vpop.f32.mrf.mxu1  ;;  %2651 = vmatpush3.msra.mxu0 %v1864_v53 }
 0x103   : > { %v1162_v8 = vmul.f32 %v3370_v4, %v3370_v4  ;;  %2652 = vmatprep.subr.mxu0 %v1863_v58  ;;  %v2394_v9 = vpop.f32.mrf.mxu0 }
 0x104   : > { %v1044_v10 = vpop.f32.mrf.mxu1  ;;  %2653 = vmatpush3.msra.mxu0 %v1863_v58  ;;  %v2395_v21 = vadd.f32 %v2394_v9, %v2393_v5 }
 0x105   : > { %v3374_v11 = vadd.f32 %v2389_v7, %v1044_v10  ;;  %2605 = vmatprep.mubr.f32.mxu0 %v1162_v8  ;;  %v2396_v12 = vpop.f32.mrf.mxu0 }
 0x106   : > { %v1046_v13 = vpop.f32.mrf.mxu1 }
 0x107   : > { %v1163_v15 = vmul.f32 %v3374_v11, %v3374_v11  ;;  %v2397_v16 = vpop.f32.mrf.mxu0 }
 0x108   : > { %v1049_v17 = vpop.f32.mrf.mxu1  ;;  %v2398_v28 = vadd.f32 %v2397_v16, %v2396_v12 }
 0x109   : > { %v3378_v18 = vadd.f32 %v2392_v14, %v1049_v17  ;;  %2606 = vmatmul.mubr.f32.gmra.mxu0 %v1163_v15  ;;  %v2399_v19 = vpop.f32.mrf.mxu0 }
 0x10a   : > { %v1051_v20 = vpop.f32.mrf.mxu1 }
 0x10b   : > { %v1164_v22 = vmul.f32 %v3378_v18, %v3378_v18  ;;  %v2400_v23 = vpop.f32.mrf.mxu0 }
 0x10c   : > { %v1052_v24 = vpop.f32.mrf.mxu1  ;;  %v2401_v35 = vadd.f32 %v2400_v23, %v2399_v19 }
 0x10d   : > { %v3382_v25 = vadd.f32 %v2395_v21, %v1052_v24  ;;  %2608 = vmatprep.mubr.f32.mxu0 %v1164_v22  ;;  %v2402_v26 = vpop.f32.mrf.mxu0 }
 0x10e   : > { %v1054_v27 = vpop.f32.mrf.mxu1 }
 0x10f   : > { %v1165_v29 = vmul.f32 %v3382_v25, %v3382_v25  ;;  %v2403_v30 = vpop.f32.mrf.mxu0 }
 0x110   : > { %v1057_v31 = vpop.f32.mrf.mxu1  ;;  %v2404_v42 = vadd.f32 %v2403_v30, %v2402_v26 }
 0x111   : > { %v3386_v32 = vadd.f32 %v2398_v28, %v1057_v31  ;;  %2609 = vmatmul.mubr.f32.gmra.mxu0 %v1165_v29  ;;  %v2405_v33 = vpop.f32.mrf.mxu0 }
 0x112   : > { %v1059_v34 = vpop.f32.mrf.mxu1 }
 0x113   : > { %v1166_v36 = vmul.f32 %v3386_v32, %v3386_v32  ;;  %v2406_v37 = vpop.f32.mrf.mxu0 }
 0x114   : > { %v1060_v38 = vpop.f32.mrf.mxu1  ;;  %v2407_v49 = vadd.f32 %v2406_v37, %v2405_v33 }
 0x115   : > { %v3390_v39 = vadd.f32 %v2401_v35, %v1060_v38  ;;  %2611 = vmatprep.mubr.f32.mxu0 %v1166_v36  ;;  %v2408_v40 = vpop.f32.mrf.mxu0 }
 0x116   : > { %v1062_v41 = vpop.f32.mrf.mxu1 }
 0x117   : > { %v1167_v43 = vmul.f32 %v3390_v39, %v3390_v39  ;;  %v2409_v44 = vpop.f32.mrf.mxu0 }
 0x118   : > { %v1065_v45 = vpop.f32.mrf.mxu1  ;;  %v2410_v57 = vadd.f32 %v2409_v44, %v2408_v40 }
 0x119   : > { %v3394_v46 = vadd.f32 %v2404_v42, %v1065_v45  ;;  %2612 = vmatmul.mubr.f32.gmra.mxu0 %v1167_v43  ;;  %v2411_v47 = vpop.f32.mrf.mxu0 }
 0x11a   : > { %v1067_v48 = vpop.f32.mrf.mxu1 }
 0x11b   : > { %v1168_v50 = vmul.f32 %v3394_v46, %v3394_v46  ;;  %v2412_v51 = vpop.f32.mrf.mxu0 }
 0x11c   : > { %v1068_v53 = vpop.f32.mrf.mxu1  ;;  %v2413_v1 = vadd.f32 %v2412_v51, %v2411_v47 }
 0x11d   : > { %v3398_v54 = vadd.f32 %v2407_v49, %v1068_v53  ;;  %2614 = vmatprep.mubr.f32.mxu0 %v1168_v50  ;;  %v2414_v55 = vpop.f32.mrf.mxu0 }
 0x11e   : > { %v1070_v56 = vpop.f32.mrf.mxu1 }
 0x11f   : > { %v1169_v58 = vmul.f32 %v3398_v54, %v3398_v54  ;;  %v2415_v59 = vpop.f32.mrf.mxu0 }
 0x120   : > { %v1073_v60 = vpop.f32.mrf.mxu1  ;;  %v2416_v9 = vadd.f32 %v2415_v59, %v2414_v55 }
 0x121   : > { %v3402_v62 = vadd.f32 %v2410_v57, %v1073_v60  ;;  %2615 = vmatmul.mubr.f32.gmra.mxu0 %v1169_v58  ;;  %v2417_v63 = vpop.f32.mrf.mxu0 }
 0x122   : > { %v1075_v0 = vpop.f32.mrf.mxu1 }
 0x123   : > { %v1170_v2 = vmul.f32 %v3402_v62, %v3402_v62  ;;  %v2418_v3 = vpop.f32.mrf.mxu0 }
 0x124   : > { %v1076_v5 = vpop.f32.mrf.mxu1  ;;  %v2419_v17 = vadd.f32 %v2418_v3, %v2417_v63 }
 0x125   : > { %v3406_v6 = vadd.f32 %v2413_v1, %v1076_v5  ;;  %2617 = vmatprep.mubr.f32.mxu0 %v1170_v2  ;;  %v2420_v7 = vpop.f32.mrf.mxu0 }
 0x126   : > { %v1078_v8 = vpop.f32.mrf.mxu1 }
 0x127   : > { %v1171_v10 = vmul.f32 %v3406_v6, %v3406_v6  ;;  %v2421_v12 = vpop.f32.mrf.mxu0 }
 0x128   : > { %v1081_v13 = vpop.f32.mrf.mxu1  ;;  %v2422_v26 = vadd.f32 %v2421_v12, %v2420_v7 }
 0x129   : > { %v3410_v14 = vadd.f32 %v2416_v9, %v1081_v13  ;;  %2618 = vmatmul.mubr.f32.gmra.mxu0 %v1171_v10  ;;  %v2423_v15 = vpop.f32.mrf.mxu0 }
 0x12a   : > { %v1083_v16 = vpop.f32.mrf.mxu1 }
 0x12b   : > { %v1172_v19 = vmul.f32 %v3410_v14, %v3410_v14  ;;  %v2424_v20 = vpop.f32.mrf.mxu0 }
 0x12c   : > { %v1084_v21 = vpop.f32.mrf.mxu1  ;;  %v2425_v34 = vadd.f32 %v2424_v20, %v2423_v15 }
 0x12d   : > { %v3414_v22 = vadd.f32 %v2419_v17, %v1084_v21  ;;  %2620 = vmatprep.mubr.f32.mxu0 %v1172_v19  ;;  %v2426_v23 = vpop.f32.mrf.mxu0 }
 0x12e   : > { %v1086_v24 = vpop.f32.mrf.mxu1 }
 0x12f   : > { %v1173_v27 = vmul.f32 %v3414_v22, %v3414_v22  ;;  %v2427_v28 = vpop.f32.mrf.mxu0 }
 0x130   : > { %v1089_v29 = vpop.f32.mrf.mxu1  ;;  %v2428_v42 = vadd.f32 %v2427_v28, %v2426_v23 }
 0x131   : > { %v3418_v30 = vadd.f32 %v2422_v26, %v1089_v29  ;;  %2621 = vmatmul.mubr.f32.gmra.mxu0 %v1173_v27  ;;  %v2429_v31 = vpop.f32.mrf.mxu0 }
 0x132   : > { %v1091_v33 = vpop.f32.mrf.mxu1 }
 0x133   : > { %v1174_v35 = vmul.f32 %v3418_v30, %v3418_v30  ;;  %v2430_v36 = vpop.f32.mrf.mxu0 }
 0x134   : > { %v1092_v37 = vpop.f32.mrf.mxu1  ;;  %v2431_v50 = vadd.f32 %v2430_v36, %v2429_v31 }
 0x135   : > { %v3422_v38 = vadd.f32 %v2425_v34, %v1092_v37  ;;  %2623 = vmatprep.mubr.f32.mxu0 %v1174_v35  ;;  %v2432_v40 = vpop.f32.mrf.mxu0 }
 0x136   : > { %v1094_v41 = vpop.f32.mrf.mxu1 }
 0x137   : > { %v1175_v43 = vmul.f32 %v3422_v38, %v3422_v38  ;;  %v2433_v44 = vpop.f32.mrf.mxu0 }
 0x138   : > { %v1097_v45 = vpop.f32.mrf.mxu1  ;;  %v2434_v59 = vadd.f32 %v2433_v44, %v2432_v40 }
 0x139   : > { %v3426_v47 = vadd.f32 %v2428_v42, %v1097_v45  ;;  %2624 = vmatmul.mubr.f32.gmra.mxu0 %v1175_v43  ;;  %v2435_v48 = vpop.f32.mrf.mxu0 }
 0x13a   : > { %v1099_v49 = vpop.f32.mrf.mxu1 }
 0x13b   : > { %v1176_v51 = vmul.f32 %v3426_v47, %v3426_v47  ;;  %v2436_v53 = vpop.f32.mrf.mxu0 }
 0x13c   : > { %v1100_v55 = vpop.f32.mrf.mxu1  ;;  %v2437_v5 = vadd.f32 %v2436_v53, %v2435_v48 }
 0x13d   : > { %v3430_v56 = vadd.f32 %v2431_v50, %v1100_v55  ;;  %2626 = vmatprep.mubr.f32.mxu0 %v1176_v51  ;;  %v2438_v57 = vpop.f32.mrf.mxu0 }
 0x13e   : > { %v1102_v58 = vpop.f32.mrf.mxu1 }
 0x13f   : > { %v1177_v60 = vmul.f32 %v3430_v56, %v3430_v56  ;;  %v2439_v63 = vpop.f32.mrf.mxu0 }
 0x140   : > { %v1105_v0 = vpop.f32.mrf.mxu1  ;;  %v2440_v15 = vadd.f32 %v2439_v63, %v2438_v57 }
 0x141   : > { %v3434_v1 = vadd.f32 %v2434_v59, %v1105_v0  ;;  %2627 = vmatmul.mubr.f32.gmra.mxu0 %v1177_v60  ;;  %v2441_v2 = vpop.f32.mrf.mxu0  ;;  %v1862_v0 = vld [vmem:[%s3800_s3 + $0x68] sm:$0xff] }
 0x142   : > { %v1107_v3 = vpop.f32.mrf.mxu1  ;;  %2732 = vmatprep.subr.mxu1 %v1862_v0  ;;  %2654 = vmatprep.subr.mxu0 %v1862_v0 }
 0x143   : > { %v1178_v7 = vmul.f32 %v3434_v1, %v3434_v1  ;;  %v2442_v8 = vpop.f32.mrf.mxu0  ;;  %2748 = vmatpush3.msra.mxu1 %v1862_v0  ;;  %2655 = vmatpush3.msra.mxu0 %v1862_v0 }
 0x144   : > { %v1108_v9 = vpop.f32.mrf.mxu1  ;;  %v2443_v24 = vadd.f32 %v2442_v8, %v2441_v2  ;;  %v1861_v8 = vld [vmem:[%s3800_s3 + $0x60] sm:$0xff] }
 0x145   : > { %v3438_v10 = vadd.f32 %v2437_v5, %v1108_v9  ;;  %2629 = vmatprep.mubr.f32.mxu0 %v1178_v7  ;;  %v2444_v12 = vpop.f32.mrf.mxu0  ;;  %2733 = vmatprep.subr.mxu1 %v1861_v8 }
 0x146   : > { %v1110_v13 = vpop.f32.mrf.mxu1  ;;  %2749 = vmatpush3.msra.mxu1 %v1861_v8  ;;  %2656 = vmatprep.subr.mxu0 %v1861_v8 }
 0x147   : > { %v1179_v16 = vmul.f32 %v3438_v10, %v3438_v10  ;;  %v2445_v17 = vpop.f32.mrf.mxu0  ;;  %2657 = vmatpush3.msra.mxu0 %v1861_v8 }
 0x148   : > { %v1113_v19 = vpop.f32.mrf.mxu1  ;;  %v2446_v34 = vadd.f32 %v2445_v17, %v2444_v12  ;;  %v1860_v17 = vld [vmem:[%s3800_s3 + $0x58] sm:$0xff] }
 0x149   : > { %v3442_v20 = vadd.f32 %v2440_v15, %v1113_v19  ;;  %2630 = vmatmul.mubr.f32.gmra.mxu0 %v1179_v16  ;;  %v2447_v21 = vpop.f32.mrf.mxu0  ;;  %2734 = vmatprep.subr.mxu1 %v1860_v17 }
 0x14a   : > { %v1115_v23 = vpop.f32.mrf.mxu1  ;;  %2658 = vmatprep.subr.mxu0 %v1860_v17  ;;  %2750 = vmatpush3.msra.mxu1 %v1860_v17 }
 0x14b   : > { %v1180_v26 = vmul.f32 %v3442_v20, %v3442_v20  ;;  %v2448_v27 = vpop.f32.mrf.mxu0  ;;  %2659 = vmatpush3.msra.mxu0 %v1860_v17  ;;  %v1851_v17 = vld [vmem:[%s3800_s3 + $0x10] sm:$0xff] }
 0x14c   : > { %v1116_v28 = vpop.f32.mrf.mxu1  ;;  %v2449_v43 = vadd.f32 %v2448_v27, %v2447_v21 }
 0x14d   : > { %v3446_v29 = vadd.f32 %v2443_v24, %v1116_v28  ;;  %2632 = vmatprep.mubr.f32.mxu0 %v1180_v26  ;;  %v2450_v31 = vpop.f32.mrf.mxu0  ;;  %v1859_v24 = vld [vmem:[%s3800_s3 + $0x50] sm:$0xff] }
 0x14e   : > { %v1118_v33 = vpop.f32.mrf.mxu1  ;;  %2735 = vmatprep.subr.mxu1 %v1859_v24  ;;  %2660 = vmatprep.subr.mxu0 %v1859_v24 }
 0x14f   : > { %v1181_v35 = vmul.f32 %v3446_v29, %v3446_v29  ;;  %v2451_v36 = vpop.f32.mrf.mxu0  ;;  %2751 = vmatpush3.msra.mxu1 %v1859_v24  ;;  %v1858_v33 = vld [vmem:[%s3800_s3 + $0x48] sm:$0xff]  ;;  %2661 = vmatpush3.msra.mxu0 %v1859_v24 }
 0x150   : > { %v1121_v37 = vpop.f32.mrf.mxu1  ;;  %v2452_v53 = vadd.f32 %v2451_v36, %v2450_v31  ;;  %2736 = vmatprep.subr.mxu1 %v1858_v33  ;;  %2662 = vmatprep.subr.mxu0 %v1858_v33 }
 0x151   : > { %v3450_v40 = vadd.f32 %v2446_v34, %v1121_v37  ;;  %2633 = vmatmul.mubr.f32.gmra.mxu0 %v1181_v35  ;;  %v2453_v41 = vpop.f32.mrf.mxu0  ;;  %v1857_v37 = vld [vmem:[%s3800_s3 + $0x40] sm:$0xff]  ;;  %2752 = vmatpush3.msra.mxu1 %v1858_v33 }
 0x152   : > { %v1123_v42 = vpop.f32.mrf.mxu1  ;;  %2663 = vmatpush3.msra.mxu0 %v1858_v33  ;;  %2737 = vmatprep.subr.mxu1 %v1857_v37 }
 0x153   : > { %v1182_v44 = vmul.f32 %v3450_v40, %v3450_v40  ;;  %v2454_v45 = vpop.f32.mrf.mxu0  ;;  %2664 = vmatprep.subr.mxu0 %v1857_v37  ;;  %2753 = vmatpush3.msra.mxu1 %v1857_v37 }
 0x154   : > { %v1124_v48 = vpop.f32.mrf.mxu1  ;;  %v2455_v2 = vadd.f32 %v2454_v45, %v2453_v41  ;;  %v1856_v45 = vld [vmem:[%s3800_s3 + $0x38] sm:$0xff]  ;;  %2665 = vmatpush3.msra.mxu0 %v1857_v37 }
 0x155   : > { %v3454_v49 = vadd.f32 %v2449_v43, %v1124_v48  ;;  %2635 = vmatprep.mubr.f32.mxu0 %v1182_v44  ;;  %v2456_v50 = vpop.f32.mrf.mxu0  ;;  %2666 = vmatprep.subr.mxu0 %v1856_v45 }
 0x156   : > { %v1126_v51 = vpop.f32.mrf.mxu1  ;;  %2667 = vmatpush3.msra.mxu0 %v1856_v45  ;;  %2738 = vmatprep.subr.mxu1 %v1856_v45 }
 0x157   : > { %v1183_v55 = vmul.f32 %v3454_v49, %v3454_v49  ;;  %v2457_v57 = vpop.f32.mrf.mxu0  ;;  %2754 = vmatpush3.msra.mxu1 %v1856_v45 }
 0x158   : > { %v1129_v58 = vpop.f32.mrf.mxu1  ;;  %v2458_v15 = vadd.f32 %v2457_v57, %v2456_v50 }
 0x159   : > { %v3458_v59 = vadd.f32 %v2452_v53, %v1129_v58  ;;  %2636 = vmatmul.mubr.f32.gmra.mxu0 %v1183_v55  ;;  %v2459_v60 = vpop.f32.mrf.mxu0  ;;  %v1855_v53 = vld [vmem:[%s3800_s3 + $0x30] sm:$0xff] }
 0x15a   : > { %v1131_v63 = vpop.f32.mrf.mxu1  ;;  %2668 = vmatprep.subr.mxu0 %v1855_v53  ;;  %2739 = vmatprep.subr.mxu1 %v1855_v53 }
 0x15b   : > { %v1184_v3 = vmul.f32 %v3458_v59, %v3458_v59  ;;  %v2460_v5 = vpop.f32.mrf.mxu0  ;;  %2669 = vmatpush3.msra.mxu0 %v1855_v53  ;;  %2755 = vmatpush3.msra.mxu1 %v1855_v53 }
 0x15c   : > { %v1132_v7 = vpop.f32.mrf.mxu1  ;;  %v2461_v28 = vadd.f32 %v2460_v5, %v2459_v60  ;;  %v1854_v60 = vld [vmem:[%s3800_s3 + $0x28] sm:$0xff] }
 0x15d   : > { %v3468_v9 = vadd.f32 %v2455_v2, %v1132_v7  ;;  %2638 = vmatprep.mubr.f32.mxu0 %v1184_v3  ;;  %v2462_v12 = vpop.f32.mrf.mxu0  ;;  %2670 = vmatprep.subr.mxu0 %v1854_v60  ;;  %v1853_v3 = vld [vmem:[%s3800_s3 + $0x20] sm:$0xff] }
 0x15e   : > { %v1134_v13 = vpop.f32.mrf.mxu1  ;;  %2671 = vmatpush3.msra.mxu0 %v1854_v60  ;;  %2740 = vmatprep.subr.mxu1 %v1854_v60 }
 0x15f   : > { %v1185_v16 = vmul.f32 %v3468_v9, %v3468_v9  ;;  %v2463_v19 = vpop.f32.mrf.mxu0  ;;  %2672 = vmatprep.subr.mxu0 %v1853_v3  ;;  %2756 = vmatpush3.msra.mxu1 %v1854_v60 }
 0x160   : > { %v1137_v21 = vpop.f32.mrf.mxu1  ;;  %v2464_v43 = vadd.f32 %v2463_v19, %v2462_v12  ;;  %v1852_v12 = vld [vmem:[%s3800_s3 + $0x18] sm:$0xff]  ;;  %2673 = vmatpush3.msra.mxu0 %v1853_v3  ;;  %2741 = vmatprep.subr.mxu1 %v1853_v3 }
 0x161   : > { %v3475_v23 = vadd.f32 %v2458_v15, %v1137_v21  ;;  %2639 = vmatmul.mubr.f32.gmra.mxu0 %v1185_v16  ;;  %v2465_v26 = vpop.f32.mrf.mxu0  ;;  %2674 = vmatprep.subr.mxu0 %v1852_v12 }
 0x162   : > { %v1139_v27 = vpop.f32.mrf.mxu1  ;;  %2675 = vmatpush3.msra.mxu0 %v1852_v12  ;;  %2757 = vmatpush3.msra.mxu1 %v1853_v3 }
 0x163   : > { %v1186_v31 = vmul.f32 %v3475_v23, %v3475_v23  ;;  %v2466_v34 = vpop.f32.mrf.mxu0  ;;  %2676 = vmatprep.subr.mxu0 %v1851_v17  ;;  %2742 = vmatprep.subr.mxu1 %v1852_v12 }
 0x164   : > { %v1140_v35 = vpop.f32.mrf.mxu1  ;;  %v2467_v57 = vadd.f32 %v2466_v34, %v2465_v26  ;;  %v1850_v26 = vld [vmem:[%s3800_s3 + $0x8] sm:$0xff]  ;;  %2677 = vmatpush3.msra.mxu0 %v1851_v17  ;;  %2758 = vmatpush3.msra.mxu1 %v1852_v12 }
 0x165   : > { %v3485_v36 = vadd.f32 %v2461_v28, %v1140_v35  ;;  %2641 = vmatprep.mubr.f32.mxu0 %v1186_v31  ;;  %v2468_v41 = vpop.f32.mrf.mxu0  ;;  %2678 = vmatprep.subr.mxu0 %v1850_v26  ;;  %v1849_v31 = vld [vmem:[%s3800_s3] sm:$0xff] }
 0x166   : > { %v1142_v42 = vpop.f32.mrf.mxu1  ;;  %2679 = vmatpush3.msra.mxu0 %v1850_v26  ;;  %2743 = vmatprep.subr.mxu1 %v1851_v17 }
 0x167   : > { %v1187_v44 = vmul.f32 %v3485_v36, %v3485_v36  ;;  %v2469_v48 = vpop.f32.mrf.mxu0  ;;  %2680 = vmatprep.subr.mxu0 %v1849_v31  ;;  %2759 = vmatpush3.msra.mxu1 %v1851_v17 }
 0x168   : > { %v1145_v50 = vpop.f32.mrf.mxu1  ;;  %v2470_v7 = vadd.f32 %v2469_v48, %v2468_v41  ;;  %2681 = vmatpush3.msra.mxu0 %v1849_v31  ;;  %2744 = vmatprep.subr.mxu1 %v1850_v26 }
 0x169   : > { %v3495_v51 = vadd.f32 %v2464_v43, %v1145_v50  ;;  %2642 = vmatmul.mubr.f32.gmra.mxu0 %v1187_v44  ;;  %v2471_v63 = vpop.f32.mrf.mxu0  ;;  %2760 = vmatpush3.msra.mxu1 %v1850_v26 }
 0x16a   : > { %v1147_v55 = vpop.f32.mrf.mxu1  ;;  %2745 = vmatprep.subr.mxu1 %v1849_v31 }
 0x16b   : > { %v1188_v58 = vmul.f32 %v3495_v51, %v3495_v51  ;;  %v2472_v13 = vpop.f32.mrf.mxu0  ;;  %2761 = vmatpush3.msra.mxu1 %v1849_v31 }
 0x16c   : > { %v1148_v0 = vpop.f32.mrf.mxu1  ;;  %v2473_v21 = vadd.f32 %v2472_v13, %v2471_v63 }
 0x16d   : > { %v3505_v2 = vadd.f32 %v2467_v57, %v1148_v0  ;;  %2644 = vmatprep.mubr.f32.mxu0 %v1188_v58 }
 0x16e   : > { %v1150_v5 = vpop.f32.mrf.mxu1 }
 0x16f   : > { %v1189_v8 = vmul.f32 %v3505_v2, %v3505_v2 }
 0x170   : > { %v1153_v15 = vpop.f32.mrf.mxu1 }
 0x171   : > { %v3515_v16 = vadd.f32 %v2470_v7, %v1153_v15  ;;  %2645 = vmatmul.mubr.f32.gmra.mxu0 %v1189_v8 }
 0x172   : > { %v1155_v19 = vpop.f32.mrf.mxu1 }
 0x173   : > { %v1190_v24 = vmul.f32 %v3515_v16, %v3515_v16 }
 0x174   : > { %v1156_v27 = vpop.f32.mrf.mxu1 }
 0x175   : > { %v3525_v28 = vadd.f32 %v2473_v21, %v1156_v27  ;;  %2647 = vmatprep.mubr.f32.mxu0 %v1190_v24 }
 0x176   : > { %v1158_v33 = vpop.f32.mrf.mxu1 }
 0x177   : > { %v1191_v34 = vmul.f32 %v3525_v28, %v3525_v28 }
 0x179   : > { %2648 = vmatmul.mubr.f32.gmra.mxu0 %v1191_v34 }
 0x1c1   : > { %v2604_v35 = vpop.f32.mrf.mxu0 }
 0x1c2   : > { %2894 = vrsqrt.f32 %v2604_v35  ;;  %vm1442_vm1 = vcmp.eq.f32.partialorder %v2604_v35, inf  ;;  %v1445_v48 = vand.u32 2147483648, %v2604_v35  ;;  %vm1444_vm2 = vcmp.eq.f32.partialorder %v2604_v35, 0.0 }
 0x1c3   : > { %v1274_v37 = vpop.f32.mrf.mxu0 }
 0x1c4   : > { %2896 = vrsqrt.f32 %v1274_v37  ;;  %vm1435_vm3 = vcmp.eq.f32.partialorder %v1274_v37, inf  ;;  %v1438_v58 = vand.u32 2147483648, %v1274_v37  ;;  %vm1437_vm4 = vcmp.eq.f32.partialorder %v1274_v37, 0.0 }
 0x1c9   : > { %v2607_v41 = vpop.f32.mrf.mxu0 }
 0x1ca   : > { %2898 = vrsqrt.f32 %v2607_v41  ;;  %vm1456_vm5 = vcmp.eq.f32.partialorder %v2607_v41, inf  ;;  %v1459_v13 = vand.u32 2147483648, %v2607_v41  ;;  %vm1458_vm6 = vcmp.eq.f32.partialorder %v2607_v41, 0.0 }
 0x1cb   : > { %v1284_v42 = vpop.f32.mrf.mxu0 }
 0x1cc   : > { %2900 = vrsqrt.f32 %v1284_v42  ;;  %vm1449_vm7 = vcmp.eq.f32.partialorder %v1284_v42, inf  ;;  %v1452_v24 = vand.u32 2147483648, %v1284_v42  ;;  %vm1451_vm8 = vcmp.eq.f32.partialorder %v1284_v42, 0.0 }
 0x1cf   : > { %v2895_v43 = vpop.eup %2894 }
 0x1d0   : > { %v1441_v44 = vmul.f32 %v2895_v43, %v2604_v35 }
 0x1d1   : > { %v2897_v45 = vpop.eup %2896  ;;  %v2610_v50 = vpop.f32.mrf.mxu0 }
 0x1d2   : > { %v1443_v53 = vsel %vm1442_vm1, %v2604_v35, %v1441_v44  ;;  %v1434_v55 = vmul.f32 %v2897_v45, %v1274_v37  ;;  %2902 = vrsqrt.f32 %v2610_v50  ;;  %vm1470_vm9 = vcmp.eq.f32.partialorder %v2610_v50, inf }
 0x1d3   : > { %v1446_v57 = vsel %vm1444_vm2, %v1445_v48, %v1443_v53  ;;  %v1294_v60 = vpop.f32.mrf.mxu0  ;;  %v1473_v44 = vand.u32 2147483648, %v2610_v50  ;;  %vm1472_vm10 = vcmp.eq.f32.partialorder %v2610_v50, 0.0 }
 0x1d4   : > { %v2328_v63 = vmul.f32 -1.442695, %v1446_v57  ;;  %v1436_v0 = vsel %vm1435_vm3, %v1274_v37, %v1434_v55  ;;  %2904 = vrsqrt.f32 %v1294_v60  ;;  %vm1463_vm11 = vcmp.eq.f32.partialorder %v1294_v60, inf }
 0x1d5   : > { %v1439_v3 = vsel %vm1437_vm4, %v1438_v58, %v1436_v0  ;;  %vm1465_vm12 = vcmp.eq.f32.partialorder %v1294_v60, 0.0 }
 0x1d6   : > { %2906 = vpow2.f32 %v2328_v63  ;;  %v2327_v5 = vmul.f32 -1.442695, %v1439_v3 }
 0x1d7   : > { %v2899_v7 = vpop.eup %2898 }
 0x1d8   : > { %2908 = vpow2.f32 %v2327_v5  ;;  %v1455_v8 = vmul.f32 %v2899_v7, %v2607_v41 }
 0x1d9   : > { %v2901_v12 = vpop.eup %2900  ;;  %v2613_v15 = vpop.f32.mrf.mxu0 }
 0x1da   : > { %v1457_v17 = vsel %vm1456_vm5, %v2607_v41, %v1455_v8  ;;  %v1448_v19 = vmul.f32 %v2901_v12, %v1284_v42  ;;  %2910 = vrsqrt.f32 %v2613_v15  ;;  %vm1484_vm13 = vcmp.eq.f32.partialorder %v2613_v15, inf }
 0x1db   : > { %v1460_v21 = vsel %vm1458_vm6, %v1459_v13, %v1457_v17  ;;  %v1304_v26 = vpop.f32.mrf.mxu0  ;;  %v1487_v17 = vand.u32 2147483648, %v2613_v15  ;;  %vm1486_vm14 = vcmp.eq.f32.partialorder %v2613_v15, 0.0 }
 0x1dc   : > { %v2330_v27 = vmul.f32 -1.442695, %v1460_v21  ;;  %v1450_v31 = vsel %vm1449_vm7, %v1284_v42, %v1448_v19  ;;  %2912 = vrsqrt.f32 %v1304_v26  ;;  %v1466_v42 = vand.u32 2147483648, %v1294_v60 }
 0x1dd   : > { %v1453_v33 = vsel %vm1451_vm8, %v1452_v24, %v1450_v31  ;;  %vm1477_vm15 = vcmp.eq.f32.partialorder %v1304_v26, inf  ;;  %vm1479_vm0 = vcmp.eq.f32.partialorder %v1304_v26, 0.0  ;;  %v1480_v31 = vand.u32 2147483648, %v1304_v26 }
 0x1de   : > { %2914 = vpow2.f32 %v2330_v27  ;;  %v2329_v34 = vmul.f32 -1.442695, %v1453_v33 }
 0x1df   : > { %v2903_v35 = vpop.eup %2902 }
 0x1e0   : > { %2916 = vpow2.f32 %v2329_v34  ;;  %v1469_v37 = vmul.f32 %v2903_v35, %v2610_v50 }
 0x1e1   : > { %v2905_v43 = vpop.eup %2904  ;;  %v3532_v41 = vpop.f32.mrf.mxu0 }
 0x1e2   : > { %v1471_v45 = vsel %vm1470_vm9, %v2610_v50, %v1469_v37  ;;  %v1462_v48 = vmul.f32 %v2905_v43, %v1294_v60  ;;  %2918 = vrsqrt.f32 %v3532_v41  ;;  %vm1498_vm1 = vcmp.eq.f32.partialorder %v3532_v41, inf }
 0x1e3   : > { %v2907_v53 = vpop.eup %2906  ;;  %v1474_v55 = vsel %vm1472_vm10, %v1473_v44, %v1471_v45  ;;  %v3535_v57 = vpop.f32.mrf.mxu0  ;;  %vm1500_vm2 = vcmp.eq.f32.partialorder %v3532_v41, 0.0 }
 0x1e4   : > { %v1754_v58 = vadd.f32 1.0, %v2907_v53  ;;  %v2332_v63 = vmul.f32 -1.442695, %v1474_v55  ;;  %v1464_v0 = vsel %vm1463_vm11, %v1294_v60, %v1462_v48  ;;  %2920 = vrsqrt.f32 %v3535_v57 }
 0x1e5   : > { %v2909_v3 = vpop.eup %2908  ;;  %v1467_v5 = vsel %vm1465_vm12, %v1466_v42, %v1464_v0  ;;  %v1501_v42 = vand.u32 2147483648, %v3532_v41  ;;  %vm1491_vm3 = vcmp.eq.f32.partialorder %v3535_v57, inf  ;;  %vm1493_vm4 = vcmp.eq.f32.partialorder %v3535_v57, 0.0 }
 0x1e6   : > { %2922 = vrcp.f32 %v1754_v58  ;;  %v1753_v7 = vadd.f32 1.0, %v2909_v3  ;;  %v2331_v50 = vmul.f32 -1.442695, %v1467_v5  ;;  %v1494_v5 = vand.u32 2147483648, %v3535_v57 }
 0x1e7   : > { %v2911_v8 = vpop.eup %2910  ;;  %2924 = vpow2.f32 %v2332_v63 }
 0x1e8   : > { %2926 = vrcp.f32 %v1753_v7  ;;  %v1483_v12 = vmul.f32 %v2911_v8, %v2613_v15 }
 0x1e9   : > { %v2913_v13 = vpop.eup %2912  ;;  %2928 = vpow2.f32 %v2331_v50  ;;  %v3538_v19 = vpop.f32.mrf.mxu0 }
 0x1ea   : > { %v1485_v21 = vsel %vm1484_vm13, %v2613_v15, %v1483_v12  ;;  %v1476_v60 = vmul.f32 %v2913_v13, %v1304_v26  ;;  %2930 = vrsqrt.f32 %v3538_v19  ;;  %vm1512_vm5 = vcmp.eq.f32.partialorder %v3538_v19, inf }
 0x1eb   : > { %v2915_v24 = vpop.eup %2914  ;;  %v1488_v27 = vsel %vm1486_vm14, %v1487_v17, %v1485_v21  ;;  %v3541_v33 = vpop.f32.mrf.mxu0  ;;  %vm1514_vm6 = vcmp.eq.f32.partialorder %v3538_v19, 0.0 }
 0x1ec   : > { %v1756_v34 = vadd.f32 1.0, %v2915_v24  ;;  %v2334_v35 = vmul.f32 -1.442695, %v1488_v27  ;;  %v1478_v37 = vsel %vm1477_vm15, %v1304_v26, %v1476_v60  ;;  %2932 = vrsqrt.f32 %v3541_v33 }
 0x1ed   : > { %v2917_v43 = vpop.eup %2916  ;;  %v1481_v44 = vsel %vm1479_vm0, %v1480_v31, %v1478_v37  ;;  %vm1505_vm7 = vcmp.eq.f32.partialorder %v3541_v33, inf  ;;  %vm1507_vm8 = vcmp.eq.f32.partialorder %v3541_v33, 0.0 }
 0x1ee   : > { %2934 = vrcp.f32 %v1756_v34  ;;  %v1755_v45 = vadd.f32 1.0, %v2917_v43  ;;  %v2333_v15 = vmul.f32 -1.442695, %v1481_v44 }
 0x1ef   : > { %v2919_v48 = vpop.eup %2918  ;;  %2936 = vpow2.f32 %v2334_v35 }
 0x1f0   : > { %2938 = vrcp.f32 %v1755_v45  ;;  %v1497_v53 = vmul.f32 %v2919_v48, %v3532_v41 }
 0x1f1   : > { %v2921_v55 = vpop.eup %2920  ;;  %2940 = vpow2.f32 %v2333_v15  ;;  %v3547_v58 = vpop.f32.mrf.mxu0  ;;  %v1508_v15 = vand.u32 2147483648, %v3541_v33 }
 0x1f2   : > { %v1499_v26 = vsel %vm1498_vm1, %v3532_v41, %v1497_v53  ;;  %v1490_v63 = vmul.f32 %v2921_v55, %v3535_v57  ;;  %2942 = vrsqrt.f32 %v3547_v58  ;;  %vm1526_vm9 = vcmp.eq.f32.partialorder %v3547_v58, inf }
 0x1f3   : > { %v2923_v0 = vpop.eup %2922  ;;  %v1502_v3 = vsel %vm1500_vm2, %v1501_v42, %v1499_v26  ;;  %v3555_v7 = vpop.f32.mrf.mxu0  ;;  %vm1528_vm10 = vcmp.eq.f32.partialorder %v3547_v58, 0.0 }
 0x1f4   : > { %v2925_v50 = vpop.eup %2924  ;;  %v2336_v8 = vmul.f32 -1.442695, %v1502_v3  ;;  %v1492_v12 = vsel %vm1491_vm3, %v3535_v57, %v1490_v63  ;;  %2944 = vrsqrt.f32 %v3555_v7  ;;  %v1515_v57 = vand.u32 2147483648, %v3538_v19 }
 0x1f5   : > { %v2927_v41 = vpop.eup %2926  ;;  %v1758_v13 = vadd.f32 1.0, %v2925_v50  ;;  %v1495_v17 = vsel %vm1493_vm4, %v1494_v5, %v1492_v12  ;;  %vm1519_vm11 = vcmp.eq.f32.partialorder %v3555_v7, inf  ;;  %vm1521_vm12 = vcmp.eq.f32.partialorder %v3555_v7, 0.0 }
 0x1f6   : > { %v2929_v21 = vpop.eup %2928  ;;  %2946 = vpow2.f32 %v2336_v8  ;;  %v2335_v60 = vmul.f32 -1.442695, %v1495_v17  ;;  %2682 = vmatprep.mubr.f32.mxu0 %v2927_v41 }
 0x1f7   : > { %v2931_v24 = vpop.eup %2930  ;;  %2948 = vrcp.f32 %v1758_v13  ;;  %v1757_v27 = vadd.f32 1.0, %v2929_v21  ;;  %2683 = vmatmul.mubr.f32.vlgmr.msra.gmra.mxu0 %v2923_v0 }
 0x1f8   : > { %2950 = vpow2.f32 %v2335_v60  ;;  %v1511_v31 = vmul.f32 %v2931_v24, %v3538_v19  ;;  %v1522_v24 = vand.u32 2147483648, %v3555_v7 }
 0x1f9   : > { %v2933_v34 = vpop.eup %2932  ;;  %2952 = vrcp.f32 %v1757_v27  ;;  %v3563_v35 = vpop.f32.mrf.mxu0 }
 0x1fa   : > { %v1513_v37 = vsel %vm1512_vm5, %v3538_v19, %v1511_v31  ;;  %v1504_v43 = vmul.f32 %v2933_v34, %v3541_v33  ;;  %2954 = vrsqrt.f32 %v3563_v35  ;;  %vm1540_vm13 = vcmp.eq.f32.partialorder %v3563_v35, inf }
 0x1fb   : > { %v2935_v44 = vpop.eup %2934  ;;  %v1516_v45 = vsel %vm1514_vm6, %v1515_v57, %v1513_v37  ;;  %v3571_v48 = vpop.f32.mrf.mxu0  ;;  %vm1542_vm14 = vcmp.eq.f32.partialorder %v3563_v35, 0.0 }
 0x1fc   : > { %v2937_v53 = vpop.eup %2936  ;;  %v2338_v55 = vmul.f32 -1.442695, %v1516_v45  ;;  %v1506_v42 = vsel %vm1505_vm7, %v3541_v33, %v1504_v43  ;;  %2956 = vrsqrt.f32 %v3571_v48  ;;  %v1529_v33 = vand.u32 2147483648, %v3547_v58 }
 0x1fd   : > { %v2939_v19 = vpop.eup %2938  ;;  %v1760_v26 = vadd.f32 1.0, %v2937_v53  ;;  %v1509_v63 = vsel %vm1507_vm8, %v1508_v15, %v1506_v42  ;;  %vm1533_vm15 = vcmp.eq.f32.partialorder %v3571_v48, inf  ;;  %vm1535_vm0 = vcmp.eq.f32.partialorder %v3571_v48, 0.0 }
 0x1fe   : > { %v2941_v0 = vpop.eup %2940  ;;  %2958 = vpow2.f32 %v2338_v55  ;;  %v2337_v3 = vmul.f32 -1.442695, %v1509_v63  ;;  %2685 = vmatprep.mubr.f32.mxu1 %v2939_v19 }
 0x1ff   : > { %v2943_v5 = vpop.eup %2942  ;;  %2960 = vrcp.f32 %v1760_v26  ;;  %v1759_v50 = vadd.f32 1.0, %v2941_v0  ;;  %2686 = vmatmul.mubr.f32.vlgmr.msra.gmra.mxu1 %v2935_v44 }
 0x200   : > { %2962 = vpow2.f32 %v2337_v3  ;;  %v1525_v8 = vmul.f32 %v2943_v5, %v3547_v58  ;;  %v1536_v5 = vand.u32 2147483648, %v3571_v48 }
 0x201   : > { %v2945_v12 = vpop.eup %2944  ;;  %2964 = vrcp.f32 %v1759_v50  ;;  %v3579_v41 = vpop.f32.mrf.mxu0 }
 0x202   : > { %v1527_v13 = vsel %vm1526_vm9, %v3547_v58, %v1525_v8  ;;  %v1518_v17 = vmul.f32 %v2945_v12, %v3555_v7  ;;  %2966 = vrsqrt.f32 %v3579_v41  ;;  %vm1554_vm1 = vcmp.eq.f32.partialorder %v3579_v41, inf }
 0x203   : > { %v2947_v21 = vpop.eup %2946  ;;  %v1530_v60 = vsel %vm1528_vm10, %v1529_v33, %v1527_v13  ;;  %v3588_v27 = vpop.f32.mrf.mxu0  ;;  %vm1556_vm2 = vcmp.eq.f32.partialorder %v3579_v41, 0.0 }
 0x204   : > { %v2949_v31 = vpop.eup %2948  ;;  %v1762_v34 = vadd.f32 1.0, %v2947_v21  ;;  %v2340_v57 = vmul.f32 -1.442695, %v1530_v60  ;;  %v1520_v37 = vsel %vm1519_vm11, %v3555_v7, %v1518_v17  ;;  %2968 = vrsqrt.f32 %v3588_v27 }
 0x205   : > { %v2951_v58 = vpop.eup %2950  ;;  %v1523_v43 = vsel %vm1521_vm12, %v1522_v24, %v1520_v37  ;;  %v1543_v7 = vand.u32 2147483648, %v3563_v35  ;;  %vm1547_vm3 = vcmp.eq.f32.partialorder %v3588_v27, inf  ;;  %vm1549_vm4 = vcmp.eq.f32.partialorder %v3588_v27, 0.0 }
 0x206   : > { %v2953_v44 = vpop.eup %2952  ;;  %2970 = vrcp.f32 %v1762_v34  ;;  %v1761_v45 = vadd.f32 1.0, %v2951_v58  ;;  %v2339_v15 = vmul.f32 -1.442695, %v1523_v43 }
 0x207   : > { %v2955_v53 = vpop.eup %2954  ;;  %2972 = vpow2.f32 %v2340_v57  ;;  %2688 = vmatprep.mubr.f32.mxu1 %v2953_v44 }
 0x208   : > { %2974 = vrcp.f32 %v1761_v45  ;;  %v1539_v55 = vmul.f32 %v2955_v53, %v3563_v35  ;;  %2689 = vmatmul.mubr.f32.gmra.mxu1 %v2949_v31 }
 0x209   : > { %v2957_v42 = vpop.eup %2956  ;;  %2976 = vpow2.f32 %v2339_v15  ;;  %v3595_v19 = vpop.f32.mrf.mxu0  ;;  %v1550_v15 = vand.u32 2147483648, %v3588_v27 }
 0x20a   : > { %v1541_v26 = vsel %vm1540_vm13, %v3563_v35, %v1539_v55  ;;  %v1532_v63 = vmul.f32 %v2957_v42, %v3571_v48  ;;  %2978 = vrsqrt.f32 %v3595_v19  ;;  %vm1568_vm5 = vcmp.eq.f32.partialorder %v3595_v19, inf }
 0x20b   : > { %v2959_v0 = vpop.eup %2958  ;;  %v1544_v3 = vsel %vm1542_vm14, %v1543_v7, %v1541_v26  ;;  %v3604_v50 = vpop.f32.mrf.mxu0  ;;  %vm1570_vm6 = vcmp.eq.f32.partialorder %v3595_v19, 0.0 }
 0x20c   : > { %v2961_v8 = vpop.eup %2960  ;;  %v1764_v12 = vadd.f32 1.0, %v2959_v0  ;;  %v2342_v33 = vmul.f32 -1.442695, %v1544_v3  ;;  %v1534_v13 = vsel %vm1533_vm15, %v3571_v48, %v1532_v63  ;;  %2980 = vrsqrt.f32 %v3604_v50 }
 0x20d   : > { %v2963_v35 = vpop.eup %2962  ;;  %v1537_v17 = vsel %vm1535_vm0, %v1536_v5, %v1534_v13  ;;  %v1557_v48 = vand.u32 2147483648, %v3579_v41  ;;  %vm1561_vm7 = vcmp.eq.f32.partialorder %v3604_v50, inf  ;;  %vm1563_vm8 = vcmp.eq.f32.partialorder %v3604_v50, 0.0 }
 0x20e   : > { %v2965_v21 = vpop.eup %2964  ;;  %2982 = vrcp.f32 %v1764_v12  ;;  %v1763_v60 = vadd.f32 1.0, %v2963_v35  ;;  %v2341_v24 = vmul.f32 -1.442695, %v1537_v17 }
 0x20f   : > { %v2967_v31 = vpop.eup %2966  ;;  %2984 = vpow2.f32 %v2342_v33  ;;  %2691 = vmatprep.mubr.f32.mxu1 %v2965_v21 }
 0x210   : > { %2986 = vrcp.f32 %v1763_v60  ;;  %v1553_v34 = vmul.f32 %v2967_v31, %v3579_v41  ;;  %2692 = vmatmul.mubr.f32.gmra.mxu1 %v2961_v8 }
 0x211   : > { %v2969_v57 = vpop.eup %2968  ;;  %2988 = vpow2.f32 %v2341_v24  ;;  %v3611_v37 = vpop.f32.mrf.mxu0  ;;  %v1564_v24 = vand.u32 2147483648, %v3604_v50 }
 0x212   : > { %v1555_v58 = vsel %vm1554_vm1, %v3579_v41, %v1553_v34  ;;  %v1546_v43 = vmul.f32 %v2969_v57, %v3588_v27  ;;  %2990 = vrsqrt.f32 %v3611_v37  ;;  %vm1582_vm9 = vcmp.eq.f32.partialorder %v3611_v37, inf }
 0x213   : > { %v2971_v44 = vpop.eup %2970  ;;  %v1558_v45 = vsel %vm1556_vm2, %v1557_v48, %v1555_v58  ;;  %v3619_v53 = vpop.f32.mrf.mxu0  ;;  %vm1584_vm10 = vcmp.eq.f32.partialorder %v3611_v37, 0.0 }
 0x214   : > { %v2973_v55 = vpop.eup %2972  ;;  %v2344_v42 = vmul.f32 -1.442695, %v1558_v45  ;;  %v1548_v7 = vsel %vm1547_vm3, %v3588_v27, %v1546_v43  ;;  %2992 = vrsqrt.f32 %v3619_v53  ;;  %v1571_v27 = vand.u32 2147483648, %v3595_v19 }
 0x215   : > { %v2975_v41 = vpop.eup %2974  ;;  %v1766_v26 = vadd.f32 1.0, %v2973_v55  ;;  %v1551_v63 = vsel %vm1549_vm4, %v1550_v15, %v1548_v7  ;;  %vm1575_vm11 = vcmp.eq.f32.partialorder %v3619_v53, inf  ;;  %vm1577_vm12 = vcmp.eq.f32.partialorder %v3619_v53, 0.0 }
 0x216   : > { %v2977_v0 = vpop.eup %2976  ;;  %2994 = vpow2.f32 %v2344_v42  ;;  %v2343_v3 = vmul.f32 -1.442695, %v1551_v63  ;;  %2694 = vmatprep.mubr.f32.mxu1 %v2975_v41 }
 0x217   : > { %v2979_v5 = vpop.eup %2978  ;;  %2996 = vrcp.f32 %v1766_v26  ;;  %v1765_v8 = vadd.f32 1.0, %v2977_v0  ;;  %2695 = vmatmul.mubr.f32.gmra.mxu1 %v2971_v44 }
 0x218   : > { %2998 = vpow2.f32 %v2343_v3  ;;  %v1567_v12 = vmul.f32 %v2979_v5, %v3595_v19  ;;  %v1578_v5 = vand.u32 2147483648, %v3619_v53 }
 0x219   : > { %v2981_v33 = vpop.eup %2980  ;;  %3000 = vrcp.f32 %v1765_v8  ;;  %v3627_v13 = vpop.f32.mrf.mxu0 }
 0x21a   : > { %v1569_v35 = vsel %vm1568_vm5, %v3595_v19, %v1567_v12  ;;  %v1560_v17 = vmul.f32 %v2981_v33, %v3604_v50  ;;  %3002 = vrsqrt.f32 %v3627_v13  ;;  %vm1596_vm13 = vcmp.eq.f32.partialorder %v3627_v13, inf }
 0x21b   : > { %v2983_v21 = vpop.eup %2982  ;;  %v1572_v60 = vsel %vm1570_vm6, %v1571_v27, %v1569_v35  ;;  %v3635_v31 = vpop.f32.mrf.mxu0  ;;  %vm1598_vm14 = vcmp.eq.f32.partialorder %v3627_v13, 0.0 }
 0x21c   : > { %v2985_v34 = vpop.eup %2984  ;;  %v2346_v57 = vmul.f32 -1.442695, %v1572_v60  ;;  %v1562_v48 = vsel %vm1561_vm7, %v3604_v50, %v1560_v17  ;;  %3004 = vrsqrt.f32 %v3635_v31  ;;  %v1585_v50 = vand.u32 2147483648, %v3611_v37 }
 0x21d   : > { %v2987_v19 = vpop.eup %2986  ;;  %v1768_v58 = vadd.f32 1.0, %v2985_v34  ;;  %v1565_v43 = vsel %vm1563_vm8, %v1564_v24, %v1562_v48  ;;  %vm1589_vm15 = vcmp.eq.f32.partialorder %v3635_v31, inf  ;;  %vm1591_vm0 = vcmp.eq.f32.partialorder %v3635_v31, 0.0 }
 0x21e   : > { %v2989_v44 = vpop.eup %2988  ;;  %3006 = vpow2.f32 %v2346_v57  ;;  %v2345_v45 = vmul.f32 -1.442695, %v1565_v43  ;;  %2697 = vmatprep.mubr.f32.mxu1 %v2987_v19 }
 0x21f   : > { %v2991_v15 = vpop.eup %2990  ;;  %3008 = vrcp.f32 %v1768_v58  ;;  %v1767_v55 = vadd.f32 1.0, %v2989_v44  ;;  %2698 = vmatmul.mubr.f32.gmra.mxu1 %v2983_v21 }
 0x220   : > { %3010 = vpow2.f32 %v2345_v45  ;;  %v1581_v42 = vmul.f32 %v2991_v15, %v3611_v37  ;;  %v1592_v15 = vand.u32 2147483648, %v3635_v31 }
 0x221   : > { %v2993_v7 = vpop.eup %2992  ;;  %3012 = vrcp.f32 %v1767_v55  ;;  %v3643_v41 = vpop.f32.mrf.mxu0 }
 0x222   : > { %v1583_v26 = vsel %vm1582_vm9, %v3611_v37, %v1581_v42  ;;  %v1574_v63 = vmul.f32 %v2993_v7, %v3619_v53  ;;  %3014 = vrsqrt.f32 %v3643_v41  ;;  %vm1610_vm1 = vcmp.eq.f32.partialorder %v3643_v41, inf }
 0x223   : > { %v2995_v0 = vpop.eup %2994  ;;  %v1586_v3 = vsel %vm1584_vm10, %v1585_v50, %v1583_v26  ;;  %v3652_v8 = vpop.f32.mrf.mxu0  ;;  %vm1612_vm2 = vcmp.eq.f32.partialorder %v3643_v41, 0.0 }
 0x224   : > { %v2997_v12 = vpop.eup %2996  ;;  %v1770_v33 = vadd.f32 1.0, %v2995_v0  ;;  %v2348_v27 = vmul.f32 -1.442695, %v1586_v3  ;;  %v1576_v35 = vsel %vm1575_vm11, %v3619_v53, %v1574_v63  ;;  %3016 = vrsqrt.f32 %v3652_v8 }
 0x225   : > { %v2999_v37 = vpop.eup %2998  ;;  %v1579_v17 = vsel %vm1577_vm12, %v1578_v5, %v1576_v35  ;;  %v1599_v53 = vand.u32 2147483648, %v3627_v13  ;;  %vm1603_vm3 = vcmp.eq.f32.partialorder %v3652_v8, inf  ;;  %vm1605_vm4 = vcmp.eq.f32.partialorder %v3652_v8, 0.0 }
 0x226   : > { %v3001_v21 = vpop.eup %3000  ;;  %3018 = vrcp.f32 %v1770_v33  ;;  %v1769_v60 = vadd.f32 1.0, %v2999_v37  ;;  %v2347_v24 = vmul.f32 -1.442695, %v1579_v17 }
 0x227   : > { %v3003_v34 = vpop.eup %3002  ;;  %3020 = vpow2.f32 %v2348_v27  ;;  %2700 = vmatprep.mubr.f32.mxu1 %v3001_v21 }
 0x228   : > { %3022 = vrcp.f32 %v1769_v60  ;;  %v1595_v57 = vmul.f32 %v3003_v34, %v3627_v13  ;;  %2701 = vmatmul.mubr.f32.gmra.mxu1 %v2997_v12 }
 0x229   : > { %v3005_v48 = vpop.eup %3004  ;;  %3024 = vpow2.f32 %v2347_v24  ;;  %v3659_v19 = vpop.f32.mrf.mxu0  ;;  %v1606_v24 = vand.u32 2147483648, %v3652_v8 }
 0x22a   : > { %v1597_v58 = vsel %vm1596_vm13, %v3627_v13, %v1595_v57  ;;  %v1588_v43 = vmul.f32 %v3005_v48, %v3635_v31  ;;  %3026 = vrsqrt.f32 %v3659_v19  ;;  %vm1624_vm5 = vcmp.eq.f32.partialorder %v3659_v19, inf }
 0x22b   : > { %v3007_v44 = vpop.eup %3006  ;;  %v1600_v45 = vsel %vm1598_vm14, %v1599_v53, %v1597_v58  ;;  %v3668_v55 = vpop.f32.mrf.mxu0  ;;  %vm1626_vm6 = vcmp.eq.f32.partialorder %v3659_v19, 0.0 }
 0x22c   : > { %v3009_v42 = vpop.eup %3008  ;;  %v1772_v7 = vadd.f32 1.0, %v3007_v44  ;;  %v2350_v50 = vmul.f32 -1.442695, %v1600_v45  ;;  %v1590_v26 = vsel %vm1589_vm15, %v3635_v31, %v1588_v43  ;;  %3028 = vrsqrt.f32 %v3668_v55 }
 0x22d   : > { %v3011_v13 = vpop.eup %3010  ;;  %v1593_v63 = vsel %vm1591_vm0, %v1592_v15, %v1590_v26  ;;  %v1613_v31 = vand.u32 2147483648, %v3643_v41  ;;  %vm1617_vm7 = vcmp.eq.f32.partialorder %v3668_v55, inf  ;;  %vm1619_vm8 = vcmp.eq.f32.partialorder %v3668_v55, 0.0 }
 0x22e   : > { %v3013_v0 = vpop.eup %3012  ;;  %3030 = vrcp.f32 %v1772_v7  ;;  %v1771_v3 = vadd.f32 1.0, %v3011_v13  ;;  %v2349_v5 = vmul.f32 -1.442695, %v1593_v63 }
 0x22f   : > { %v3015_v12 = vpop.eup %3014  ;;  %3032 = vpow2.f32 %v2350_v50  ;;  %2703 = vmatprep.mubr.f32.mxu1 %v3013_v0 }
 0x230   : > { %3034 = vrcp.f32 %v1771_v3  ;;  %v1609_v33 = vmul.f32 %v3015_v12, %v3643_v41  ;;  %2704 = vmatmul.mubr.f32.gmra.mxu1 %v3009_v42 }
 0x231   : > { %v3017_v27 = vpop.eup %3016  ;;  %3036 = vpow2.f32 %v2349_v5  ;;  %v3675_v35 = vpop.f32.mrf.mxu0  ;;  %v1620_v5 = vand.u32 2147483648, %v3668_v55 }
 0x232   : > { %v1611_v37 = vsel %vm1610_vm1, %v3643_v41, %v1609_v33  ;;  %v1602_v17 = vmul.f32 %v3017_v27, %v3652_v8  ;;  %3038 = vrsqrt.f32 %v3675_v35  ;;  %vm1638_vm9 = vcmp.eq.f32.partialorder %v3675_v35, inf }
 0x233   : > { %v3019_v21 = vpop.eup %3018  ;;  %v1614_v60 = vsel %vm1612_vm2, %v1613_v31, %v1611_v37  ;;  %v3683_v34 = vpop.f32.mrf.mxu0  ;;  %vm1640_vm10 = vcmp.eq.f32.partialorder %v3675_v35, 0.0 }
 0x234   : > { %v3021_v57 = vpop.eup %3020  ;;  %v2352_v48 = vmul.f32 -1.442695, %v1614_v60  ;;  %v1604_v53 = vsel %vm1603_vm3, %v3652_v8, %v1602_v17  ;;  %3040 = vrsqrt.f32 %v3683_v34  ;;  %v1627_v8 = vand.u32 2147483648, %v3659_v19 }
 0x235   : > { %v3023_v41 = vpop.eup %3022  ;;  %v1774_v58 = vadd.f32 1.0, %v3021_v57  ;;  %v1607_v43 = vsel %vm1605_vm4, %v1606_v24, %v1604_v53  ;;  %vm1631_vm11 = vcmp.eq.f32.partialorder %v3683_v34, inf  ;;  %vm1633_vm12 = vcmp.eq.f32.partialorder %v3683_v34, 0.0 }
 0x236   : > { %v3025_v44 = vpop.eup %3024  ;;  %3042 = vpow2.f32 %v2352_v48  ;;  %v2351_v45 = vmul.f32 -1.442695, %v1607_v43  ;;  %2706 = vmatprep.mubr.f32.mxu1 %v3023_v41 }
 0x237   : > { %v3027_v15 = vpop.eup %3026  ;;  %3044 = vrcp.f32 %v1774_v58  ;;  %v1773_v42 = vadd.f32 1.0, %v3025_v44  ;;  %2707 = vmatmul.mubr.f32.gmra.mxu1 %v3019_v21 }
 0x238   : > { %3046 = vpow2.f32 %v2351_v45  ;;  %v1623_v7 = vmul.f32 %v3027_v15, %v3659_v19  ;;  %v1634_v45 = vand.u32 2147483648, %v3683_v34 }
 0x239   : > { %v3029_v50 = vpop.eup %3028  ;;  %3048 = vrcp.f32 %v1773_v42  ;;  %v3691_v26 = vpop.f32.mrf.mxu0 }
 0x23a   : > { %v1625_v13 = vsel %vm1624_vm5, %v3659_v19, %v1623_v7  ;;  %v1616_v63 = vmul.f32 %v3029_v50, %v3668_v55  ;;  %3050 = vrsqrt.f32 %v3691_v26  ;;  %vm1652_vm13 = vcmp.eq.f32.partialorder %v3691_v26, inf }
 0x23b   : > { %v3031_v0 = vpop.eup %3030  ;;  %v1628_v3 = vsel %vm1626_vm6, %v1627_v8, %v1625_v13  ;;  %v3699_v12 = vpop.f32.mrf.mxu0  ;;  %vm1654_vm14 = vcmp.eq.f32.partialorder %v3691_v26, 0.0 }
 0x23c   : > { %v3033_v33 = vpop.eup %3032  ;;  %v2354_v27 = vmul.f32 -1.442695, %v1628_v3  ;;  %v1618_v31 = vsel %vm1617_vm7, %v3668_v55, %v1616_v63  ;;  %3052 = vrsqrt.f32 %v3699_v12  ;;  %v1641_v55 = vand.u32 2147483648, %v3675_v35 }
 0x23d   : > { %v3035_v19 = vpop.eup %3034  ;;  %v1621_v37 = vsel %vm1619_vm8, %v1620_v5, %v1618_v31  ;;  %v1776_v21 = vadd.f32 1.0, %v3033_v33  ;;  %vm1645_vm15 = vcmp.eq.f32.partialorder %v3699_v12, inf  ;;  %vm1647_vm0 = vcmp.eq.f32.partialorder %v3699_v12, 0.0 }
 0x23e   : > { %v3037_v17 = vpop.eup %3036  ;;  %3054 = vpow2.f32 %v2354_v27  ;;  %v2353_v60 = vmul.f32 -1.442695, %v1621_v37  ;;  %2709 = vmatprep.mubr.f32.mxu1 %v3035_v19  ;;  %v1655_v27 = vand.u32 2147483648, %v3691_v26 }
 0x23f   : > { %v3039_v24 = vpop.eup %3038  ;;  %v1775_v57 = vadd.f32 1.0, %v3037_v17  ;;  %2710 = vmatmul.mubr.f32.gmra.mxu1 %v3031_v0  ;;  %v1648_v17 = vand.u32 2147483648, %v3699_v12 }
 0x240   : > { %3056 = vpow2.f32 %v2353_v60  ;;  %v1637_v48 = vmul.f32 %v3039_v24, %v3675_v35 }
 0x241   : > { %v3041_v53 = vpop.eup %3040  ;;  %3058 = vrcp.f32 %v1775_v57 }
 0x242   : > { %3060 = vrcp.f32 %v1776_v21  ;;  %v1639_v41 = vsel %vm1638_vm9, %v3675_v35, %v1637_v48  ;;  %v1630_v58 = vmul.f32 %v3041_v53, %v3683_v34 }
 0x243   : > { %v3043_v43 = vpop.eup %3042  ;;  %v1642_v44 = vsel %vm1640_vm10, %v1641_v55, %v1639_v41 }
 0x244   : > { %v3045_v15 = vpop.eup %3044  ;;  %v1778_v42 = vadd.f32 1.0, %v3043_v43  ;;  %v2356_v7 = vmul.f32 -1.442695, %v1642_v44  ;;  %v1632_v50 = vsel %vm1631_vm11, %v3683_v34, %v1630_v58 }
 0x245   : > { %v3047_v8 = vpop.eup %3046  ;;  %v1635_v13 = vsel %vm1633_vm12, %v1634_v45, %v1632_v50 }
 0x246   : > { %v3049_v63 = vpop.eup %3048  ;;  %3062 = vrcp.f32 %v1778_v42  ;;  %v1777_v35 = vadd.f32 1.0, %v3047_v8  ;;  %v2355_v0 = vmul.f32 -1.442695, %v1635_v13 }
 0x247   : > { %v3051_v3 = vpop.eup %3050  ;;  %3064 = vpow2.f32 %v2356_v7  ;;  %2712 = vmatprep.mubr.f32.mxu1 %v3049_v63 }
 0x248   : > { %3066 = vrcp.f32 %v1777_v35  ;;  %v1651_v5 = vmul.f32 %v3051_v3, %v3691_v26  ;;  %2713 = vmatmul.mubr.f32.gmra.mxu1 %v3045_v15 }
 0x249   : > { %v3053_v33 = vpop.eup %3052  ;;  %3068 = vpow2.f32 %v2355_v0 }
 0x24a   : > { %v1653_v34 = vsel %vm1652_vm13, %v3691_v26, %v1651_v5  ;;  %v1644_v31 = vmul.f32 %v3053_v33, %v3699_v12 }
 0x24b   : > { %v3055_v19 = vpop.eup %3054  ;;  %v1656_v37 = vsel %vm1654_vm14, %v1655_v27, %v1653_v34 }
 0x24c   : > { %v1780_v21 = vadd.f32 1.0, %v3055_v19  ;;  %v2358_v60 = vmul.f32 -1.442695, %v1656_v37  ;;  %v1646_v24 = vsel %vm1645_vm15, %v3699_v12, %v1644_v31 }
 0x24d   : > { %v3057_v57 = vpop.eup %3056  ;;  %v1649_v48 = vsel %vm1647_vm0, %v1648_v17, %v1646_v24 }
 0x24e   : > { %v3059_v53 = vpop.eup %3058  ;;  %3070 = vrcp.f32 %v1780_v21  ;;  %v1779_v55 = vadd.f32 1.0, %v3057_v57  ;;  %v2357_v26 = vmul.f32 -1.442695, %v1649_v48 }
 0x24f   : > { %v3061_v41 = vpop.eup %3060  ;;  %3072 = vpow2.f32 %v2358_v60  ;;  %2715 = vmatprep.mubr.f32.mxu1 %v3059_v53 }
 0x250   : > { %3074 = vrcp.f32 %v1779_v55  ;;  %2716 = vmatmul.mubr.f32.gmra.mxu1 %v3061_v41 }
 0x251   : > { %3076 = vpow2.f32 %v2357_v26 }
 0x253   : > { %v3063_v58 = vpop.eup %3062 }
 0x254   : > { %v3065_v43 = vpop.eup %3064 }
 0x255   : > { %v3067_v44 = vpop.eup %3066  ;;  %v1782_v15 = vadd.f32 1.0, %v3065_v43 }
 0x256   : > { %v3069_v45 = vpop.eup %3068  ;;  %2718 = vmatprep.mubr.f32.mxu1 %v3067_v44 }
 0x257   : > { %v1781_v42 = vadd.f32 1.0, %v3069_v45  ;;  %2719 = vmatmul.mubr.f32.gmra.mxu1 %v3063_v58 }
 0x259   : > { %3078 = vrcp.f32 %v1781_v42 }
 0x25a   : > { %3080 = vrcp.f32 %v1782_v15 }
 0x25b   : > { %v3071_v12 = vpop.eup %3070 }
 0x25c   : > { %v3073_v7 = vpop.eup %3072 }
 0x25d   : > { %v3075_v50 = vpop.eup %3074  ;;  %v1784_v13 = vadd.f32 1.0, %v3073_v7 }
 0x25e   : > { %v3077_v8 = vpop.eup %3076  ;;  %2721 = vmatprep.mubr.f32.mxu1 %v3075_v50 }
 0x25f   : > { %v1783_v63 = vadd.f32 1.0, %v3077_v8  ;;  %2722 = vmatmul.mubr.f32.gmra.mxu1 %v3071_v12 }
 0x261   : > { %3082 = vrcp.f32 %v1783_v63 }
 0x262   : > { %3084 = vrcp.f32 %v1784_v13 }
 0x266   : > { %v3079_v35 = vpop.eup %3078 }
 0x267   : > { %v3081_v0 = vpop.eup %3080  ;;  %2724 = vmatprep.mubr.f32.mxu1 %v3079_v35 }
 0x268   : > { %2725 = vmatmul.mubr.f32.gmra.mxu1 %v3081_v0 }
 0x26e   : > { %v3083_v3 = vpop.eup %3082 }
 0x26f   : > { %v3085_v5 = vpop.eup %3084  ;;  %2727 = vmatprep.mubr.f32.mxu1 %v3083_v3 }
 0x270   : > { %2728 = vmatmul.mubr.f32.gmra.mxu1 %v3085_v5 }
 0x2b7   : > { %v2684_v33 = vpop.f32.mrf.mxu0 }
 0x2b8   : > { %v2091_v27 = vmul.f32 %v2684_v33, %v3366_v61 }
 0x2b9   : > { %v1931_v34 = vpop.f32.mrf.mxu0 }
 0x2ba   : > { %2123 = vst [vmem:[%s3728_s23 + $0x8] sm:$0xff] %v2091_v27  ;;  %v2090_v31 = vmul.f32 %v1931_v34, %v3356_v52 }
 0x2bc   : > { %2122 = vst [vmem:[%s3728_s23] sm:$0xff] %v2090_v31 }
 0x2bf   : > { %v2687_v19 = vpop.f32.mrf.mxu1 }
 0x2c0   : > { %v2093_v37 = vmul.f32 %v2687_v19, %v3374_v11 }
 0x2c1   : > { %v1941_v17 = vpop.f32.mrf.mxu1 }
 0x2c2   : > { %2125 = vst [vmem:[%s3728_s23 + $0x18] sm:$0xff] %v2093_v37  ;;  %v2092_v21 = vmul.f32 %v1941_v17, %v3370_v4 }
 0x2c4   : > { %2124 = vst [vmem:[%s3728_s23 + $0x10] sm:$0xff] %v2092_v21 }
 0x2c8   : > { %v2690_v60 = vpop.f32.mrf.mxu1 }
 0x2c9   : > { %v2095_v61 = vmul.f32 %v2690_v60, %v3382_v25 }
 0x2ca   : > { %v1951_v24 = vpop.f32.mrf.mxu1 }
 0x2cb   : > { %2127 = vst [vmem:[%s3728_s23 + $0x28] sm:$0xff] %v2095_v61  ;;  %v2094_v52 = vmul.f32 %v1951_v24, %v3378_v18 }
 0x2cd   : > { %2126 = vst [vmem:[%s3728_s23 + $0x20] sm:$0xff] %v2094_v52 }
 0x2d0   : > { %v2693_v57 = vpop.f32.mrf.mxu1 }
 0x2d1   : > { %v2097_v11 = vmul.f32 %v2693_v57, %v3390_v39 }
 0x2d2   : > { %v1961_v48 = vpop.f32.mrf.mxu1 }
 0x2d3   : > { %2129 = vst [vmem:[%s3728_s23 + $0x38] sm:$0xff] %v2097_v11  ;;  %v2096_v4 = vmul.f32 %v1961_v48, %v3386_v32 }
 0x2d5   : > { %2128 = vst [vmem:[%s3728_s23 + $0x30] sm:$0xff] %v2096_v4 }
 0x2d7   : > { %v2696_v53 = vpop.f32.mrf.mxu1 }
 0x2d8   : > { %v2099_v25 = vmul.f32 %v2696_v53, %v3398_v54 }
 0x2d9   : > { %v1971_v55 = vpop.f32.mrf.mxu1 }
 0x2da   : > { %2131 = vst [vmem:[%s3728_s23 + $0x48] sm:$0xff] %v2099_v25  ;;  %v2098_v18 = vmul.f32 %v1971_v55, %v3394_v46 }
 0x2dc   : > { %2130 = vst [vmem:[%s3728_s23 + $0x40] sm:$0xff] %v2098_v18 }
 0x2df   : > { %v2699_v26 = vpop.f32.mrf.mxu1 }
 0x2e0   : > { %v2101_v39 = vmul.f32 %v2699_v26, %v3406_v6 }
 0x2e1   : > { %v1981_v41 = vpop.f32.mrf.mxu1 }
 0x2e2   : > { %2133 = vst [vmem:[%s3728_s23 + $0x58] sm:$0xff] %v2101_v39  ;;  %v2100_v32 = vmul.f32 %v1981_v41, %v3402_v62 }
 0x2e4   : > { %2132 = vst [vmem:[%s3728_s23 + $0x50] sm:$0xff] %v2100_v32 }
 0x2e8   : > { %v2702_v58 = vpop.f32.mrf.mxu1 }
 0x2e9   : > { %v2103_v54 = vmul.f32 %v2702_v58, %v3414_v22 }
 0x2ea   : > { %v1991_v43 = vpop.f32.mrf.mxu1 }
 0x2eb   : > { %2135 = vst [vmem:[%s3728_s23 + $0x68] sm:$0xff] %v2103_v54  ;;  %v2102_v46 = vmul.f32 %v1991_v43, %v3410_v14 }
 0x2ed   : > { %2134 = vst [vmem:[%s3728_s23 + $0x60] sm:$0xff] %v2102_v46 }
 0x2f0   : > { %v2705_v44 = vpop.f32.mrf.mxu1 }
 0x2f1   : > { %v2105_v6 = vmul.f32 %v2705_v44, %v3422_v38 }
 0x2f2   : > { %v2001_v45 = vpop.f32.mrf.mxu1 }
 0x2f3   : > { %2137 = vst [vmem:[%s3728_s23 + $0x78] sm:$0xff] %v2105_v6  ;;  %v2104_v62 = vmul.f32 %v2001_v45, %v3418_v30 }
 0x2f5   : > { %2136 = vst [vmem:[%s3728_s23 + $0x70] sm:$0xff] %v2104_v62 }
 0x2f7   : > { %v2708_v15 = vpop.f32.mrf.mxu1 }
 0x2f8   : > { %v2107_v22 = vmul.f32 %v2708_v15, %v3430_v56 }
 0x2f9   : > { %v2011_v42 = vpop.f32.mrf.mxu1 }
 0x2fa   : > { %2139 = vst [vmem:[%s3728_s23 + $0x88] sm:$0xff] %v2107_v22  ;;  %v2106_v14 = vmul.f32 %v2011_v42, %v3426_v47 }
 0x2fc   : > { %2138 = vst [vmem:[%s3728_s23 + $0x80] sm:$0xff] %v2106_v14 }
 0x2ff   : > { %v2711_v12 = vpop.f32.mrf.mxu1 }
 0x300   : > { %v2109_v38 = vmul.f32 %v2711_v12, %v3438_v10 }
 0x301   : > { %v2021_v7 = vpop.f32.mrf.mxu1 }
 0x302   : > { %2141 = vst [vmem:[%s3728_s23 + $0x98] sm:$0xff] %v2109_v38  ;;  %v2108_v30 = vmul.f32 %v2021_v7, %v3434_v1 }
 0x304   : > { %2140 = vst [vmem:[%s3728_s23 + $0x90] sm:$0xff] %v2108_v30 }
 0x308   : > { %v2714_v50 = vpop.f32.mrf.mxu1 }
 0x309   : > { %v2111_v56 = vmul.f32 %v2714_v50, %v3446_v29 }
 0x30a   : > { %v2031_v8 = vpop.f32.mrf.mxu1 }
 0x30b   : > { %2143 = vst [vmem:[%s3728_s23 + $0xa8] sm:$0xff] %v2111_v56  ;;  %v2110_v47 = vmul.f32 %v2031_v8, %v3442_v20 }
 0x30d   : > { %2142 = vst [vmem:[%s3728_s23 + $0xa0] sm:$0xff] %v2110_v47 }
 0x310   : > { %v2717_v13 = vpop.f32.mrf.mxu1 }
 0x311   : > { %v2113_v10 = vmul.f32 %v2717_v13, %v3454_v49 }
 0x312   : > { %v2041_v63 = vpop.f32.mrf.mxu1 }
 0x313   : > { %2145 = vst [vmem:[%s3728_s23 + $0xb8] sm:$0xff] %v2113_v10  ;;  %v2112_v1 = vmul.f32 %v2041_v63, %v3450_v40 }
 0x315   : > { %2144 = vst [vmem:[%s3728_s23 + $0xb0] sm:$0xff] %v2112_v1 }
 0x317   : > { %v2720_v35 = vpop.f32.mrf.mxu1 }
 0x318   : > { %v2115_v29 = vmul.f32 %v2720_v35, %v3468_v9 }
 0x319   : > { %v2051_v0 = vpop.f32.mrf.mxu1 }
 0x31a   : > { %2147 = vst [vmem:[%s3728_s23 + $0xc8] sm:$0xff] %v2115_v29  ;;  %v2114_v20 = vmul.f32 %v2051_v0, %v3458_v59 }
 0x31c   : > { %2146 = vst [vmem:[%s3728_s23 + $0xc0] sm:$0xff] %v2114_v20 }
 0x31f   : > { %v2723_v3 = vpop.f32.mrf.mxu1 }
 0x320   : > { %v2117_v49 = vmul.f32 %v2723_v3, %v3485_v36 }
 0x321   : > { %v2061_v5 = vpop.f32.mrf.mxu1 }
 0x322   : > { %2149 = vst [vmem:[%s3728_s23 + $0xd8] sm:$0xff] %v2117_v49  ;;  %v2116_v40 = vmul.f32 %v2061_v5, %v3475_v23 }
 0x324   : > { %2148 = vst [vmem:[%s3728_s23 + $0xd0] sm:$0xff] %v2116_v40 }
 0x328   : > { %v2726_v33 = vpop.f32.mrf.mxu1 }
 0x329   : > { %v2119_v27 = vmul.f32 %v2726_v33, %v3505_v2 }
 0x32a   : > { %v2071_v9 = vpop.f32.mrf.mxu1 }
 0x32b   : > { %2151 = vst [vmem:[%s3728_s23 + $0xe8] sm:$0xff] %v2119_v27  ;;  %v2118_v34 = vmul.f32 %v2071_v9, %v3495_v51 }
 0x32d   : > { %2150 = vst [vmem:[%s3728_s23 + $0xe0] sm:$0xff] %v2118_v34 }
 0x330   : > { %v2729_v59 = vpop.f32.mrf.mxu1 }
 0x331   : > { %v2121_v31 = vmul.f32 %v2729_v59, %v3525_v28 }
 0x332   : > { %v2081_v19 = vpop.f32.mrf.mxu1 }
 0x333   : > { %2153 = vst [vmem:[%s3728_s23 + $0xf8] sm:$0xff] %v2121_v31  ;;  %v2120_v36 = vmul.f32 %v2081_v19, %v3515_v16 }
 0x335   : > { %2152 = vst [vmem:[%s3728_s23 + $0xf0] sm:$0xff] %v2120_v36 }
 0x336 PF: > { %s14_s15 = sadd.s32 1, %s3092_s15  }
 0x337   : > { %p11_p4 = scmp.ge.s32.totalorder %s14_s15, 6  }
 0x339   :  { %13 = sbr.rel (!%p11_p4) target bundleno = 1 (0x1), region = 66 }

// kernel: fwd.6
= control target key start
LH: loop header
LB: loop body
LE: loop exit
PB: predicated region body
PF: predicated region fallthrough
CT: control target
= control target key end

     0   :  { %s4415_s15 = smov 0   ;;  %s5739_s0 = inlined_call_operand.vmem [shape: bf16[1024,864], index: 0, kind: input, shape index: {}]   ;;  %s5740_s1 = inlined_call_operand.vmem [shape: bf16[864,128], index: 1, kind: input, shape index: {}]   ;;  %s5741_s2 = inlined_call_operand.vmem [shape: f32[128,128], index: 2, kind: input, shape index: {}]   ;;  %s5742_s3 = inlined_call_operand.vmem [shape: f32[128,128], index: 3, kind: input, shape index: {}]   ;;  %s5743_s4 = inlined_call_operand.vmem [shape: f32[1024,128], index: 4, kind: output, shape index: {}]  }
   0x1 LB: > { %s3068_s16 = sadd.s32 4294967295, %s4388_s15   ;;  %p3072_p0 = scmp.ge.s32.totalorder %s4388_s15, 1  ;;  %s4388_s15 = sphi %s4415_s15, %s14_s15  }
   0x2   : > { %p164_p1 = scmp.lt.s32.totalorder %s4388_s15, 5 }
   0x4   : > { %p165_p2 = pnand %p3072_p0, %p164_p1 }
   0x6   : > { %168 = sbr.rel (%p165_p2) target bundleno = 932 (0x3a4), region = 36 }
   0xb   : > { %v3976_v0 = vld [vmem:[%s5740_s1 + $0x78] sm:$0xff]   ;;  %s3073_s19 = sshll.u32 %s3068_s16, 5  ;;  %v3978_v2 = vld [vmem:[%s5740_s1 + $0x70] sm:$0xff]   ;;  %v3980_v4 = vld [vmem:[%s5740_s1 + $0x68] sm:$0xff]   ;;  %vm1325_vm0 = vcmask 785408  }
   0xc   : > { %v3977_v1 = vld [vmem:[%s5740_s1 + $0x38] sm:$0xff]   ;;  %3293 = vmatprep.subr.bf16.mxu0 %v3976_v0  ;;  %3951 = vmatprep.subr.bf16.mxu1 %v3976_v0  ;;  %p192_p3 = scmp.lt.s32.totalorder %s3073_s19, 127  ;;  %v3979_v3 = vld [vmem:[%s5740_s1 + $0x30] sm:$0xff]   ;;  %v3981_v5 = vld [vmem:[%s5740_s1 + $0x28] sm:$0xff]  }
   0xd   : > { %3294 = vmatpush3.bf16.msra.mxu0 %v3977_v1  ;;  %3959 = vmatpush3.bf16.msra.mxu1 %v3977_v1  ;;  %v3982_v6 = vld [vmem:[%s5740_s1 + $0x60] sm:$0xff]   ;;  %v3984_v8 = vld [vmem:[%s5740_s1 + $0x58] sm:$0xff]   ;;  %v3986_v10 = vld [vmem:[%s5740_s1 + $0x50] sm:$0xff]  }
   0xe   : > { %3295 = vmatprep.subr.bf16.mxu0 %v3978_v2  ;;  %3952 = vmatprep.subr.bf16.mxu1 %v3978_v2  ;;  %s5771_s19 = smov (!%p192_p3, %s3073_s19), 127  ;;  %v3983_v7 = vld [vmem:[%s5740_s1 + $0x20] sm:$0xff]   ;;  %v3985_v9 = vld [vmem:[%s5740_s1 + $0x18] sm:$0xff]   ;;  %v3987_v13 = vld [vmem:[%s5740_s1 + $0x10] sm:$0xff]  }
   0xf   : > { %s3967_s6 = smul.u32 28, %s5771_s19  ;;  %v3988_v14 = vld [vmem:[%s5740_s1 + $0x48] sm:$0xff]   ;;  %v3990_v16 = vld [vmem:[%s5740_s1 + $0x40] sm:$0xff]   ;;  %v3998_v18 = vld [vmem:[%s5740_s1 + $0xf8] sm:$0xff]   ;;  %s3076_s30 = sshll.u32 %s5771_s19, 3 }
  0x10   : > { %v3989_v15 = vld [vmem:[%s5740_s1 + $0x8] sm:$0xff]   ;;  %v3991_v17 = vld [vmem:[%s5740_s1] sm:$0xff]   ;;  %v3999_v21 = vld [vmem:[%s5740_s1 + $0x178] sm:$0xff]   ;;  %s5670_s7 = scalar_lea.vmem %s5743_s4, %s3076_s30 }
  0x11   : > { %3296 = vmatpush3.bf16.msra.mxu0 %v3979_v3  ;;  %3960 = vmatpush3.bf16.msra.mxu1 %v3979_v3  ;;  %s4456_s13 = scalar_lea.vmem %s5739_s0, %s3967_s6  ;;  %v4000_v22 = vld [vmem:[%s5740_s1 + $0xb8] sm:$0xff]   ;;  %v4002_v24 = vld [vmem:[%s5740_s1 + $0xf0] sm:$0xff]   ;;  %v4010_v32 = vld [vmem:[%s5740_s1 + $0xe8] sm:$0xff]  }
  0x12   : > { %3297 = vmatprep.subr.bf16.mxu0 %v3980_v4  ;;  %3953 = vmatprep.subr.bf16.mxu1 %v3980_v4  ;;  %v3994_v11 = vld [vmem:[%s4456_s13 + $0x4] ss:$28 sps:$4 sm:$0xff]   ;;  %v4001_v23 = vld [vmem:[%s5740_s1 + $0x138] sm:$0xff]   ;;  %v4013_v27 = vld [vmem:[%s5740_s1 + $0x170] sm:$0xff]  }
  0x13   : > { %v3997_v12 = vld [vmem:[%s4456_s13 + $0x2a4] ss:$28 sps:$4 sm:$0xff]   ;;  %1406 = vmatprep.mubr.bf16.mxu0 %v3994_v11  ;;  %v4004_v25 = vld [vmem:[%s4456_s13 + $0x3c] ss:$28 sps:$4 sm:$0xff]   ;;  %v4003_v28 = vld [vmem:[%s5740_s1 + $0xb0] sm:$0xff]  }
  0x14   : > { %1502 = vmatprep.mubr.bf16.mxu1 %v3997_v12  ;;  %v3992_v19 = vld [vmem:[%s4456_s13] ss:$28 sps:$4 sm:$0xff]   ;;  %v4015_v29 = vld [vmem:[%s5740_s1 + $0x130] sm:$0xff]   ;;  %v4011_v33 = vld [vmem:[%s5740_s1 + $0xa8] sm:$0xff]  }
  0x15   : > { %3298 = vmatpush3.bf16.msra.mxu0 %v3981_v5  ;;  %3961 = vmatpush3.bf16.msra.mxu1 %v3981_v5  ;;  %v3995_v20 = vld [vmem:[%s4456_s13 + $0x2a0] ss:$28 sps:$4 sm:$0xff]   ;;  %v4008_v30 = vld [vmem:[%s4456_s13 + $0x38] ss:$28 sps:$4 sm:$0xff]   ;;  %v4020_v39 = vld [vmem:[%s4456_s13 + $0x70] ss:$28 sps:$4 sm:$0xff]  }
  0x16   : > { %3299 = vmatprep.subr.bf16.mxu0 %v3982_v6  ;;  %3954 = vmatprep.subr.bf16.mxu1 %v3982_v6  ;;  %v4006_v26 = vld [vmem:[%s4456_s13 + $0x2dc] ss:$28 sps:$4 sm:$0xff]   ;;  %v4012_v34 = vld [vmem:[%s5740_s1 + $0xe0] sm:$0xff]   ;;  %v4016_v35 = vld [vmem:[%s4456_s13 + $0x74] ss:$28 sps:$4 sm:$0xff]  }
  0x17   : > { %v4009_v31 = vld [vmem:[%s4456_s13 + $0x2d8] ss:$28 sps:$4 sm:$0xff]   ;;  %v4014_v37 = vld [vmem:[%s5740_s1 + $0xa0] sm:$0xff]   ;;  %v4021_v40 = vld [vmem:[%s4456_s13 + $0x310] ss:$28 sps:$4 sm:$0xff]  }
  0x18   : > { %v4018_v36 = vld [vmem:[%s4456_s13 + $0x314] ss:$28 sps:$4 sm:$0xff]   ;;  %v4022_v38 = vld [vmem:[%s5740_s1 + $0xd8] sm:$0xff]   ;;  %v4033_v41 = vld [vmem:[%s5740_s1 + $0x168] sm:$0xff]  }
  0x19   : > { %3300 = vmatpush3.bf16.msra.mxu0 %v3983_v7  ;;  %3962 = vmatpush3.bf16.msra.mxu1 %v3983_v7  ;;  %v4023_v42 = vld [vmem:[%s5740_s1 + $0x98] sm:$0xff]   ;;  %v4024_v43 = vld [vmem:[%s5740_s1 + $0xd0] sm:$0xff]   ;;  %v4035_v44 = vld [vmem:[%s5740_s1 + $0x128] sm:$0xff]  }
  0x1a   : > { %3301 = vmatprep.subr.bf16.mxu0 %v3984_v8  ;;  %3955 = vmatprep.subr.bf16.mxu1 %v3984_v8  ;;  %v4026_v45 = vld [vmem:[%s4456_s13 + $0xac] ss:$28 sps:$4 sm:$0xff]   ;;  %v4025_v47 = vld [vmem:[%s5740_s1 + $0x90] sm:$0xff]   ;;  %v4045_v52 = vld [vmem:[%s5740_s1 + $0x160] sm:$0xff]  }
  0x1b   : > { %v4028_v46 = vld [vmem:[%s4456_s13 + $0x34c] ss:$28 sps:$4 sm:$0xff]   ;;  %v4046_v53 = vld [vmem:[%s5740_s1 + $0x120] sm:$0xff]   ;;  %v4059_v60 = vld [vmem:[%s5740_s1 + $0x158] sm:$0xff]  }
  0x1c   : > { %v4030_v48 = vld [vmem:[%s4456_s13 + $0xa8] ss:$28 sps:$4 sm:$0xff]   ;;  %v4060_v61 = vld [vmem:[%s5740_s1 + $0x118] sm:$0xff]   ;;  %v4068_v2 = vld [vmem:[%s5740_s1 + $0x150] sm:$0xff]  }
  0x1d   : > { %3302 = vmatpush3.bf16.msra.mxu0 %v3985_v9  ;;  %3963 = vmatpush3.bf16.msra.mxu1 %v3985_v9  ;;  %v4031_v49 = vld [vmem:[%s4456_s13 + $0x348] ss:$28 sps:$4 sm:$0xff]   ;;  %v4043_v62 = vld [vmem:[%s4456_s13 + $0xe0] ss:$28 sps:$4 sm:$0xff]   ;;  %v4069_v3 = vld [vmem:[%s5740_s1 + $0x110] sm:$0xff]  }
  0x1e   : > { %3303 = vmatprep.subr.bf16.mxu0 %v3986_v10  ;;  %3956 = vmatprep.subr.bf16.mxu1 %v3986_v10  ;;  %v4032_v50 = vld [vmem:[%s5740_s1 + $0xc8] sm:$0xff]   ;;  %v4038_v54 = vld [vmem:[%s4456_s13 + $0xe4] ss:$28 sps:$4 sm:$0xff]   ;;  %v4047_v63 = vld [vmem:[%s4456_s13 + $0x11c] ss:$28 sps:$4 sm:$0xff]  }
  0x1f   : > { %v4034_v51 = vld [vmem:[%s5740_s1 + $0x88] sm:$0xff]   ;;  %v4036_v55 = vld [vmem:[%s5740_s1 + $0xc0] sm:$0xff]   ;;  %v4051_v4 = vld [vmem:[%s4456_s13 + $0x118] ss:$28 sps:$4 sm:$0xff]  }
  0x20   : > { %v4042_v56 = vld [vmem:[%s4456_s13 + $0xc] ss:$28 sps:$4 sm:$0xff]   ;;  %v4037_v57 = vld [vmem:[%s5740_s1 + $0x80] sm:$0xff]   ;;  %v4053_v6 = vld [vmem:[%s4456_s13 + $0x154] ss:$28 sps:$4 sm:$0xff]  }
  0x21   : > { %3304 = vmatpush3.bf16.msra.mxu0 %v3987_v13  ;;  %3964 = vmatpush3.bf16.msra.mxu1 %v3987_v13  ;;  %v4044_v58 = vld [vmem:[%s5740_s1 + $0x1a8] sm:$0xff]   ;;  %v4049_v0 = vld [vmem:[%s4456_s13 + $0x44] ss:$28 sps:$4 sm:$0xff]   ;;  %v4055_v7 = vld [vmem:[%s4456_s13 + $0x7c] ss:$28 sps:$4 sm:$0xff]  }
  0x22   : > { %3305 = vmatprep.subr.bf16.mxu0 %v3988_v14  ;;  %3957 = vmatprep.subr.bf16.mxu1 %v3988_v14  ;;  %v4040_v59 = vld [vmem:[%s4456_s13 + $0x8] ss:$28 sps:$4 sm:$0xff]   ;;  %v4052_v5 = vld [vmem:[%s4456_s13 + $0x40] ss:$28 sps:$4 sm:$0xff]   ;;  %v4057_v11 = vld [vmem:[%s4456_s13 + $0x150] ss:$28 sps:$4 sm:$0xff]  }
  0x23   : > { %v4061_v1 = vld [vmem:[%s5740_s1 + $0x1a0] sm:$0xff]   ;;  %v4082_v8 = vld [vmem:[%s5740_s1 + $0x148] sm:$0xff]   ;;  %v4084_v10 = vld [vmem:[%s5740_s1 + $0x198] sm:$0xff]  }
  0x24   : > { %v4083_v9 = vld [vmem:[%s5740_s1 + $0x108] sm:$0xff]   ;;  %v4058_v12 = vld [vmem:[%s4456_s13 + $0x78] ss:$28 sps:$4 sm:$0xff]  }
  0x25   : > { %3306 = vmatpush3.bf16.msra.mxu0 %v3989_v15  ;;  %3965 = vmatpush3.bf16.msra.mxu1 %v3989_v15  ;;  %v4062_v13 = vld [vmem:[%s4456_s13 + $0x18c] ss:$28 sps:$4 sm:$0xff]   ;;  %v4064_v14 = vld [vmem:[%s4456_s13 + $0xb4] ss:$28 sps:$4 sm:$0xff]   ;;  %v4091_v15 = vld [vmem:[%s5740_s1 + $0x140] sm:$0xff]  }
  0x26   : > { %3307 = vmatprep.subr.bf16.mxu0 %v3990_v16  ;;  %3958 = vmatprep.subr.bf16.mxu1 %v3990_v16  ;;  %v4092_v16 = vld [vmem:[%s5740_s1 + $0x100] sm:$0xff]  }
  0x29   : > { %3308 = vmatpush3.bf16.msra.mxu0 %v3991_v17  ;;  %3966 = vmatpush3.bf16.msra.mxu1 %v3991_v17  ;;  %v4066_v17 = vld [vmem:[%s4456_s13 + $0x188] ss:$28 sps:$4 sm:$0xff]  }
  0x2a   : > { %3405 = vmatprep.subr.bf16.mxu1 %v3998_v18  ;;  %3517 = vmatprep.subr.bf16.mxu0 %v3999_v21  ;;  %v4067_v18 = vld [vmem:[%s4456_s13 + $0xb0] ss:$28 sps:$4 sm:$0xff]  }
  0x2b   : > { %v4072_v21 = vld [vmem:[%s4456_s13 + $0xec] ss:$28 sps:$4 sm:$0xff]  }
  0x2c   : > { %1407 = vmatmul.mubr.bf16.vlgmr.msra.gmra.mxu0 %v3992_v19  ;;  %1503 = vmatmul.mubr.bf16.vlgmr.msra.gmra.mxu1 %v3995_v20  ;;  %v4070_v19 = vld [vmem:[%s4456_s13 + $0x1c4] ss:$28 sps:$4 sm:$0xff]   ;;  %v4105_v20 = vld [vmem:[%s5740_s1 + $0x190] sm:$0xff]  }
  0x2d   : > { %3406 = vmatpush3.bf16.msra.mxu1 %v4000_v22  ;;  %3518 = vmatpush3.bf16.msra.mxu0 %v4001_v23  ;;  %v4118_v22 = vld [vmem:[%s5740_s1 + $0x188] sm:$0xff]   ;;  %v4074_v23 = vld [vmem:[%s4456_s13 + $0x1c0] ss:$28 sps:$4 sm:$0xff]  }
  0x2e   : > { %3407 = vmatprep.subr.bf16.mxu1 %v4002_v24  ;;  %1414 = vmatprep.mubr.bf16.mxu0 %v4004_v25  ;;  %v4075_v24 = vld [vmem:[%s4456_s13 + $0xe8] ss:$28 sps:$4 sm:$0xff]   ;;  %v4076_v25 = vld [vmem:[%s4456_s13 + $0x1fc] ss:$28 sps:$4 sm:$0xff]  }
  0x2f   : > { %1510 = vmatprep.mubr.bf16.mxu1 %v4006_v26  ;;  %3519 = vmatprep.subr.bf16.mxu0 %v4013_v27  ;;  %v4078_v26 = vld [vmem:[%s4456_s13 + $0x124] ss:$28 sps:$4 sm:$0xff]   ;;  %v4080_v27 = vld [vmem:[%s4456_s13 + $0x1f8] ss:$28 sps:$4 sm:$0xff]  }
  0x31   : > { %3408 = vmatpush3.bf16.msra.mxu1 %v4003_v28  ;;  %3520 = vmatpush3.bf16.msra.mxu0 %v4015_v29  ;;  %v4081_v28 = vld [vmem:[%s4456_s13 + $0x120] ss:$28 sps:$4 sm:$0xff]  }
  0x32   : > { %3409 = vmatprep.subr.bf16.mxu1 %v4010_v32  ;;  %3521 = vmatprep.subr.bf16.mxu0 %v4033_v41  ;;  %v4137_v29 = vld [vmem:[%s5740_s1 + $0x180] sm:$0xff]   ;;  %v4089_v32 = vld [vmem:[%s4456_s13 + $0x230] ss:$28 sps:$4 sm:$0xff]  }
  0x33   : > { %v4104_v41 = vld [vmem:[%s4456_s13 + $0x1c8] ss:$28 sps:$4 sm:$0xff]  }
  0x34   : > { %1415 = vmatmul.mubr.bf16.gmra.mxu0 %v4008_v30  ;;  %1511 = vmatmul.mubr.bf16.gmra.mxu1 %v4009_v31  ;;  %v4085_v30 = vld [vmem:[%s4456_s13 + $0x234] ss:$28 sps:$4 sm:$0xff]   ;;  %v4087_v31 = vld [vmem:[%s4456_s13 + $0x15c] ss:$28 sps:$4 sm:$0xff]  }
  0x35   : > { %3410 = vmatpush3.bf16.msra.mxu1 %v4011_v33  ;;  %1422 = vmatprep.mubr.bf16.mxu0 %v4016_v35  ;;  %v4090_v33 = vld [vmem:[%s4456_s13 + $0x158] ss:$28 sps:$4 sm:$0xff]  }
  0x36   : > { %3411 = vmatprep.subr.bf16.mxu1 %v4012_v34  ;;  %1518 = vmatprep.mubr.bf16.mxu1 %v4018_v36  ;;  %v4093_v34 = vld [vmem:[%s4456_s13 + $0x26c] ss:$28 sps:$4 sm:$0xff]   ;;  %v4095_v35 = vld [vmem:[%s4456_s13 + $0x194] ss:$28 sps:$4 sm:$0xff]  }
  0x37   : > { %3522 = vmatpush3.bf16.msra.mxu0 %v4035_v44  ;;  %v4097_v36 = vld [vmem:[%s4456_s13 + $0x268] ss:$28 sps:$4 sm:$0xff]   ;;  %v4110_v44 = vld [vmem:[%s4456_s13 + $0x200] ss:$28 sps:$4 sm:$0xff]  }
  0x38   : > { %3523 = vmatprep.subr.bf16.mxu0 %v4045_v52  ;;  %v4123_v52 = vld [vmem:[%s4456_s13 + $0x270] ss:$28 sps:$4 sm:$0xff]  }
  0x39   : > { %3412 = vmatpush3.bf16.msra.mxu1 %v4014_v37  ;;  %v4098_v37 = vld [vmem:[%s4456_s13 + $0x190] ss:$28 sps:$4 sm:$0xff]  }
  0x3a   : > { %3413 = vmatprep.subr.bf16.mxu1 %v4022_v38  ;;  %v4099_v38 = vld [vmem:[%s4456_s13 + $0x1cc] ss:$28 sps:$4 sm:$0xff]  }
  0x3b   : > { %3524 = vmatpush3.bf16.msra.mxu0 %v4046_v53  ;;  %v4124_v53 = vld [vmem:[%s4456_s13 + $0xb8] ss:$28 sps:$4 sm:$0xff]  }
  0x3c   : > { %1423 = vmatmul.mubr.bf16.gmra.mxu0 %v4020_v39  ;;  %1519 = vmatmul.mubr.bf16.gmra.mxu1 %v4021_v40  ;;  %v4103_v39 = vld [vmem:[%s4456_s13 + $0x14] ss:$28 sps:$4 sm:$0xff]  }
  0x3d   : > { %3414 = vmatpush3.bf16.msra.mxu1 %v4023_v42  ;;  %1430 = vmatprep.mubr.bf16.mxu0 %v4026_v45  ;;  %v4101_v40 = vld [vmem:[%s4456_s13 + $0x10] ss:$28 sps:$4 sm:$0xff]   ;;  %v4106_v42 = vld [vmem:[%s4456_s13 + $0x204] ss:$28 sps:$4 sm:$0xff]  }
  0x3e   : > { %3415 = vmatprep.subr.bf16.mxu1 %v4024_v43  ;;  %1526 = vmatprep.mubr.bf16.mxu1 %v4028_v46  ;;  %v4108_v43 = vld [vmem:[%s4456_s13 + $0x4c] ss:$28 sps:$4 sm:$0xff]   ;;  %v4112_v46 = vld [vmem:[%s4456_s13 + $0x23c] ss:$28 sps:$4 sm:$0xff]  }
  0x3f   : > { %3525 = vmatprep.subr.bf16.mxu0 %v4059_v60  ;;  %v4111_v45 = vld [vmem:[%s4456_s13 + $0x48] ss:$28 sps:$4 sm:$0xff]   ;;  %v4135_v60 = vld [vmem:[%s4456_s13 + $0x2e0] ss:$28 sps:$4 sm:$0xff]  }
  0x40   : > { %3526 = vmatpush3.bf16.msra.mxu0 %v4060_v61  ;;  %v4136_v61 = vld [vmem:[%s4456_s13 + $0x128] ss:$28 sps:$4 sm:$0xff]  }
  0x41   : > { %3416 = vmatpush3.bf16.msra.mxu1 %v4025_v47  ;;  %3527 = vmatprep.subr.bf16.mxu0 %v4068_v2  ;;  %v4114_v47 = vld [vmem:[%s4456_s13 + $0x84] ss:$28 sps:$4 sm:$0xff]   ;;  %v4144_v2 = vld [vmem:[%s4456_s13 + $0x354] ss:$28 sps:$4 sm:$0xff]  }
  0x42   : > { %3417 = vmatprep.subr.bf16.mxu1 %v4032_v50  ;;  %v4119_v50 = vld [vmem:[%s4456_s13 + $0x274] ss:$28 sps:$4 sm:$0xff]  }
  0x44   : > { %1431 = vmatmul.mubr.bf16.gmra.mxu0 %v4030_v48  ;;  %1527 = vmatmul.mubr.bf16.gmra.mxu1 %v4031_v49  ;;  %v4116_v48 = vld [vmem:[%s4456_s13 + $0x238] ss:$28 sps:$4 sm:$0xff]   ;;  %v4117_v49 = vld [vmem:[%s4456_s13 + $0x80] ss:$28 sps:$4 sm:$0xff]  }
  0x45   : > { %3418 = vmatpush3.bf16.msra.mxu1 %v4034_v51  ;;  %1438 = vmatprep.mubr.bf16.mxu0 %v4038_v54  ;;  %v4121_v51 = vld [vmem:[%s4456_s13 + $0xbc] ss:$28 sps:$4 sm:$0xff]   ;;  %v4125_v54 = vld [vmem:[%s4456_s13 + $0x2ac] ss:$28 sps:$4 sm:$0xff]  }
  0x46   : > { %3419 = vmatprep.subr.bf16.mxu1 %v4036_v55  ;;  %1567 = vmatprep.mubr.bf16.mxu1 %v4042_v56  ;;  %v4127_v55 = vld [vmem:[%s4456_s13 + $0xf4] ss:$28 sps:$4 sm:$0xff]   ;;  %v4129_v56 = vld [vmem:[%s4456_s13 + $0x2a8] ss:$28 sps:$4 sm:$0xff]  }
  0x47   : > { %3528 = vmatpush3.bf16.msra.mxu0 %v4069_v3  ;;  %v4146_v3 = vld [vmem:[%s4456_s13 + $0x19c] ss:$28 sps:$4 sm:$0xff]  }
  0x48   : > { %3529 = vmatprep.subr.bf16.mxu0 %v4082_v8  ;;  %v4153_v8 = vld [vmem:[%s4456_s13 + $0x1d0] ss:$28 sps:$4 sm:$0xff]  }
  0x49   : > { %3420 = vmatpush3.bf16.msra.mxu1 %v4037_v57  ;;  %v4130_v57 = vld [vmem:[%s4456_s13 + $0xf0] ss:$28 sps:$4 sm:$0xff]  }
  0x4a   : > { %3747 = vmatprep.subr.bf16.mxu1 %v4044_v58 }
  0x4b   : > { %3530 = vmatpush3.bf16.msra.mxu0 %v4083_v9  ;;  %v4154_v9 = vld [vmem:[%s4456_s13 + $0x50] ss:$28 sps:$4 sm:$0xff]  }
  0x4c   : > { %1439 = vmatmul.mubr.bf16.gmra.mxu0 %v4043_v62  ;;  %1568 = vmatmul.mubr.bf16.vlgmr.msra.gmra.mxu1 %v4040_v59  ;;  %v4133_v59 = vld [vmem:[%s4456_s13 + $0x12c] ss:$28 sps:$4 sm:$0xff]   ;;  %v4138_v62 = vld [vmem:[%s4456_s13 + $0x31c] ss:$28 sps:$4 sm:$0xff]  }
  0x4d   : > { %3748 = vmatpush3.bf16.msra.mxu1 %v4044_v58  ;;  %1446 = vmatprep.mubr.bf16.mxu0 %v4047_v63  ;;  %v4131_v58 = vld [vmem:[%s4456_s13 + $0x2e4] ss:$28 sps:$4 sm:$0xff]  }
  0x4e   : > { %1575 = vmatprep.mubr.bf16.mxu1 %v4049_v0  ;;  %3749 = vmatprep.subr.bf16.mxu1 %v4061_v1  ;;  %v4140_v63 = vld [vmem:[%s4456_s13 + $0x164] ss:$28 sps:$4 sm:$0xff]   ;;  %v4142_v0 = vld [vmem:[%s4456_s13 + $0x318] ss:$28 sps:$4 sm:$0xff]  }
  0x4f   : > { %3531 = vmatprep.subr.bf16.mxu0 %v4091_v15  ;;  %v4162_v15 = vld [vmem:[%s4456_s13 + $0xf8] ss:$28 sps:$4 sm:$0xff]  }
  0x50   : > { %3532 = vmatpush3.bf16.msra.mxu0 %v4092_v16  ;;  %v4163_v16 = vld [vmem:[%s4456_s13 + $0x240] ss:$28 sps:$4 sm:$0xff]  }
  0x51   : > { %3750 = vmatpush3.bf16.msra.mxu1 %v4061_v1  ;;  %v4143_v1 = vld [vmem:[%s4456_s13 + $0x160] ss:$28 sps:$4 sm:$0xff]  }
  0x52   : > { %3751 = vmatprep.subr.bf16.mxu1 %v4084_v10 }
  0x54   : > { %1447 = vmatmul.mubr.bf16.gmra.mxu0 %v4051_v4  ;;  %1576 = vmatmul.mubr.bf16.gmra.mxu1 %v4052_v5  ;;  %v4148_v4 = vld [vmem:[%s4456_s13 + $0x350] ss:$28 sps:$4 sm:$0xff]   ;;  %v4149_v5 = vld [vmem:[%s4456_s13 + $0x198] ss:$28 sps:$4 sm:$0xff]  }
  0x55   : > { %1454 = vmatprep.mubr.bf16.mxu0 %v4053_v6  ;;  %1583 = vmatprep.mubr.bf16.mxu1 %v4055_v7  ;;  %v4150_v6 = vld [vmem:[%s4456_s13 + $0x1d4] ss:$28 sps:$4 sm:$0xff]  }
  0x56   : > { %3752 = vmatpush3.bf16.msra.mxu1 %v4084_v10  ;;  %v4152_v7 = vld [vmem:[%s4456_s13 + $0x18] ss:$28 sps:$4 sm:$0xff]   ;;  %v4155_v10 = vld [vmem:[%s4456_s13 + $0x20c] ss:$28 sps:$4 sm:$0xff]  }
  0x57   : > { %3753 = vmatprep.subr.bf16.mxu1 %v4105_v20 }
  0x5a   : > { %3754 = vmatpush3.bf16.msra.mxu1 %v4105_v20  ;;  %v2065_v20 = vld [vmem:[%s5741_s2 + $0x78] sm:$0xff] }
  0x5b   : > { %3755 = vmatprep.subr.bf16.mxu1 %v4118_v22 }
  0x5c   : > { %1455 = vmatmul.mubr.bf16.gmra.mxu0 %v4057_v11  ;;  %1584 = vmatmul.mubr.bf16.gmra.mxu1 %v4058_v12  ;;  %v4157_v11 = vld [vmem:[%s4456_s13 + $0x88] ss:$28 sps:$4 sm:$0xff]  }
  0x5d   : > { %1462 = vmatprep.mubr.bf16.mxu0 %v4062_v13  ;;  %1591 = vmatprep.mubr.bf16.mxu1 %v4064_v14  ;;  %v4158_v12 = vld [vmem:[%s4456_s13 + $0x208] ss:$28 sps:$4 sm:$0xff]   ;;  %v4159_v13 = vld [vmem:[%s4456_s13 + $0xc0] ss:$28 sps:$4 sm:$0xff]  }
  0x5e   : > { %3756 = vmatpush3.bf16.msra.mxu1 %v4118_v22  ;;  %v4160_v14 = vld [vmem:[%s4456_s13 + $0x244] ss:$28 sps:$4 sm:$0xff]   ;;  %v4168_v22 = vld [vmem:[%s4456_s13 + $0x278] ss:$28 sps:$4 sm:$0xff]  }
  0x5f   : > { %3757 = vmatprep.subr.bf16.mxu1 %v4137_v29 }
  0x62   : > { %3758 = vmatpush3.bf16.msra.mxu1 %v4137_v29  ;;  %v4174_v29 = vld [vmem:[%s4456_s13 + $0x210] ss:$28 sps:$4 sm:$0xff]  }
  0x63   : > { %3791 = vmatprep.subr.mxu1 %v2065_v20 }
  0x64   : > { %1463 = vmatmul.mubr.bf16.gmra.mxu0 %v4066_v17  ;;  %1592 = vmatmul.mubr.bf16.gmra.mxu1 %v4067_v18  ;;  %v4164_v17 = vld [vmem:[%s4456_s13 + $0x130] ss:$28 sps:$4 sm:$0xff]   ;;  %v4165_v18 = vld [vmem:[%s4456_s13 + $0x27c] ss:$28 sps:$4 sm:$0xff]  }
  0x65   : > { %1470 = vmatprep.mubr.bf16.mxu0 %v4070_v19  ;;  %1599 = vmatprep.mubr.bf16.mxu1 %v4072_v21  ;;  %v4167_v19 = vld [vmem:[%s4456_s13 + $0x168] ss:$28 sps:$4 sm:$0xff]   ;;  %v2064_v21 = vld [vmem:[%s5741_s2 + $0x70] sm:$0xff] }
  0x6c   : > { %1471 = vmatmul.mubr.bf16.gmra.mxu0 %v4074_v23  ;;  %1600 = vmatmul.mubr.bf16.gmra.mxu1 %v4075_v24  ;;  %v4169_v23 = vld [vmem:[%s4456_s13 + $0x1a0] ss:$28 sps:$4 sm:$0xff]   ;;  %v4170_v24 = vld [vmem:[%s4456_s13 + $0x2b4] ss:$28 sps:$4 sm:$0xff]  }
  0x6d   : > { %1478 = vmatprep.mubr.bf16.mxu0 %v4076_v25  ;;  %1607 = vmatprep.mubr.bf16.mxu1 %v4078_v26  ;;  %v4172_v25 = vld [vmem:[%s4456_s13 + $0x1d8] ss:$28 sps:$4 sm:$0xff]   ;;  %v2063_v26 = vld [vmem:[%s5741_s2 + $0x68] sm:$0xff] }
  0x74   : > { %1479 = vmatmul.mubr.bf16.gmra.mxu0 %v4080_v27  ;;  %1608 = vmatmul.mubr.bf16.gmra.mxu1 %v4081_v28  ;;  %v2062_v27 = vld [vmem:[%s5741_s2 + $0x60] sm:$0xff]  ;;  %v4173_v28 = vld [vmem:[%s4456_s13 + $0x2b0] ss:$28 sps:$4 sm:$0xff]  }
  0x75   : > { %1486 = vmatprep.mubr.bf16.mxu0 %v4085_v30  ;;  %1615 = vmatprep.mubr.bf16.mxu1 %v4087_v31  ;;  %v4175_v30 = vld [vmem:[%s4456_s13 + $0x2ec] ss:$28 sps:$4 sm:$0xff]  }
  0x76   : > { %v4177_v31 = vld [vmem:[%s4456_s13 + $0x248] ss:$28 sps:$4 sm:$0xff]  }
  0x7c   : > { %1487 = vmatmul.mubr.bf16.gmra.mxu0 %v4089_v32  ;;  %1616 = vmatmul.mubr.bf16.gmra.mxu1 %v4090_v33  ;;  %v2061_v32 = vld [vmem:[%s5741_s2 + $0x58] sm:$0xff] }
  0x7d   : > { %1494 = vmatprep.mubr.bf16.mxu0 %v4093_v34  ;;  %1623 = vmatprep.mubr.bf16.mxu1 %v4095_v35  ;;  %v2060_v35 = vld [vmem:[%s5741_s2 + $0x50] sm:$0xff] }
  0x84   : > { %1495 = vmatmul.mubr.bf16.gmra.mxu0 %v4097_v36  ;;  %1624 = vmatmul.mubr.bf16.gmra.mxu1 %v4098_v37 }
  0x85   : > { %1631 = vmatprep.mubr.bf16.mxu1 %v4099_v38  ;;  %1728 = vmatprep.mubr.bf16.mxu0 %v4103_v39 }
  0x8c   : > { %1632 = vmatmul.mubr.bf16.gmra.mxu1 %v4104_v41  ;;  %1729 = vmatmul.mubr.bf16.vlgmr.msra.gmra.mxu0 %v4101_v40  ;;  %v4178_v40 = vld [vmem:[%s4456_s13 + $0x2e8] ss:$28 sps:$4 sm:$0xff]   ;;  %v4179_v41 = vld [vmem:[%s4456_s13 + $0x280] ss:$28 sps:$4 sm:$0xff]  }
  0x8d   : > { %1639 = vmatprep.mubr.bf16.mxu1 %v4106_v42  ;;  %1736 = vmatprep.mubr.bf16.mxu0 %v4108_v43  ;;  %v4180_v42 = vld [vmem:[%s4456_s13 + $0x324] ss:$28 sps:$4 sm:$0xff]   ;;  %v4182_v43 = vld [vmem:[%s4456_s13 + $0x2b8] ss:$28 sps:$4 sm:$0xff]  }
  0x94   : > { %1640 = vmatmul.mubr.bf16.gmra.mxu1 %v4110_v44  ;;  %1737 = vmatmul.mubr.bf16.gmra.mxu0 %v4111_v45  ;;  %v2059_v44 = vld [vmem:[%s5741_s2 + $0x48] sm:$0xff] }
  0x95   : > { %1647 = vmatprep.mubr.bf16.mxu1 %v4112_v46  ;;  %1744 = vmatprep.mubr.bf16.mxu0 %v4114_v47 }
  0x9c   : > { %1648 = vmatmul.mubr.bf16.gmra.mxu1 %v4116_v48  ;;  %1745 = vmatmul.mubr.bf16.gmra.mxu0 %v4117_v49  ;;  %v2058_v49 = vld [vmem:[%s5741_s2 + $0x40] sm:$0xff] }
  0x9d   : > { %1655 = vmatprep.mubr.bf16.mxu1 %v4119_v50  ;;  %1752 = vmatprep.mubr.bf16.mxu0 %v4121_v51 }
  0xa4   : > { %1656 = vmatmul.mubr.bf16.gmra.mxu1 %v4123_v52  ;;  %1753 = vmatmul.mubr.bf16.gmra.mxu0 %v4124_v53 }
  0xa5   : > { %1663 = vmatprep.mubr.bf16.mxu1 %v4125_v54  ;;  %1760 = vmatprep.mubr.bf16.mxu0 %v4127_v55  ;;  %v4183_v54 = vld [vmem:[%s4456_s13 + $0x320] ss:$28 sps:$4 sm:$0xff]   ;;  %v4184_v55 = vld [vmem:[%s4456_s13 + $0x2f0] ss:$28 sps:$4 sm:$0xff]  }
  0xac   : > { %1664 = vmatmul.mubr.bf16.gmra.mxu1 %v4129_v56  ;;  %1761 = vmatmul.mubr.bf16.gmra.mxu0 %v4130_v57  ;;  %v4185_v56 = vld [vmem:[%s4456_s13 + $0x35c] ss:$28 sps:$4 sm:$0xff]   ;;  %v4187_v57 = vld [vmem:[%s4456_s13 + $0x328] ss:$28 sps:$4 sm:$0xff]  }
  0xad   : > { %1671 = vmatprep.mubr.bf16.mxu1 %v4131_v58  ;;  %1768 = vmatprep.mubr.bf16.mxu0 %v4133_v59  ;;  %v2057_v58 = vld [vmem:[%s5741_s2 + $0x38] sm:$0xff] }
  0xb4   : > { %1672 = vmatmul.mubr.bf16.gmra.mxu1 %v4135_v60  ;;  %1769 = vmatmul.mubr.bf16.gmra.mxu0 %v4136_v61 }
  0xb5   : > { %1679 = vmatprep.mubr.bf16.mxu1 %v4138_v62  ;;  %1776 = vmatprep.mubr.bf16.mxu0 %v4140_v63  ;;  %v2056_v63 = vld [vmem:[%s5741_s2 + $0x30] sm:$0xff] }
  0xbc   : > { %1680 = vmatmul.mubr.bf16.gmra.mxu1 %v4142_v0  ;;  %1777 = vmatmul.mubr.bf16.gmra.mxu0 %v4143_v1 }
  0xbd   : > { %1687 = vmatprep.mubr.bf16.mxu1 %v4144_v2  ;;  %1784 = vmatprep.mubr.bf16.mxu0 %v4146_v3 }
  0xc4   : > { %1688 = vmatmul.mubr.bf16.gmra.mxu1 %v4148_v4  ;;  %1785 = vmatmul.mubr.bf16.gmra.mxu0 %v4149_v5  ;;  %v4188_v4 = vld [vmem:[%s4456_s13 + $0x358] ss:$28 sps:$4 sm:$0xff]   ;;  %v4189_v5 = vld [vmem:[%s4456_s13 + $0x360] ss:$28 sps:$4 sm:$0xff]  }
  0xc5   : > { %1792 = vmatprep.mubr.bf16.mxu0 %v4150_v6  ;;  %3759 = vmatprep.mubr.msk.bf16.mxu1 %vm1325_vm0, %v4152_v7  ;;  %v2055_v6 = vld [vmem:[%s5741_s2 + $0x28] sm:$0xff] }
  0xcc   : > { %1793 = vmatmul.mubr.bf16.gmra.mxu0 %v4153_v8  ;;  %3760 = vmatmul.mubr.msk.bf16.vlgmr.msra.gmra.mxu1 %vm1325_vm0, %v4154_v9 }
  0xcd   : > { %1800 = vmatprep.mubr.bf16.mxu0 %v4155_v10  ;;  %3763 = vmatprep.mubr.msk.bf16.mxu1 %vm1325_vm0, %v4157_v11  ;;  %v2054_v11 = vld [vmem:[%s5741_s2 + $0x20] sm:$0xff] }
  0xce   : > { %3792 = vmatpush3.msra.mxu1 %v2065_v20 }
  0xcf   : > { %3793 = vmatprep.subr.mxu1 %v2064_v21 }
  0xd0   : > { %3794 = vmatpush3.msra.mxu1 %v2064_v21  ;;  %v2052_v21 = vld [vmem:[%s5741_s2 + $0x10] sm:$0xff] }
  0xd1   : > { %3795 = vmatprep.subr.mxu1 %v2063_v26 }
  0xd2   : > { %3796 = vmatpush3.msra.mxu1 %v2063_v26 }
  0xd3   : > { %3797 = vmatprep.subr.mxu1 %v2062_v27 }
  0xd4   : > { %1801 = vmatmul.mubr.bf16.gmra.mxu0 %v4158_v12  ;;  %3764 = vmatmul.mubr.msk.bf16.gmra.mxu1 %vm1325_vm0, %v4159_v13 }
  0xd5   : > { %1808 = vmatprep.mubr.bf16.mxu0 %v4160_v14  ;;  %3767 = vmatprep.mubr.msk.bf16.mxu1 %vm1325_vm0, %v4162_v15 }
  0xd6   : > { %3798 = vmatpush3.msra.mxu1 %v2062_v27 }
  0xd7   : > { %3799 = vmatprep.subr.mxu1 %v2061_v32 }
  0xd8   : > { %3800 = vmatpush3.msra.mxu1 %v2061_v32 }
  0xd9   : > { %3801 = vmatprep.subr.mxu1 %v2060_v35 }
  0xda   : > { %3802 = vmatpush3.msra.mxu1 %v2060_v35 }
  0xdb   : > { %3803 = vmatprep.subr.mxu1 %v2059_v44 }
  0xdc   : > { %1809 = vmatmul.mubr.bf16.gmra.mxu0 %v4163_v16  ;;  %3768 = vmatmul.mubr.msk.bf16.gmra.mxu1 %vm1325_vm0, %v4164_v17  ;;  %v2053_v16 = vld [vmem:[%s5741_s2 + $0x18] sm:$0xff] }
  0xdd   : > { %1816 = vmatprep.mubr.bf16.mxu0 %v4165_v18  ;;  %3771 = vmatprep.mubr.msk.bf16.mxu1 %vm1325_vm0, %v4167_v19 }
  0xde   : > { %3804 = vmatpush3.msra.mxu1 %v2059_v44 }
  0xdf   : > { %3805 = vmatprep.subr.mxu1 %v2058_v49 }
  0xe0   : > { %3806 = vmatpush3.msra.mxu1 %v2058_v49 }
  0xe1   : > { %3807 = vmatprep.subr.mxu1 %v2057_v58 }
  0xe2   : > { %3808 = vmatpush3.msra.mxu1 %v2057_v58 }
  0xe3   : > { %3809 = vmatprep.subr.mxu1 %v2056_v63 }
  0xe4   : > { %1817 = vmatmul.mubr.bf16.gmra.mxu0 %v4168_v22  ;;  %3772 = vmatmul.mubr.msk.bf16.gmra.mxu1 %vm1325_vm0, %v4169_v23 }
  0xe5   : > { %1824 = vmatprep.mubr.bf16.mxu0 %v4170_v24  ;;  %3775 = vmatprep.mubr.msk.bf16.mxu1 %vm1325_vm0, %v4172_v25 }
  0xe6   : > { %3810 = vmatpush3.msra.mxu1 %v2056_v63 }
  0xe7   : > { %3811 = vmatprep.subr.mxu1 %v2055_v6 }
  0xe8   : > { %3812 = vmatpush3.msra.mxu1 %v2055_v6 }
  0xe9   : > { %3813 = vmatprep.subr.mxu1 %v2054_v11 }
  0xea   : > { %3814 = vmatpush3.msra.mxu1 %v2054_v11 }
  0xeb   : > { %3815 = vmatprep.subr.mxu1 %v2053_v16 }
  0xec   : > { %v4719_v33 = vpop.f32.mrf.mxu0  ;;  %v4721_v34 = vpop.f32.mrf.mxu1  ;;  %1825 = vmatmul.mubr.bf16.gmra.mxu0 %v4173_v28  ;;  %3776 = vmatmul.mubr.msk.bf16.gmra.mxu1 %vm1325_vm0, %v4174_v29  ;;  %v2051_v29 = vld [vmem:[%s5741_s2 + $0x8] sm:$0xff] }
  0xed   : > { %1832 = vmatprep.mubr.bf16.mxu0 %v4175_v30  ;;  %3779 = vmatprep.mubr.msk.bf16.mxu1 %vm1325_vm0, %v4177_v31 }
  0xee   : > { %v4728_v36 = vpop.f32.mrf.mxu0  ;;  %v4730_v37 = vpop.f32.mrf.mxu1  ;;  %3816 = vmatpush3.msra.mxu1 %v2053_v16 }
  0xef   : > { %3817 = vmatprep.subr.mxu1 %v2052_v21  ;;  %v3311_v24 = vadd.f32 %v4728_v36, %v4719_v33 }
  0xf0   : > { %v4732_v38 = vpop.f32.mrf.mxu0  ;;  %v4734_v39 = vpop.f32.mrf.mxu1  ;;  %3818 = vmatpush3.msra.mxu1 %v2052_v21 }
  0xf1   : > { %3819 = vmatprep.subr.mxu1 %v2051_v29 }
  0xf2   : > { %v4743_v45 = vpop.f32.mrf.mxu0  ;;  %v4745_v46 = vpop.f32.mrf.mxu1  ;;  %3820 = vmatpush3.msra.mxu1 %v2051_v29 }
  0xf3   : > { %v3314_v32 = vadd.f32 %v4743_v45, %v4732_v38 }
  0xf4   : > { %v4747_v47 = vpop.f32.mrf.mxu0  ;;  %v4749_v48 = vpop.f32.mrf.mxu1  ;;  %1833 = vmatmul.mubr.bf16.gmra.mxu0 %v4178_v40  ;;  %3780 = vmatmul.mubr.msk.bf16.gmra.mxu1 %vm1325_vm0, %v4179_v41  ;;  %v2050_v40 = vld [vmem:[%s5741_s2] sm:$0xff] }
  0xf5   : > { %1840 = vmatprep.mubr.bf16.mxu0 %v4180_v42  ;;  %3783 = vmatprep.mubr.msk.bf16.mxu1 %vm1325_vm0, %v4182_v43 }
  0xf6   : > { %v4756_v50 = vpop.f32.mrf.mxu0  ;;  %v4758_v51 = vpop.f32.mrf.mxu1  ;;  %3821 = vmatprep.subr.mxu1 %v2050_v40 }
  0xf7   : > { %3822 = vmatpush3.msra.mxu1 %v2050_v40  ;;  %v3317_v44 = vadd.f32 %v4756_v50, %v4747_v47 }
  0xf8   : > { %v4760_v52 = vpop.f32.mrf.mxu0  ;;  %v4762_v53 = vpop.f32.mrf.mxu1 }
  0xfa   : > { %v4771_v59 = vpop.f32.mrf.mxu0  ;;  %v4773_v60 = vpop.f32.mrf.mxu1 }
  0xfc   : > { %v4775_v61 = vpop.f32.mrf.mxu0  ;;  %v4777_v62 = vpop.f32.mrf.mxu1  ;;  %1841 = vmatmul.mubr.bf16.gmra.mxu0 %v4183_v54  ;;  %3784 = vmatmul.mubr.msk.bf16.gmra.mxu1 %vm1325_vm0, %v4184_v55 }
  0xfd   : > { %1848 = vmatprep.mubr.bf16.mxu0 %v4185_v56  ;;  %3787 = vmatprep.mubr.msk.bf16.mxu1 %vm1325_vm0, %v4187_v57  ;;  %v3320_v57 = vadd.f32 %v4771_v59, %v4760_v52 }
  0xfe   : > { %v4784_v0 = vpop.f32.mrf.mxu0  ;;  %v4786_v1 = vpop.f32.mrf.mxu1 }
  0xff   : > { %v3323_v47 = vadd.f32 %v4784_v0, %v4775_v61 }
 0x100   : > { %v4788_v2 = vpop.f32.mrf.mxu0  ;;  %v4790_v3 = vpop.f32.mrf.mxu1 }
 0x102   : > { %v4797_v7 = vpop.f32.mrf.mxu0  ;;  %v4799_v8 = vpop.f32.mrf.mxu1 }
 0x103   : > { %v3326_v59 = vadd.f32 %v4797_v7, %v4788_v2 }
 0x104   : > { %v4801_v9 = vpop.f32.mrf.mxu0  ;;  %v4803_v10 = vpop.f32.mrf.mxu1  ;;  %1849 = vmatmul.mubr.bf16.gmra.mxu0 %v4188_v4  ;;  %3788 = vmatmul.mubr.msk.bf16.gmra.mxu1 %vm1325_vm0, %v4189_v5 }
 0x106   : > { %v4809_v12 = vpop.f32.mrf.mxu0  ;;  %v4811_v13 = vpop.f32.mrf.mxu1 }
 0x107   : > { %v3329_v0 = vadd.f32 %v4809_v12, %v4801_v9 }
 0x108   : > { %v4813_v14 = vpop.f32.mrf.mxu0  ;;  %v4815_v15 = vpop.f32.mrf.mxu1 }
 0x10a   : > { %v4820_v17 = vpop.f32.mrf.mxu0  ;;  %v4822_v18 = vpop.f32.mrf.mxu1 }
 0x10b   : > { %v3332_v7 = vadd.f32 %v4820_v17, %v4813_v14 }
 0x10c   : > { %v4824_v19 = vpop.f32.mrf.mxu0  ;;  %v3421_v20 = vpop.f32.mrf.mxu1 }
 0x10e   : > { %v4829_v22 = vpop.f32.mrf.mxu0  ;;  %v3422_v23 = vpop.f32.mrf.mxu1 }
 0x10f   : > { %v3423_v25 = vadd.f32 %v3422_v23, %v3421_v20  ;;  %v3335_v9 = vadd.f32 %v4829_v22, %v4824_v19 }
 0x110   : > { %v4833_v26 = vpop.f32.mrf.mxu0  ;;  %v3424_v27 = vpop.f32.mrf.mxu1 }
 0x111   : > { %v4835_v28 = vadd.f32 %v3423_v25, %v3311_v24 }
 0x112   : > { %v4840_v30 = vpop.f32.mrf.mxu0  ;;  %v3425_v31 = vpop.f32.mrf.mxu1 }
 0x113   : > { %v3426_v35 = vadd.f32 %v3425_v31, %v3424_v27  ;;  %v3338_v14 = vadd.f32 %v4840_v30, %v4833_v26 }
 0x114   : > { %v4844_v33 = vpop.f32.mrf.mxu0  ;;  %v3427_v36 = vpop.f32.mrf.mxu1 }
 0x115   : > { %v4849_v41 = vadd.f32 %v3426_v35, %v3314_v32 }
 0x116   : > { %v3340_v42 = vpop.f32.mrf.mxu0  ;;  %v3428_v43 = vpop.f32.mrf.mxu1 }
 0x117   : > { %v3429_v49 = vadd.f32 %v3428_v43, %v3427_v36 }
 0x118   : > { %v4853_v38 = vpop.f32.mrf.mxu0  ;;  %v3430_v45 = vpop.f32.mrf.mxu1 }
 0x119   : > { %v4855_v54 = vadd.f32 %v3429_v49, %v3317_v44 }
 0x11a   : > { %v3343_v55 = vpop.f32.mrf.mxu0  ;;  %v3431_v56 = vpop.f32.mrf.mxu1 }
 0x11b   : > { %v3432_v58 = vadd.f32 %v3431_v56, %v3430_v45  ;;  %v3344_v30 = vadd.f32 %v3343_v55, %v4853_v38 }
 0x11c   : > { %v4859_v63 = vpop.f32.mrf.mxu0  ;;  %v3433_v4 = vpop.f32.mrf.mxu1 }
 0x11d   : > { %v4861_v5 = vadd.f32 %v3432_v58, %v3320_v57 }
 0x11e   : > { %v3346_v6 = vpop.f32.mrf.mxu0  ;;  %v3434_v11 = vpop.f32.mrf.mxu1 }
 0x11f   : > { %v3435_v50 = vadd.f32 %v3434_v11, %v3433_v4 }
 0x120   : > { %v4865_v16 = vpop.f32.mrf.mxu0  ;;  %v3436_v20 = vpop.f32.mrf.mxu1 }
 0x121   : > { %v4867_v21 = vadd.f32 %v3435_v50, %v3323_v47 }
 0x122   : > { %v4869_v23 = vpop.f32.mrf.mxu0  ;;  %v3437_v52 = vpop.f32.mrf.mxu1 }
 0x123   : > { %v3438_v24 = vadd.f32 %v3437_v52, %v3436_v20  ;;  %v3350_v55 = vadd.f32 %v4869_v23, %v4865_v16 }
 0x124   : > { %v4873_v25 = vpop.f32.mrf.mxu0  ;;  %v3439_v27 = vpop.f32.mrf.mxu1 }
 0x125   : > { %v4875_v29 = vadd.f32 %v3438_v24, %v3326_v59 }
 0x126   : > { %v4877_v31 = vpop.f32.mrf.mxu0  ;;  %v3440_v61 = vpop.f32.mrf.mxu1 }
 0x127   : > { %v3441_v32 = vadd.f32 %v3440_v61, %v3439_v27 }
 0x128   : > { %v4881_v35 = vpop.f32.mrf.mxu0  ;;  %v3442_v36 = vpop.f32.mrf.mxu1 }
 0x129   : > { %v4883_v40 = vadd.f32 %v3441_v32, %v3329_v0  ;;  %v3341_v0 = vadd.f32 %v3340_v42, %v4844_v33  ;;  %v3347_v42 = vadd.f32 %v3346_v6, %v4859_v63 }
 0x12a   : > { %v4885_v43 = vpop.f32.mrf.mxu0  ;;  %v3443_v2 = vpop.f32.mrf.mxu1 }
 0x12b   : > { %v3444_v44 = vadd.f32 %v3443_v2, %v3442_v36 }
 0x12c   : > { %v3357_v49 = vpop.f32.mrf.mxu0  ;;  %v3445_v45 = vpop.f32.mrf.mxu1 }
 0x12d   : > { %v4889_v56 = vadd.f32 %v3444_v44, %v3332_v7 }
 0x12e   : > { %v3358_v57 = vpop.f32.mrf.mxu0  ;;  %v3446_v58 = vpop.f32.mrf.mxu1 }
 0x12f   : > { %v4893_v12 = vadd.f32 %v3358_v57, %v3357_v49  ;;  %v3447_v4 = vadd.f32 %v3446_v58, %v3445_v45 }
 0x130   : > { %v3360_v11 = vpop.f32.mrf.mxu0  ;;  %v3448_v47 = vpop.f32.mrf.mxu1 }
 0x131   : > { %v4895_v50 = vadd.f32 %v3447_v4, %v3335_v9 }
 0x132   : > { %v3361_v20 = vpop.f32.mrf.mxu0  ;;  %v3449_v52 = vpop.f32.mrf.mxu1 }
 0x133   : > { %v4899_v17 = vadd.f32 %v3361_v20, %v3360_v11  ;;  %v3450_v59 = vadd.f32 %v3449_v52, %v3448_v47 }
 0x134   : > { %v3363_v24 = vpop.f32.mrf.mxu0  ;;  %v3451_v27 = vpop.f32.mrf.mxu1 }
 0x135   : > { %v4901_v61 = vadd.f32 %v3450_v59, %v3338_v14 }
 0x136   : > { %v3364_v19 = vpop.f32.mrf.mxu0  ;;  %v3452_v22 = vpop.f32.mrf.mxu1 }
 0x137   : > { %v4904_v32 = vadd.f32 %v3364_v19, %v3363_v24  ;;  %v3453_v36 = vadd.f32 %v3452_v22, %v3451_v27 }
 0x138   : > { %v3366_v2 = vpop.f32.mrf.mxu0  ;;  %v3454_v7 = vpop.f32.mrf.mxu1 }
 0x139   : > { %v4906_v44 = vadd.f32 %v3453_v36, %v3341_v0 }
 0x13a   : > { %v3367_v49 = vpop.f32.mrf.mxu0  ;;  %v3455_v26 = vpop.f32.mrf.mxu1 }
 0x13b   : > { %v4909_v45 = vadd.f32 %v3367_v49, %v3366_v2  ;;  %v3456_v57 = vadd.f32 %v3455_v26, %v3454_v7  ;;  %v3353_v2 = vadd.f32 %v4877_v31, %v4873_v25 }
 0x13c   : > { %v3369_v58 = vpop.f32.mrf.mxu0  ;;  %v3457_v9 = vpop.f32.mrf.mxu1 }
 0x13d   : > { %v4911_v4 = vadd.f32 %v3456_v57, %v3344_v30 }
 0x13e   : > { %v3370_v11 = vpop.f32.mrf.mxu0  ;;  %v3458_v33 = vpop.f32.mrf.mxu1 }
 0x13f   : > { %v4914_v47 = vadd.f32 %v3370_v11, %v3369_v58  ;;  %v3459_v20 = vadd.f32 %v3458_v33, %v3457_v9  ;;  %v3356_v58 = vadd.f32 %v4885_v43, %v4881_v35 }
 0x140   : > { %v3372_v52 = vpop.f32.mrf.mxu0  ;;  %v3460_v14 = vpop.f32.mrf.mxu1 }
 0x141   : > { %v4916_v59 = vadd.f32 %v3459_v20, %v3347_v42 }
 0x142   : > { %v3373_v24 = vpop.f32.mrf.mxu0  ;;  %v3461_v38 = vpop.f32.mrf.mxu1 }
 0x143   : > { %v4920_v27 = vadd.f32 %v3373_v24, %v3372_v52  ;;  %v3462_v19 = vadd.f32 %v3461_v38, %v3460_v14 }
 0x144   : > { %v3375_v22 = vpop.f32.mrf.mxu0  ;;  %v3463_v0 = vpop.f32.mrf.mxu1 }
 0x145   : > { %v4922_v36 = vadd.f32 %v3462_v19, %v3350_v55  ;;  %v2722_v19 = vld [vmem:[%s5742_s3 + $0x78] sm:$0xff] }
 0x146   : > { %v3376_v63 = vpop.f32.mrf.mxu0  ;;  %v3464_v6 = vpop.f32.mrf.mxu1  ;;  %3871 = vmatprep.subr.mxu0 %v2722_v19 }
 0x147   : > { %v4926_v7 = vadd.f32 %v3376_v63, %v3375_v22  ;;  %v3465_v49 = vadd.f32 %v3464_v6, %v3463_v0  ;;  %v2721_v22 = vld [vmem:[%s5742_s3 + $0x70] sm:$0xff]  ;;  %3872 = vmatpush3.msra.mxu0 %v2722_v19 }
 0x148   : > { %v3378_v26 = vpop.f32.mrf.mxu0  ;;  %v3466_v30 = vpop.f32.mrf.mxu1  ;;  %3873 = vmatprep.subr.mxu0 %v2721_v22 }
 0x149   : > { %v4928_v57 = vadd.f32 %v3465_v49, %v3353_v2  ;;  %3874 = vmatpush3.msra.mxu0 %v2721_v22 }
 0x14a   : > { %v3379_v16 = vpop.f32.mrf.mxu0  ;;  %v3467_v23 = vpop.f32.mrf.mxu1 }
 0x14b   : > { %v4932_v9 = vadd.f32 %v3379_v16, %v3378_v26  ;;  %v3468_v11 = vadd.f32 %v3467_v23, %v3466_v30  ;;  %v2719_v30 = vld [vmem:[%s5742_s3 + $0x60] sm:$0xff] }
 0x14c   : > { %v3469_v33 = vpop.f32.mrf.mxu1  ;;  %v4934_v42 = vpop.f32.mrf.mxu0 }
 0x14d   : > { %v4936_v20 = vadd.f32 %v3468_v11, %v3356_v58  ;;  %v2718_v58 = vld [vmem:[%s5742_s3 + $0x58] sm:$0xff] }
 0x14e   : > { %v3470_v25 = vpop.f32.mrf.mxu1  ;;  %v4938_v31 = vpop.f32.mrf.mxu0 }
 0x14f   : > { %5744 = vst [vmem:[#allocation2_spill] sm:$0xff] %v4936_v20  ;;  %v3471_v52 = vadd.f32 %v3470_v25, %v3469_v33 }
 0x150   : > { %v3472_v14 = vpop.f32.mrf.mxu1  ;;  %v4940_v24 = vpop.f32.mrf.mxu0 }
 0x151   : > { %v4943_v38 = vadd.f32 %v3471_v52, %v4893_v12  ;;  %v2720_v12 = vld [vmem:[%s5742_s3 + $0x68] sm:$0xff]  ;;  %v2717_v52 = vld [vmem:[%s5742_s3 + $0x50] sm:$0xff] }
 0x152   : > { %v3473_v55 = vpop.f32.mrf.mxu1  ;;  %v4945_v35 = vpop.f32.mrf.mxu0  ;;  %3875 = vmatprep.subr.mxu0 %v2720_v12 }
 0x153   : > { %5745 = vst [vmem:[#allocation3_spill] sm:$0xff] %v4943_v38  ;;  %v3474_v43 = vadd.f32 %v3473_v55, %v3472_v14  ;;  %3876 = vmatpush3.msra.mxu0 %v2720_v12  ;;  %v2715_v12 = vld [vmem:[%s5742_s3 + $0x40] sm:$0xff] }
 0x154   : > { %v3475_v0 = vpop.f32.mrf.mxu1  ;;  %v4953_v63 = vpop.f32.mrf.mxu0  ;;  %3877 = vmatprep.subr.mxu0 %v2719_v30 }
 0x155   : > { %v4956_v6 = vadd.f32 %v3474_v43, %v4899_v17  ;;  %3878 = vmatpush3.msra.mxu0 %v2719_v30  ;;  %v2716_v43 = vld [vmem:[%s5742_s3 + $0x48] sm:$0xff]  ;;  %v2714_v30 = vld [vmem:[%s5742_s3 + $0x38] sm:$0xff] }
 0x156   : > { %v3476_v2 = vpop.f32.mrf.mxu1  ;;  %v4961_v49 = vpop.f32.mrf.mxu0  ;;  %3879 = vmatprep.subr.mxu0 %v2718_v58 }
 0x157   : > { %5746 = vst [vmem:[#allocation4_spill] sm:$0xff] %v4956_v6  ;;  %v3477_v26 = vadd.f32 %v3476_v2, %v3475_v0  ;;  %3880 = vmatpush3.msra.mxu0 %v2718_v58 }
 0x158   : > { %v3478_v16 = vpop.f32.mrf.mxu1  ;;  %v4966_v23 = vpop.f32.mrf.mxu0  ;;  %3881 = vmatprep.subr.mxu0 %v2717_v52 }
 0x159   : > { %v4969_v17 = vadd.f32 %v3477_v26, %v4904_v32  ;;  %3882 = vmatpush3.msra.mxu0 %v2717_v52 }
 0x15a   : > { %v3479_v11 = vpop.f32.mrf.mxu1  ;;  %v4974_v33 = vpop.f32.mrf.mxu0  ;;  %3883 = vmatprep.subr.mxu0 %v2716_v43 }
 0x15b   : > { %5747 = vst [vmem:[#allocation5_spill] sm:$0xff] %v4969_v17  ;;  %v3480_v25 = vadd.f32 %v3479_v11, %v3478_v16  ;;  %3884 = vmatpush3.msra.mxu0 %v2716_v43 }
 0x15c   : > { %v3481_v14 = vpop.f32.mrf.mxu1  ;;  %v4979_v55 = vpop.f32.mrf.mxu0  ;;  %3885 = vmatprep.subr.mxu0 %v2715_v12 }
 0x15d   : > { %v4982_v32 = vadd.f32 %v3480_v25, %v4909_v45  ;;  %3886 = vmatpush3.msra.mxu0 %v2715_v12  ;;  %v2713_v25 = vld [vmem:[%s5742_s3 + $0x30] sm:$0xff] }
 0x15e   : > { %v3482_v19 = vpop.f32.mrf.mxu1  ;;  %v4987_v22 = vpop.f32.mrf.mxu0  ;;  %3887 = vmatprep.subr.mxu0 %v2714_v30 }
 0x15f   : > { %5748 = vst [vmem:[#allocation6_spill] sm:$0xff] %v4982_v32  ;;  %v3483_v0 = vadd.f32 %v3482_v19, %v3481_v14  ;;  %3888 = vmatpush3.msra.mxu0 %v2714_v30 }
 0x160   : > { %v3484_v2 = vpop.f32.mrf.mxu1  ;;  %v4992_v26 = vpop.f32.mrf.mxu0  ;;  %3889 = vmatprep.subr.mxu0 %v2713_v25 }
 0x161   : > { %v4995_v45 = vadd.f32 %v3483_v0, %v4914_v47  ;;  %3890 = vmatpush3.msra.mxu0 %v2713_v25  ;;  %v3383_v25 = vadd.f32 %v4730_v37, %v4721_v34  ;;  %v3389_v37 = vadd.f32 %v4758_v51, %v4749_v48  ;;  %v3395_v51 = vadd.f32 %v4786_v1, %v4777_v62 }
 0x162   : > { %v3485_v16 = vpop.f32.mrf.mxu1  ;;  %v5000_v58 = vpop.f32.mrf.mxu0  ;;  %v3401_v1 = vadd.f32 %v4811_v13, %v4803_v10 }
 0x163   : > { %5749 = vst [vmem:[#allocation7_spill] sm:$0xff] %v4995_v45  ;;  %v3486_v11 = vadd.f32 %v3485_v16, %v3484_v2 }
 0x164   : > { %v3487_v52 = vpop.f32.mrf.mxu1  ;;  %v5005_v14 = vpop.f32.mrf.mxu0 }
 0x165   : > { %v5008_v47 = vadd.f32 %v3486_v11, %v4920_v27 }
 0x166   : > { %v3488_v43 = vpop.f32.mrf.mxu1  ;;  %v5010_v19 = vpop.f32.mrf.mxu0 }
 0x167   : > { %5750 = vst [vmem:[#allocation8_spill] sm:$0xff] %v5008_v47  ;;  %v3489_v0 = vadd.f32 %v3488_v43, %v3487_v52 }
 0x168   : > { %v3490_v2 = vpop.f32.mrf.mxu1  ;;  %v5012_v12 = vpop.f32.mrf.mxu0 }
 0x169   : > { %v5015_v16 = vadd.f32 %v3489_v0, %v4926_v7 }
 0x16a   : > { %v3491_v45 = vpop.f32.mrf.mxu1  ;;  %v5017_v32 = vpop.f32.mrf.mxu0 }
 0x16b   : > { %5751 = vst [vmem:[#allocation9_spill] sm:$0xff] %v5015_v16  ;;  %v3492_v6 = vadd.f32 %v3491_v45, %v3490_v2  ;;  %v3386_v2 = vadd.f32 %v4745_v46, %v4734_v39  ;;  %v3392_v46 = vadd.f32 %v4773_v60, %v4762_v53  ;;  %v3398_v60 = vadd.f32 %v4799_v8, %v4790_v3 }
 0x16c   : > { %v3493_v17 = vpop.f32.mrf.mxu1  ;;  %v5019_v27 = vpop.f32.mrf.mxu0 }
 0x16d   : > { %v5022_v30 = vadd.f32 %v3492_v6, %v4932_v9 }
 0x16e   : > { %v3494_v11 = vpop.f32.mrf.mxu1  ;;  %v5024_v47 = vpop.f32.mrf.mxu0 }
 0x16f   : > { %5752 = vst [vmem:[#allocation10_spill] sm:$0xff] %v5022_v30  ;;  %v3495_v52 = vadd.f32 %v3494_v11, %v3493_v17 }
 0x170   : > { %v3496_v43 = vpop.f32.mrf.mxu1  ;;  %v5028_v7 = vpop.f32.mrf.mxu0 }
 0x171   : > { %v5030_v0 = vadd.f32 %v3495_v52, %v3383_v25 }
 0x172   : > { %v3497_v16 = vpop.f32.mrf.mxu1  ;;  %v5032_v45 = vpop.f32.mrf.mxu0 }
 0x173   : > { %5753 = vst [vmem:[#allocation11_spill] sm:$0xff] %v5030_v0  ;;  %v3498_v9 = vadd.f32 %v3497_v16, %v3496_v43 }
 0x174   : > { %v3499_v6 = vpop.f32.mrf.mxu1  ;;  %v5036_v30 = vpop.f32.mrf.mxu0 }
 0x175   : > { %v5038_v38 = vadd.f32 %v3498_v9, %v3386_v2 }
 0x176   : > { %v3500_v20 = vpop.f32.mrf.mxu1  ;;  %v5040_v34 = vpop.f32.mrf.mxu0 }
 0x177   : > { %5754 = vst [vmem:[#allocation12_spill] sm:$0xff] %v5038_v38  ;;  %v3501_v17 = vadd.f32 %v3500_v20, %v3499_v6 }
 0x178   : > { %v3502_v11 = vpop.f32.mrf.mxu1  ;;  %v5044_v25 = vpop.f32.mrf.mxu0 }
 0x179   : > { %v5046_v52 = vadd.f32 %v3501_v17, %v3389_v37 }
 0x17a   : > { %v3503_v0 = vpop.f32.mrf.mxu1  ;;  %v5048_v39 = vpop.f32.mrf.mxu0 }
 0x17b   : > { %5755 = vst [vmem:[#allocation13_spill] sm:$0xff] %v5046_v52  ;;  %v3504_v16 = vadd.f32 %v3503_v0, %v3502_v11 }
 0x17c   : > { %v3505_v43 = vpop.f32.mrf.mxu1  ;;  %v5052_v2 = vpop.f32.mrf.mxu0 }
 0x17d   : > { %v5054_v9 = vadd.f32 %v3504_v16, %v3392_v46 }
 0x17e   : > { %v3506_v38 = vpop.f32.mrf.mxu1  ;;  %v5056_v48 = vpop.f32.mrf.mxu0 }
 0x17f   : > { %5756 = vst [vmem:[#allocation14_spill] sm:$0xff] %v5054_v9  ;;  %v3507_v20 = vadd.f32 %v3506_v38, %v3505_v43 }
 0x180   : > { %v3508_v6 = vpop.f32.mrf.mxu1  ;;  %v5060_v37 = vpop.f32.mrf.mxu0 }
 0x181   : > { %v5062_v17 = vadd.f32 %v3507_v20, %v3395_v51  ;;  %v3535_v20 = vadd.f32 %v4938_v31, %v4934_v42 }
 0x182   : > { %v3509_v52 = vpop.f32.mrf.mxu1  ;;  %v5064_v53 = vpop.f32.mrf.mxu0 }
 0x183   : > { %v3510_v0 = vadd.f32 %v3509_v52, %v3508_v6  ;;  %v3404_v6 = vadd.f32 %v4822_v18, %v4815_v15  ;;  %v1731_v42 = vadd.f32 %v3535_v20, %v4835_v28  ;;  %v3544_v15 = vadd.f32 %v4974_v33, %v4966_v23 }
 0x184   : > { %v3511_v11 = vpop.f32.mrf.mxu1  ;;  %v5068_v46 = vpop.f32.mrf.mxu0 }
 0x185   : > { %v5070_v16 = vadd.f32 %v3510_v0, %v3398_v60  ;;  %v3541_v0 = vadd.f32 %v4961_v49, %v4953_v63  ;;  %v1742_v33 = vadd.f32 %v3544_v15, %v4861_v5 }
 0x186   : > { %v3512_v9 = vpop.f32.mrf.mxu1  ;;  %v5072_v62 = vpop.f32.mrf.mxu0 }
 0x187   : > { %v3513_v38 = vadd.f32 %v3512_v9, %v3511_v11  ;;  %v3538_v9 = vadd.f32 %v4945_v35, %v4940_v24  ;;  %v1739_v63 = vadd.f32 %v3541_v0, %v4855_v54  ;;  %v3547_v24 = vadd.f32 %v4987_v22, %v4979_v55 }
 0x188   : > { %v3514_v43 = vpop.f32.mrf.mxu1  ;;  %v5076_v51 = vpop.f32.mrf.mxu0  ;;  %v3553_v54 = vadd.f32 %v5010_v19, %v5005_v14  ;;  %v3550_v22 = vadd.f32 %v5000_v58, %v4992_v26  ;;  %v3556_v14 = vadd.f32 %v5017_v32, %v5012_v12 }
 0x189   : > { %v5080_v3 = vadd.f32 %v3513_v38, %v3401_v1  ;;  %v1734_v28 = vadd.f32 %v3538_v9, %v4849_v41  ;;  %v1747_v0 = vadd.f32 %v3547_v24, %v4867_v21  ;;  %v3559_v21 = vadd.f32 %v5024_v47, %v5019_v27 }
 0x18a   : > { %v3515_v8 = vpop.f32.mrf.mxu1  ;;  %v5082_v52 = vpop.f32.mrf.mxu0  ;;  %v1755_v26 = vadd.f32 %v3553_v54, %v4883_v40  ;;  %v1750_v32 = vadd.f32 %v3550_v22, %v4875_v29  ;;  %v3565_v47 = vadd.f32 %v5040_v34, %v5036_v30  ;;  %v3562_v29 = vadd.f32 %v5032_v45, %v5028_v7 }
 0x18b   : > { %v3516_v60 = vadd.f32 %v3515_v8, %v3514_v43  ;;  %v3568_v34 = vadd.f32 %v5048_v39, %v5044_v25 }
 0x18c   : > { %v5088_v10 = vpop.f32.mrf.mxu0  ;;  %v3761_v13 = vpop.f32.mrf.mxu1  ;;  %v1771_v7 = vadd.f32 %v3565_v47, %v4906_v44  ;;  %v1766_v25 = vadd.f32 %v3562_v29, %v4901_v61 }
 0x18d   : > { %v5092_v11 = vadd.f32 %v3516_v60, %v3404_v6  ;;  %v5109_v43 = vadd.f32 %v3761_v13, %v1739_v63 }
 0x18e   : > { %v5095_v31 = vpop.f32.mrf.mxu0  ;;  %v1891_v1 = vpop.f32.mrf.mxu1 }
 0x18f   : > { %v5099_v18 = vadd.f32 %v1891_v1, %v1731_v42  ;;  %v2020_v5 = vmul.f32 %v5109_v43, %v5109_v43 }
 0x190   : > { %v5102_v49 = vpop.f32.mrf.mxu0  ;;  %v3762_v38 = vpop.f32.mrf.mxu1 }
 0x191   : > { %v2018_v35 = vmul.f32 %v5099_v18, %v5099_v18  ;;  %v5122_v41 = vadd.f32 %v3762_v38, %v1742_v33  ;;  %v1758_v38 = vadd.f32 %v3556_v14, %v4889_v56  ;;  %v1763_v56 = vadd.f32 %v3559_v21, %v4895_v50 }
 0x192   : > { %v5111_v20 = vpop.f32.mrf.mxu0  ;;  %v1894_v23 = vpop.f32.mrf.mxu1  ;;  %v3571_v50 = vadd.f32 %v5056_v48, %v5052_v2  ;;  %v3577_v2 = vadd.f32 %v5072_v62, %v5068_v46  ;;  %v3580_v46 = vadd.f32 %v5082_v52, %v5076_v51 }
 0x193   : > { %v5114_v8 = vadd.f32 %v1894_v23, %v1734_v28  ;;  %3823 = vmatprep.mubr.f32.mxu1 %v2018_v35  ;;  %v2021_v1 = vmul.f32 %v5122_v41, %v5122_v41 }
 0x194   : > { %v5118_v6 = vpop.f32.mrf.mxu0  ;;  %v3765_v55 = vpop.f32.mrf.mxu1 }
 0x195   : > { %v2019_v60 = vmul.f32 %v5114_v8, %v5114_v8  ;;  %v5145_v12 = vadd.f32 %v3765_v55, %v1755_v26 }
 0x196   : > { %v5129_v13 = vpop.f32.mrf.mxu0  ;;  %v1907_v9 = vpop.f32.mrf.mxu1 }
 0x197   : > { %v5133_v19 = vadd.f32 %v1907_v9, %v1747_v0  ;;  %3824 = vmatmul.mubr.f32.vlgmr.msra.gmra.mxu1 %v2019_v60  ;;  %v2024_v33 = vmul.f32 %v5145_v12, %v5145_v12  ;;  %v1774_v9 = vadd.f32 %v3568_v34, %v4911_v4 }
 0x198   : > { %v5136_v58 = vpop.f32.mrf.mxu0  ;;  %v3766_v42 = vpop.f32.mrf.mxu1  ;;  %3826 = vmatprep.mubr.f32.mxu1 %v2020_v5 }
 0x199   : > { %v2022_v15 = vmul.f32 %v5133_v19, %v5133_v19  ;;  %v5158_v28 = vadd.f32 %v3766_v42, %v1758_v38  ;;  %v3574_v42 = vadd.f32 %v5064_v53, %v5060_v37  ;;  %v1787_v37 = vadd.f32 %v3577_v2, %v4928_v57 }
 0x19a   : > { %v5147_v63 = vpop.f32.mrf.mxu0  ;;  %v1910_v40 = vpop.f32.mrf.mxu1  ;;  %v3583_v38 = vadd.f32 %v5095_v31, %v5088_v10  ;;  %v3589_v10 = vadd.f32 %v5129_v13, %v5118_v6 }
 0x19b   : > { %v5150_v24 = vadd.f32 %v1910_v40, %v1750_v32  ;;  %3827 = vmatmul.mubr.f32.gmra.mxu1 %v2021_v1  ;;  %v2025_v60 = vmul.f32 %v5158_v28, %v5158_v28  ;;  %v1779_v1 = vadd.f32 %v3571_v50, %v4916_v59  ;;  %v3592_v6 = vadd.f32 %v5147_v63, %v5136_v58 }
 0x19c   : > { %v5154_v27 = vpop.f32.mrf.mxu0  ;;  %v3769_v35 = vpop.f32.mrf.mxu1  ;;  %3829 = vmatprep.mubr.f32.mxu1 %v2022_v15 }
 0x19d   : > { %v2023_v23 = vmul.f32 %v5150_v24, %v5150_v24  ;;  %v5181_v39 = vadd.f32 %v3769_v35, %v1771_v7  ;;  %v1782_v35 = vadd.f32 %v3574_v42, %v4922_v36  ;;  %v5758_v7 = vld [vmem:[#allocation3_spill] sm:$0xff]  ;;  %v5760_v42 = vld [vmem:[#allocation4_spill] sm:$0xff] }
 0x19e   : > { %v5165_v54 = vpop.f32.mrf.mxu0  ;;  %v1923_v30 = vpop.f32.mrf.mxu1 }
 0x19f   : > { %v5169_v55 = vadd.f32 %v1923_v30, %v1763_v56  ;;  %3830 = vmatmul.mubr.f32.gmra.mxu1 %v2023_v23  ;;  %v2028_v4 = vmul.f32 %v5181_v39, %v5181_v39  ;;  %v5757_v23 = vld [vmem:[#allocation2_spill] sm:$0xff]  ;;  %v3586_v30 = vadd.f32 %v5111_v20, %v5102_v49 }
 0x1a0   : > { %v5172_v45 = vpop.f32.mrf.mxu0  ;;  %v3770_v22 = vpop.f32.mrf.mxu1  ;;  %3832 = vmatprep.mubr.f32.mxu1 %v2024_v33  ;;  %v1790_v57 = vadd.f32 %v3580_v46, %v5757_v23 }
 0x1a1   : > { %v2026_v0 = vmul.f32 %v5169_v55, %v5169_v55  ;;  %v5192_v61 = vadd.f32 %v3770_v22, %v1774_v9  ;;  %v1795_v22 = vadd.f32 %v3583_v38, %v5758_v7  ;;  %v3595_v9 = vadd.f32 %v5165_v54, %v5154_v27 }
 0x1a2   : > { %v5183_v5 = vpop.f32.mrf.mxu0  ;;  %v1926_v44 = vpop.f32.mrf.mxu1 }
 0x1a3   : > { %v5186_v14 = vadd.f32 %v1926_v44, %v1766_v25  ;;  %3833 = vmatmul.mubr.f32.gmra.mxu1 %v2025_v60  ;;  %v2029_v59 = vmul.f32 %v5192_v61, %v5192_v61  ;;  %v5759_v25 = vld [vmem:[#allocation5_spill] sm:$0xff]  ;;  %v3598_v54 = vadd.f32 %v5183_v5, %v5172_v45 }
 0x1a4   : > { %v3599_v48 = vpop.f32.mrf.mxu0  ;;  %v3773_v26 = vpop.f32.mrf.mxu1  ;;  %3835 = vmatprep.mubr.f32.mxu1 %v2026_v0  ;;  %v1803_v49 = vadd.f32 %v3589_v10, %v5759_v25 }
 0x1a5   : > { %v2027_v21 = vmul.f32 %v5186_v14, %v5186_v14  ;;  %v5211_v51 = vadd.f32 %v3773_v26, %v1787_v37 }
 0x1a6   : > { %v3600_v15 = vpop.f32.mrf.mxu0  ;;  %v1939_v32 = vpop.f32.mrf.mxu1 }
 0x1a7   : > { %v5201_v62 = vadd.f32 %v1939_v32, %v1779_v1  ;;  %3836 = vmatmul.mubr.f32.gmra.mxu1 %v2027_v21  ;;  %v2032_v50 = vmul.f32 %v5211_v51, %v5211_v51  ;;  %v1798_v21 = vadd.f32 %v3586_v30, %v5760_v42  ;;  %v3601_v37 = vadd.f32 %v3600_v15, %v3599_v48  ;;  %v5763_v15 = vld [vmem:[#allocation9_spill] sm:$0xff]  ;;  %v5766_v42 = vld [vmem:[#allocation11_spill] sm:$0xff] }
 0x1a8   : > { %v3602_v53 = vpop.f32.mrf.mxu0  ;;  %v3774_v40 = vpop.f32.mrf.mxu1  ;;  %3838 = vmatprep.mubr.f32.mxu1 %v2028_v4  ;;  %v5761_v4 = vld [vmem:[#allocation6_spill] sm:$0xff] }
 0x1a9   : > { %v2030_v47 = vmul.f32 %v5201_v62, %v5201_v62  ;;  %v5220_v34 = vadd.f32 %v3774_v40, %v1790_v57  ;;  %v1806_v32 = vadd.f32 %v3592_v6, %v5761_v4  ;;  %v5765_v6 = vld [vmem:[#allocation10_spill] sm:$0xff] }
 0x1aa   : > { %v3603_v52 = vpop.f32.mrf.mxu0  ;;  %v1942_v29 = vpop.f32.mrf.mxu1 }
 0x1ab   : > { %v5214_v56 = vadd.f32 %v1942_v29, %v1782_v35  ;;  %3839 = vmatmul.mubr.f32.gmra.mxu1 %v2029_v59  ;;  %v2033_v2 = vmul.f32 %v5220_v34, %v5220_v34  ;;  %v3604_v10 = vadd.f32 %v3603_v52, %v3602_v53 }
 0x1ac   : > { %v3605_v31 = vpop.f32.mrf.mxu0  ;;  %v3777_v33 = vpop.f32.mrf.mxu1  ;;  %3841 = vmatprep.mubr.f32.mxu1 %v2030_v47  ;;  %v5762_v47 = vld [vmem:[#allocation7_spill] sm:$0xff] }
 0x1ad   : > { %v2031_v36 = vmul.f32 %v5214_v56, %v5214_v56  ;;  %v5239_v58 = vadd.f32 %v3777_v33, %v1803_v49  ;;  %v1811_v35 = vadd.f32 %v3595_v9, %v5762_v47  ;;  %v1819_v33 = vadd.f32 %v3601_v37, %v5763_v15 }
 0x1ae   : > { %v3606_v60 = vpop.f32.mrf.mxu0  ;;  %v1955_v0 = vpop.f32.mrf.mxu1  ;;  %v1822_v25 = vadd.f32 %v3604_v10, %v5765_v6 }
 0x1af   : > { %v5229_v13 = vadd.f32 %v1955_v0, %v1795_v22  ;;  %3842 = vmatmul.mubr.f32.gmra.mxu1 %v2031_v36  ;;  %v2036_v29 = vmul.f32 %v5239_v58, %v5239_v58  ;;  %v3607_v5 = vadd.f32 %v3606_v60, %v3605_v31  ;;  %v5764_v22 = vld [vmem:[#allocation8_spill] sm:$0xff] }
 0x1b0   : > { %v3608_v20 = vpop.f32.mrf.mxu0  ;;  %v3778_v44 = vpop.f32.mrf.mxu1  ;;  %3844 = vmatprep.mubr.f32.mxu1 %v2032_v50  ;;  %v1814_v50 = vadd.f32 %v3598_v54, %v5764_v22 }
 0x1b1   : > { %v2034_v26 = vmul.f32 %v5229_v13, %v5229_v13  ;;  %v5246_v38 = vadd.f32 %v3778_v44, %v1806_v32 }
 0x1b2   : > { %v3609_v63 = vpop.f32.mrf.mxu0  ;;  %v1958_v1 = vpop.f32.mrf.mxu1 }
 0x1b3   : > { %v5242_v46 = vadd.f32 %v1958_v1, %v1798_v21  ;;  %3845 = vmatmul.mubr.f32.gmra.mxu1 %v2033_v2  ;;  %v2037_v36 = vmul.f32 %v5246_v38, %v5246_v38  ;;  %v3610_v60 = vadd.f32 %v3609_v63, %v3608_v20  ;;  %v1827_v21 = vadd.f32 %v3607_v5, %v5766_v42 }
 0x1b4   : > { %v3611_v40 = vpop.f32.mrf.mxu0  ;;  %v3781_v27 = vpop.f32.mrf.mxu1  ;;  %3847 = vmatprep.mubr.f32.mxu1 %v2034_v26 }
 0x1b5   : > { %v2035_v59 = vmul.f32 %v5242_v46, %v5242_v46  ;;  %v5261_v0 = vadd.f32 %v3781_v27, %v1819_v33  ;;  %v5769_v33 = vld [vmem:[#allocation14_spill] sm:$0xff] }
 0x1b6   : > { %v3612_v23 = vpop.f32.mrf.mxu0  ;;  %v1971_v57 = vpop.f32.mrf.mxu1 }
 0x1b7   : > { %v5253_v48 = vadd.f32 %v1971_v57, %v1811_v35  ;;  %3848 = vmatmul.mubr.f32.gmra.mxu1 %v2035_v59  ;;  %v3613_v44 = vadd.f32 %v3612_v23, %v3611_v40  ;;  %v2040_v1 = vmul.f32 %v5261_v0, %v5261_v0  ;;  %v5767_v40 = vld [vmem:[#allocation13_spill] sm:$0xff] }
 0x1b8   : > { %v3614_v30 = vpop.f32.mrf.mxu0  ;;  %v3782_v45 = vpop.f32.mrf.mxu1  ;;  %3850 = vmatprep.mubr.f32.mxu1 %v2036_v29  ;;  %v5768_v29 = vld [vmem:[#allocation12_spill] sm:$0xff] }
 0x1b9   : > { %v2038_v7 = vmul.f32 %v5253_v48, %v5253_v48  ;;  %v5266_v2 = vadd.f32 %v3782_v45, %v1822_v25  ;;  %v1835_v54 = vadd.f32 %v3613_v44, %v5767_v40  ;;  %v1830_v23 = vadd.f32 %v3610_v60, %v5768_v29  ;;  %v2708_v29 = vld [vmem:[%s5742_s3 + $0x8] sm:$0xff] }
 0x1ba   : > { %v3615_v53 = vpop.f32.mrf.mxu0  ;;  %v1974_v52 = vpop.f32.mrf.mxu1 }
 0x1bb   : > { %v5264_v49 = vadd.f32 %v1974_v52, %v1814_v50  ;;  %3851 = vmatmul.mubr.f32.gmra.mxu1 %v2037_v36  ;;  %v3616_v37 = vadd.f32 %v3615_v53, %v3614_v30  ;;  %v2041_v63 = vmul.f32 %v5266_v2, %v5266_v2 }
 0x1bc   : > { %v3617_v9 = vpop.f32.mrf.mxu0  ;;  %v3785_v31 = vpop.f32.mrf.mxu1  ;;  %3853 = vmatprep.mubr.f32.mxu1 %v2038_v7 }
 0x1bd   : > { %v2039_v26 = vmul.f32 %v5264_v49, %v5264_v49  ;;  %v5281_v57 = vadd.f32 %v3785_v31, %v1835_v54  ;;  %v1838_v30 = vadd.f32 %v3616_v37, %v5769_v33 }
 0x1be   : > { %v3618_v4 = vpop.f32.mrf.mxu0  ;;  %v1987_v32 = vpop.f32.mrf.mxu1 }
 0x1bf   : > { %v5273_v27 = vadd.f32 %v1987_v32, %v1827_v21  ;;  %3854 = vmatmul.mubr.f32.gmra.mxu1 %v2039_v26  ;;  %v3619_v47 = vadd.f32 %v3618_v4, %v3617_v9  ;;  %v2044_v52 = vmul.f32 %v5281_v57, %v5281_v57 }
 0x1c0   : > { %v3620_v59 = vpop.f32.mrf.mxu0  ;;  %v3786_v20 = vpop.f32.mrf.mxu1  ;;  %3856 = vmatprep.mubr.f32.mxu1 %v2040_v1 }
 0x1c1   : > { %v2042_v35 = vmul.f32 %v5273_v27, %v5273_v27  ;;  %v5286_v7 = vadd.f32 %v3786_v20, %v1838_v30  ;;  %v1843_v53 = vadd.f32 %v3619_v47, %v5062_v17  ;;  %v2710_v47 = vld [vmem:[%s5742_s3 + $0x18] sm:$0xff] }
 0x1c2   : > { %v3621_v10 = vpop.f32.mrf.mxu0  ;;  %v1990_v15 = vpop.f32.mrf.mxu1 }
 0x1c3   : > { %v5284_v45 = vadd.f32 %v1990_v15, %v1830_v23  ;;  %3857 = vmatmul.mubr.f32.gmra.mxu1 %v2041_v63  ;;  %v3622_v22 = vadd.f32 %v3621_v10, %v3620_v59  ;;  %v2045_v26 = vmul.f32 %v5286_v7, %v5286_v7  ;;  %v2712_v63 = vld [vmem:[%s5742_s3 + $0x28] sm:$0xff]  ;;  %v2707_v23 = vld [vmem:[%s5742_s3] sm:$0xff] }
 0x1c4   : > { %v3623_v5 = vpop.f32.mrf.mxu0  ;;  %v3789_v36 = vpop.f32.mrf.mxu1  ;;  %3859 = vmatprep.mubr.f32.mxu1 %v2042_v35  ;;  %3891 = vmatprep.subr.mxu0 %v2712_v63  ;;  %v2709_v35 = vld [vmem:[%s5742_s3 + $0x10] sm:$0xff] }
 0x1c5   : > { %v2043_v50 = vmul.f32 %v5284_v45, %v5284_v45  ;;  %v1846_v21 = vadd.f32 %v3622_v22, %v5070_v16  ;;  %3892 = vmatpush3.msra.mxu0 %v2712_v63 }
 0x1c6   : > { %v3624_v6 = vpop.f32.mrf.mxu0  ;;  %v2003_v25 = vpop.f32.mrf.mxu1 }
 0x1c7   : > { %v3625_v44 = vadd.f32 %v3624_v6, %v3623_v5  ;;  %v5293_v9 = vadd.f32 %v2003_v25, %v1843_v53  ;;  %3860 = vmatmul.mubr.f32.gmra.mxu1 %v2043_v50 }
 0x1c8   : > { %v3626_v31 = vpop.f32.mrf.mxu0  ;;  %v3790_v60 = vpop.f32.mrf.mxu1  ;;  %3862 = vmatprep.mubr.f32.mxu1 %v2044_v52 }
 0x1c9   : > { %v1851_v42 = vadd.f32 %v3625_v44, %v5080_v3  ;;  %v2046_v17 = vmul.f32 %v5293_v9, %v5293_v9 }
 0x1ca   : > { %v3627_v1 = vpop.f32.mrf.mxu0  ;;  %v2006_v4 = vpop.f32.mrf.mxu1 }
 0x1cb   : > { %v5301_v32 = vadd.f32 %v3789_v36, %v1851_v42  ;;  %v3628_v37 = vadd.f32 %v3627_v1, %v3626_v31  ;;  %v5303_v40 = vadd.f32 %v2006_v4, %v1846_v21  ;;  %3863 = vmatmul.mubr.f32.gmra.mxu1 %v2045_v26 }
 0x1cc   : > { %3865 = vmatprep.mubr.f32.mxu1 %v2046_v17 }
 0x1cd   : > { %v1854_v54 = vadd.f32 %v3628_v37, %v5092_v11  ;;  %v2047_v59 = vmul.f32 %v5303_v40, %v5303_v40  ;;  %v2048_v3 = vmul.f32 %v5301_v32, %v5301_v32  ;;  %v2711_v11 = vld [vmem:[%s5742_s3 + $0x20] sm:$0xff] }
 0x1ce   : > { %3893 = vmatprep.subr.mxu0 %v2711_v11 }
 0x1cf   : > { %v5310_v20 = vadd.f32 %v3790_v60, %v1854_v54  ;;  %3866 = vmatmul.mubr.f32.gmra.mxu1 %v2047_v59  ;;  %3894 = vmatpush3.msra.mxu0 %v2711_v11 }
 0x1d0   : > { %3868 = vmatprep.mubr.f32.mxu1 %v2048_v3  ;;  %3895 = vmatprep.subr.mxu0 %v2710_v47 }
 0x1d1   : > { %v2049_v16 = vmul.f32 %v5310_v20, %v5310_v20  ;;  %3896 = vmatpush3.msra.mxu0 %v2710_v47 }
 0x1d2   : > { %3897 = vmatprep.subr.mxu0 %v2709_v35 }
 0x1d3   : > { %3869 = vmatmul.mubr.f32.gmra.mxu1 %v2049_v16  ;;  %3898 = vmatpush3.msra.mxu0 %v2709_v35 }
 0x1d4   : > { %3899 = vmatprep.subr.mxu0 %v2708_v29 }
 0x1d5   : > { %3900 = vmatpush3.msra.mxu0 %v2708_v29 }
 0x1d6   : > { %3901 = vmatprep.subr.mxu0 %v2707_v23 }
 0x1d7   : > { %3902 = vmatpush3.msra.mxu0 %v2707_v23 }
 0x257   : > { %v3825_v10 = vpop.f32.mrf.mxu1 }
 0x258   : > { %4190 = vrsqrt.f32 %v3825_v10  ;;  %vm2300_vm1 = vcmp.eq.f32.partialorder %v3825_v10, inf  ;;  %vm2302_vm2 = vcmp.eq.f32.partialorder %v3825_v10, 0.0  ;;  %v2303_v53 = vand.u32 2147483648, %v3825_v10 }
 0x259   : > { %v2132_v15 = vpop.f32.mrf.mxu1 }
 0x25a   : > { %4192 = vrsqrt.f32 %v2132_v15  ;;  %vm2293_vm3 = vcmp.eq.f32.partialorder %v2132_v15, inf  ;;  %vm2295_vm4 = vcmp.eq.f32.partialorder %v2132_v15, 0.0  ;;  %v2296_v25 = vand.u32 2147483648, %v2132_v15 }
 0x25b   : > { %v3828_v33 = vpop.f32.mrf.mxu1 }
 0x25c   : > { %4194 = vrsqrt.f32 %v3828_v33  ;;  %vm2314_vm5 = vcmp.eq.f32.partialorder %v3828_v33, inf  ;;  %vm2316_vm6 = vcmp.eq.f32.partialorder %v3828_v33, 0.0  ;;  %v2317_v31 = vand.u32 2147483648, %v3828_v33 }
 0x25d   : > { %v2142_v30 = vpop.f32.mrf.mxu1 }
 0x25e   : > { %4196 = vrsqrt.f32 %v2142_v30  ;;  %vm2307_vm7 = vcmp.eq.f32.partialorder %v2142_v30, inf  ;;  %vm2309_vm8 = vcmp.eq.f32.partialorder %v2142_v30, 0.0  ;;  %v2310_v17 = vand.u32 2147483648, %v2142_v30 }
 0x25f   : > { %v5332_v5 = vpop.f32.mrf.mxu1 }
 0x260   : > { %4198 = vrsqrt.f32 %v5332_v5  ;;  %vm2328_vm9 = vcmp.eq.f32.partialorder %v5332_v5, inf  ;;  %vm2330_vm10 = vcmp.eq.f32.partialorder %v5332_v5, 0.0  ;;  %v2331_v4 = vand.u32 2147483648, %v5332_v5 }
 0x261   : > { %v5335_v36 = vpop.f32.mrf.mxu1 }
 0x262   : > { %4200 = vrsqrt.f32 %v5335_v36  ;;  %vm2321_vm11 = vcmp.eq.f32.partialorder %v5335_v36, inf  ;;  %vm2323_vm12 = vcmp.eq.f32.partialorder %v5335_v36, 0.0  ;;  %v2324_v11 = vand.u32 2147483648, %v5335_v36 }
 0x263   : > { %v5338_v22 = vpop.f32.mrf.mxu1 }
 0x264   : > { %4202 = vrsqrt.f32 %v5338_v22  ;;  %vm2342_vm13 = vcmp.eq.f32.partialorder %v5338_v22, inf  ;;  %vm2344_vm14 = vcmp.eq.f32.partialorder %v5338_v22, 0.0 }
 0x265   : > { %v4191_v50 = vpop.eup %4190  ;;  %v5341_v52 = vpop.f32.mrf.mxu1 }
 0x266   : > { %v2299_v6 = vmul.f32 %v4191_v50, %v3825_v10  ;;  %4204 = vrsqrt.f32 %v5341_v52  ;;  %vm2335_vm15 = vcmp.eq.f32.partialorder %v5341_v52, inf  ;;  %vm2337_vm0 = vcmp.eq.f32.partialorder %v5341_v52, 0.0 }
 0x267   : > { %v4193_v44 = vpop.eup %4192  ;;  %v5344_v60 = vpop.f32.mrf.mxu1 }
 0x268   : > { %v2301_v26 = vsel %vm2300_vm1, %v3825_v10, %v2299_v6  ;;  %v2292_v42 = vmul.f32 %v4193_v44, %v2132_v15  ;;  %4206 = vrsqrt.f32 %v5344_v60  ;;  %vm2356_vm1 = vcmp.eq.f32.partialorder %v5344_v60, inf }
 0x269   : > { %v4195_v21 = vpop.eup %4194  ;;  %v2304_v1 = vsel %vm2302_vm2, %v2303_v53, %v2301_v26  ;;  %v5352_v37 = vpop.f32.mrf.mxu1  ;;  %vm2358_vm2 = vcmp.eq.f32.partialorder %v5344_v60, 0.0 }
 0x26a   : > { %v3260_v54 = vmul.f32 -1.442695, %v2304_v1  ;;  %v2294_v59 = vsel %vm2293_vm3, %v2132_v15, %v2292_v42  ;;  %v2313_v3 = vmul.f32 %v4195_v21, %v3828_v33  ;;  %4208 = vrsqrt.f32 %v5352_v37 }
 0x26b   : > { %v4197_v16 = vpop.eup %4196  ;;  %v2297_v63 = vsel %vm2295_vm4, %v2296_v25, %v2294_v59  ;;  %v5360_v47 = vpop.f32.mrf.mxu1  ;;  %vm2349_vm3 = vcmp.eq.f32.partialorder %v5352_v37, inf  ;;  %vm2351_vm4 = vcmp.eq.f32.partialorder %v5352_v37, 0.0 }
 0x26c   : > { %4210 = vpow2.f32 %v3260_v54  ;;  %v3259_v35 = vmul.f32 -1.442695, %v2297_v63  ;;  %v2315_v29 = vsel %vm2314_vm5, %v3828_v33, %v2313_v3  ;;  %v2306_v23 = vmul.f32 %v4197_v16, %v2142_v30 }
 0x26d   : > { %v4199_v10 = vpop.eup %4198  ;;  %v2318_v50 = vsel %vm2316_vm6, %v2317_v31, %v2315_v29  ;;  %4212 = vrsqrt.f32 %v5360_v47  ;;  %v5367_v15 = vpop.f32.mrf.mxu1  ;;  %v2345_v33 = vand.u32 2147483648, %v5338_v22  ;;  %vm2370_vm5 = vcmp.eq.f32.partialorder %v5360_v47, inf }
 0x26e   : > { %4214 = vpow2.f32 %v3259_v35  ;;  %v3262_v53 = vmul.f32 -1.442695, %v2318_v50  ;;  %v2308_v6 = vsel %vm2307_vm7, %v2142_v30, %v2306_v23  ;;  %v2327_v25 = vmul.f32 %v4199_v10, %v5332_v5 }
 0x26f   : > { %v4201_v44 = vpop.eup %4200  ;;  %v2311_v26 = vsel %vm2309_vm8, %v2310_v17, %v2308_v6  ;;  %4216 = vrsqrt.f32 %v5367_v15  ;;  %v5375_v31 = vpop.f32.mrf.mxu1  ;;  %v2338_v17 = vand.u32 2147483648, %v5341_v52  ;;  %vm2372_vm6 = vcmp.eq.f32.partialorder %v5360_v47, 0.0 }
 0x270   : > { %4218 = vpow2.f32 %v3262_v53  ;;  %v3261_v42 = vmul.f32 -1.442695, %v2311_v26  ;;  %v2329_v21 = vsel %vm2328_vm9, %v5332_v5, %v2327_v25  ;;  %v2320_v1 = vmul.f32 %v4201_v44, %v5335_v36 }
 0x271   : > { %v4203_v54 = vpop.eup %4202  ;;  %v2332_v30 = vsel %vm2330_vm10, %v2331_v4, %v2329_v21  ;;  %4220 = vrsqrt.f32 %v5375_v31  ;;  %v5386_v59 = vpop.f32.mrf.mxu1  ;;  %v2359_v4 = vand.u32 2147483648, %v5344_v60  ;;  %vm2363_vm7 = vcmp.eq.f32.partialorder %v5367_v15, inf }
 0x272   : > { %4222 = vpow2.f32 %v3261_v42  ;;  %v3264_v3 = vmul.f32 -1.442695, %v2332_v30  ;;  %v2322_v16 = vsel %vm2321_vm11, %v5335_v36, %v2320_v1  ;;  %v2341_v63 = vmul.f32 %v4203_v54, %v5338_v22 }
 0x273   : > { %v4205_v35 = vpop.eup %4204  ;;  %v2325_v5 = vsel %vm2323_vm12, %v2324_v11, %v2322_v16  ;;  %v5397_v29 = vpop.f32.mrf.mxu1  ;;  %vm2365_vm8 = vcmp.eq.f32.partialorder %v5367_v15, 0.0  ;;  %vm2384_vm9 = vcmp.eq.f32.partialorder %v5375_v31, inf  ;;  %vm2386_vm10 = vcmp.eq.f32.partialorder %v5375_v31, 0.0 }
 0x274   : > { %4224 = vpow2.f32 %v3264_v3  ;;  %v3263_v23 = vmul.f32 -1.442695, %v2325_v5  ;;  %v2343_v10 = vsel %vm2342_vm13, %v5338_v22, %v2341_v63  ;;  %v2334_v50 = vmul.f32 %v4205_v35, %v5341_v52 }
 0x275   : > { %v4207_v53 = vpop.eup %4206  ;;  %v2346_v36 = vsel %vm2344_vm14, %v2345_v33, %v2343_v10  ;;  %4226 = vrsqrt.f32 %v5386_v59  ;;  %v5408_v11 = vpop.f32.mrf.mxu1  ;;  %v2352_v33 = vand.u32 2147483648, %v5352_v37  ;;  %vm2377_vm11 = vcmp.eq.f32.partialorder %v5386_v59, inf }
 0x276   : > { %4228 = vpow2.f32 %v3263_v23  ;;  %v3266_v6 = vmul.f32 -1.442695, %v2346_v36  ;;  %v2336_v25 = vsel %vm2335_vm15, %v5341_v52, %v2334_v50  ;;  %v2355_v44 = vmul.f32 %v4207_v53, %v5344_v60 }
 0x277   : > { %v4209_v26 = vpop.eup %4208  ;;  %v2339_v22 = vsel %vm2337_vm0, %v2338_v17, %v2336_v25  ;;  %4230 = vrsqrt.f32 %v5397_v29  ;;  %v5419_v42 = vpop.f32.mrf.mxu1  ;;  %v2373_v17 = vand.u32 2147483648, %v5360_v47  ;;  %vm2379_vm12 = vcmp.eq.f32.partialorder %v5386_v59, 0.0 }
 0x278   : > { %4232 = vpow2.f32 %v3266_v6  ;;  %v3265_v21 = vmul.f32 -1.442695, %v2339_v22  ;;  %v2357_v1 = vsel %vm2356_vm1, %v5344_v60, %v2355_v44  ;;  %v2348_v54 = vmul.f32 %v4209_v26, %v5352_v37 }
 0x279   : > { %v4211_v30 = vpop.eup %4210  ;;  %v2360_v52 = vsel %vm2358_vm2, %v2359_v4, %v2357_v1  ;;  %4234 = vrsqrt.f32 %v5408_v11  ;;  %v5430_v3 = vpop.f32.mrf.mxu1  ;;  %v2366_v6 = vand.u32 2147483648, %v5367_v15  ;;  %vm2398_vm13 = vcmp.eq.f32.partialorder %v5397_v29, inf }
 0x27a   : > { %v4213_v16 = vpop.eup %4212  ;;  %v2612_v63 = vadd.f32 1.0, %v4211_v30  ;;  %4236 = vpow2.f32 %v3265_v21  ;;  %v3268_v35 = vmul.f32 -1.442695, %v2360_v52  ;;  %v2350_v5 = vsel %vm2349_vm3, %v5352_v37, %v2348_v54 }
 0x27b   : > { %v4215_v23 = vpop.eup %4214  ;;  %v2353_v60 = vsel %vm2351_vm4, %v2352_v33, %v2350_v5  ;;  %v2369_v4 = vmul.f32 %v4213_v16, %v5360_v47  ;;  %v5440_v10 = vpop.f32.mrf.mxu1  ;;  %vm2400_vm14 = vcmp.eq.f32.partialorder %v5397_v29, 0.0  ;;  %vm2391_vm15 = vcmp.eq.f32.partialorder %v5408_v11, inf }
 0x27c   : > { %v4217_v50 = vpop.eup %4216  ;;  %4238 = vrcp.f32 %v2612_v63  ;;  %v2611_v53 = vadd.f32 1.0, %v4215_v23  ;;  %v3267_v36 = vmul.f32 -1.442695, %v2353_v60  ;;  %vm2393_vm0 = vcmp.eq.f32.partialorder %v5408_v11, 0.0 }
 0x27d   : > { %v4219_v25 = vpop.eup %4218  ;;  %4240 = vpow2.f32 %v3268_v35  ;;  %v2371_v37 = vsel %vm2370_vm5, %v5360_v47, %v2369_v4  ;;  %v2362_v44 = vmul.f32 %v4217_v50, %v5367_v15  ;;  %v5448_v26 = vpop.f32.mrf.mxu1  ;;  %v2387_v47 = vand.u32 2147483648, %v5375_v31 }
 0x27e   : > { %v4221_v22 = vpop.eup %4220  ;;  %4242 = vrcp.f32 %v2611_v53  ;;  %v2614_v33 = vadd.f32 1.0, %v4219_v25  ;;  %v2374_v21 = vsel %vm2372_vm6, %v2373_v17, %v2371_v37  ;;  %v2380_v25 = vand.u32 2147483648, %v5386_v59 }
 0x27f   : > { %v4223_v1 = vpop.eup %4222  ;;  %4244 = vpow2.f32 %v3267_v36  ;;  %v3270_v54 = vmul.f32 -1.442695, %v2374_v21  ;;  %v2364_v30 = vsel %vm2363_vm7, %v5367_v15, %v2362_v44  ;;  %v2383_v52 = vmul.f32 %v4221_v22, %v5375_v31  ;;  %v5457_v16 = vpop.f32.mrf.mxu1 }
 0x280   : > { %4246 = vrcp.f32 %v2614_v33  ;;  %v2613_v63 = vadd.f32 1.0, %v4223_v1  ;;  %v2367_v35 = vsel %vm2365_vm8, %v2366_v6, %v2364_v30  ;;  %v2401_v1 = vand.u32 2147483648, %v5397_v29 }
 0x281   : > { %v4225_v17 = vpop.eup %4224  ;;  %4248 = vpow2.f32 %v3270_v54  ;;  %v3269_v5 = vmul.f32 -1.442695, %v2367_v35  ;;  %v2385_v23 = vsel %vm2384_vm9, %v5375_v31, %v2383_v52  ;;  %v5466_v60 = vpop.f32.mrf.mxu1  ;;  %vm2412_vm1 = vcmp.eq.f32.partialorder %v5419_v42, inf }
 0x282   : > { %v4227_v4 = vpop.eup %4226  ;;  %4250 = vrcp.f32 %v2613_v63  ;;  %v2616_v50 = vadd.f32 1.0, %v4225_v17  ;;  %v2388_v15 = vsel %vm2386_vm10, %v2387_v47, %v2385_v23  ;;  %vm2414_vm2 = vcmp.eq.f32.partialorder %v5419_v42, 0.0 }
 0x283   : > { %v4229_v53 = vpop.eup %4228  ;;  %4252 = vpow2.f32 %v3269_v5  ;;  %v3272_v36 = vmul.f32 -1.442695, %v2388_v15  ;;  %v2376_v6 = vmul.f32 %v4227_v4, %v5386_v59  ;;  %v5473_v37 = vpop.f32.mrf.mxu1  ;;  %vm2405_vm3 = vcmp.eq.f32.partialorder %v5430_v3, inf }
 0x284   : > { %v4231_v44 = vpop.eup %4230  ;;  %4254 = vrcp.f32 %v2616_v50  ;;  %v2615_v22 = vadd.f32 1.0, %v4229_v53  ;;  %v2394_v50 = vand.u32 2147483648, %v5408_v11  ;;  %vm2407_vm4 = vcmp.eq.f32.partialorder %v5430_v3, 0.0 }
 0x285   : > { %v4233_v31 = vpop.eup %4232  ;;  %4256 = vpow2.f32 %v3272_v36  ;;  %v2378_v33 = vsel %vm2377_vm11, %v5386_v59, %v2376_v6  ;;  %v2397_v21 = vmul.f32 %v4231_v44, %v5397_v29  ;;  %v5482_v54 = vpop.f32.mrf.mxu1  ;;  %vm2426_vm5 = vcmp.eq.f32.partialorder %v5440_v10, inf }
 0x286   : > { %v4235_v30 = vpop.eup %4234  ;;  %4258 = vrcp.f32 %v2615_v22  ;;  %v2618_v52 = vadd.f32 1.0, %v4233_v31  ;;  %v2381_v63 = vsel %vm2379_vm12, %v2380_v25, %v2378_v33  ;;  %vm2428_vm6 = vcmp.eq.f32.partialorder %v5440_v10, 0.0 }
 0x287   : > { %v4237_v35 = vpop.eup %4236  ;;  %v3271_v47 = vmul.f32 -1.442695, %v2381_v63  ;;  %v2399_v17 = vsel %vm2398_vm13, %v5397_v29, %v2397_v21  ;;  %v2390_v5 = vmul.f32 %v4235_v30, %v5408_v11  ;;  %4260 = vrsqrt.f32 %v5419_v42  ;;  %v5493_v15 = vpop.f32.mrf.mxu1 }
 0x288   : > { %4262 = vrcp.f32 %v2618_v52  ;;  %v2617_v23 = vadd.f32 1.0, %v4237_v35  ;;  %v2402_v4 = vsel %vm2400_vm14, %v2401_v1, %v2399_v17  ;;  %vm2419_vm7 = vcmp.eq.f32.partialorder %v5448_v26, inf }
 0x289   : > { %v4239_v59 = vpop.eup %4238  ;;  %4264 = vpow2.f32 %v3271_v47  ;;  %v3274_v53 = vmul.f32 -1.442695, %v2402_v4  ;;  %v2392_v36 = vsel %vm2391_vm15, %v5408_v11, %v2390_v5  ;;  %v5498_v33 = vpop.f32.mrf.mxu1  ;;  %vm2421_vm8 = vcmp.eq.f32.partialorder %v5448_v26, 0.0 }
 0x28a   : > { %v4241_v6 = vpop.eup %4240  ;;  %4266 = vrcp.f32 %v2617_v23  ;;  %v2395_v25 = vsel %vm2393_vm0, %v2394_v50, %v2392_v36  ;;  %vm2440_vm9 = vcmp.eq.f32.partialorder %v5457_v16, inf  ;;  %vm2442_vm10 = vcmp.eq.f32.partialorder %v5457_v16, 0.0 }
 0x28b   : > { %v4243_v44 = vpop.eup %4242  ;;  %v2620_v22 = vadd.f32 1.0, %v4241_v6  ;;  %4268 = vpow2.f32 %v3274_v53  ;;  %v3273_v31 = vmul.f32 -1.442695, %v2395_v25  ;;  %v5501_v35 = vpop.f32.mrf.mxu1  ;;  %v2415_v25 = vand.u32 2147483648, %v5419_v42 }
 0x28c   : > { %v4245_v29 = vpop.eup %4244  ;;  %4270 = vrsqrt.f32 %v5430_v3  ;;  %3903 = vmatprep.mubr.f32.mxu0 %v4243_v44  ;;  %vm2433_vm11 = vcmp.eq.f32.partialorder %v5466_v60, inf  ;;  %vm2435_vm12 = vcmp.eq.f32.partialorder %v5466_v60, 0.0  ;;  %vm2454_vm13 = vcmp.eq.f32.partialorder %v5473_v37, inf }
 0x28d   : > { %v4247_v21 = vpop.eup %4246  ;;  %4272 = vrcp.f32 %v2620_v22  ;;  %v2619_v1 = vadd.f32 1.0, %v4245_v29  ;;  %3904 = vmatmul.mubr.f32.vlgmr.msra.gmra.mxu0 %v4239_v59  ;;  %v5505_v59 = vpop.f32.mrf.mxu1  ;;  %vm2456_vm14 = vcmp.eq.f32.partialorder %v5473_v37, 0.0  ;;  %vm2447_vm15 = vcmp.eq.f32.partialorder %v5482_v54, inf }
 0x28e   : > { %v4249_v30 = vpop.eup %4248  ;;  %4274 = vpow2.f32 %v3273_v31  ;;  %vm2449_vm0 = vcmp.eq.f32.partialorder %v5482_v54, 0.0 }
 0x28f   : > { %v4251_v11 = vpop.eup %4250  ;;  %4276 = vrcp.f32 %v2619_v1  ;;  %v2622_v52 = vadd.f32 1.0, %v4249_v30  ;;  %v2408_v1 = vand.u32 2147483648, %v5430_v3  ;;  %v5519_v30 = vpop.f32.mrf.mxu1 }
 0x290   : > { %v4253_v63 = vpop.eup %4252  ;;  %4278 = vrsqrt.f32 %v5440_v10  ;;  %3906 = vmatprep.mubr.f32.mxu0 %v4251_v11 }
 0x291   : > { %v4255_v47 = vpop.eup %4254  ;;  %4280 = vrcp.f32 %v2622_v52  ;;  %v2621_v17 = vadd.f32 1.0, %v4253_v63  ;;  %3907 = vmatmul.mubr.f32.gmra.mxu0 %v4247_v21 }
 0x292   : > { %v4257_v5 = vpop.eup %4256  ;;  %4282 = vrsqrt.f32 %v5448_v26 }
 0x293   : > { %v4259_v23 = vpop.eup %4258  ;;  %4284 = vrcp.f32 %v2621_v17  ;;  %v2624_v4 = vadd.f32 1.0, %v4257_v5  ;;  %v2429_v17 = vand.u32 2147483648, %v5440_v10 }
 0x294   : > { %v4261_v50 = vpop.eup %4260  ;;  %4286 = vrsqrt.f32 %v5457_v16  ;;  %3909 = vmatprep.mubr.f32.mxu0 %v4259_v23  ;;  %v2422_v23 = vand.u32 2147483648, %v5448_v26 }
 0x295   : > { %v4263_v53 = vpop.eup %4262  ;;  %4288 = vrcp.f32 %v2624_v4  ;;  %v2411_v36 = vmul.f32 %v4261_v50, %v5419_v42  ;;  %3910 = vmatmul.mubr.f32.gmra.mxu0 %v4255_v47 }
 0x296   : > { %v4265_v6 = vpop.eup %4264  ;;  %4290 = vrsqrt.f32 %v5466_v60 }
 0x297   : > { %v4267_v44 = vpop.eup %4266  ;;  %v2623_v22 = vadd.f32 1.0, %v4265_v6  ;;  %v2413_v31 = vsel %vm2412_vm1, %v5419_v42, %v2411_v36  ;;  %4292 = vrsqrt.f32 %v5473_v37  ;;  %v5533_v36 = vpop.f32.mrf.mxu1  ;;  %vm2468_vm1 = vcmp.eq.f32.partialorder %v5493_v15, inf }
 0x298   : > { %v4269_v29 = vpop.eup %4268  ;;  %v2416_v21 = vsel %vm2414_vm2, %v2415_v25, %v2413_v31  ;;  %4294 = vrsqrt.f32 %v5482_v54  ;;  %3912 = vmatprep.mubr.f32.mxu0 %v4267_v44  ;;  %v2443_v44 = vand.u32 2147483648, %v5457_v16  ;;  %vm2470_vm2 = vcmp.eq.f32.partialorder %v5493_v15, 0.0 }
 0x299   : > { %v4271_v11 = vpop.eup %4270  ;;  %4296 = vrcp.f32 %v2623_v22  ;;  %v2626_v52 = vadd.f32 1.0, %v4269_v29  ;;  %v3276_v63 = vmul.f32 -1.442695, %v2416_v21  ;;  %3913 = vmatmul.mubr.f32.gmra.mxu0 %v4263_v53  ;;  %v2436_v21 = vand.u32 2147483648, %v5466_v60 }
 0x29a   : > { %v4273_v42 = vpop.eup %4272  ;;  %v2404_v47 = vmul.f32 %v4271_v11, %v5430_v3  ;;  %4298 = vrsqrt.f32 %v5493_v15 }
 0x29b   : > { %v4275_v5 = vpop.eup %4274  ;;  %4300 = vrcp.f32 %v2626_v52 }
 0x29c   : > { %v4277_v4 = vpop.eup %4276  ;;  %v2625_v50 = vadd.f32 1.0, %v4275_v5  ;;  %4302 = vpow2.f32 %v3276_v63  ;;  %v2406_v53 = vsel %vm2405_vm3, %v5430_v3, %v2404_v47  ;;  %v2457_v3 = vand.u32 2147483648, %v5473_v37 }
 0x29d   : > { %v4279_v6 = vpop.eup %4278  ;;  %v2409_v25 = vsel %vm2407_vm4, %v2408_v1, %v2406_v53  ;;  %4304 = vrsqrt.f32 %v5498_v33  ;;  %3915 = vmatprep.mubr.f32.mxu0 %v4277_v4  ;;  %v2450_v4 = vand.u32 2147483648, %v5482_v54  ;;  %vm2461_vm3 = vcmp.eq.f32.partialorder %v5498_v33, inf }
 0x29e   : > { %v4281_v22 = vpop.eup %4280  ;;  %4306 = vrcp.f32 %v2625_v50  ;;  %v3275_v31 = vmul.f32 -1.442695, %v2409_v25  ;;  %v2425_v29 = vmul.f32 %v4279_v6, %v5440_v10  ;;  %3916 = vmatmul.mubr.f32.gmra.mxu0 %v4273_v42  ;;  %v5552_v42 = vpop.f32.mrf.mxu1  ;;  %vm2463_vm4 = vcmp.eq.f32.partialorder %v5498_v33, 0.0 }
 0x29f   : > { %v4283_v11 = vpop.eup %4282  ;;  %4308 = vrsqrt.f32 %v5501_v35 }
 0x2a0   : > { %v4285_v1 = vpop.eup %4284  ;;  %4310 = vpow2.f32 %v3275_v31  ;;  %v2427_v52 = vsel %vm2426_vm5, %v5440_v10, %v2425_v29  ;;  %v2418_v63 = vmul.f32 %v4283_v11, %v5448_v26  ;;  %v2471_v31 = vand.u32 2147483648, %v5493_v15 }
 0x2a1   : > { %v4287_v47 = vpop.eup %4286  ;;  %v2430_v5 = vsel %vm2428_vm6, %v2429_v17, %v2427_v52  ;;  %4312 = vrsqrt.f32 %v5505_v59  ;;  %3918 = vmatprep.mubr.f32.mxu0 %v4285_v1  ;;  %v2464_v29 = vand.u32 2147483648, %v5498_v33  ;;  %vm2482_vm5 = vcmp.eq.f32.partialorder %v5501_v35, inf }
 0x2a2   : > { %v4289_v50 = vpop.eup %4288  ;;  %v3278_v53 = vmul.f32 -1.442695, %v2430_v5  ;;  %v2420_v6 = vsel %vm2419_vm7, %v5448_v26, %v2418_v63  ;;  %v2439_v25 = vmul.f32 %v4287_v47, %v5457_v16  ;;  %4314 = vrsqrt.f32 %v5519_v30  ;;  %3919 = vmatmul.mubr.f32.gmra.mxu0 %v4281_v22  ;;  %v5576_v26 = vpop.f32.mrf.mxu1 }
 0x2a3   : > { %v4291_v10 = vpop.eup %4290  ;;  %v2423_v17 = vsel %vm2421_vm8, %v2422_v23, %v2420_v6  ;;  %4316 = vrsqrt.f32 %v5533_v36  ;;  %v2485_v5 = vand.u32 2147483648, %v5501_v35  ;;  %vm2484_vm6 = vcmp.eq.f32.partialorder %v5501_v35, 0.0 }
 0x2a4   : > { %v4293_v11 = vpop.eup %4292  ;;  %4318 = vpow2.f32 %v3278_v53  ;;  %v3277_v1 = vmul.f32 -1.442695, %v2423_v17  ;;  %v2441_v52 = vsel %vm2440_vm9, %v5457_v16, %v2439_v25  ;;  %v2432_v22 = vmul.f32 %v4291_v10, %v5466_v60 }
 0x2a5   : > { %v4295_v23 = vpop.eup %4294  ;;  %v2444_v63 = vsel %vm2442_vm10, %v2443_v44, %v2441_v52  ;;  %v2453_v47 = vmul.f32 %v4293_v11, %v5473_v37  ;;  %4320 = vrsqrt.f32 %v5552_v42  ;;  %v2478_v11 = vand.u32 2147483648, %v5505_v59 }
 0x2a6   : > { %v4297_v53 = vpop.eup %4296  ;;  %4322 = vpow2.f32 %v3277_v1  ;;  %v3280_v6 = vmul.f32 -1.442695, %v2444_v63  ;;  %v2434_v25 = vsel %vm2433_vm11, %v5466_v60, %v2432_v22  ;;  %v2446_v10 = vmul.f32 %v4295_v23, %v5482_v54 }
 0x2a7   : > { %v4299_v16 = vpop.eup %4298  ;;  %v2437_v44 = vsel %vm2435_vm12, %v2436_v21, %v2434_v25  ;;  %v2455_v17 = vsel %vm2454_vm13, %v5473_v37, %v2453_v47  ;;  %4324 = vrsqrt.f32 %v5576_v26  ;;  %3921 = vmatprep.mubr.f32.mxu0 %v4297_v53  ;;  %vm2475_vm7 = vcmp.eq.f32.partialorder %v5505_v59, inf }
 0x2a8   : > { %v4301_v1 = vpop.eup %4300  ;;  %4326 = vpow2.f32 %v3280_v6  ;;  %v3279_v52 = vmul.f32 -1.442695, %v2437_v44  ;;  %v2458_v22 = vsel %vm2456_vm14, %v2457_v3, %v2455_v17  ;;  %v2448_v60 = vsel %vm2447_vm15, %v5482_v54, %v2446_v10  ;;  %3922 = vmatmul.mubr.f32.gmra.mxu0 %v4289_v50 }
 0x2a9   : > { %v4303_v21 = vpop.eup %4302  ;;  %v3282_v23 = vmul.f32 -1.442695, %v2458_v22  ;;  %v2451_v63 = vsel %vm2449_vm0, %v2450_v4, %v2448_v60  ;;  %v2467_v47 = vmul.f32 %v4299_v16, %v5493_v15  ;;  %vm2477_vm8 = vcmp.eq.f32.partialorder %v5505_v59, 0.0 }
 0x2aa   : > { %vm2496_vm9 = vcmp.eq.f32.partialorder %v5519_v30, inf  ;;  %v4305_v37 = vpop.eup %4304  ;;  %v2628_v3 = vadd.f32 1.0, %v4303_v21  ;;  %4328 = vpow2.f32 %v3279_v52  ;;  %v3281_v53 = vmul.f32 -1.442695, %v2451_v63 }
 0x2ab   : > { %vm2498_vm10 = vcmp.eq.f32.partialorder %v5519_v30, 0.0  ;;  %v4307_v6 = vpop.eup %4306  ;;  %4330 = vpow2.f32 %v3282_v23  ;;  %v2469_v50 = vsel %vm2468_vm1, %v5493_v15, %v2467_v47  ;;  %v2460_v54 = vmul.f32 %v4305_v37, %v5498_v33 }
 0x2ac   : > { %v2499_v4 = vand.u32 2147483648, %v5519_v30  ;;  %v4309_v25 = vpop.eup %4308  ;;  %v2472_v10 = vsel %vm2470_vm2, %v2471_v31, %v2469_v50  ;;  %vm2489_vm11 = vcmp.eq.f32.partialorder %v5533_v36, inf  ;;  %vm2491_vm12 = vcmp.eq.f32.partialorder %v5533_v36, 0.0  ;;  %3924 = vmatprep.mubr.f32.mxu0 %v4307_v6 }
 0x2ad   : > { %v2492_v16 = vand.u32 2147483648, %v5533_v36  ;;  %v4311_v44 = vpop.eup %4310  ;;  %4332 = vpow2.f32 %v3281_v53  ;;  %v3284_v17 = vmul.f32 -1.442695, %v2472_v10  ;;  %v2462_v52 = vsel %vm2461_vm3, %v5498_v33, %v2460_v54  ;;  %3925 = vmatmul.mubr.f32.gmra.mxu0 %v4301_v1 }
 0x2ae   : > { %v2481_v22 = vmul.f32 %v4309_v25, %v5501_v35  ;;  %v4313_v60 = vpop.eup %4312  ;;  %4334 = vrcp.f32 %v2628_v3  ;;  %v2627_v15 = vadd.f32 1.0, %v4311_v44  ;;  %v2465_v31 = vsel %vm2463_vm4, %v2464_v29, %v2462_v52 }
 0x2af   : > { %vm2510_vm13 = vcmp.eq.f32.partialorder %v5552_v42, inf  ;;  %v4315_v21 = vpop.eup %4314  ;;  %4336 = vpow2.f32 %v3284_v17  ;;  %v3283_v23 = vmul.f32 -1.442695, %v2465_v31  ;;  %v2474_v47 = vmul.f32 %v4313_v60, %v5505_v59 }
 0x2b0   : > { %v2483_v63 = vsel %vm2482_vm5, %v5501_v35, %v2481_v22  ;;  %v4317_v1 = vpop.eup %4316  ;;  %4338 = vrcp.f32 %v2627_v15  ;;  %v2495_v33 = vmul.f32 %v4315_v21, %v5519_v30  ;;  %vm2512_vm14 = vcmp.eq.f32.partialorder %v5552_v42, 0.0 }
 0x2b1   : > { %v2486_v37 = vsel %vm2484_vm6, %v2485_v5, %v2483_v63  ;;  %v4319_v29 = vpop.eup %4318  ;;  %4340 = vpow2.f32 %v3283_v23  ;;  %v2476_v53 = vsel %vm2475_vm7, %v5505_v59, %v2474_v47  ;;  %v2488_v6 = vmul.f32 %v4317_v1, %v5533_v36 }
 0x2b2   : > { %v3286_v3 = vmul.f32 -1.442695, %v2486_v37  ;;  %v4321_v50 = vpop.eup %4320  ;;  %v2630_v54 = vadd.f32 1.0, %v4319_v29  ;;  %v2479_v25 = vsel %vm2477_vm8, %v2478_v11, %v2476_v53  ;;  %v2497_v35 = vsel %vm2496_vm9, %v5519_v30, %v2495_v33 }
 0x2b3   : > { %v2513_v5 = vand.u32 2147483648, %v5552_v42  ;;  %v4323_v10 = vpop.eup %4322  ;;  %v3285_v44 = vmul.f32 -1.442695, %v2479_v25  ;;  %v2500_v17 = vsel %vm2498_vm10, %v2499_v4, %v2497_v35  ;;  %v2490_v52 = vsel %vm2489_vm11, %v5533_v36, %v2488_v6 }
 0x2b4   : > { %4342 = vpow2.f32 %v3286_v3  ;;  %v4325_v22 = vpop.eup %4324  ;;  %v2629_v59 = vadd.f32 1.0, %v4323_v10  ;;  %v3288_v11 = vmul.f32 -1.442695, %v2500_v17  ;;  %v2493_v60 = vsel %vm2491_vm12, %v2492_v16, %v2490_v52 }
 0x2b5   : > { %4344 = vrcp.f32 %v2630_v54  ;;  %v4327_v15 = vpop.eup %4326  ;;  %v3287_v31 = vmul.f32 -1.442695, %v2493_v60  ;;  %v2509_v21 = vmul.f32 %v4321_v50, %v5552_v42  ;;  %v2502_v23 = vmul.f32 %v4325_v22, %v5576_v26 }
 0x2b6   : > { %4346 = vpow2.f32 %v3285_v44  ;;  %vm2503_vm15 = vcmp.eq.f32.partialorder %v5576_v26, inf  ;;  %vm2505_vm0 = vcmp.eq.f32.partialorder %v5576_v26, 0.0  ;;  %v2506_v30 = vand.u32 2147483648, %v5576_v26 }
 0x2b7   : > { %4348 = vrcp.f32 %v2629_v59  ;;  %v4329_v4 = vpop.eup %4328  ;;  %v2632_v63 = vadd.f32 1.0, %v4327_v15  ;;  %v2511_v36 = vsel %vm2510_vm13, %v5552_v42, %v2509_v21  ;;  %v2504_v16 = vsel %vm2503_vm15, %v5576_v26, %v2502_v23 }
 0x2b8   : > { %4350 = vpow2.f32 %v3288_v11  ;;  %v4331_v47 = vpop.eup %4330  ;;  %v2631_v1 = vadd.f32 1.0, %v4329_v4  ;;  %v2514_v37 = vsel %vm2512_vm14, %v2513_v5, %v2511_v36  ;;  %v2507_v33 = vsel %vm2505_vm0, %v2506_v30, %v2504_v16 }
 0x2b9   : > { %4352 = vpow2.f32 %v3287_v31  ;;  %v3290_v29 = vmul.f32 -1.442695, %v2514_v37  ;;  %v3289_v53 = vmul.f32 -1.442695, %v2507_v33  ;;  %v2634_v50 = vadd.f32 1.0, %v4331_v47 }
 0x2ba   : > { %v4333_v3 = vpop.eup %4332  ;;  %4354 = vrcp.f32 %v2631_v1 }
 0x2bb   : > { %v4335_v6 = vpop.eup %4334  ;;  %4356 = vrcp.f32 %v2632_v63  ;;  %v2633_v54 = vadd.f32 1.0, %v4333_v3 }
 0x2bc   : > { %v4337_v25 = vpop.eup %4336  ;;  %4358 = vpow2.f32 %v3290_v29 }
 0x2bd   : > { %v4339_v35 = vpop.eup %4338  ;;  %4360 = vrcp.f32 %v2633_v54  ;;  %v2636_v42 = vadd.f32 1.0, %v4337_v25 }
 0x2be   : > { %v4341_v26 = vpop.eup %4340  ;;  %4362 = vpow2.f32 %v3289_v53  ;;  %3927 = vmatprep.mubr.f32.mxu0 %v4339_v35 }
 0x2bf   : > { %4364 = vrcp.f32 %v2634_v50  ;;  %v2635_v5 = vadd.f32 1.0, %v4341_v26  ;;  %3928 = vmatmul.mubr.f32.gmra.mxu0 %v4335_v6 }
 0x2c1   : > { %v4343_v10 = vpop.eup %4342  ;;  %4366 = vrcp.f32 %v2635_v5 }
 0x2c2   : > { %v4345_v44 = vpop.eup %4344  ;;  %4368 = vrcp.f32 %v2636_v42  ;;  %v2638_v22 = vadd.f32 1.0, %v4343_v10 }
 0x2c3   : > { %v4347_v17 = vpop.eup %4346 }
 0x2c4   : > { %v4349_v52 = vpop.eup %4348  ;;  %v2637_v59 = vadd.f32 1.0, %v4347_v17 }
 0x2c5   : > { %v4351_v11 = vpop.eup %4350  ;;  %3930 = vmatprep.mubr.f32.mxu0 %v4349_v52 }
 0x2c6   : > { %4370 = vrcp.f32 %v2637_v59  ;;  %3931 = vmatmul.mubr.f32.gmra.mxu0 %v4345_v44  ;;  %v4353_v60 = vpop.eup %4352  ;;  %v2640_v31 = vadd.f32 1.0, %v4351_v11 }
 0x2c7   : > { %v4355_v15 = vpop.eup %4354  ;;  %4372 = vrcp.f32 %v2638_v22  ;;  %v2639_v21 = vadd.f32 1.0, %v4353_v60 }
 0x2c8   : > { %v4357_v23 = vpop.eup %4356  ;;  %3933 = vmatprep.mubr.f32.mxu0 %v4355_v15 }
 0x2c9   : > { %v4359_v30 = vpop.eup %4358  ;;  %4374 = vrcp.f32 %v2639_v21 }
 0x2ca   : > { %3934 = vmatmul.mubr.f32.gmra.mxu0 %v4357_v23  ;;  %v4361_v4 = vpop.eup %4360  ;;  %4376 = vrcp.f32 %v2640_v31  ;;  %v2642_v36 = vadd.f32 1.0, %v4359_v30 }
 0x2cb   : > { %v4363_v63 = vpop.eup %4362  ;;  %3936 = vmatprep.mubr.f32.mxu0 %v4361_v4 }
 0x2cc   : > { %v4365_v16 = vpop.eup %4364  ;;  %v2641_v47 = vadd.f32 1.0, %v4363_v63 }
 0x2ce   : > { %3937 = vmatmul.mubr.f32.gmra.mxu0 %v4365_v16  ;;  %v4367_v1 = vpop.eup %4366  ;;  %4378 = vrcp.f32 %v2641_v47 }
 0x2cf   : > { %4380 = vrcp.f32 %v2642_v36  ;;  %3939 = vmatprep.mubr.f32.mxu0 %v4367_v1  ;;  %v4369_v37 = vpop.eup %4368 }
 0x2d2   : > { %3940 = vmatmul.mubr.f32.gmra.mxu0 %v4369_v37 }
 0x2d3   : > { %v4371_v33 = vpop.eup %4370 }
 0x2d4   : > { %3942 = vmatprep.mubr.f32.mxu0 %v4371_v33  ;;  %v4373_v29 = vpop.eup %4372 }
 0x2d6   : > { %3943 = vmatmul.mubr.f32.gmra.mxu0 %v4373_v29  ;;  %v4375_v3 = vpop.eup %4374 }
 0x2d7   : > { %3945 = vmatprep.mubr.f32.mxu0 %v4375_v3  ;;  %v4377_v53 = vpop.eup %4376 }
 0x2da   : > { %3946 = vmatmul.mubr.f32.gmra.mxu0 %v4377_v53 }
 0x2db   : > { %v4379_v6 = vpop.eup %4378 }
 0x2dc   : > { %v4381_v50 = vpop.eup %4380  ;;  %3948 = vmatprep.mubr.f32.mxu0 %v4379_v6 }
 0x2de   : > { %3949 = vmatmul.mubr.f32.gmra.mxu0 %v4381_v50 }
 0x34d   : > { %v3905_v54 = vpop.f32.mrf.mxu0 }
 0x34e   : > { %v2949_v25 = vmul.f32 %v3905_v54, %v5114_v8 }
 0x34f   : > { %v2789_v35 = vpop.f32.mrf.mxu0 }
 0x350   : > { %2981 = vst [vmem:[%s5670_s7 + $0x8] sm:$0xff] %v2949_v25  ;;  %v2948_v26 = vmul.f32 %v2789_v35, %v5099_v18 }
 0x351   : > { %v3908_v42 = vpop.f32.mrf.mxu0 }
 0x352   : > { %2980 = vst [vmem:[%s5670_s7] sm:$0xff] %v2948_v26  ;;  %v2951_v5 = vmul.f32 %v3908_v42, %v5122_v41 }
 0x353   : > { %v2799_v10 = vpop.f32.mrf.mxu0 }
 0x354   : > { %2983 = vst [vmem:[%s5670_s7 + $0x18] sm:$0xff] %v2951_v5  ;;  %v2950_v44 = vmul.f32 %v2799_v10, %v5109_v43 }
 0x355   : > { %v3911_v17 = vpop.f32.mrf.mxu0 }
 0x356   : > { %2982 = vst [vmem:[%s5670_s7 + $0x10] sm:$0xff] %v2950_v44  ;;  %v2953_v8 = vmul.f32 %v3911_v17, %v5150_v24 }
 0x357   : > { %v2809_v52 = vpop.f32.mrf.mxu0 }
 0x358   : > { %2985 = vst [vmem:[%s5670_s7 + $0x28] sm:$0xff] %v2953_v8  ;;  %v2952_v18 = vmul.f32 %v2809_v52, %v5133_v19 }
 0x359   : > { %v3914_v22 = vpop.f32.mrf.mxu0 }
 0x35a   : > { %2984 = vst [vmem:[%s5670_s7 + $0x20] sm:$0xff] %v2952_v18  ;;  %v2955_v41 = vmul.f32 %v3914_v22, %v5158_v28 }
 0x35b   : > { %v2819_v59 = vpop.f32.mrf.mxu0 }
 0x35c   : > { %2987 = vst [vmem:[%s5670_s7 + $0x38] sm:$0xff] %v2955_v41  ;;  %v2954_v43 = vmul.f32 %v2819_v59, %v5145_v12 }
 0x35e   : > { %2986 = vst [vmem:[%s5670_s7 + $0x30] sm:$0xff] %v2954_v43  ;;  %v3917_v11 = vpop.f32.mrf.mxu0 }
 0x35f   : > { %v2957_v24 = vmul.f32 %v3917_v11, %v5186_v14 }
 0x360   : > { %v2829_v60 = vpop.f32.mrf.mxu0 }
 0x361   : > { %2989 = vst [vmem:[%s5670_s7 + $0x48] sm:$0xff] %v2957_v24  ;;  %v2956_v19 = vmul.f32 %v2829_v60, %v5169_v55 }
 0x362   : > { %v3920_v15 = vpop.f32.mrf.mxu0 }
 0x363   : > { %2988 = vst [vmem:[%s5670_s7 + $0x40] sm:$0xff] %v2956_v19  ;;  %v2959_v28 = vmul.f32 %v3920_v15, %v5192_v61 }
 0x364   : > { %v2839_v31 = vpop.f32.mrf.mxu0 }
 0x365   : > { %2991 = vst [vmem:[%s5670_s7 + $0x58] sm:$0xff] %v2959_v28  ;;  %v2958_v12 = vmul.f32 %v2839_v31, %v5181_v39 }
 0x367   : > { %2990 = vst [vmem:[%s5670_s7 + $0x50] sm:$0xff] %v2958_v12 }
 0x368   : > { %v3923_v21 = vpop.f32.mrf.mxu0 }
 0x369   : > { %v2961_v14 = vmul.f32 %v3923_v21, %v5214_v56 }
 0x36a   : > { %v2849_v23 = vpop.f32.mrf.mxu0 }
 0x36b   : > { %2993 = vst [vmem:[%s5670_s7 + $0x68] sm:$0xff] %v2961_v14  ;;  %v2960_v55 = vmul.f32 %v2849_v23, %v5201_v62 }
 0x36d   : > { %2992 = vst [vmem:[%s5670_s7 + $0x60] sm:$0xff] %v2960_v55  ;;  %v3926_v30 = vpop.f32.mrf.mxu0 }
 0x36e   : > { %v2963_v61 = vmul.f32 %v3926_v30, %v5220_v34 }
 0x36f   : > { %v2859_v4 = vpop.f32.mrf.mxu0 }
 0x370   : > { %2995 = vst [vmem:[%s5670_s7 + $0x78] sm:$0xff] %v2963_v61  ;;  %v2962_v39 = vmul.f32 %v2859_v4, %v5211_v51 }
 0x372   : > { %2994 = vst [vmem:[%s5670_s7 + $0x70] sm:$0xff] %v2962_v39 }
 0x37f   : > { %v3929_v63 = vpop.f32.mrf.mxu0 }
 0x380   : > { %v2965_v56 = vmul.f32 %v3929_v63, %v5242_v46 }
 0x381   : > { %v2869_v36 = vpop.f32.mrf.mxu0 }
 0x382   : > { %2997 = vst [vmem:[%s5670_s7 + $0x88] sm:$0xff] %v2965_v56  ;;  %v2964_v62 = vmul.f32 %v2869_v36, %v5229_v13 }
 0x384   : > { %2996 = vst [vmem:[%s5670_s7 + $0x80] sm:$0xff] %v2964_v62 }
 0x386   : > { %v3932_v16 = vpop.f32.mrf.mxu0 }
 0x387   : > { %v2967_v34 = vmul.f32 %v3932_v16, %v5246_v38 }
 0x388   : > { %v2879_v47 = vpop.f32.mrf.mxu0 }
 0x389   : > { %2999 = vst [vmem:[%s5670_s7 + $0x98] sm:$0xff] %v2967_v34  ;;  %v2966_v51 = vmul.f32 %v2879_v47, %v5239_v58 }
 0x38a   : > { %v3935_v1 = vpop.f32.mrf.mxu0 }
 0x38b   : > { %2998 = vst [vmem:[%s5670_s7 + $0x90] sm:$0xff] %v2966_v51  ;;  %v2969_v46 = vmul.f32 %v3935_v1, %v5264_v49 }
 0x38c   : > { %v2889_v37 = vpop.f32.mrf.mxu0 }
 0x38d   : > { %3001 = vst [vmem:[%s5670_s7 + $0xa8] sm:$0xff] %v2969_v46  ;;  %v2968_v13 = vmul.f32 %v2889_v37, %v5253_v48 }
 0x38e   : > { %v3938_v33 = vpop.f32.mrf.mxu0 }
 0x38f   : > { %3000 = vst [vmem:[%s5670_s7 + $0xa0] sm:$0xff] %v2968_v13  ;;  %v2971_v38 = vmul.f32 %v3938_v33, %v5266_v2 }
 0x390   : > { %v2899_v29 = vpop.f32.mrf.mxu0 }
 0x391   : > { %3003 = vst [vmem:[%s5670_s7 + $0xb8] sm:$0xff] %v2971_v38  ;;  %v2970_v58 = vmul.f32 %v2899_v29, %v5261_v0 }
 0x392   : > { %v3941_v3 = vpop.f32.mrf.mxu0 }
 0x393   : > { %3002 = vst [vmem:[%s5670_s7 + $0xb0] sm:$0xff] %v2970_v58  ;;  %v2973_v49 = vmul.f32 %v3941_v3, %v5284_v45 }
 0x394   : > { %v2909_v53 = vpop.f32.mrf.mxu0 }
 0x395   : > { %3005 = vst [vmem:[%s5670_s7 + $0xc8] sm:$0xff] %v2973_v49  ;;  %v2972_v48 = vmul.f32 %v2909_v53, %v5273_v27 }
 0x396   : > { %v3944_v6 = vpop.f32.mrf.mxu0 }
 0x397   : > { %3004 = vst [vmem:[%s5670_s7 + $0xc0] sm:$0xff] %v2972_v48  ;;  %v2975_v2 = vmul.f32 %v3944_v6, %v5286_v7 }
 0x398   : > { %v2919_v50 = vpop.f32.mrf.mxu0 }
 0x399   : > { %3007 = vst [vmem:[%s5670_s7 + $0xd8] sm:$0xff] %v2975_v2  ;;  %v2974_v0 = vmul.f32 %v2919_v50, %v5281_v57 }
 0x39a   : > { %v3947_v54 = vpop.f32.mrf.mxu0 }
 0x39b   : > { %3006 = vst [vmem:[%s5670_s7 + $0xd0] sm:$0xff] %v2974_v0  ;;  %v2977_v25 = vmul.f32 %v3947_v54, %v5303_v40 }
 0x39c   : > { %v2929_v45 = vpop.f32.mrf.mxu0 }
 0x39d   : > { %3009 = vst [vmem:[%s5670_s7 + $0xe8] sm:$0xff] %v2977_v25  ;;  %v2976_v35 = vmul.f32 %v2929_v45, %v5293_v9 }
 0x39e   : > { %v3950_v26 = vpop.f32.mrf.mxu0 }
 0x39f   : > { %3008 = vst [vmem:[%s5670_s7 + $0xe0] sm:$0xff] %v2976_v35  ;;  %v2979_v27 = vmul.f32 %v3950_v26, %v5310_v20 }
 0x3a0   : > { %v2939_v42 = vpop.f32.mrf.mxu0 }
 0x3a1   : > { %3011 = vst [vmem:[%s5670_s7 + $0xf8] sm:$0xff] %v2979_v27  ;;  %v2978_v7 = vmul.f32 %v2939_v42, %v5301_v32 }
 0x3a3   : > { %3010 = vst [vmem:[%s5670_s7 + $0xf0] sm:$0xff] %v2978_v7 }
 0x3a4 PF: > { %s14_s15 = sadd.s32 1, %s4388_s15  }
 0x3a5   : > { %p11_p4 = scmp.ge.s32.totalorder %s14_s15, 6  }
 0x3a7   :  { %13 = sbr.rel (!%p11_p4) target bundleno = 1 (0x1), region = 66 }

// kernel: fwd.7
= control target key start
LH: loop header
LB: loop body
LE: loop exit
PB: predicated region body
PF: predicated region fallthrough
CT: control target
= control target key end

     0   :  { %9 = vsyncpa [#allocation3], 0  ;;  %s8333_s0 = inlined_call_operand.vmem [shape: bf16[1024,1728], index: 0, kind: input, shape index: {}]   ;;  %s8334_s1 = inlined_call_operand.vmem [shape: bf16[1728,128], index: 1, kind: input, shape index: {}]   ;;  %s8335_s2 = inlined_call_operand.vmem [shape: f32[128,128], index: 2, kind: input, shape index: {}, may-alias: {2,3}]   ;;  %s8336_s3 = inlined_call_operand.vmem [shape: f32[128,128], index: 3, kind: input, shape index: {}, may-alias: {2,3}]   ;;  %s8337_s4 = inlined_call_operand.hbm [shape: f32[1024,128], index: 4, kind: output, shape index: {}]  }
   0x1   :  { %11 = vsyncpa [#allocation3 + $0x1], 0  ;;  %s6732_s15 = smov 0   ;;  %s6734_s16 = smov 0  }
   0x2   :  { %s6736_s17 = smov 0   ;;  %s6738_s18 = smov 0  }
   0x3 LB: > { %s6753_s19 = sadd.s32 4294967295, %s6701_s18   ;;  %s4641_s20 = sadd.s32 4294967294, %s6701_s18   ;;  %s6701_s18 = sphi %s6738_s18, %s8373_s18   ;;  %s6697_s17 = sphi %s6736_s17, %s8372_s17   ;;  %s6693_s16 = sphi %s6734_s16, %s8371_s16   ;;  %s6689_s15 = sphi %s6732_s15, %s8370_s15  }
   0x4   : > { %s6757_s21 = sadd.s32 1, %s6701_s18   ;;  %s113_s22 = sadd.s32 1, %s6697_s17 }
   0x5   : > { %s110_s23 = ssub.s32 %s6701_s18, %s6757_s21  ;;  %p123_p0 = scmp.ne.s32.totalorder %s6697_s17, %s6693_s16 }
   0x6   : > { %p111_p1 = scmp.eq.s32.totalorder %s110_s23, 0  ;;  %p124_p2 = scmp.eq.s32.totalorder %s6753_s19, 3 }
   0x7   : > { %p129_p3 = scmp.ne.s32.totalorder %s6693_s16, %s6689_s15  ;;  %p130_p4 = scmp.eq.s32.totalorder %s4641_s20, 3 }
   0x8   : > { %s6768_s24 = scalar_select %p111_p1, %s6697_s17, %s113_s22  }
   0x9   : > { %p6770_p5 = por %p124_p2, %p123_p0  ;;  %p6774_p6 = por %p130_p4, %p129_p3 }
   0xa   : > { %p4644_p7 = scmp.ge.s32.totalorder %s6701_s18, 1  ;;  %p167_p8 = scmp.lt.s32.totalorder %s6701_s18, 5 }
   0xc   : > { %p168_p9 = pnand %p4644_p7, %p167_p8 }
   0xe   : > { %171 = sbr.rel (%p168_p9) target bundleno = 1216 (0x4c0), region = 36 }
  0x13   : > { %v6005_v0 = vld [vmem:[%s8334_s1 + $0x78] sm:$0xff]   ;;  %v6009_v4 = vld [vmem:[%s8334_s1 + $0x70] sm:$0xff]   ;;  %v6013_v8 = vld [vmem:[%s8334_s1 + $0x68] sm:$0xff]   ;;  %s4646_s14 = sshll.u32 %s6753_s19, 5  ;;  %vm2395_vm0 = vcmask 523264   ;;  %s191_s9 = sand.u32 1, %s6693_s16  }
  0x14   : > { %v6006_v1 = vld [vmem:[%s8334_s1 + $0xf8] sm:$0xff]   ;;  %5034 = vmatprep.subr.bf16.mxu0 %v6005_v0  ;;  %v6010_v5 = vld [vmem:[%s8334_s1 + $0xf0] sm:$0xff]   ;;  %v6014_v9 = vld [vmem:[%s8334_s1 + $0xe8] sm:$0xff]   ;;  %p195_p10 = scmp.lt.s32.totalorder %s4646_s14, 127  ;;  %s4645_s10 = sshll.u32 %s191_s9, 8 }
  0x15   : > { %v6007_v2 = vld [vmem:[%s8334_s1 + $0x38] sm:$0xff]   ;;  %5146 = vmatprep.subr.bf16.mxu1 %v6006_v1  ;;  %v6011_v6 = vld [vmem:[%s8334_s1 + $0x30] sm:$0xff]   ;;  %v6015_v10 = vld [vmem:[%s8334_s1 + $0x28] sm:$0xff]   ;;  %s5033_s11 = sshll.u32 %s6753_s19, 12  ;;  %s8293_s19 = scalar_lea.sflag [#allocation3], %s191_s9 }
  0x16   : > { %v6008_v3 = vld [vmem:[%s8334_s1 + $0xb8] sm:$0xff]   ;;  %5035 = vmatpush3.bf16.msra.mxu0 %v6007_v2  ;;  %v6012_v7 = vld [vmem:[%s8334_s1 + $0xb0] sm:$0xff]   ;;  %v6016_v11 = vld [vmem:[%s8334_s1 + $0xa8] sm:$0xff]   ;;  %s8375_s14 = smov (!%p195_p10, %s4646_s14), 127  ;;  %s8284_s22 = scalar_lea.hbm %s8337_s4, %s5033_s11 }
  0x17   : > { %5147 = vmatpush3.bf16.msra.mxu1 %v6008_v3  ;;  %5036 = vmatprep.subr.bf16.mxu0 %v6009_v4  ;;  %v6017_v12 = vld [vmem:[%s8334_s1 + $0x60] sm:$0xff]   ;;  %v6021_v16 = vld [vmem:[%s8334_s1 + $0x58] sm:$0xff]   ;;  %v6025_v20 = vld [vmem:[%s8334_s1 + $0x50] sm:$0xff]   ;;  %s5962_s30 = smul.u32 56, %s8375_s14  ;;  %s6704_s27 = smov [#allocation2]  }
  0x18   : > { %5148 = vmatprep.subr.bf16.mxu1 %v6010_v5  ;;  %v6018_v13 = vld [vmem:[%s8334_s1 + $0xe0] sm:$0xff]   ;;  %v6022_v17 = vld [vmem:[%s8334_s1 + $0xd8] sm:$0xff]   ;;  %v6026_v21 = vld [vmem:[%s8334_s1 + $0xd0] sm:$0xff]   ;;  %s6645_s28 = sshll.u32 %s6704_s27, 4  ;;  %s6646_s28 = int_to_ptr.vmem [resolvable:$false] %s6645_s28 }
  0x19   : > { %v6019_v14 = vld [vmem:[%s8334_s1 + $0x20] sm:$0xff]   ;;  %v6023_v18 = vld [vmem:[%s8334_s1 + $0x18] sm:$0xff]   ;;  %v6027_v22 = vld [vmem:[%s8334_s1 + $0x10] sm:$0xff]   ;;  %s6874_s20 = scalar_lea.vmem %s8333_s0, %s5962_s30  ;;  %s6647_s29 = scalar_lea.vmem %s6646_s28, 8192 }
  0x1a   : > { %5037 = vmatpush3.bf16.msra.mxu0 %v6011_v6  ;;  %v6020_v15 = vld [vmem:[%s8334_s1 + $0xa0] sm:$0xff]   ;;  %v6024_v19 = vld [vmem:[%s8334_s1 + $0x98] sm:$0xff]   ;;  %v6028_v23 = vld [vmem:[%s8334_s1 + $0x90] sm:$0xff]  }
  0x1b   : > { %5149 = vmatpush3.bf16.msra.mxu1 %v6012_v7  ;;  %5038 = vmatprep.subr.bf16.mxu0 %v6013_v8  ;;  %v6029_v24 = vld [vmem:[%s8334_s1 + $0x48] sm:$0xff]   ;;  %v6033_v28 = vld [vmem:[%s8334_s1 + $0x40] sm:$0xff]   ;;  %v6043_v36 = vld [vmem:[%s8334_s1 + $0x178] sm:$0xff]  }
  0x1c   : > { %5150 = vmatprep.subr.bf16.mxu1 %v6014_v9  ;;  %v6030_v25 = vld [vmem:[%s8334_s1 + $0xc8] sm:$0xff]   ;;  %v6034_v29 = vld [vmem:[%s8334_s1 + $0xc0] sm:$0xff]   ;;  %v6044_v37 = vld [vmem:[%s8334_s1 + $0x138] sm:$0xff]  }
  0x1d   : > { %v6031_v26 = vld [vmem:[%s8334_s1 + $0x8] sm:$0xff]   ;;  %v6035_v30 = vld [vmem:[%s8334_s1] sm:$0xff]   ;;  %v6047_v39 = vld [vmem:[%s6874_s20 + $0x7c] ss:$56 sps:$4 sm:$0xff]  }
  0x1e   : > { %5039 = vmatpush3.bf16.msra.mxu0 %v6015_v10  ;;  %v6032_v27 = vld [vmem:[%s8334_s1 + $0x88] sm:$0xff]   ;;  %v6036_v31 = vld [vmem:[%s8334_s1 + $0x80] sm:$0xff]   ;;  %v6050_v41 = vld [vmem:[%s6874_s20 + $0x78] ss:$56 sps:$4 sm:$0xff]  }
  0x1f   : > { %5151 = vmatpush3.bf16.msra.mxu1 %v6016_v11  ;;  %5040 = vmatprep.subr.bf16.mxu0 %v6017_v12  ;;  %v6037_v32 = vld [vmem:[%s6874_s20] ss:$56 sps:$4 sm:$0xff]   ;;  %v6039_v33 = vld [vmem:[%s6874_s20 + $0x4] ss:$56 sps:$4 sm:$0xff]   ;;  %v6045_v38 = vld [vmem:[%s6874_s20 + $0x74] ss:$56 sps:$4 sm:$0xff]  }
  0x20   : > { %5152 = vmatprep.subr.bf16.mxu1 %v6018_v13  ;;  %v6040_v34 = vld [vmem:[%s6874_s20 + $0x8] ss:$56 sps:$4 sm:$0xff]   ;;  %v6042_v35 = vld [vmem:[%s6874_s20 + $0xc] ss:$56 sps:$4 sm:$0xff]   ;;  %2476 = vmatprep.mubr.bf16.mxu0 %v6039_v33  ;;  %v6057_v44 = vld [vmem:[%s8334_s1 + $0x170] sm:$0xff]  }
  0x21   : > { %2637 = vmatprep.mubr.bf16.mxu1 %v6042_v35  ;;  %v6049_v40 = vld [vmem:[%s6874_s20 + $0x70] ss:$56 sps:$4 sm:$0xff]   ;;  %v6051_v42 = vld [vmem:[%s6874_s20 + $0xe4] ss:$56 sps:$4 sm:$0xff]   ;;  %v6055_v46 = vld [vmem:[%s6874_s20 + $0xe0] ss:$56 sps:$4 sm:$0xff]  }
  0x22   : > { %5041 = vmatpush3.bf16.msra.mxu0 %v6019_v14  ;;  %v6053_v43 = vld [vmem:[%s6874_s20 + $0xec] ss:$56 sps:$4 sm:$0xff]   ;;  %v6058_v45 = vld [vmem:[%s8334_s1 + $0x130] sm:$0xff]   ;;  %v6056_v47 = vld [vmem:[%s6874_s20 + $0xe8] ss:$56 sps:$4 sm:$0xff]  }
  0x23   : > { %5153 = vmatpush3.bf16.msra.mxu1 %v6020_v15  ;;  %5042 = vmatprep.subr.bf16.mxu0 %v6021_v16  ;;  %v6059_v48 = vld [vmem:[%s6874_s20 + $0x154] ss:$56 sps:$4 sm:$0xff]   ;;  %v6063_v52 = vld [vmem:[%s6874_s20 + $0x150] ss:$56 sps:$4 sm:$0xff]   ;;  %v6065_v54 = vld [vmem:[%s6874_s20 + $0x1c4] ss:$56 sps:$4 sm:$0xff]  }
  0x24   : > { %5154 = vmatprep.subr.bf16.mxu1 %v6022_v17  ;;  %v6061_v49 = vld [vmem:[%s6874_s20 + $0x15c] ss:$56 sps:$4 sm:$0xff]   ;;  %v6071_v50 = vld [vmem:[%s8334_s1 + $0x168] sm:$0xff]   ;;  %v6064_v53 = vld [vmem:[%s6874_s20 + $0x158] ss:$56 sps:$4 sm:$0xff]  }
  0x25   : > { %v6072_v51 = vld [vmem:[%s8334_s1 + $0x128] sm:$0xff]   ;;  %v6085_v56 = vld [vmem:[%s8334_s1 + $0x160] sm:$0xff]   ;;  %v6099_v61 = vld [vmem:[%s8334_s1 + $0x158] sm:$0xff]  }
  0x26   : > { %5043 = vmatpush3.bf16.msra.mxu0 %v6023_v18  ;;  %v6067_v55 = vld [vmem:[%s6874_s20 + $0x1cc] ss:$56 sps:$4 sm:$0xff]   ;;  %v6069_v58 = vld [vmem:[%s6874_s20 + $0x1c0] ss:$56 sps:$4 sm:$0xff]   ;;  %v6075_v63 = vld [vmem:[%s6874_s20 + $0x23c] ss:$56 sps:$4 sm:$0xff]  }
  0x27   : > { %5155 = vmatpush3.bf16.msra.mxu1 %v6024_v19  ;;  %5044 = vmatprep.subr.bf16.mxu0 %v6025_v20  ;;  %v6086_v57 = vld [vmem:[%s8334_s1 + $0x120] sm:$0xff]   ;;  %v6073_v60 = vld [vmem:[%s6874_s20 + $0x234] ss:$56 sps:$4 sm:$0xff]   ;;  %v6100_v62 = vld [vmem:[%s8334_s1 + $0x118] sm:$0xff]  }
  0x28   : > { %5156 = vmatprep.subr.bf16.mxu1 %v6026_v21  ;;  %v6070_v59 = vld [vmem:[%s6874_s20 + $0x1c8] ss:$56 sps:$4 sm:$0xff]   ;;  %v6078_v1 = vld [vmem:[%s6874_s20 + $0x238] ss:$56 sps:$4 sm:$0xff]   ;;  %v6079_v2 = vld [vmem:[%s6874_s20 + $0x2a4] ss:$56 sps:$4 sm:$0xff]  }
  0x29   : > { %v6077_v0 = vld [vmem:[%s6874_s20 + $0x230] ss:$56 sps:$4 sm:$0xff]   ;;  %v6081_v5 = vld [vmem:[%s6874_s20 + $0x2ac] ss:$56 sps:$4 sm:$0xff]   ;;  %v6083_v6 = vld [vmem:[%s6874_s20 + $0x2a0] ss:$56 sps:$4 sm:$0xff]  }
  0x2a   : > { %5045 = vmatpush3.bf16.msra.mxu0 %v6027_v22  ;;  %v6113_v3 = vld [vmem:[%s8334_s1 + $0x150] sm:$0xff]   ;;  %v6084_v7 = vld [vmem:[%s6874_s20 + $0x2a8] ss:$56 sps:$4 sm:$0xff]   ;;  %v6129_v12 = vld [vmem:[%s8334_s1 + $0x1f8] sm:$0xff]  }
  0x2b   : > { %5157 = vmatpush3.bf16.msra.mxu1 %v6028_v23  ;;  %5046 = vmatprep.subr.bf16.mxu0 %v6029_v24  ;;  %v6114_v4 = vld [vmem:[%s8334_s1 + $0x110] sm:$0xff]   ;;  %v6127_v9 = vld [vmem:[%s8334_s1 + $0x148] sm:$0xff]   ;;  %v6130_v13 = vld [vmem:[%s8334_s1 + $0x1b8] sm:$0xff]  }
  0x2c   : > { %5158 = vmatprep.subr.bf16.mxu1 %v6030_v25  ;;  %v6087_v8 = vld [vmem:[%s6874_s20 + $0x314] ss:$56 sps:$4 sm:$0xff]   ;;  %v6091_v15 = vld [vmem:[%s6874_s20 + $0x310] ss:$56 sps:$4 sm:$0xff]   ;;  %v6093_v18 = vld [vmem:[%s6874_s20 + $0x384] ss:$56 sps:$4 sm:$0xff]  }
  0x2d   : > { %v6089_v10 = vld [vmem:[%s6874_s20 + $0x31c] ss:$56 sps:$4 sm:$0xff]   ;;  %v6128_v11 = vld [vmem:[%s8334_s1 + $0x108] sm:$0xff]   ;;  %v6092_v17 = vld [vmem:[%s6874_s20 + $0x318] ss:$56 sps:$4 sm:$0xff]  }
  0x2e   : > { %5047 = vmatpush3.bf16.msra.mxu0 %v6031_v26  ;;  %v6131_v14 = vld [vmem:[%s8334_s1 + $0x1f0] sm:$0xff]   ;;  %v6095_v19 = vld [vmem:[%s6874_s20 + $0x38c] ss:$56 sps:$4 sm:$0xff]   ;;  %v6097_v24 = vld [vmem:[%s6874_s20 + $0x380] ss:$56 sps:$4 sm:$0xff]  }
  0x2f   : > { %5159 = vmatpush3.bf16.msra.mxu1 %v6032_v27  ;;  %5048 = vmatprep.subr.bf16.mxu0 %v6033_v28  ;;  %v6136_v16 = vld [vmem:[%s8334_s1 + $0x1b0] sm:$0xff]   ;;  %v6139_v20 = vld [vmem:[%s8334_s1 + $0x1e8] sm:$0xff]   ;;  %v6141_v22 = vld [vmem:[%s8334_s1 + $0x1e0] sm:$0xff]  }
  0x30   : > { %5160 = vmatprep.subr.bf16.mxu1 %v6034_v29  ;;  %v6140_v21 = vld [vmem:[%s8334_s1 + $0x1a8] sm:$0xff]   ;;  %v6146_v23 = vld [vmem:[%s8334_s1 + $0x1a0] sm:$0xff]   ;;  %v6103_v29 = vld [vmem:[%s6874_s20 + $0x3fc] ss:$56 sps:$4 sm:$0xff]  }
  0x31   : > { %v6149_v25 = vld [vmem:[%s8334_s1 + $0x140] sm:$0xff]   ;;  %v6101_v27 = vld [vmem:[%s6874_s20 + $0x3f4] ss:$56 sps:$4 sm:$0xff]   ;;  %v6106_v35 = vld [vmem:[%s6874_s20 + $0x3f8] ss:$56 sps:$4 sm:$0xff]  }
  0x32   : > { %5049 = vmatpush3.bf16.msra.mxu0 %v6035_v30  ;;  %v6098_v26 = vld [vmem:[%s6874_s20 + $0x388] ss:$56 sps:$4 sm:$0xff]   ;;  %v6151_v30 = vld [vmem:[%s8334_s1 + $0x1d8] sm:$0xff]   ;;  %v6158_v33 = vld [vmem:[%s8334_s1 + $0x190] sm:$0xff]  }
  0x33   : > { %5161 = vmatpush3.bf16.msra.mxu1 %v6036_v31  ;;  %5258 = vmatprep.subr.bf16.mxu0 %v6043_v36  ;;  %v6150_v28 = vld [vmem:[%s8334_s1 + $0x100] sm:$0xff]   ;;  %v6152_v31 = vld [vmem:[%s8334_s1 + $0x198] sm:$0xff]   ;;  %v6161_v36 = vld [vmem:[%s8334_s1 + $0x1c8] sm:$0xff]  }
  0x34   : > { %5370 = vmatprep.subr.bf16.mxu1 %v6129_v12  ;;  %v6185_v12 = vld [vmem:[%s8334_s1 + $0x230] sm:$0xff]  }
  0x35   : > { %2477 = vmatmul.mubr.bf16.vlgmr.msra.gmra.mxu0 %v6037_v32  ;;  %v6153_v32 = vld [vmem:[%s8334_s1 + $0x1d0] sm:$0xff]  }
  0x36   : > { %2638 = vmatmul.mubr.bf16.vlgmr.msra.gmra.mxu1 %v6040_v34  ;;  %5259 = vmatpush3.bf16.msra.mxu0 %v6044_v37  ;;  %v6105_v34 = vld [vmem:[%s6874_s20 + $0x3f0] ss:$56 sps:$4 sm:$0xff]  }
  0x37   : > { %2484 = vmatprep.mubr.bf16.mxu0 %v6045_v38  ;;  %2645 = vmatprep.mubr.bf16.mxu1 %v6047_v39  ;;  %v6162_v37 = vld [vmem:[%s8334_s1 + $0x188] sm:$0xff]   ;;  %v6107_v38 = vld [vmem:[%s6874_s20 + $0x464] ss:$56 sps:$4 sm:$0xff]  }
  0x38   : > { %5260 = vmatprep.subr.bf16.mxu0 %v6057_v44  ;;  %5371 = vmatpush3.bf16.msra.mxu1 %v6130_v13  ;;  %v6109_v39 = vld [vmem:[%s6874_s20 + $0x46c] ss:$56 sps:$4 sm:$0xff]   ;;  %v6112_v44 = vld [vmem:[%s6874_s20 + $0x468] ss:$56 sps:$4 sm:$0xff]  }
  0x39   : > { %5372 = vmatprep.subr.bf16.mxu1 %v6131_v14  ;;  %v6175_v13 = vld [vmem:[%s6874_s20 + $0x80] ss:$56 sps:$4 sm:$0xff]   ;;  %v6196_v14 = vld [vmem:[%s8334_s1 + $0x268] sm:$0xff]  }
  0x3a   : > { %5261 = vmatpush3.bf16.msra.mxu0 %v6058_v45  ;;  %v6115_v45 = vld [vmem:[%s6874_s20 + $0x4d4] ss:$56 sps:$4 sm:$0xff]  }
  0x3b   : > { %5262 = vmatprep.subr.bf16.mxu0 %v6071_v50  ;;  %v6123_v50 = vld [vmem:[%s6874_s20 + $0x54c] ss:$56 sps:$4 sm:$0xff]  }
  0x3c   : > { %5373 = vmatpush3.bf16.msra.mxu1 %v6136_v16  ;;  %v6179_v16 = vld [vmem:[%s6874_s20 + $0xf4] ss:$56 sps:$4 sm:$0xff]  }
  0x3d   : > { %2485 = vmatmul.mubr.bf16.gmra.mxu0 %v6049_v40  ;;  %5374 = vmatprep.subr.bf16.mxu1 %v6139_v20  ;;  %v6163_v40 = vld [vmem:[%s8334_s1 + $0x1c0] sm:$0xff]   ;;  %v6199_v20 = vld [vmem:[%s8334_s1 + $0x228] sm:$0xff]  }
  0x3e   : > { %2646 = vmatmul.mubr.bf16.gmra.mxu1 %v6050_v41  ;;  %2492 = vmatprep.mubr.bf16.mxu0 %v6051_v42  ;;  %v6167_v41 = vld [vmem:[%s8334_s1 + $0x180] sm:$0xff]   ;;  %v6168_v42 = vld [vmem:[%s8334_s1 + $0x278] sm:$0xff]  }
  0x3f   : > { %2653 = vmatprep.mubr.bf16.mxu1 %v6053_v43  ;;  %5263 = vmatpush3.bf16.msra.mxu0 %v6072_v51  ;;  %v6111_v43 = vld [vmem:[%s6874_s20 + $0x460] ss:$56 sps:$4 sm:$0xff]  }
  0x40   : > { %5264 = vmatprep.subr.bf16.mxu0 %v6085_v56  ;;  %5375 = vmatpush3.bf16.msra.mxu1 %v6140_v21  ;;  %v6125_v51 = vld [vmem:[%s6874_s20 + $0x540] ss:$56 sps:$4 sm:$0xff]  }
  0x41   : > { %5376 = vmatprep.subr.bf16.mxu1 %v6141_v22  ;;  %v6138_v56 = vld [vmem:[%s6874_s20 + $0x5b8] ss:$56 sps:$4 sm:$0xff]   ;;  %v6210_v21 = vld [vmem:[%s8334_s1 + $0x260] sm:$0xff]   ;;  %v6268_v22 = vld [vmem:[%s8334_s1 + $0x2a8] sm:$0xff]  }
  0x43   : > { %5265 = vmatpush3.bf16.msra.mxu0 %v6086_v57  ;;  %v6142_v57 = vld [vmem:[%s6874_s20 + $0x624] ss:$56 sps:$4 sm:$0xff]  }
  0x44   : > { %5266 = vmatprep.subr.bf16.mxu0 %v6099_v61  ;;  %5377 = vmatpush3.bf16.msra.mxu1 %v6146_v23  ;;  %v6154_v61 = vld [vmem:[%s6874_s20 + $0x694] ss:$56 sps:$4 sm:$0xff]   ;;  %v6269_v23 = vld [vmem:[%s8334_s1 + $0x2e0] sm:$0xff]  }
  0x45   : > { %2493 = vmatmul.mubr.bf16.gmra.mxu0 %v6055_v46  ;;  %5378 = vmatprep.subr.bf16.mxu1 %v6151_v30  ;;  %v6117_v46 = vld [vmem:[%s6874_s20 + $0x4dc] ss:$56 sps:$4 sm:$0xff]   ;;  %v6190_v30 = vld [vmem:[%s6874_s20 + $0x16c] ss:$56 sps:$4 sm:$0xff]  }
  0x46   : > { %2654 = vmatmul.mubr.bf16.gmra.mxu1 %v6056_v47  ;;  %2500 = vmatprep.mubr.bf16.mxu0 %v6059_v48  ;;  %v6119_v47 = vld [vmem:[%s6874_s20 + $0x4d0] ss:$56 sps:$4 sm:$0xff]  }
  0x47   : > { %2661 = vmatprep.mubr.bf16.mxu1 %v6061_v49  ;;  %5267 = vmatpush3.bf16.msra.mxu0 %v6100_v62  ;;  %v6120_v48 = vld [vmem:[%s6874_s20 + $0x4d8] ss:$56 sps:$4 sm:$0xff]   ;;  %v6121_v49 = vld [vmem:[%s6874_s20 + $0x544] ss:$56 sps:$4 sm:$0xff]  }
  0x48   : > { %5268 = vmatprep.subr.bf16.mxu0 %v6113_v3  ;;  %5379 = vmatpush3.bf16.msra.mxu1 %v6152_v31  ;;  %v6156_v62 = vld [vmem:[%s6874_s20 + $0x69c] ss:$56 sps:$4 sm:$0xff]  }
  0x49   : > { %5380 = vmatprep.subr.bf16.mxu1 %v6153_v32  ;;  %v6257_v3 = vld [vmem:[%s8334_s1 + $0x2f8] sm:$0xff]  }
  0x4a   : > { %v6279_v31 = vld [vmem:[%s8334_s1 + $0x2d8] sm:$0xff]  }
  0x4b   : > { %5269 = vmatpush3.bf16.msra.mxu0 %v6114_v4  ;;  %v6164_v4 = vld [vmem:[%s6874_s20 + $0x10] ss:$56 sps:$4 sm:$0xff]   ;;  %v6227_v32 = vld [vmem:[%s8334_s1 + $0x218] sm:$0xff]  }
  0x4c   : > { %5270 = vmatprep.subr.bf16.mxu0 %v6127_v9  ;;  %5381 = vmatpush3.bf16.msra.mxu1 %v6158_v33  ;;  %v6182_v9 = vld [vmem:[%s8334_s1 + $0x270] sm:$0xff]  }
  0x4d   : > { %2501 = vmatmul.mubr.bf16.gmra.mxu0 %v6063_v52  ;;  %5382 = vmatprep.subr.bf16.mxu1 %v6161_v36  ;;  %v6126_v52 = vld [vmem:[%s6874_s20 + $0x548] ss:$56 sps:$4 sm:$0xff]   ;;  %v6238_v33 = vld [vmem:[%s8334_s1 + $0x250] sm:$0xff]  }
  0x4e   : > { %2662 = vmatmul.mubr.bf16.gmra.mxu1 %v6064_v53  ;;  %2508 = vmatprep.mubr.bf16.mxu0 %v6065_v54  ;;  %v6132_v53 = vld [vmem:[%s6874_s20 + $0x5b4] ss:$56 sps:$4 sm:$0xff]   ;;  %v6189_v36 = vld [vmem:[%s6874_s20 + $0x160] ss:$56 sps:$4 sm:$0xff]  }
  0x4f   : > { %2669 = vmatprep.mubr.bf16.mxu1 %v6067_v55  ;;  %5271 = vmatpush3.bf16.msra.mxu0 %v6128_v11  ;;  %v6134_v54 = vld [vmem:[%s6874_s20 + $0x5bc] ss:$56 sps:$4 sm:$0xff]   ;;  %v6137_v55 = vld [vmem:[%s6874_s20 + $0x5b0] ss:$56 sps:$4 sm:$0xff]  }
  0x50   : > { %5272 = vmatprep.subr.bf16.mxu0 %v6149_v25  ;;  %5383 = vmatpush3.bf16.msra.mxu1 %v6162_v37  ;;  %v6259_v11 = vld [vmem:[%s8334_s1 + $0x2f0] sm:$0xff]   ;;  %v6213_v25 = vld [vmem:[%s8334_s1 + $0x220] sm:$0xff]  }
  0x51   : > { %5384 = vmatprep.subr.bf16.mxu1 %v6163_v40  ;;  %v6241_v37 = vld [vmem:[%s8334_s1 + $0x210] sm:$0xff]   ;;  %v6252_v40 = vld [vmem:[%s8334_s1 + $0x248] sm:$0xff]  }
  0x53   : > { %5273 = vmatpush3.bf16.msra.mxu0 %v6150_v28  ;;  %v6187_v28 = vld [vmem:[%s6874_s20 + $0x164] ss:$56 sps:$4 sm:$0xff]  }
  0x54   : > { %5482 = vmatprep.subr.bf16.mxu0 %v6168_v42  ;;  %5385 = vmatpush3.bf16.msra.mxu1 %v6167_v41  ;;  %v6285_v41 = vld [vmem:[%s8334_s1 + $0x290] sm:$0xff]   ;;  %v6289_v42 = vld [vmem:[%s8334_s1 + $0x2c8] sm:$0xff]  }
  0x55   : > { %2509 = vmatmul.mubr.bf16.gmra.mxu0 %v6069_v58  ;;  %v6144_v58 = vld [vmem:[%s6874_s20 + $0x62c] ss:$56 sps:$4 sm:$0xff]   ;;  %5594 = vmatprep.subr.bf16.mxu1 %v6257_v3  ;;  %v6223_v3 = vld [vmem:[%s6874_s20 + $0x390] ss:$56 sps:$4 sm:$0xff]  }
  0x56   : > { %2670 = vmatmul.mubr.bf16.gmra.mxu1 %v6070_v59  ;;  %2516 = vmatprep.mubr.bf16.mxu0 %v6073_v60  ;;  %v6147_v59 = vld [vmem:[%s6874_s20 + $0x620] ss:$56 sps:$4 sm:$0xff]  }
  0x57   : > { %2677 = vmatprep.mubr.bf16.mxu1 %v6075_v63  ;;  %v6148_v60 = vld [vmem:[%s6874_s20 + $0x628] ss:$56 sps:$4 sm:$0xff]  }
  0x58   : > { %v6159_v63 = vld [vmem:[%s6874_s20 + $0x690] ss:$56 sps:$4 sm:$0xff]  }
  0x5d   : > { %2517 = vmatmul.mubr.bf16.gmra.mxu0 %v6077_v0  ;;  %v6160_v0 = vld [vmem:[%s6874_s20 + $0x698] ss:$56 sps:$4 sm:$0xff]  }
  0x5e   : > { %2678 = vmatmul.mubr.bf16.gmra.mxu1 %v6078_v1  ;;  %2524 = vmatprep.mubr.bf16.mxu0 %v6079_v2  ;;  %v6166_v1 = vld [vmem:[%s6874_s20 + $0x14] ss:$56 sps:$4 sm:$0xff]  }
  0x5f   : > { %2685 = vmatprep.mubr.bf16.mxu1 %v6081_v5  ;;  %v6171_v2 = vld [vmem:[%s6874_s20 + $0x1c] ss:$56 sps:$4 sm:$0xff]   ;;  %v6169_v5 = vld [vmem:[%s6874_s20 + $0x18] ss:$56 sps:$4 sm:$0xff]  }
  0x65   : > { %2525 = vmatmul.mubr.bf16.gmra.mxu0 %v6083_v6  ;;  %v6172_v6 = vld [vmem:[%s8334_s1 + $0x238] sm:$0xff]  }
  0x66   : > { %2686 = vmatmul.mubr.bf16.gmra.mxu1 %v6084_v7  ;;  %2532 = vmatprep.mubr.bf16.mxu0 %v6087_v8  ;;  %v6173_v7 = vld [vmem:[%s6874_s20 + $0x84] ss:$56 sps:$4 sm:$0xff]  }
  0x67   : > { %2693 = vmatprep.mubr.bf16.mxu1 %v6089_v10  ;;  %v6176_v8 = vld [vmem:[%s6874_s20 + $0x8c] ss:$56 sps:$4 sm:$0xff]   ;;  %v6258_v10 = vld [vmem:[%s8334_s1 + $0x2b8] sm:$0xff]  }
  0x6d   : > { %2533 = vmatmul.mubr.bf16.gmra.mxu0 %v6091_v15  ;;  %v6178_v15 = vld [vmem:[%s6874_s20 + $0x88] ss:$56 sps:$4 sm:$0xff]  }
  0x6e   : > { %2694 = vmatmul.mubr.bf16.gmra.mxu1 %v6092_v17  ;;  %2540 = vmatprep.mubr.bf16.mxu0 %v6093_v18  ;;  %v6263_v17 = vld [vmem:[%s8334_s1 + $0x2b0] sm:$0xff]   ;;  %v6267_v18 = vld [vmem:[%s8334_s1 + $0x2e8] sm:$0xff]  }
  0x6f   : > { %2701 = vmatprep.mubr.bf16.mxu1 %v6095_v19  ;;  %v6183_v19 = vld [vmem:[%s6874_s20 + $0xfc] ss:$56 sps:$4 sm:$0xff]  }
  0x75   : > { %2541 = vmatmul.mubr.bf16.gmra.mxu0 %v6097_v24  ;;  %v6181_v24 = vld [vmem:[%s6874_s20 + $0xf0] ss:$56 sps:$4 sm:$0xff]  }
  0x76   : > { %2702 = vmatmul.mubr.bf16.gmra.mxu1 %v6098_v26  ;;  %2548 = vmatprep.mubr.bf16.mxu0 %v6101_v27  ;;  %v6224_v26 = vld [vmem:[%s8334_s1 + $0x258] sm:$0xff]  }
  0x77   : > { %2709 = vmatprep.mubr.bf16.mxu1 %v6103_v29  ;;  %v6186_v27 = vld [vmem:[%s6874_s20 + $0xf8] ss:$56 sps:$4 sm:$0xff]   ;;  %v6273_v29 = vld [vmem:[%s8334_s1 + $0x2a0] sm:$0xff]  }
  0x7d   : > { %2549 = vmatmul.mubr.bf16.gmra.mxu0 %v6105_v34  ;;  %v6280_v34 = vld [vmem:[%s8334_s1 + $0x298] sm:$0xff]  }
  0x7e   : > { %2710 = vmatmul.mubr.bf16.gmra.mxu1 %v6106_v35  ;;  %2556 = vmatprep.mubr.bf16.mxu0 %v6107_v38  ;;  %v6281_v35 = vld [vmem:[%s8334_s1 + $0x2d0] sm:$0xff]   ;;  %v6192_v38 = vld [vmem:[%s6874_s20 + $0x168] ss:$56 sps:$4 sm:$0xff]  }
  0x7f   : > { %2717 = vmatprep.mubr.bf16.mxu1 %v6109_v39  ;;  %v6193_v39 = vld [vmem:[%s6874_s20 + $0x1d4] ss:$56 sps:$4 sm:$0xff]  }
  0x85   : > { %2557 = vmatmul.mubr.bf16.gmra.mxu0 %v6111_v43  ;;  %v6197_v43 = vld [vmem:[%s6874_s20 + $0x1dc] ss:$56 sps:$4 sm:$0xff]  }
  0x86   : > { %2718 = vmatmul.mubr.bf16.gmra.mxu1 %v6112_v44  ;;  %2564 = vmatprep.mubr.bf16.mxu0 %v6115_v45  ;;  %v6256_v44 = vld [vmem:[%s8334_s1 + $0x208] sm:$0xff]   ;;  %v6274_v45 = vld [vmem:[%s8334_s1 + $0x240] sm:$0xff]  }
  0x87   : > { %2725 = vmatprep.mubr.bf16.mxu1 %v6117_v46  ;;  %v6290_v46 = vld [vmem:[%s8334_s1 + $0x288] sm:$0xff]  }
  0x8d   : > { %2565 = vmatmul.mubr.bf16.gmra.mxu0 %v6119_v47  ;;  %v6291_v47 = vld [vmem:[%s8334_s1 + $0x2c0] sm:$0xff]  }
  0x8e   : > { %2726 = vmatmul.mubr.bf16.gmra.mxu1 %v6120_v48  ;;  %2572 = vmatprep.mubr.bf16.mxu0 %v6121_v49  ;;  %v6195_v48 = vld [vmem:[%s6874_s20 + $0x1d0] ss:$56 sps:$4 sm:$0xff]   ;;  %v6278_v49 = vld [vmem:[%s8334_s1 + $0x200] sm:$0xff]  }
  0x8f   : > { %2733 = vmatprep.mubr.bf16.mxu1 %v6123_v50  ;;  %v6295_v50 = vld [vmem:[%s8334_s1 + $0x280] sm:$0xff]  }
  0x95   : > { %2573 = vmatmul.mubr.bf16.gmra.mxu0 %v6125_v51  ;;  %v6200_v51 = vld [vmem:[%s6874_s20 + $0x1d8] ss:$56 sps:$4 sm:$0xff]  }
  0x96   : > { %2734 = vmatmul.mubr.bf16.gmra.mxu1 %v6126_v52  ;;  %2580 = vmatprep.mubr.bf16.mxu0 %v6132_v53  ;;  %v6201_v52 = vld [vmem:[%s6874_s20 + $0x244] ss:$56 sps:$4 sm:$0xff]  }
  0x97   : > { %2741 = vmatprep.mubr.bf16.mxu1 %v6134_v54  ;;  %v6204_v53 = vld [vmem:[%s6874_s20 + $0x24c] ss:$56 sps:$4 sm:$0xff]   ;;  %v6703_v54 = vmov 0  }
  0x9d   : > { %2581 = vmatmul.mubr.bf16.gmra.mxu0 %v6137_v55  ;;  %v6203_v55 = vld [vmem:[%s6874_s20 + $0x240] ss:$56 sps:$4 sm:$0xff]  }
  0x9e   : > { %2742 = vmatmul.mubr.bf16.gmra.mxu1 %v6138_v56  ;;  %2588 = vmatprep.mubr.bf16.mxu0 %v6142_v57  ;;  %v6206_v56 = vld [vmem:[%s6874_s20 + $0x248] ss:$56 sps:$4 sm:$0xff]   ;;  %v6207_v57 = vld [vmem:[%s6874_s20 + $0x2b4] ss:$56 sps:$4 sm:$0xff]  }
  0x9f   : > { %2749 = vmatprep.mubr.bf16.mxu1 %v6144_v58  ;;  %v6211_v58 = vld [vmem:[%s6874_s20 + $0x2bc] ss:$56 sps:$4 sm:$0xff]  }
  0xa5   : > { %2589 = vmatmul.mubr.bf16.gmra.mxu0 %v6147_v59  ;;  %v6209_v59 = vld [vmem:[%s6874_s20 + $0x2b0] ss:$56 sps:$4 sm:$0xff]  }
  0xa6   : > { %2750 = vmatmul.mubr.bf16.gmra.mxu1 %v6148_v60  ;;  %2596 = vmatprep.mubr.bf16.mxu0 %v6154_v61  ;;  %v6214_v60 = vld [vmem:[%s6874_s20 + $0x2b8] ss:$56 sps:$4 sm:$0xff]   ;;  %v6215_v61 = vld [vmem:[%s6874_s20 + $0x324] ss:$56 sps:$4 sm:$0xff]  }
  0xa7   : > { %2757 = vmatprep.mubr.bf16.mxu1 %v6156_v62  ;;  %v6218_v62 = vld [vmem:[%s6874_s20 + $0x32c] ss:$56 sps:$4 sm:$0xff]  }
  0xad   : > { %2597 = vmatmul.mubr.bf16.gmra.mxu0 %v6159_v63  ;;  %v6217_v63 = vld [vmem:[%s6874_s20 + $0x320] ss:$56 sps:$4 sm:$0xff]  }
  0xae   : > { %2758 = vmatmul.mubr.bf16.gmra.mxu1 %v6160_v0  ;;  %2798 = vmatprep.mubr.bf16.mxu0 %v6166_v1  ;;  %v6220_v0 = vld [vmem:[%s6874_s20 + $0x328] ss:$56 sps:$4 sm:$0xff]   ;;  %v6221_v1 = vld [vmem:[%s6874_s20 + $0x394] ss:$56 sps:$4 sm:$0xff]  }
  0xaf   : > { %2959 = vmatprep.mubr.bf16.mxu1 %v6171_v2  ;;  %v6225_v2 = vld [vmem:[%s6874_s20 + $0x39c] ss:$56 sps:$4 sm:$0xff]  }
  0xb5   : > { %2799 = vmatmul.mubr.bf16.vlgmr.msra.gmra.mxu0 %v6164_v4  ;;  %v6228_v4 = vld [vmem:[%s6874_s20 + $0x398] ss:$56 sps:$4 sm:$0xff]  }
  0xb6   : > { %5483 = vmatpush3.bf16.msra.mxu0 %v6172_v6  ;;  %2960 = vmatmul.mubr.bf16.vlgmr.msra.gmra.mxu1 %v6169_v5  ;;  %v6229_v5 = vld [vmem:[%s6874_s20 + $0x404] ss:$56 sps:$4 sm:$0xff]  }
  0xb7   : > { %2806 = vmatprep.mubr.bf16.mxu0 %v6173_v7  ;;  %2967 = vmatprep.mubr.bf16.mxu1 %v6176_v8  ;;  %v6232_v6 = vld [vmem:[%s6874_s20 + $0x40c] ss:$56 sps:$4 sm:$0xff]  }
  0xb8   : > { %5484 = vmatprep.subr.bf16.mxu0 %v6182_v9  ;;  %5595 = vmatpush3.bf16.msra.mxu1 %v6258_v10  ;;  %v6231_v10 = vld [vmem:[%s6874_s20 + $0x400] ss:$56 sps:$4 sm:$0xff]  }
  0xb9   : > { %5596 = vmatprep.subr.bf16.mxu1 %v6259_v11 }
  0xba   : > { %5485 = vmatpush3.bf16.msra.mxu0 %v6185_v12 }
  0xbb   : > { %5486 = vmatprep.subr.bf16.mxu0 %v6196_v14  ;;  %v6235_v14 = vld [vmem:[%s6874_s20 + $0x474] ss:$56 sps:$4 sm:$0xff]  }
  0xbc   : > { %5597 = vmatpush3.bf16.msra.mxu1 %v6263_v17 }
  0xbd   : > { %2807 = vmatmul.mubr.bf16.gmra.mxu0 %v6175_v13  ;;  %5598 = vmatprep.subr.bf16.mxu1 %v6267_v18  ;;  %v6234_v13 = vld [vmem:[%s6874_s20 + $0x408] ss:$56 sps:$4 sm:$0xff]  }
  0xbe   : > { %2968 = vmatmul.mubr.bf16.gmra.mxu1 %v6178_v15  ;;  %2814 = vmatprep.mubr.bf16.mxu0 %v6179_v16 }
  0xbf   : > { %2975 = vmatprep.mubr.bf16.mxu1 %v6183_v19  ;;  %5487 = vmatpush3.bf16.msra.mxu0 %v6199_v20  ;;  %v6239_v20 = vld [vmem:[%s6874_s20 + $0x47c] ss:$56 sps:$4 sm:$0xff]  }
  0xc0   : > { %5488 = vmatprep.subr.bf16.mxu0 %v6210_v21  ;;  %5599 = vmatpush3.bf16.msra.mxu1 %v6268_v22 }
  0xc1   : > { %5600 = vmatprep.subr.bf16.mxu1 %v6269_v23 }
  0xc3   : > { %5489 = vmatpush3.bf16.msra.mxu0 %v6213_v25 }
  0xc4   : > { %5490 = vmatprep.subr.bf16.mxu0 %v6224_v26  ;;  %5601 = vmatpush3.bf16.msra.mxu1 %v6273_v29 }
  0xc5   : > { %2815 = vmatmul.mubr.bf16.gmra.mxu0 %v6181_v24  ;;  %5602 = vmatprep.subr.bf16.mxu1 %v6279_v31 }
  0xc6   : > { %2976 = vmatmul.mubr.bf16.gmra.mxu1 %v6186_v27  ;;  %2822 = vmatprep.mubr.bf16.mxu0 %v6187_v28 }
  0xc7   : > { %2983 = vmatprep.mubr.bf16.mxu1 %v6190_v30  ;;  %5491 = vmatpush3.bf16.msra.mxu0 %v6227_v32  ;;  %v6237_v32 = vld [vmem:[%s6874_s20 + $0x470] ss:$56 sps:$4 sm:$0xff]  }
  0xc8   : > { %5492 = vmatprep.subr.bf16.mxu0 %v6238_v33  ;;  %5603 = vmatpush3.bf16.msra.mxu1 %v6280_v34  ;;  %v6242_v34 = vld [vmem:[%s6874_s20 + $0x478] ss:$56 sps:$4 sm:$0xff]  }
  0xc9   : > { %5604 = vmatprep.subr.bf16.mxu1 %v6281_v35  ;;  %v6243_v35 = vld [vmem:[%s6874_s20 + $0x4e4] ss:$56 sps:$4 sm:$0xff]  }
  0xcb   : > { %5493 = vmatpush3.bf16.msra.mxu0 %v6241_v37 }
  0xcc   : > { %5494 = vmatprep.subr.bf16.mxu0 %v6252_v40  ;;  %5605 = vmatpush3.bf16.msra.mxu1 %v6285_v41 }
  0xcd   : > { %2823 = vmatmul.mubr.bf16.gmra.mxu0 %v6189_v36  ;;  %5606 = vmatprep.subr.bf16.mxu1 %v6289_v42 }
  0xce   : > { %2984 = vmatmul.mubr.bf16.gmra.mxu1 %v6192_v38  ;;  %2830 = vmatprep.mubr.bf16.mxu0 %v6193_v39  ;;  %v6246_v38 = vld [vmem:[%s6874_s20 + $0x4ec] ss:$56 sps:$4 sm:$0xff]  }
  0xcf   : > { %2991 = vmatprep.mubr.bf16.mxu1 %v6197_v43  ;;  %5495 = vmatpush3.bf16.msra.mxu0 %v6256_v44 }
  0xd0   : > { %5496 = vmatprep.subr.bf16.mxu0 %v6274_v45  ;;  %5607 = vmatpush3.bf16.msra.mxu1 %v6290_v46 }
  0xd1   : > { %5608 = vmatprep.subr.bf16.mxu1 %v6291_v47 }
  0xd3   : > { %5497 = vmatpush3.bf16.msra.mxu0 %v6278_v49 }
  0xd4   : > { %5609 = vmatpush3.bf16.msra.mxu1 %v6295_v50  ;;  %3410 = vmatprep.subr.bf16.mxu0 %v6703_v54  ;;  %v6245_v50 = vld [vmem:[%s6874_s20 + $0x4e0] ss:$56 sps:$4 sm:$0xff]  }
  0xd5   : > { %2831 = vmatmul.mubr.bf16.gmra.mxu0 %v6195_v48 }
  0xd6   : > { %2992 = vmatmul.mubr.bf16.gmra.mxu1 %v6200_v51  ;;  %2838 = vmatprep.mubr.bf16.mxu0 %v6201_v52  ;;  %v6248_v52 = vld [vmem:[%s6874_s20 + $0x4e8] ss:$56 sps:$4 sm:$0xff]  }
  0xd7   : > { %2999 = vmatprep.mubr.bf16.mxu1 %v6204_v53  ;;  %v6251_v53 = vld [vmem:[%s6874_s20 + $0x554] ss:$56 sps:$4 sm:$0xff]  }
  0xdd   : > { %2839 = vmatmul.mubr.bf16.gmra.mxu0 %v6203_v55 }
  0xde   : > { %3000 = vmatmul.mubr.bf16.gmra.mxu1 %v6206_v56  ;;  %2846 = vmatprep.mubr.bf16.mxu0 %v6207_v57  ;;  %v6255_v57 = vld [vmem:[%s6874_s20 + $0x55c] ss:$56 sps:$4 sm:$0xff]  }
  0xdf   : > { %3007 = vmatprep.mubr.bf16.mxu1 %v6211_v58 }
  0xe5   : > { %2847 = vmatmul.mubr.bf16.gmra.mxu0 %v6209_v59 }
  0xe6   : > { %3008 = vmatmul.mubr.bf16.gmra.mxu1 %v6214_v60  ;;  %2854 = vmatprep.mubr.bf16.mxu0 %v6215_v61 }
  0xe7   : > { %3015 = vmatprep.mubr.bf16.mxu1 %v6218_v62 }
  0xed   : > { %2855 = vmatmul.mubr.bf16.gmra.mxu0 %v6217_v63 }
  0xee   : > { %3016 = vmatmul.mubr.bf16.gmra.mxu1 %v6220_v0  ;;  %2862 = vmatprep.mubr.bf16.mxu0 %v6221_v1 }
  0xef   : > { %3023 = vmatprep.mubr.bf16.mxu1 %v6225_v2 }
  0xf5   : > { %v5050_v7 = vpop.f32.mrf.mxu0  ;;  %2863 = vmatmul.mubr.bf16.gmra.mxu0 %v6223_v3 }
  0xf6   : > { %v5162_v8 = vpop.f32.mrf.mxu1  ;;  %3024 = vmatmul.mubr.bf16.gmra.mxu1 %v6228_v4  ;;  %2870 = vmatprep.mubr.bf16.mxu0 %v6229_v5  ;;  %v6249_v5 = vld [vmem:[%s6874_s20 + $0x550] ss:$56 sps:$4 sm:$0xff]  }
  0xf7   : > { %v5051_v9 = vpop.f32.mrf.mxu0  ;;  %3031 = vmatprep.mubr.bf16.mxu1 %v6232_v6 }
  0xf8   : > { %v5052_v11 = vadd.f32 %v5051_v9, %v5050_v7  ;;  %v5163_v12 = vpop.f32.mrf.mxu1  ;;  %v6253_v7 = vld [vmem:[%s6874_s20 + $0x558] ss:$56 sps:$4 sm:$0xff]  }
  0xf9   : > { %v5164_v15 = vadd.f32 %v5163_v12, %v5162_v8  ;;  %v5053_v16 = vpop.f32.mrf.mxu0  ;;  %v6262_v8 = vld [vmem:[%s6874_s20 + $0x5c4] ss:$56 sps:$4 sm:$0xff]  }
  0xfa   : > { %v5165_v17 = vpop.f32.mrf.mxu1 }
  0xfb   : > { %v7180_v18 = vadd.f32 %v5164_v15, %v5052_v11  ;;  %v5054_v19 = vpop.f32.mrf.mxu0  ;;  %v6266_v11 = vld [vmem:[%s6874_s20 + $0x5cc] ss:$56 sps:$4 sm:$0xff]  }
  0xfc   : > { %v5055_v21 = vadd.f32 %v5054_v19, %v5053_v16  ;;  %v5166_v22 = vpop.f32.mrf.mxu1 }
  0xfd   : > { %v5167_v23 = vadd.f32 %v5166_v22, %v5165_v17  ;;  %v5056_v24 = vpop.f32.mrf.mxu0  ;;  %2871 = vmatmul.mubr.bf16.gmra.mxu0 %v6231_v10 }
  0xfe   : > { %v5168_v25 = vpop.f32.mrf.mxu1  ;;  %3032 = vmatmul.mubr.bf16.gmra.mxu1 %v6234_v13  ;;  %2878 = vmatprep.mubr.bf16.mxu0 %v6235_v14 }
  0xff   : > { %v7183_v26 = vadd.f32 %v5167_v23, %v5055_v21  ;;  %v5057_v27 = vpop.f32.mrf.mxu0  ;;  %3039 = vmatprep.mubr.bf16.mxu1 %v6239_v20 }
 0x100   : > { %v5058_v28 = vadd.f32 %v5057_v27, %v5056_v24  ;;  %v5169_v29 = vpop.f32.mrf.mxu1  ;;  %v6260_v24 = vld [vmem:[%s6874_s20 + $0x5c0] ss:$56 sps:$4 sm:$0xff]  }
 0x101   : > { %v5170_v30 = vadd.f32 %v5169_v29, %v5168_v25  ;;  %v5059_v31 = vpop.f32.mrf.mxu0  ;;  %v6264_v27 = vld [vmem:[%s6874_s20 + $0x5c8] ss:$56 sps:$4 sm:$0xff]  }
 0x102   : > { %v5171_v33 = vpop.f32.mrf.mxu1 }
 0x103   : > { %v7188_v36 = vadd.f32 %v5170_v30, %v5058_v28  ;;  %v5060_v37 = vpop.f32.mrf.mxu0  ;;  %v6272_v28 = vld [vmem:[%s6874_s20 + $0x634] ss:$56 sps:$4 sm:$0xff]  }
 0x104   : > { %v5061_v39 = vadd.f32 %v5060_v37, %v5059_v31  ;;  %v5172_v40 = vpop.f32.mrf.mxu1  ;;  %v6277_v31 = vld [vmem:[%s6874_s20 + $0x63c] ss:$56 sps:$4 sm:$0xff]  }
 0x105   : > { %v5173_v41 = vadd.f32 %v5172_v40, %v5171_v33  ;;  %v5062_v42 = vpop.f32.mrf.mxu0  ;;  %2879 = vmatmul.mubr.bf16.gmra.mxu0 %v6237_v32 }
 0x106   : > { %v5174_v43 = vpop.f32.mrf.mxu1  ;;  %3040 = vmatmul.mubr.bf16.gmra.mxu1 %v6242_v34  ;;  %2886 = vmatprep.mubr.bf16.mxu0 %v6243_v35 }
 0x107   : > { %v7191_v44 = vadd.f32 %v5173_v41, %v5061_v39  ;;  %v5063_v45 = vpop.f32.mrf.mxu0  ;;  %3047 = vmatprep.mubr.bf16.mxu1 %v6246_v38 }
 0x108   : > { %v5064_v46 = vadd.f32 %v5063_v45, %v5062_v42  ;;  %v5175_v47 = vpop.f32.mrf.mxu1  ;;  %v6270_v45 = vld [vmem:[%s6874_s20 + $0x630] ss:$56 sps:$4 sm:$0xff]  }
 0x109   : > { %v5176_v48 = vadd.f32 %v5175_v47, %v5174_v43  ;;  %v5065_v49 = vpop.f32.mrf.mxu0  ;;  %v6275_v47 = vld [vmem:[%s6874_s20 + $0x638] ss:$56 sps:$4 sm:$0xff]  }
 0x10a   : > { %v5177_v51 = vpop.f32.mrf.mxu1 }
 0x10b   : > { %v7196_v55 = vadd.f32 %v5176_v48, %v5064_v46  ;;  %v5066_v56 = vpop.f32.mrf.mxu0  ;;  %v6284_v48 = vld [vmem:[%s6874_s20 + $0x6a4] ss:$56 sps:$4 sm:$0xff]  }
 0x10c   : > { %v5067_v58 = vadd.f32 %v5066_v56, %v5065_v49  ;;  %v5178_v59 = vpop.f32.mrf.mxu1 }
 0x10d   : > { %v5179_v60 = vadd.f32 %v5178_v59, %v5177_v51  ;;  %v5068_v61 = vpop.f32.mrf.mxu0  ;;  %2887 = vmatmul.mubr.bf16.gmra.mxu0 %v6245_v50  ;;  %v6288_v51 = vld [vmem:[%s6874_s20 + $0x6ac] ss:$56 sps:$4 sm:$0xff]  }
 0x10e   : > { %v5180_v62 = vpop.f32.mrf.mxu1  ;;  %3048 = vmatmul.mubr.bf16.gmra.mxu1 %v6248_v52  ;;  %2894 = vmatprep.mubr.bf16.mxu0 %v6251_v53 }
 0x10f   : > { %v7199_v63 = vadd.f32 %v5179_v60, %v5067_v58  ;;  %v5069_v0 = vpop.f32.mrf.mxu0  ;;  %3055 = vmatprep.mubr.bf16.mxu1 %v6255_v57 }
 0x110   : > { %v5070_v1 = vadd.f32 %v5069_v0, %v5068_v61  ;;  %v5181_v2 = vpop.f32.mrf.mxu1 }
 0x111   : > { %v5182_v3 = vadd.f32 %v5181_v2, %v5180_v62  ;;  %v5071_v4 = vpop.f32.mrf.mxu0  ;;  %v6282_v2 = vld [vmem:[%s6874_s20 + $0x6a0] ss:$56 sps:$4 sm:$0xff]  }
 0x112   : > { %v5183_v6 = vpop.f32.mrf.mxu1 }
 0x113   : > { %v7204_v9 = vadd.f32 %v5182_v3, %v5070_v1  ;;  %v5072_v10 = vpop.f32.mrf.mxu0 }
 0x114   : > { %v5073_v12 = vadd.f32 %v5072_v10, %v5071_v4  ;;  %v5184_v13 = vpop.f32.mrf.mxu1  ;;  %v6286_v4 = vld [vmem:[%s6874_s20 + $0x6a8] ss:$56 sps:$4 sm:$0xff]  }
 0x115   : > { %v5185_v14 = vadd.f32 %v5184_v13, %v5183_v6  ;;  %v5074_v15 = vpop.f32.mrf.mxu0  ;;  %2895 = vmatmul.mubr.bf16.gmra.mxu0 %v6249_v5  ;;  %v6294_v5 = vld [vmem:[%s6874_s20 + $0x24] ss:$56 sps:$4 sm:$0xff]  }
 0x116   : > { %v5186_v16 = vpop.f32.mrf.mxu1  ;;  %3056 = vmatmul.mubr.bf16.gmra.mxu1 %v6253_v7  ;;  %2902 = vmatprep.mubr.bf16.mxu0 %v6262_v8  ;;  %v6298_v8 = vld [vmem:[%s6874_s20 + $0x2c] ss:$56 sps:$4 sm:$0xff]  }
 0x117   : > { %v7207_v17 = vadd.f32 %v5185_v14, %v5073_v12  ;;  %v5075_v19 = vpop.f32.mrf.mxu0  ;;  %3063 = vmatprep.mubr.bf16.mxu1 %v6266_v11 }
 0x118   : > { %v5076_v20 = vadd.f32 %v5075_v19, %v5074_v15  ;;  %v5187_v21 = vpop.f32.mrf.mxu1 }
 0x119   : > { %v5188_v22 = vadd.f32 %v5187_v21, %v5186_v16  ;;  %v5077_v23 = vpop.f32.mrf.mxu0 }
 0x11a   : > { %v5189_v25 = vpop.f32.mrf.mxu1 }
 0x11b   : > { %v7212_v29 = vadd.f32 %v5188_v22, %v5076_v20  ;;  %v5078_v30 = vpop.f32.mrf.mxu0 }
 0x11c   : > { %v5079_v32 = vadd.f32 %v5078_v30, %v5077_v23  ;;  %v5190_v33 = vpop.f32.mrf.mxu1  ;;  %v6292_v23 = vld [vmem:[%s6874_s20 + $0x20] ss:$56 sps:$4 sm:$0xff]  }
 0x11d   : > { %v5191_v34 = vadd.f32 %v5190_v33, %v5189_v25  ;;  %v5080_v35 = vpop.f32.mrf.mxu0  ;;  %2903 = vmatmul.mubr.bf16.gmra.mxu0 %v6260_v24  ;;  %v6296_v25 = vld [vmem:[%s6874_s20 + $0x28] ss:$56 sps:$4 sm:$0xff]  }
 0x11e   : > { %v5192_v37 = vpop.f32.mrf.mxu1  ;;  %3064 = vmatmul.mubr.bf16.gmra.mxu1 %v6264_v27  ;;  %2910 = vmatprep.mubr.bf16.mxu0 %v6272_v28  ;;  %v6299_v27 = vld [vmem:[%s8334_s1 + $0x338] sm:$0xff]  }
 0x11f   : > { %v7215_v38 = vadd.f32 %v5191_v34, %v5079_v32  ;;  %v5081_v39 = vpop.f32.mrf.mxu0  ;;  %3071 = vmatprep.mubr.bf16.mxu1 %v6277_v31  ;;  %v6302_v31 = vld [vmem:[%s6874_s20 + $0x94] ss:$56 sps:$4 sm:$0xff]  }
 0x120   : > { %v5082_v40 = vadd.f32 %v5081_v39, %v5080_v35  ;;  %v5193_v41 = vpop.f32.mrf.mxu1  ;;  %v6305_v32 = vld [vmem:[%s6874_s20 + $0x9c] ss:$56 sps:$4 sm:$0xff]  }
 0x121   : > { %v5194_v42 = vadd.f32 %v5193_v41, %v5192_v37  ;;  %v5083_v43 = vpop.f32.mrf.mxu0 }
 0x122   : > { %v5195_v46 = vpop.f32.mrf.mxu1 }
 0x123   : > { %v7220_v49 = vadd.f32 %v5194_v42, %v5082_v40  ;;  %v5084_v50 = vpop.f32.mrf.mxu0  ;;  %v6306_v40 = vld [vmem:[%s8334_s1 + $0x330] sm:$0xff]  }
 0x124   : > { %v5085_v52 = vadd.f32 %v5084_v50, %v5083_v43  ;;  %v5196_v53 = vpop.f32.mrf.mxu1 }
 0x125   : > { %v5197_v56 = vadd.f32 %v5196_v53, %v5195_v46  ;;  %v5086_v57 = vpop.f32.mrf.mxu0  ;;  %2911 = vmatmul.mubr.bf16.gmra.mxu0 %v6270_v45 }
 0x126   : > { %v5198_v58 = vpop.f32.mrf.mxu1  ;;  %3072 = vmatmul.mubr.bf16.gmra.mxu1 %v6275_v47  ;;  %2918 = vmatprep.mubr.bf16.mxu0 %v6284_v48  ;;  %v6300_v48 = vld [vmem:[%s6874_s20 + $0x90] ss:$56 sps:$4 sm:$0xff]  }
 0x127   : > { %v7223_v59 = vadd.f32 %v5197_v56, %v5085_v52  ;;  %v5087_v60 = vpop.f32.mrf.mxu0  ;;  %3079 = vmatprep.mubr.bf16.mxu1 %v6288_v51  ;;  %v6303_v51 = vld [vmem:[%s6874_s20 + $0x98] ss:$56 sps:$4 sm:$0xff]   ;;  %v6309_v52 = vld [vmem:[%s6874_s20 + $0x104] ss:$56 sps:$4 sm:$0xff]  }
 0x128   : > { %v5088_v61 = vadd.f32 %v5087_v60, %v5086_v57  ;;  %v5199_v62 = vpop.f32.mrf.mxu1  ;;  %v6312_v57 = vld [vmem:[%s6874_s20 + $0x10c] ss:$56 sps:$4 sm:$0xff]  }
 0x129   : > { %v5200_v0 = vadd.f32 %v5199_v62, %v5198_v58  ;;  %v5089_v1 = vpop.f32.mrf.mxu0  ;;  %v6316_v58 = vld [vmem:[%s8334_s1 + $0x328] sm:$0xff]  }
 0x12a   : > { %v5201_v3 = vpop.f32.mrf.mxu1 }
 0x12b   : > { %v7228_v6 = vadd.f32 %v5200_v0, %v5088_v61  ;;  %v5090_v7 = vpop.f32.mrf.mxu0 }
 0x12c   : > { %v5091_v10 = vadd.f32 %v5090_v7, %v5089_v1  ;;  %v5202_v11 = vpop.f32.mrf.mxu1 }
 0x12d   : > { %v5203_v12 = vadd.f32 %v5202_v11, %v5201_v3  ;;  %v5092_v13 = vpop.f32.mrf.mxu0  ;;  %2919 = vmatmul.mubr.bf16.gmra.mxu0 %v6282_v2  ;;  %v6307_v11 = vld [vmem:[%s6874_s20 + $0x100] ss:$56 sps:$4 sm:$0xff]  }
 0x12e   : > { %v5204_v14 = vpop.f32.mrf.mxu1  ;;  %3080 = vmatmul.mubr.bf16.gmra.mxu1 %v6286_v4  ;;  %3120 = vmatprep.mubr.bf16.mxu0 %v6294_v5  ;;  %v6326_v4 = vld [vmem:[%s8334_s1 + $0x320] sm:$0xff]  }
 0x12f   : > { %v7231_v15 = vadd.f32 %v5203_v12, %v5091_v10  ;;  %v5093_v16 = vpop.f32.mrf.mxu0  ;;  %3281 = vmatprep.mubr.bf16.mxu1 %v6298_v8 }
 0x130   : > { %v5094_v19 = vadd.f32 %v5093_v16, %v5092_v13  ;;  %v5205_v20 = vpop.f32.mrf.mxu1  ;;  %v6310_v13 = vld [vmem:[%s6874_s20 + $0x108] ss:$56 sps:$4 sm:$0xff]  }
 0x131   : > { %v5206_v21 = vadd.f32 %v5205_v20, %v5204_v14  ;;  %v5095_v22 = vpop.f32.mrf.mxu0  ;;  %v6315_v14 = vld [vmem:[%s6874_s20 + $0x174] ss:$56 sps:$4 sm:$0xff]  }
 0x132   : > { %v5207_v24 = vpop.f32.mrf.mxu1  ;;  %v6319_v20 = vld [vmem:[%s6874_s20 + $0x17c] ss:$56 sps:$4 sm:$0xff]  }
 0x133   : > { %v7238_v28 = vadd.f32 %v5206_v21, %v5094_v19  ;;  %v5096_v30 = vpop.f32.mrf.mxu0  ;;  %v6333_v21 = vld [vmem:[%s8334_s1 + $0x318] sm:$0xff]  }
 0x134   : > { %v5097_v33 = vadd.f32 %v5096_v30, %v5095_v22  ;;  %v5208_v34 = vpop.f32.mrf.mxu1 }
 0x135   : > { %v5209_v35 = vadd.f32 %v5208_v34, %v5207_v24  ;;  %v5098_v37 = vpop.f32.mrf.mxu0  ;;  %3121 = vmatmul.mubr.bf16.vlgmr.msra.gmra.mxu0 %v6292_v23 }
 0x136   : > { %v5210_v39 = vpop.f32.mrf.mxu1  ;;  %3411 = vmatpush1.bf16.msra.mxu0 %v6299_v27  ;;  %3282 = vmatmul.mubr.bf16.vlgmr.msra.gmra.mxu1 %v6296_v25 }
 0x137   : > { %v7245_v41 = vadd.f32 %v5209_v35, %v5097_v33  ;;  %v5099_v42 = vpop.f32.mrf.mxu0  ;;  %3128 = vmatprep.mubr.bf16.mxu0 %v6302_v31  ;;  %3289 = vmatprep.mubr.bf16.mxu1 %v6305_v32  ;;  %v6343_v32 = vld [vmem:[%s8334_s1 + $0x310] sm:$0xff]  }
 0x138   : > { %v5100_v43 = vadd.f32 %v5099_v42, %v5098_v37  ;;  %v5211_v45 = vpop.f32.mrf.mxu1  ;;  %3412 = vmatprep.subr.bf16.mxu0 %v6703_v54  ;;  %v6317_v42 = vld [vmem:[%s6874_s20 + $0x178] ss:$56 sps:$4 sm:$0xff]  }
 0x139   : > { %v5212_v46 = vadd.f32 %v5211_v45, %v5210_v39  ;;  %v5101_v47 = vpop.f32.mrf.mxu0  ;;  %v6313_v39 = vld [vmem:[%s6874_s20 + $0x170] ss:$56 sps:$4 sm:$0xff]  }
 0x13a   : > { %v5213_v50 = vpop.f32.mrf.mxu1  ;;  %3413 = vmatpush1.bf16.msra.mxu0 %v6306_v40 }
 0x13b   : > { %v7251_v53 = vadd.f32 %v5212_v46, %v5100_v43  ;;  %v5102_v56 = vpop.f32.mrf.mxu0  ;;  %3414 = vmatprep.subr.bf16.mxu0 %v6703_v54  ;;  %v6322_v43 = vld [vmem:[%s6874_s20 + $0x1e4] ss:$56 sps:$4 sm:$0xff]  }
 0x13c   : > { %v5103_v60 = vadd.f32 %v5102_v56, %v5101_v47  ;;  %v5214_v61 = vpop.f32.mrf.mxu1  ;;  %v6325_v47 = vld [vmem:[%s6874_s20 + $0x1ec] ss:$56 sps:$4 sm:$0xff]  }
 0x13d   : > { %v5215_v62 = vadd.f32 %v5214_v61, %v5213_v50  ;;  %v5104_v0 = vpop.f32.mrf.mxu0  ;;  %3129 = vmatmul.mubr.bf16.gmra.mxu0 %v6300_v48  ;;  %v6353_v48 = vld [vmem:[%s8334_s1 + $0x308] sm:$0xff]   ;;  %v6360_v61 = vld [vmem:[%s8334_s1 + $0x300] sm:$0xff]  }
 0x13e   : > { %v5216_v1 = vpop.f32.mrf.mxu1  ;;  %3290 = vmatmul.mubr.bf16.gmra.mxu1 %v6303_v51  ;;  %3136 = vmatprep.mubr.bf16.mxu0 %v6309_v52 }
 0x13f   : > { %v7258_v2 = vadd.f32 %v5215_v62, %v5103_v60  ;;  %v5105_v3 = vpop.f32.mrf.mxu0  ;;  %3297 = vmatprep.mubr.bf16.mxu1 %v6312_v57  ;;  %3415 = vmatpush1.bf16.msra.mxu0 %v6316_v58 }
 0x140   : > { %v5106_v5 = vadd.f32 %v5105_v3, %v5104_v0  ;;  %v5217_v7 = vpop.f32.mrf.mxu1  ;;  %3416 = vmatprep.subr.bf16.mxu0 %v6703_v54 }
 0x141   : > { %v5218_v8 = vadd.f32 %v5217_v7, %v5216_v1  ;;  %v5107_v10 = vpop.f32.mrf.mxu0  ;;  %v6323_v7 = vld [vmem:[%s6874_s20 + $0x1e8] ss:$56 sps:$4 sm:$0xff]  }
 0x142   : > { %v5219_v12 = vpop.f32.mrf.mxu1 }
 0x143   : > { %v7267_v16 = vadd.f32 %v5218_v8, %v5106_v5  ;;  %v5108_v19 = vpop.f32.mrf.mxu0  ;;  %3417 = vmatpush1.bf16.msra.mxu0 %v6326_v4  ;;  %v6320_v4 = vld [vmem:[%s6874_s20 + $0x1e0] ss:$56 sps:$4 sm:$0xff]   ;;  %v6329_v8 = vld [vmem:[%s6874_s20 + $0x254] ss:$56 sps:$4 sm:$0xff]  }
 0x144   : > { %v5109_v22 = vadd.f32 %v5108_v19, %v5107_v10  ;;  %v5220_v23 = vpop.f32.mrf.mxu1  ;;  %3418 = vmatprep.subr.bf16.mxu0 %v6703_v54 }
 0x145   : > { %v5221_v24 = vadd.f32 %v5220_v23, %v5219_v12  ;;  %v5110_v25 = vpop.f32.mrf.mxu0  ;;  %3137 = vmatmul.mubr.bf16.gmra.mxu0 %v6307_v11  ;;  %v6332_v12 = vld [vmem:[%s6874_s20 + $0x25c] ss:$56 sps:$4 sm:$0xff]  }
 0x146   : > { %v5222_v27 = vpop.f32.mrf.mxu1  ;;  %3298 = vmatmul.mubr.bf16.gmra.mxu1 %v6310_v13  ;;  %3144 = vmatprep.mubr.bf16.mxu0 %v6315_v14  ;;  %v6370_v13 = vld [vmem:[%s8334_s1 + $0x358] sm:$0xff]  }
 0x147   : > { %v7274_v30 = vadd.f32 %v5221_v24, %v5109_v22  ;;  %v5111_v31 = vpop.f32.mrf.mxu0  ;;  %3305 = vmatprep.mubr.bf16.mxu1 %v6319_v20  ;;  %3419 = vmatpush1.bf16.msra.mxu0 %v6333_v21 }
 0x148   : > { %v5112_v33 = vadd.f32 %v5111_v31, %v5110_v25  ;;  %v5223_v34 = vpop.f32.mrf.mxu1  ;;  %3420 = vmatprep.subr.bf16.mxu0 %v6703_v54  ;;  %v6380_v25 = vld [vmem:[%s8334_s1 + $0x350] sm:$0xff]  }
 0x149   : > { %v5224_v35 = vadd.f32 %v5223_v34, %v5222_v27  ;;  %v5113_v37 = vpop.f32.mrf.mxu0  ;;  %v6327_v34 = vld [vmem:[%s6874_s20 + $0x250] ss:$56 sps:$4 sm:$0xff]  }
 0x14a   : > { %v5225_v40 = vpop.f32.mrf.mxu1 }
 0x14b   : > { %v7283_v45 = vadd.f32 %v5224_v35, %v5112_v33  ;;  %v5114_v46 = vpop.f32.mrf.mxu0  ;;  %3421 = vmatpush1.bf16.msra.mxu0 %v6343_v32 }
 0x14c   : > { %v5115_v50 = vadd.f32 %v5114_v46, %v5113_v37  ;;  %v5226_v51 = vpop.f32.mrf.mxu1  ;;  %3422 = vmatprep.subr.bf16.mxu0 %v6703_v54  ;;  %v6330_v37 = vld [vmem:[%s6874_s20 + $0x258] ss:$56 sps:$4 sm:$0xff]   ;;  %v6387_v46 = vld [vmem:[%s8334_s1 + $0x348] sm:$0xff]  }
 0x14d   : > { %v5227_v52 = vadd.f32 %v5226_v51, %v5225_v40  ;;  %v5116_v56 = vpop.f32.mrf.mxu0  ;;  %3145 = vmatmul.mubr.bf16.gmra.mxu0 %v6313_v39  ;;  %v6336_v39 = vld [vmem:[%s6874_s20 + $0x2c4] ss:$56 sps:$4 sm:$0xff]  }
 0x14e   : > { %v5228_v57 = vpop.f32.mrf.mxu1  ;;  %3306 = vmatmul.mubr.bf16.gmra.mxu1 %v6317_v42  ;;  %3152 = vmatprep.mubr.bf16.mxu0 %v6322_v43  ;;  %v6339_v43 = vld [vmem:[%s6874_s20 + $0x2cc] ss:$56 sps:$4 sm:$0xff]  }
 0x14f   : > { %v7290_v58 = vadd.f32 %v5227_v52, %v5115_v50  ;;  %v5117_v60 = vpop.f32.mrf.mxu0  ;;  %3313 = vmatprep.mubr.bf16.mxu1 %v6325_v47  ;;  %3423 = vmatpush1.bf16.msra.mxu0 %v6353_v48 }
 0x150   : > { %v5118_v62 = vadd.f32 %v5117_v60, %v5116_v56  ;;  %v5229_v0 = vpop.f32.mrf.mxu1  ;;  %3424 = vmatprep.subr.bf16.mxu0 %v6703_v54  ;;  %v6397_v60 = vld [vmem:[%s8334_s1 + $0x340] sm:$0xff]  }
 0x151   : > { %v5230_v1 = vadd.f32 %v5229_v0, %v5228_v57  ;;  %v5119_v3 = vpop.f32.mrf.mxu0 }
 0x152   : > { %v5231_v5 = vpop.f32.mrf.mxu1 }
 0x153   : > { %v7299_v10 = vadd.f32 %v5230_v1, %v5118_v62  ;;  %v5120_v11 = vpop.f32.mrf.mxu0  ;;  %3425 = vmatpush1.bf16.msra.mxu0 %v6360_v61 }
 0x154   : > { %v5121_v14 = vadd.f32 %v5120_v11, %v5119_v3  ;;  %v5232_v19 = vpop.f32.mrf.mxu1  ;;  %3434 = vmatprep.subr.bf16.mxu0 %v6703_v54  ;;  %v6334_v3 = vld [vmem:[%s6874_s20 + $0x2c0] ss:$56 sps:$4 sm:$0xff]  }
 0x155   : > { %v5233_v20 = vadd.f32 %v5232_v19, %v5231_v5  ;;  %v5122_v21 = vpop.f32.mrf.mxu0  ;;  %3153 = vmatmul.mubr.bf16.gmra.mxu0 %v6320_v4  ;;  %v6337_v5 = vld [vmem:[%s6874_s20 + $0x2c8] ss:$56 sps:$4 sm:$0xff]  }
 0x156   : > { %v5234_v22 = vpop.f32.mrf.mxu1  ;;  %3314 = vmatmul.mubr.bf16.gmra.mxu1 %v6323_v7  ;;  %3160 = vmatprep.mubr.bf16.mxu0 %v6329_v8  ;;  %v6342_v7 = vld [vmem:[%s6874_s20 + $0x334] ss:$56 sps:$4 sm:$0xff]  }
 0x157   : > { %v7306_v23 = vadd.f32 %v5233_v20, %v5121_v14  ;;  %v5123_v24 = vpop.f32.mrf.mxu0  ;;  %3321 = vmatprep.mubr.bf16.mxu1 %v6332_v12  ;;  %3435 = vmatpush2.bf16.msra.mxu0 %v6370_v13  ;;  %v6346_v12 = vld [vmem:[%s6874_s20 + $0x33c] ss:$56 sps:$4 sm:$0xff]  }
 0x158   : > { %v5124_v27 = vadd.f32 %v5123_v24, %v5122_v21  ;;  %v5235_v31 = vpop.f32.mrf.mxu1  ;;  %3436 = vmatprep.subr.bf16.mxu0 %v6703_v54 }
 0x159   : > { %v5236_v32 = vadd.f32 %v5235_v31, %v5234_v22  ;;  %v5125_v33 = vpop.f32.mrf.mxu0 }
 0x15a   : > { %v5237_v35 = vpop.f32.mrf.mxu1 }
 0x15b   : > { %v7315_v40 = vadd.f32 %v5236_v32, %v5124_v27  ;;  %v5126_v42 = vpop.f32.mrf.mxu0  ;;  %3437 = vmatpush2.bf16.msra.mxu0 %v6380_v25  ;;  %v6340_v32 = vld [vmem:[%s6874_s20 + $0x330] ss:$56 sps:$4 sm:$0xff]  }
 0x15c   : > { %v5127_v47 = vadd.f32 %v5126_v42, %v5125_v33  ;;  %v5238_v48 = vpop.f32.mrf.mxu1  ;;  %3438 = vmatprep.subr.bf16.mxu0 %v6703_v54  ;;  %v6352_v42 = vld [vmem:[%s6874_s20 + $0x3ac] ss:$56 sps:$4 sm:$0xff]  }
 0x15d   : > { %v5239_v50 = vadd.f32 %v5238_v48, %v5237_v35  ;;  %v5128_v51 = vpop.f32.mrf.mxu0  ;;  %3161 = vmatmul.mubr.bf16.gmra.mxu0 %v6327_v34  ;;  %v6344_v34 = vld [vmem:[%s6874_s20 + $0x338] ss:$56 sps:$4 sm:$0xff]   ;;  %v6349_v35 = vld [vmem:[%s6874_s20 + $0x3a4] ss:$56 sps:$4 sm:$0xff]  }
 0x15e   : > { %v5240_v52 = vpop.f32.mrf.mxu1  ;;  %3322 = vmatmul.mubr.bf16.gmra.mxu1 %v6330_v37  ;;  %3168 = vmatprep.mubr.bf16.mxu0 %v6336_v39 }
 0x15f   : > { %v7322_v56 = vadd.f32 %v5239_v50, %v5127_v47  ;;  %v5129_v57 = vpop.f32.mrf.mxu0  ;;  %3329 = vmatprep.mubr.bf16.mxu1 %v6339_v43  ;;  %3439 = vmatpush2.bf16.msra.mxu0 %v6387_v46 }
 0x160   : > { %v5130_v61 = vadd.f32 %v5129_v57, %v5128_v51  ;;  %v5241_v62 = vpop.f32.mrf.mxu1  ;;  %3440 = vmatprep.subr.bf16.mxu0 %v6703_v54 }
 0x161   : > { %v5242_v0 = vadd.f32 %v5241_v62, %v5240_v52  ;;  %v5131_v1 = vpop.f32.mrf.mxu0 }
 0x162   : > { %v5243_v4 = vpop.f32.mrf.mxu1 }
 0x163   : > { %v7331_v8 = vadd.f32 %v5242_v0, %v5130_v61  ;;  %v5132_v11 = vpop.f32.mrf.mxu0  ;;  %3441 = vmatpush2.bf16.msra.mxu0 %v6397_v60  ;;  %v6347_v0 = vld [vmem:[%s6874_s20 + $0x3a0] ss:$56 sps:$4 sm:$0xff]  }
 0x164   : > { %v5133_v13 = vadd.f32 %v5132_v11, %v5131_v1  ;;  %v5244_v14 = vpop.f32.mrf.mxu1  ;;  %v6359_v11 = vld [vmem:[%s6874_s20 + $0x41c] ss:$56 sps:$4 sm:$0xff]  }
 0x165   : > { %v5245_v19 = vadd.f32 %v5244_v14, %v5243_v4  ;;  %v5134_v20 = vpop.f32.mrf.mxu0  ;;  %3169 = vmatmul.mubr.bf16.gmra.mxu0 %v6334_v3  ;;  %v6350_v3 = vld [vmem:[%s6874_s20 + $0x3a8] ss:$56 sps:$4 sm:$0xff]   ;;  %v6356_v4 = vld [vmem:[%s6874_s20 + $0x414] ss:$56 sps:$4 sm:$0xff]  }
 0x166   : > { %v5246_v54 = vpop.f32.mrf.mxu1  ;;  %3330 = vmatmul.mubr.bf16.gmra.mxu1 %v6337_v5  ;;  %3176 = vmatprep.mubr.bf16.mxu0 %v6342_v7 }
 0x167   : > { %v7334_v21 = vadd.f32 %v5245_v19, %v5133_v13  ;;  %v5135_v22 = vpop.f32.mrf.mxu0  ;;  %3337 = vmatprep.mubr.bf16.mxu1 %v6346_v12 }
 0x168   : > { %v5136_v24 = vadd.f32 %v5135_v22, %v5134_v20  ;;  %v5247_v25 = vpop.f32.mrf.mxu1 }
 0x169   : > { %v5248_v27 = vadd.f32 %v5247_v25, %v5246_v54  ;;  %v5137_v31 = vpop.f32.mrf.mxu0 }
 0x16a   : > { %v5249_v33 = vpop.f32.mrf.mxu1 }
 0x16b   : > { %v7339_v37 = vadd.f32 %v5248_v27, %v5136_v24  ;;  %v5138_v39 = vpop.f32.mrf.mxu0 }
 0x16c   : > { %v5139_v43 = vadd.f32 %v5138_v39, %v5137_v31  ;;  %v5250_v46 = vpop.f32.mrf.mxu1  ;;  %v6363_v39 = vld [vmem:[%s6874_s20 + $0x484] ss:$56 sps:$4 sm:$0xff]  }
 0x16d   : > { %v5251_v47 = vadd.f32 %v5250_v46, %v5249_v33  ;;  %v5140_v48 = vpop.f32.mrf.mxu0  ;;  %3177 = vmatmul.mubr.bf16.gmra.mxu0 %v6340_v32  ;;  %v6354_v32 = vld [vmem:[%s6874_s20 + $0x410] ss:$56 sps:$4 sm:$0xff]  }
 0x16e   : > { %v5252_v50 = vpop.f32.mrf.mxu1  ;;  %3338 = vmatmul.mubr.bf16.gmra.mxu1 %v6344_v34  ;;  %3184 = vmatprep.mubr.bf16.mxu0 %v6349_v35  ;;  %v6357_v35 = vld [vmem:[%s6874_s20 + $0x418] ss:$56 sps:$4 sm:$0xff]  }
 0x16f   : > { %v7342_v51 = vadd.f32 %v5251_v47, %v5139_v43  ;;  %v5141_v52 = vpop.f32.mrf.mxu0  ;;  %3345 = vmatprep.mubr.bf16.mxu1 %v6352_v42  ;;  %v6366_v43 = vld [vmem:[%s6874_s20 + $0x48c] ss:$56 sps:$4 sm:$0xff]  }
 0x170   : > { %v5142_v57 = vadd.f32 %v5141_v52, %v5140_v48  ;;  %v5253_v60 = vpop.f32.mrf.mxu1 }
 0x171   : > { %v5254_v61 = vadd.f32 %v5253_v60, %v5252_v50  ;;  %v5143_v62 = vpop.f32.mrf.mxu0 }
 0x172   : > { %v5255_v1 = vpop.f32.mrf.mxu1 }
 0x173   : > { %v7347_v5 = vadd.f32 %v5254_v61, %v5142_v57  ;;  %v5144_v7 = vpop.f32.mrf.mxu0 }
 0x174   : > { %v5145_v12 = vadd.f32 %v5144_v7, %v5143_v62  ;;  %v5256_v13 = vpop.f32.mrf.mxu1 }
 0x175   : > { %v5257_v14 = vadd.f32 %v5256_v13, %v5255_v1  ;;  %v5274_v19 = vpop.f32.mrf.mxu0  ;;  %3185 = vmatmul.mubr.bf16.gmra.mxu0 %v6347_v0  ;;  %v6369_v13 = vld [vmem:[%s6874_s20 + $0x4f4] ss:$56 sps:$4 sm:$0xff]  }
 0x176   : > { %v5386_v20 = vpop.f32.mrf.mxu1  ;;  %3346 = vmatmul.mubr.bf16.gmra.mxu1 %v6350_v3  ;;  %3192 = vmatprep.mubr.bf16.mxu0 %v6356_v4  ;;  %v6361_v4 = vld [vmem:[%s6874_s20 + $0x480] ss:$56 sps:$4 sm:$0xff]  }
 0x177   : > { %v7350_v54 = vadd.f32 %v5257_v14, %v5145_v12  ;;  %v5275_v22 = vpop.f32.mrf.mxu0  ;;  %3353 = vmatprep.mubr.bf16.mxu1 %v6359_v11  ;;  %v6364_v12 = vld [vmem:[%s6874_s20 + $0x488] ss:$56 sps:$4 sm:$0xff]  }
 0x178   : > { %v5276_v24 = vadd.f32 %v5275_v22, %v5274_v19  ;;  %v5387_v25 = vpop.f32.mrf.mxu1 }
 0x179   : > { %v5277_v27 = vpop.f32.mrf.mxu0  ;;  %v5388_v31 = vadd.f32 %v5387_v25, %v5386_v20 }
 0x17a   : > { %v2801_v33 = vadd.f32 %v5276_v24, %v7180_v18  ;;  %v5389_v34 = vpop.f32.mrf.mxu1 }
 0x17b   : > { %v5278_v42 = vpop.f32.mrf.mxu0 }
 0x17c   : > { %v7357_v46 = vadd.f32 %v5388_v31, %v2801_v33  ;;  %v5279_v47 = vadd.f32 %v5278_v42, %v5277_v27  ;;  %v5390_v48 = vpop.f32.mrf.mxu1  ;;  %v6367_v42 = vld [vmem:[%s6874_s20 + $0x4f0] ss:$56 sps:$4 sm:$0xff]  }
 0x17d   : > { %v5280_v50 = vpop.f32.mrf.mxu0  ;;  %v5391_v52 = vadd.f32 %v5390_v48, %v5389_v34  ;;  %3193 = vmatmul.mubr.bf16.gmra.mxu0 %v6354_v32  ;;  %v6371_v48 = vld [vmem:[%s6874_s20 + $0x4f8] ss:$56 sps:$4 sm:$0xff]  }
 0x17e   : > { %v2804_v57 = vadd.f32 %v5279_v47, %v7183_v26  ;;  %v5392_v60 = vpop.f32.mrf.mxu1  ;;  %3354 = vmatmul.mubr.bf16.gmra.mxu1 %v6357_v35  ;;  %3200 = vmatprep.mubr.bf16.mxu0 %v6363_v39  ;;  %v6373_v26 = vld [vmem:[%s6874_s20 + $0x4fc] ss:$56 sps:$4 sm:$0xff]  }
 0x17f   : > { %v5281_v18 = vpop.f32.mrf.mxu0  ;;  %3361 = vmatprep.mubr.bf16.mxu1 %v6366_v43 }
 0x180   : > { %v7360_v61 = vadd.f32 %v5391_v52, %v2804_v57  ;;  %v5282_v62 = vadd.f32 %v5281_v18, %v5280_v50  ;;  %v5393_v0 = vpop.f32.mrf.mxu1  ;;  %v6376_v50 = vld [vmem:[%s6874_s20 + $0x564] ss:$56 sps:$4 sm:$0xff]  }
 0x181   : > { %v5283_v1 = vpop.f32.mrf.mxu0  ;;  %v5394_v3 = vadd.f32 %v5393_v0, %v5392_v60 }
 0x182   : > { %v2809_v7 = vadd.f32 %v5282_v62, %v7188_v36  ;;  %v5395_v11 = vpop.f32.mrf.mxu1 }
 0x183   : > { %v5284_v14 = vpop.f32.mrf.mxu0 }
 0x184   : > { %v7367_v19 = vadd.f32 %v5394_v3, %v2809_v7  ;;  %v5285_v20 = vadd.f32 %v5284_v14, %v5283_v1  ;;  %v5396_v22 = vpop.f32.mrf.mxu1  ;;  %v6374_v14 = vld [vmem:[%s6874_s20 + $0x560] ss:$56 sps:$4 sm:$0xff]  }
 0x185   : > { %v5286_v24 = vpop.f32.mrf.mxu0  ;;  %v5397_v25 = vadd.f32 %v5396_v22, %v5395_v11  ;;  %3201 = vmatmul.mubr.bf16.gmra.mxu0 %v6361_v4  ;;  %v6377_v22 = vld [vmem:[%s6874_s20 + $0x568] ss:$56 sps:$4 sm:$0xff]  }
 0x186   : > { %v2812_v27 = vadd.f32 %v5285_v20, %v7191_v44  ;;  %v5398_v31 = vpop.f32.mrf.mxu1  ;;  %3362 = vmatmul.mubr.bf16.gmra.mxu1 %v6364_v12  ;;  %3208 = vmatprep.mubr.bf16.mxu0 %v6369_v13  ;;  %v6379_v44 = vld [vmem:[%s6874_s20 + $0x56c] ss:$56 sps:$4 sm:$0xff]  }
 0x187   : > { %v5287_v36 = vpop.f32.mrf.mxu0  ;;  %3369 = vmatprep.mubr.bf16.mxu1 %v6373_v26 }
 0x188   : > { %v7370_v32 = vadd.f32 %v5397_v25, %v2812_v27  ;;  %v5288_v33 = vadd.f32 %v5287_v36, %v5286_v24  ;;  %v5399_v34 = vpop.f32.mrf.mxu1  ;;  %v6383_v24 = vld [vmem:[%s6874_s20 + $0x5d4] ss:$56 sps:$4 sm:$0xff]  }
 0x189   : > { %v5289_v35 = vpop.f32.mrf.mxu0  ;;  %v5400_v39 = vadd.f32 %v5399_v34, %v5398_v31 }
 0x18a   : > { %v2817_v43 = vadd.f32 %v5288_v33, %v7196_v55  ;;  %v5401_v47 = vpop.f32.mrf.mxu1 }
 0x18b   : > { %v5290_v52 = vpop.f32.mrf.mxu0 }
 0x18c   : > { %v7377_v57 = vadd.f32 %v5400_v39, %v2817_v43  ;;  %v5291_v60 = vadd.f32 %v5290_v52, %v5289_v35  ;;  %v5402_v18 = vpop.f32.mrf.mxu1  ;;  %v6381_v52 = vld [vmem:[%s6874_s20 + $0x5d0] ss:$56 sps:$4 sm:$0xff]  }
 0x18d   : > { %v5292_v62 = vpop.f32.mrf.mxu0  ;;  %v5403_v0 = vadd.f32 %v5402_v18, %v5401_v47  ;;  %3209 = vmatmul.mubr.bf16.gmra.mxu0 %v6367_v42  ;;  %v6384_v18 = vld [vmem:[%s6874_s20 + $0x5d8] ss:$56 sps:$4 sm:$0xff]  }
 0x18e   : > { %v2820_v1 = vadd.f32 %v5291_v60, %v7199_v63  ;;  %v5404_v3 = vpop.f32.mrf.mxu1  ;;  %3370 = vmatmul.mubr.bf16.gmra.mxu1 %v6371_v48  ;;  %3216 = vmatprep.mubr.bf16.mxu0 %v6376_v50  ;;  %v6386_v63 = vld [vmem:[%s6874_s20 + $0x5dc] ss:$56 sps:$4 sm:$0xff]  }
 0x18f   : > { %v5293_v55 = vpop.f32.mrf.mxu0  ;;  %3377 = vmatprep.mubr.bf16.mxu1 %v6379_v44 }
 0x190   : > { %v7380_v4 = vadd.f32 %v5403_v0, %v2820_v1  ;;  %v5294_v7 = vadd.f32 %v5293_v55, %v5292_v62  ;;  %v5405_v11 = vpop.f32.mrf.mxu1  ;;  %v6390_v62 = vld [vmem:[%s6874_s20 + $0x644] ss:$56 sps:$4 sm:$0xff]  }
 0x191   : > { %v5295_v12 = vpop.f32.mrf.mxu0  ;;  %v5406_v13 = vadd.f32 %v5405_v11, %v5404_v3 }
 0x192   : > { %v2825_v26 = vadd.f32 %v5294_v7, %v7204_v9  ;;  %v5407_v20 = vpop.f32.mrf.mxu1 }
 0x193   : > { %v5296_v25 = vpop.f32.mrf.mxu0 }
 0x194   : > { %v7387_v27 = vadd.f32 %v5406_v13, %v2825_v26  ;;  %v5297_v31 = vadd.f32 %v5296_v25, %v5295_v12  ;;  %v5408_v36 = vpop.f32.mrf.mxu1  ;;  %v6388_v25 = vld [vmem:[%s6874_s20 + $0x640] ss:$56 sps:$4 sm:$0xff]  }
 0x195   : > { %v5298_v33 = vpop.f32.mrf.mxu0  ;;  %v5409_v34 = vadd.f32 %v5408_v36, %v5407_v20  ;;  %3217 = vmatmul.mubr.bf16.gmra.mxu0 %v6374_v14  ;;  %v6391_v36 = vld [vmem:[%s6874_s20 + $0x648] ss:$56 sps:$4 sm:$0xff]  }
 0x196   : > { %v2828_v35 = vadd.f32 %v5297_v31, %v7207_v17  ;;  %v5410_v39 = vpop.f32.mrf.mxu1  ;;  %3378 = vmatmul.mubr.bf16.gmra.mxu1 %v6377_v22  ;;  %3224 = vmatprep.mubr.bf16.mxu0 %v6383_v24  ;;  %v6393_v17 = vld [vmem:[%s6874_s20 + $0x64c] ss:$56 sps:$4 sm:$0xff]  }
 0x197   : > { %v5299_v9 = vpop.f32.mrf.mxu0  ;;  %3385 = vmatprep.mubr.bf16.mxu1 %v6386_v63 }
 0x198   : > { %v7390_v42 = vadd.f32 %v5409_v34, %v2828_v35  ;;  %v5300_v43 = vadd.f32 %v5299_v9, %v5298_v33  ;;  %v5411_v47 = vpop.f32.mrf.mxu1  ;;  %v6396_v33 = vld [vmem:[%s6874_s20 + $0x6b4] ss:$56 sps:$4 sm:$0xff]  }
 0x199   : > { %v5301_v48 = vpop.f32.mrf.mxu0  ;;  %v5412_v50 = vadd.f32 %v5411_v47, %v5410_v39 }
 0x19a   : > { %v2833_v44 = vadd.f32 %v5300_v43, %v7212_v29  ;;  %v5413_v60 = vpop.f32.mrf.mxu1 }
 0x19b   : > { %v5302_v0 = vpop.f32.mrf.mxu0 }
 0x19c   : > { %v7397_v1 = vadd.f32 %v5412_v50, %v2833_v44  ;;  %v5303_v3 = vadd.f32 %v5302_v0, %v5301_v48  ;;  %v5414_v55 = vpop.f32.mrf.mxu1  ;;  %v6394_v0 = vld [vmem:[%s6874_s20 + $0x6b0] ss:$56 sps:$4 sm:$0xff]  }
 0x19d   : > { %v5304_v7 = vpop.f32.mrf.mxu0  ;;  %v5415_v11 = vadd.f32 %v5414_v55, %v5413_v60  ;;  %3225 = vmatmul.mubr.bf16.gmra.mxu0 %v6381_v52  ;;  %v6398_v55 = vld [vmem:[%s6874_s20 + $0x6b8] ss:$56 sps:$4 sm:$0xff]  }
 0x19e   : > { %v2836_v12 = vadd.f32 %v5303_v3, %v7215_v38  ;;  %v5416_v13 = vpop.f32.mrf.mxu1  ;;  %3386 = vmatmul.mubr.bf16.gmra.mxu1 %v6384_v18  ;;  %3232 = vmatprep.mubr.bf16.mxu0 %v6390_v62  ;;  %v6400_v38 = vld [vmem:[%s6874_s20 + $0x6bc] ss:$56 sps:$4 sm:$0xff]  }
 0x19f   : > { %v5305_v29 = vpop.f32.mrf.mxu0  ;;  %3393 = vmatprep.mubr.bf16.mxu1 %v6393_v17 }
 0x1a0   : > { %v7400_v14 = vadd.f32 %v5415_v11, %v2836_v12  ;;  %v5306_v26 = vadd.f32 %v5305_v29, %v5304_v7  ;;  %v5417_v20 = vpop.f32.mrf.mxu1  ;;  %v6403_v7 = vld [vmem:[%s6874_s20 + $0x34] ss:$56 sps:$4 sm:$0xff]  }
 0x1a1   : > { %v5307_v22 = vpop.f32.mrf.mxu0  ;;  %v5418_v24 = vadd.f32 %v5417_v20, %v5416_v13 }
 0x1a2   : > { %v2841_v63 = vadd.f32 %v5306_v26, %v7220_v49  ;;  %v5419_v31 = vpop.f32.mrf.mxu1 }
 0x1a3   : > { %v5308_v34 = vpop.f32.mrf.mxu0 }
 0x1a4   : > { %v7407_v35 = vadd.f32 %v5418_v24, %v2841_v63  ;;  %v5309_v39 = vadd.f32 %v5308_v34, %v5307_v22  ;;  %v5420_v9 = vpop.f32.mrf.mxu1 }
 0x1a5   : > { %v5310_v43 = vpop.f32.mrf.mxu0  ;;  %v5421_v47 = vadd.f32 %v5420_v9, %v5419_v31  ;;  %3233 = vmatmul.mubr.bf16.gmra.mxu0 %v6388_v25 }
 0x1a6   : > { %v2844_v48 = vadd.f32 %v5309_v39, %v7223_v59  ;;  %v5422_v50 = vpop.f32.mrf.mxu1  ;;  %3394 = vmatmul.mubr.bf16.gmra.mxu1 %v6391_v36  ;;  %3240 = vmatprep.mubr.bf16.mxu0 %v6396_v33  ;;  %v6401_v33 = vld [vmem:[%s6874_s20 + $0x30] ss:$56 sps:$4 sm:$0xff]   ;;  %v6404_v39 = vld [vmem:[%s6874_s20 + $0xa4] ss:$56 sps:$4 sm:$0xff]  }
 0x1a7   : > { %v5311_v49 = vpop.f32.mrf.mxu0  ;;  %3401 = vmatprep.mubr.bf16.mxu1 %v6400_v38 }
 0x1a8   : > { %v7410_v52 = vadd.f32 %v5421_v47, %v2844_v48  ;;  %v5312_v44 = vadd.f32 %v5311_v49, %v5310_v43  ;;  %v5423_v60 = vpop.f32.mrf.mxu1 }
 0x1a9   : > { %v5313_v18 = vpop.f32.mrf.mxu0  ;;  %v5424_v62 = vadd.f32 %v5423_v60, %v5422_v50 }
 0x1aa   : > { %v2849_v17 = vadd.f32 %v5312_v44, %v7228_v6  ;;  %v5425_v3 = vpop.f32.mrf.mxu1 }
 0x1ab   : > { %v5314_v11 = vpop.f32.mrf.mxu0 }
 0x1ac   : > { %v7416_v59 = vadd.f32 %v5424_v62, %v2849_v17  ;;  %v5315_v12 = vadd.f32 %v5314_v11, %v5313_v18  ;;  %v5426_v13 = vpop.f32.mrf.mxu1  ;;  %v6407_v11 = vld [vmem:[%s6874_s20 + $0x114] ss:$56 sps:$4 sm:$0xff]  }
 0x1ad   : > { %v5316_v29 = vpop.f32.mrf.mxu0  ;;  %v5427_v26 = vadd.f32 %v5426_v13, %v5425_v3  ;;  %3241 = vmatmul.mubr.bf16.gmra.mxu0 %v6394_v0  ;;  %v6406_v3 = vld [vmem:[%s6874_s20 + $0xa0] ss:$56 sps:$4 sm:$0xff]  }
 0x1ae   : > { %v2852_v20 = vadd.f32 %v5315_v12, %v7231_v15  ;;  %v5428_v22 = vpop.f32.mrf.mxu1  ;;  %3402 = vmatmul.mubr.bf16.gmra.mxu1 %v6398_v55  ;;  %4980 = vmatprep.mubr.msk.bf16.mxu0 %vm2395_vm0, %v6403_v7  ;;  %v3618_v12 = vld [vmem:[%s8335_s2 + $0x78] sm:$0xff] }
 0x1af   : > { %v5317_v6 = vpop.f32.mrf.mxu0  ;;  %5802 = vmatprep.subr.mxu1 %v3618_v12 }
 0x1b0   : > { %v7420_v24 = vadd.f32 %v5427_v26, %v2852_v20  ;;  %v5318_v25 = vadd.f32 %v5317_v6, %v5316_v29  ;;  %v5429_v63 = vpop.f32.mrf.mxu1  ;;  %5803 = vmatpush3.msra.mxu1 %v3618_v12 }
 0x1b1   : > { %v5319_v31 = vpop.f32.mrf.mxu0  ;;  %v5430_v36 = vadd.f32 %v5429_v63, %v5428_v22 }
 0x1b2   : > { %v2857_v34 = vadd.f32 %v5318_v25, %v7238_v28  ;;  %v5431_v38 = vpop.f32.mrf.mxu1 }
 0x1b3   : > { %v5320_v9 = vpop.f32.mrf.mxu0 }
 0x1b4   : > { %v7425_v43 = vadd.f32 %v5430_v36, %v2857_v34  ;;  %v5321_v15 = vadd.f32 %v5320_v9, %v5319_v31  ;;  %v5432_v47 = vpop.f32.mrf.mxu1 }
 0x1b5   : > { %v5322_v48 = vpop.f32.mrf.mxu0  ;;  %v5433_v50 = vadd.f32 %v5432_v47, %v5431_v38  ;;  %3443 = vmatmul.mubr.bf16.vlgmr.msra.gmra.mxu0 %v6401_v33  ;;  %v6409_v38 = vld [vmem:[%s6874_s20 + $0x110] ss:$56 sps:$4 sm:$0xff]  }
 0x1b6   : > { %v2860_v49 = vadd.f32 %v5321_v15, %v7245_v41  ;;  %v5434_v44 = vpop.f32.mrf.mxu1  ;;  %4981 = vmatprep.mubr.msk.bf16.mxu0 %vm2395_vm0, %v6404_v39  ;;  %v6410_v15 = vld [vmem:[%s6874_s20 + $0x184] ss:$56 sps:$4 sm:$0xff]   ;;  %v3617_v47 = vld [vmem:[%s8335_s2 + $0x70] sm:$0xff] }
 0x1b7   : > { %v5323_v60 = vpop.f32.mrf.mxu0  ;;  %5804 = vmatprep.subr.mxu1 %v3617_v47 }
 0x1b8   : > { %v7429_v18 = vadd.f32 %v5433_v50, %v2860_v49  ;;  %v5324_v28 = vadd.f32 %v5323_v60, %v5322_v48  ;;  %v5435_v62 = vpop.f32.mrf.mxu1  ;;  %5805 = vmatpush3.msra.mxu1 %v3617_v47 }
 0x1b9   : > { %v5325_v0 = vpop.f32.mrf.mxu0  ;;  %v5436_v17 = vadd.f32 %v5435_v62, %v5434_v44 }
 0x1ba   : > { %v2865_v55 = vadd.f32 %v5324_v28, %v7251_v53  ;;  %v5437_v7 = vpop.f32.mrf.mxu1 }
 0x1bb   : > { %v5326_v41 = vpop.f32.mrf.mxu0 }
 0x1bc   : > { %v7437_v13 = vadd.f32 %v5436_v17, %v2865_v55  ;;  %v5327_v29 = vadd.f32 %v5326_v41, %v5325_v0  ;;  %v5438_v26 = vpop.f32.mrf.mxu1 }
 0x1bd   : > { %v5328_v20 = vpop.f32.mrf.mxu0  ;;  %v5439_v22 = vadd.f32 %v5438_v26, %v5437_v7  ;;  %3451 = vmatmul.mubr.bf16.gmra.mxu0 %v6406_v3  ;;  %v3616_v26 = vld [vmem:[%s8335_s2 + $0x68] sm:$0xff] }
 0x1be   : > { %v2868_v53 = vadd.f32 %v5327_v29, %v7258_v2  ;;  %v5440_v6 = vpop.f32.mrf.mxu1  ;;  %4982 = vmatprep.mubr.msk.bf16.mxu0 %vm2395_vm0, %v6407_v11  ;;  %v6412_v11 = vld [vmem:[%s6874_s20 + $0x180] ss:$56 sps:$4 sm:$0xff]   ;;  %v6413_v29 = vld [vmem:[%s6874_s20 + $0x1f4] ss:$56 sps:$4 sm:$0xff]   ;;  %5806 = vmatprep.subr.mxu1 %v3616_v26 }
 0x1bf   : > { %v5329_v25 = vpop.f32.mrf.mxu0  ;;  %5807 = vmatpush3.msra.mxu1 %v3616_v26 }
 0x1c0   : > { %v7441_v63 = vadd.f32 %v5439_v22, %v2868_v53  ;;  %v5330_v31 = vadd.f32 %v5329_v25, %v5328_v20  ;;  %v5441_v36 = vpop.f32.mrf.mxu1 }
 0x1c1   : > { %v5331_v33 = vpop.f32.mrf.mxu0  ;;  %v5442_v34 = vadd.f32 %v5441_v36, %v5440_v6 }
 0x1c2   : > { %v2873_v39 = vadd.f32 %v5330_v31, %v7267_v16  ;;  %v5443_v9 = vpop.f32.mrf.mxu1 }
 0x1c3   : > { %v5332_v2 = vpop.f32.mrf.mxu0 }
 0x1c4   : > { %v7449_v48 = vadd.f32 %v5442_v34, %v2873_v39  ;;  %v5333_v50 = vadd.f32 %v5332_v2, %v5331_v33  ;;  %v5444_v49 = vpop.f32.mrf.mxu1 }
 0x1c5   : > { %v5334_v44 = vpop.f32.mrf.mxu0  ;;  %v5445_v60 = vadd.f32 %v5444_v49, %v5443_v9  ;;  %3459 = vmatmul.mubr.bf16.gmra.mxu0 %v6409_v38  ;;  %v3615_v49 = vld [vmem:[%s8335_s2 + $0x60] sm:$0xff] }
 0x1c6   : > { %v2876_v16 = vadd.f32 %v5333_v50, %v7274_v30  ;;  %v5446_v28 = vpop.f32.mrf.mxu1  ;;  %4983 = vmatprep.mubr.msk.bf16.mxu0 %vm2395_vm0, %v6410_v15  ;;  %v6415_v15 = vld [vmem:[%s6874_s20 + $0x1f0] ss:$56 sps:$4 sm:$0xff]   ;;  %v6416_v50 = vld [vmem:[%s6874_s20 + $0x264] ss:$56 sps:$4 sm:$0xff]   ;;  %5808 = vmatprep.subr.mxu1 %v3615_v49 }
 0x1c7   : > { %v5335_v62 = vpop.f32.mrf.mxu0  ;;  %5809 = vmatpush3.msra.mxu1 %v3615_v49 }
 0x1c8   : > { %v7453_v0 = vadd.f32 %v5445_v60, %v2876_v16  ;;  %v5336_v17 = vadd.f32 %v5335_v62, %v5334_v44  ;;  %v5447_v3 = vpop.f32.mrf.mxu1 }
 0x1c9   : > { %v5337_v55 = vpop.f32.mrf.mxu0  ;;  %v5448_v7 = vadd.f32 %v5447_v3, %v5446_v28 }
 0x1ca   : > { %v2881_v12 = vadd.f32 %v5336_v17, %v7283_v45  ;;  %v5449_v41 = vpop.f32.mrf.mxu1 }
 0x1cb   : > { %v5338_v30 = vpop.f32.mrf.mxu0 }
 0x1cc   : > { %v7461_v20 = vadd.f32 %v5448_v7, %v2881_v12  ;;  %v5339_v22 = vadd.f32 %v5338_v30, %v5337_v55  ;;  %v5450_v53 = vpop.f32.mrf.mxu1 }
 0x1cd   : > { %v5340_v6 = vpop.f32.mrf.mxu0  ;;  %v5451_v25 = vadd.f32 %v5450_v53, %v5449_v41  ;;  %3467 = vmatmul.mubr.bf16.gmra.mxu0 %v6412_v11  ;;  %v3614_v53 = vld [vmem:[%s8335_s2 + $0x58] sm:$0xff] }
 0x1ce   : > { %v2884_v45 = vadd.f32 %v5339_v22, %v7290_v58  ;;  %v5452_v31 = vpop.f32.mrf.mxu1  ;;  %4984 = vmatprep.mubr.msk.bf16.mxu0 %vm2395_vm0, %v6413_v29  ;;  %v6418_v29 = vld [vmem:[%s6874_s20 + $0x260] ss:$56 sps:$4 sm:$0xff]   ;;  %v6419_v22 = vld [vmem:[%s6874_s20 + $0x2d4] ss:$56 sps:$4 sm:$0xff]   ;;  %5810 = vmatprep.subr.mxu1 %v3614_v53 }
 0x1cf   : > { %v5341_v36 = vpop.f32.mrf.mxu0  ;;  %5811 = vmatpush3.msra.mxu1 %v3614_v53 }
 0x1d0   : > { %v7465_v33 = vadd.f32 %v5451_v25, %v2884_v45  ;;  %v5342_v34 = vadd.f32 %v5341_v36, %v5340_v6  ;;  %v5453_v38 = vpop.f32.mrf.mxu1 }
 0x1d1   : > { %v5343_v39 = vpop.f32.mrf.mxu0  ;;  %v5454_v9 = vadd.f32 %v5453_v38, %v5452_v31 }
 0x1d2   : > { %v2889_v47 = vadd.f32 %v5342_v34, %v7299_v10  ;;  %v5455_v2 = vpop.f32.mrf.mxu1 }
 0x1d3   : > { %v5344_v58 = vpop.f32.mrf.mxu0 }
 0x1d4   : > { %v7473_v44 = vadd.f32 %v5454_v9, %v2889_v47  ;;  %v5345_v60 = vadd.f32 %v5344_v58, %v5343_v39  ;;  %v5456_v16 = vpop.f32.mrf.mxu1 }
 0x1d5   : > { %v5346_v28 = vpop.f32.mrf.mxu0  ;;  %v5457_v62 = vadd.f32 %v5456_v16, %v5455_v2  ;;  %3475 = vmatmul.mubr.bf16.gmra.mxu0 %v6415_v15  ;;  %v3613_v16 = vld [vmem:[%s8335_s2 + $0x50] sm:$0xff] }
 0x1d6   : > { %v2892_v10 = vadd.f32 %v5345_v60, %v7306_v23  ;;  %v5458_v17 = vpop.f32.mrf.mxu1  ;;  %4985 = vmatprep.mubr.msk.bf16.mxu0 %vm2395_vm0, %v6416_v50  ;;  %v6421_v50 = vld [vmem:[%s6874_s20 + $0x2d0] ss:$56 sps:$4 sm:$0xff]   ;;  %v6422_v60 = vld [vmem:[%s6874_s20 + $0x344] ss:$56 sps:$4 sm:$0xff]   ;;  %5812 = vmatprep.subr.mxu1 %v3613_v16 }
 0x1d7   : > { %v5347_v3 = vpop.f32.mrf.mxu0  ;;  %5813 = vmatpush3.msra.mxu1 %v3613_v16 }
 0x1d8   : > { %v7477_v55 = vadd.f32 %v5457_v62, %v2892_v10  ;;  %v5348_v7 = vadd.f32 %v5347_v3, %v5346_v28  ;;  %v5459_v11 = vpop.f32.mrf.mxu1 }
 0x1d9   : > { %v5349_v12 = vpop.f32.mrf.mxu0  ;;  %v5460_v41 = vadd.f32 %v5459_v11, %v5458_v17 }
 0x1da   : > { %v2897_v26 = vadd.f32 %v5348_v7, %v7315_v40  ;;  %v5461_v30 = vpop.f32.mrf.mxu1 }
 0x1db   : > { %v5350_v23 = vpop.f32.mrf.mxu0 }
 0x1dc   : > { %v7485_v6 = vadd.f32 %v5460_v41, %v2897_v26  ;;  %v5351_v25 = vadd.f32 %v5350_v23, %v5349_v12  ;;  %v5462_v45 = vpop.f32.mrf.mxu1 }
 0x1dd   : > { %v5352_v31 = vpop.f32.mrf.mxu0  ;;  %v5463_v36 = vadd.f32 %v5462_v45, %v5461_v30  ;;  %3483 = vmatmul.mubr.bf16.gmra.mxu0 %v6418_v29  ;;  %v3612_v45 = vld [vmem:[%s8335_s2 + $0x48] sm:$0xff] }
 0x1de   : > { %v2900_v40 = vadd.f32 %v5351_v25, %v7322_v56  ;;  %v5464_v34 = vpop.f32.mrf.mxu1  ;;  %4986 = vmatprep.mubr.msk.bf16.mxu0 %vm2395_vm0, %v6419_v22  ;;  %v6424_v22 = vld [vmem:[%s6874_s20 + $0x340] ss:$56 sps:$4 sm:$0xff]   ;;  %v6425_v25 = vld [vmem:[%s6874_s20 + $0x3b4] ss:$56 sps:$4 sm:$0xff]   ;;  %5814 = vmatprep.subr.mxu1 %v3612_v45 }
 0x1df   : > { %v5353_v38 = vpop.f32.mrf.mxu0  ;;  %5815 = vmatpush3.msra.mxu1 %v3612_v45 }
 0x1e0   : > { %v7489_v39 = vadd.f32 %v5463_v36, %v2900_v40  ;;  %v5354_v9 = vadd.f32 %v5353_v38, %v5352_v31  ;;  %v5465_v15 = vpop.f32.mrf.mxu1 }
 0x1e1   : > { %v5355_v47 = vpop.f32.mrf.mxu0  ;;  %v5466_v2 = vadd.f32 %v5465_v15, %v5464_v34  ;;  %v3611_v34 = vld [vmem:[%s8335_s2 + $0x40] sm:$0xff] }
 0x1e2   : > { %v2905_v49 = vadd.f32 %v5354_v9, %v7331_v8  ;;  %v5467_v58 = vpop.f32.mrf.mxu1  ;;  %5816 = vmatprep.subr.mxu1 %v3611_v34 }
 0x1e3   : > { %v5356_v56 = vpop.f32.mrf.mxu0  ;;  %5817 = vmatpush3.msra.mxu1 %v3611_v34 }
 0x1e4   : > { %v7497_v28 = vadd.f32 %v5466_v2, %v2905_v49  ;;  %v5357_v62 = vadd.f32 %v5356_v56, %v5355_v47  ;;  %v5468_v10 = vpop.f32.mrf.mxu1  ;;  %v3610_v47 = vld [vmem:[%s8335_s2 + $0x38] sm:$0xff]  ;;  %v6427_v56 = vld [vmem:[%s6874_s20 + $0x3b0] ss:$56 sps:$4 sm:$0xff]  }
 0x1e5   : > { %v5358_v17 = vpop.f32.mrf.mxu0  ;;  %v5469_v3 = vadd.f32 %v5468_v10, %v5467_v58  ;;  %3491 = vmatmul.mubr.bf16.gmra.mxu0 %v6421_v50  ;;  %5818 = vmatprep.subr.mxu1 %v3610_v47 }
 0x1e6   : > { %v2908_v8 = vadd.f32 %v5357_v62, %v7334_v21  ;;  %v5470_v7 = vpop.f32.mrf.mxu1  ;;  %4987 = vmatprep.mubr.msk.bf16.mxu0 %vm2395_vm0, %v6422_v60  ;;  %5819 = vmatpush3.msra.mxu1 %v3610_v47 }
 0x1e7   : > { %v5359_v11 = vpop.f32.mrf.mxu0 }
 0x1e8   : > { %v7501_v12 = vadd.f32 %v5469_v3, %v2908_v8  ;;  %v5360_v41 = vadd.f32 %v5359_v11, %v5358_v17  ;;  %v5471_v29 = vpop.f32.mrf.mxu1  ;;  %v6428_v17 = vld [vmem:[%s6874_s20 + $0x424] ss:$56 sps:$4 sm:$0xff]   ;;  %v3608_v3 = vld [vmem:[%s8335_s2 + $0x28] sm:$0xff] }
 0x1e9   : > { %v5361_v26 = vpop.f32.mrf.mxu0  ;;  %v5472_v30 = vadd.f32 %v5471_v29, %v5470_v7  ;;  %v3607_v29 = vld [vmem:[%s8335_s2 + $0x20] sm:$0xff] }
 0x1ea   : > { %v2913_v53 = vadd.f32 %v5360_v41, %v7339_v37  ;;  %v5473_v23 = vpop.f32.mrf.mxu1 }
 0x1eb   : > { %v5362_v21 = vpop.f32.mrf.mxu0 }
 0x1ec   : > { %v7509_v31 = vadd.f32 %v5472_v30, %v2913_v53  ;;  %v5363_v36 = vadd.f32 %v5362_v21, %v5361_v26  ;;  %v5474_v40 = vpop.f32.mrf.mxu1  ;;  %v3606_v53 = vld [vmem:[%s8335_s2 + $0x18] sm:$0xff] }
 0x1ed   : > { %v5364_v38 = vpop.f32.mrf.mxu0  ;;  %v5475_v9 = vadd.f32 %v5474_v40, %v5473_v23  ;;  %3499 = vmatmul.mubr.bf16.gmra.mxu0 %v6424_v22  ;;  %v6430_v40 = vld [vmem:[%s6874_s20 + $0x420] ss:$56 sps:$4 sm:$0xff]  }
 0x1ee   : > { %v2916_v37 = vadd.f32 %v5363_v36, %v7342_v51  ;;  %v5476_v15 = vpop.f32.mrf.mxu1  ;;  %4988 = vmatprep.mubr.msk.bf16.mxu0 %vm2395_vm0, %v6425_v25  ;;  %v3609_v51 = vld [vmem:[%s8335_s2 + $0x30] sm:$0xff] }
 0x1ef   : > { %v5365_v2 = vpop.f32.mrf.mxu0  ;;  %5820 = vmatprep.subr.mxu1 %v3609_v51 }
 0x1f0   : > { %v7519_v50 = vadd.f32 %v5475_v9, %v2916_v37  ;;  %v5366_v49 = vadd.f32 %v5365_v2, %v5364_v38  ;;  %v5477_v58 = vpop.f32.mrf.mxu1  ;;  %5821 = vmatpush3.msra.mxu1 %v3609_v51  ;;  %v6431_v9 = vld [vmem:[%s6874_s20 + $0x494] ss:$56 sps:$4 sm:$0xff]  }
 0x1f1   : > { %v5367_v60 = vpop.f32.mrf.mxu0  ;;  %v5478_v16 = vadd.f32 %v5477_v58, %v5476_v15  ;;  %5822 = vmatprep.subr.mxu1 %v3608_v3  ;;  %v3604_v37 = vld [vmem:[%s8335_s2 + $0x8] sm:$0xff] }
 0x1f2   : > { %v2921_v62 = vadd.f32 %v5366_v49, %v7347_v5  ;;  %v5479_v10 = vpop.f32.mrf.mxu1  ;;  %5823 = vmatpush3.msra.mxu1 %v3608_v3  ;;  %v6434_v3 = vld [vmem:[%s6874_s20 + $0x504] ss:$56 sps:$4 sm:$0xff]  }
 0x1f3   : > { %v5368_v8 = vpop.f32.mrf.mxu0  ;;  %5824 = vmatprep.subr.mxu1 %v3607_v29 }
 0x1f4   : > { %v7530_v7 = vadd.f32 %v5478_v16, %v2921_v62  ;;  %v5369_v11 = vadd.f32 %v5368_v8, %v5367_v60  ;;  %v5480_v41 = vpop.f32.mrf.mxu1  ;;  %5825 = vmatpush3.msra.mxu1 %v3607_v29 }
 0x1f5   : > { %v5481_v26 = vadd.f32 %v5480_v41, %v5479_v10  ;;  %v5498_v5 = vpop.f32.mrf.mxu0  ;;  %3507 = vmatmul.mubr.bf16.gmra.mxu0 %v6427_v56  ;;  %5826 = vmatprep.subr.mxu1 %v3606_v53  ;;  %v6433_v10 = vld [vmem:[%s6874_s20 + $0x490] ss:$56 sps:$4 sm:$0xff]  }
 0x1f6   : > { %v2924_v30 = vadd.f32 %v5369_v11, %v7350_v54  ;;  %v7536_v22 = vpop.f32.mrf.mxu1  ;;  %4989 = vmatprep.mubr.msk.bf16.mxu0 %vm2395_vm0, %v6428_v17  ;;  %5827 = vmatpush3.msra.mxu1 %v3606_v53  ;;  %v3605_v54 = vld [vmem:[%s8335_s2 + $0x10] sm:$0xff] }
 0x1f7   : > { %v5499_v23 = vpop.f32.mrf.mxu0  ;;  %5828 = vmatprep.subr.mxu1 %v3605_v54 }
 0x1f8   : > { %v7542_v25 = vadd.f32 %v5481_v26, %v2924_v30  ;;  %v5500_v45 = vadd.f32 %v5499_v23, %v5498_v5  ;;  %v7544_v21 = vpop.f32.mrf.mxu1  ;;  %5829 = vmatpush3.msra.mxu1 %v3605_v54 }
 0x1f9   : > { %v5501_v36 = vpop.f32.mrf.mxu0  ;;  %5830 = vmatprep.subr.mxu1 %v3604_v37 }
 0x1fa   : > { %v7551_v34 = vadd.f32 %v5500_v45, %v7357_v46  ;;  %v7553_v38 = vpop.f32.mrf.mxu1  ;;  %5831 = vmatpush3.msra.mxu1 %v3604_v37  ;;  %v3603_v46 = vld [vmem:[%s8335_s2] sm:$0xff]  ;;  %v6437_v45 = vld [vmem:[%s6874_s20 + $0x574] ss:$56 sps:$4 sm:$0xff]  }
 0x1fb   : > { %v5502_v15 = vpop.f32.mrf.mxu0  ;;  %5832 = vmatprep.subr.mxu1 %v3603_v46 }
 0x1fc   : > { %v5503_v47 = vadd.f32 %v5502_v15, %v5501_v36  ;;  %v7559_v2 = vpop.f32.mrf.mxu1  ;;  %5833 = vmatpush3.msra.mxu1 %v3603_v46 }
 0x1fd   : > { %v5504_v49 = vpop.f32.mrf.mxu0  ;;  %3515 = vmatmul.mubr.bf16.gmra.mxu0 %v6430_v40 }
 0x1fe   : > { %v7565_v58 = vadd.f32 %v5503_v47, %v7360_v61  ;;  %v7567_v51 = vpop.f32.mrf.mxu1  ;;  %4990 = vmatprep.mubr.msk.bf16.mxu0 %vm2395_vm0, %v6431_v9 }
 0x1ff   : > { %v5505_v60 = vpop.f32.mrf.mxu0 }
 0x200   : > { %v5506_v16 = vadd.f32 %v5505_v60, %v5504_v49  ;;  %v7570_v62 = vpop.f32.mrf.mxu1  ;;  %v6440_v60 = vld [vmem:[%s6874_s20 + $0x5e4] ss:$56 sps:$4 sm:$0xff]  }
 0x201   : > { %v5507_v56 = vpop.f32.mrf.mxu0 }
 0x202   : > { %v7574_v17 = vadd.f32 %v5506_v16, %v7367_v19  ;;  %v7577_v11 = vpop.f32.mrf.mxu1  ;;  %v6436_v19 = vld [vmem:[%s6874_s20 + $0x500] ss:$56 sps:$4 sm:$0xff]  }
 0x203   : > { %v5508_v8 = vpop.f32.mrf.mxu0 }
 0x204   : > { %v5509_v61 = vadd.f32 %v5508_v8, %v5507_v56  ;;  %v7583_v30 = vpop.f32.mrf.mxu1 }
 0x205   : > { %v5510_v41 = vpop.f32.mrf.mxu0  ;;  %3523 = vmatmul.mubr.bf16.gmra.mxu0 %v6433_v10 }
 0x206   : > { %v7580_v29 = vadd.f32 %v5509_v61, %v7370_v32  ;;  %4991 = vmatprep.mubr.msk.bf16.mxu0 %vm2395_vm0, %v6434_v3  ;;  %v7590_v40 = vpop.f32.mrf.mxu1 }
 0x207   : > { %v5511_v26 = vpop.f32.mrf.mxu0 }
 0x208   : > { %v5512_v5 = vadd.f32 %v5511_v26, %v5510_v41  ;;  %v7596_v47 = vpop.f32.mrf.mxu1 }
 0x209   : > { %v5513_v53 = vpop.f32.mrf.mxu0 }
 0x20a   : > { %v7587_v23 = vadd.f32 %v5512_v5, %v7377_v57  ;;  %v6439_v57 = vld [vmem:[%s6874_s20 + $0x570] ss:$56 sps:$4 sm:$0xff]   ;;  %v7603_v10 = vpop.f32.mrf.mxu1 }
 0x20b   : > { %v5514_v54 = vpop.f32.mrf.mxu0 }
 0x20c   : > { %v5515_v36 = vadd.f32 %v5514_v54, %v5513_v53  ;;  %v7609_v41 = vpop.f32.mrf.mxu1  ;;  %v6443_v53 = vld [vmem:[%s6874_s20 + $0x654] ss:$56 sps:$4 sm:$0xff]  }
 0x20d   : > { %v5516_v32 = vpop.f32.mrf.mxu0  ;;  %3531 = vmatmul.mubr.bf16.gmra.mxu0 %v6436_v19 }
 0x20e   : > { %v7593_v9 = vadd.f32 %v5515_v36, %v7380_v4  ;;  %4992 = vmatprep.mubr.msk.bf16.mxu0 %vm2395_vm0, %v6437_v45  ;;  %v7616_v54 = vpop.f32.mrf.mxu1 }
 0x20f   : > { %v5517_v37 = vpop.f32.mrf.mxu0 }
 0x210   : > { %v5518_v15 = vadd.f32 %v5517_v37, %v5516_v32 }
 0x211   : > { %v5519_v46 = vpop.f32.mrf.mxu0 }
 0x212   : > { %v7600_v49 = vadd.f32 %v5518_v15, %v7387_v27  ;;  %v6442_v27 = vld [vmem:[%s6874_s20 + $0x5e0] ss:$56 sps:$4 sm:$0xff]   ;;  %v7622_v15 = vpop.f32.mrf.mxu1 }
 0x213   : > { %v5520_v16 = vpop.f32.mrf.mxu0 }
 0x214   : > { %v5521_v56 = vadd.f32 %v5520_v16, %v5519_v46 }
 0x215   : > { %v5522_v4 = vpop.f32.mrf.mxu0  ;;  %3539 = vmatmul.mubr.bf16.gmra.mxu0 %v6439_v57 }
 0x216   : > { %v7606_v3 = vadd.f32 %v5521_v56, %v7390_v42  ;;  %4993 = vmatprep.mubr.msk.bf16.mxu0 %vm2395_vm0, %v6440_v60  ;;  %v6446_v60 = vld [vmem:[%s6874_s20 + $0x6c4] ss:$56 sps:$4 sm:$0xff]  }
 0x217   : > { %v5523_v8 = vpop.f32.mrf.mxu0 }
 0x218   : > { %v5524_v61 = vadd.f32 %v5523_v8, %v5522_v4  ;;  %v7629_v4 = vpop.f32.mrf.mxu1 }
 0x219   : > { %v5525_v26 = vpop.f32.mrf.mxu0 }
 0x21a   : > { %v7613_v5 = vadd.f32 %v5524_v61, %v7397_v1  ;;  %v6445_v1 = vld [vmem:[%s6874_s20 + $0x650] ss:$56 sps:$4 sm:$0xff]  }
 0x21b   : > { %v5526_v19 = vpop.f32.mrf.mxu0 }
 0x21c   : > { %v5527_v45 = vadd.f32 %v5526_v19, %v5525_v26  ;;  %v6448_v19 = vld [vmem:[%s6874_s20 + $0x6c0] ss:$56 sps:$4 sm:$0xff]   ;;  %s8217_s20 = scalar_lea.vmem [#allocation2], %s4645_s10 }
 0x21d   : > { %v5528_v42 = vpop.f32.mrf.mxu0  ;;  %3547 = vmatmul.mubr.bf16.gmra.mxu0 %v6442_v27  ;;  %v7635_v27 = vpop.f32.mrf.mxu1  ;;  %s4579_s12 = sshll.u32 %s8217_s20, 4  ;;  %s8286_s12 = int_to_ptr.vmem [resolvable:$true] %s4579_s12 }
 0x21e   : > { %v7619_v36 = vadd.f32 %v5527_v45, %v7400_v14  ;;  %4994 = vmatprep.mubr.msk.bf16.mxu0 %vm2395_vm0, %v6443_v53  ;;  %s6641_s23 = scalar_lea.vmem %s8286_s12, 4096  ;;  %p6648_p0 = scmp.lt.s32.totalorder %s8286_s12, %s6646_s28 }
 0x21f   : > { %v5529_v32 = vpop.f32.mrf.mxu0  ;;  %p6642_p11 = scmp.ne.s32.totalorder %s8286_s12, %s6641_s23  ;;  %p6649_p1 = scmp.lt.s32.totalorder %s6647_s29, %s6641_s23 }
 0x220   : > { %v5530_v37 = vadd.f32 %v5529_v32, %v5528_v42  ;;  %v7641_v32 = vpop.f32.mrf.mxu1 }
 0x221   : > { %v5531_v46 = vpop.f32.mrf.mxu0  ;;  %p6643_p12 = pnand %p6642_p11, %p6770_p5  ;;  %p6650_p2 = por %p6649_p1, %p6648_p0 }
 0x222   : > { %v7626_v57 = vadd.f32 %v5530_v37, %v7407_v35 }
 0x223   : > { %v5532_v16 = vpop.f32.mrf.mxu0  ;;  %p6644_p13 = pneg %p6643_p12 }
 0x224   : > { %v5533_v56 = vadd.f32 %v5532_v16, %v5531_v46 }
 0x225   : > { %v5534_v8 = vpop.f32.mrf.mxu0  ;;  %3555 = vmatmul.mubr.bf16.gmra.mxu0 %v6445_v1  ;;  %p6651_p3 = pnand %p6650_p2, %p6644_p13 }
 0x226   : > { %v7632_v14 = vadd.f32 %v5533_v56, %v7410_v52  ;;  %4995 = vmatprep.mubr.msk.bf16.mxu0 %vm2395_vm0, %v6446_v60  ;;  %v7646_v60 = vpop.f32.mrf.mxu1 }
 0x227   : > { %v5535_v61 = vpop.f32.mrf.mxu0 }
 0x228   : > { %v5536_v26 = vadd.f32 %v5535_v61, %v5534_v8  ;;  %v7651_v61 = vpop.f32.mrf.mxu1 }
 0x229   : > { %v5537_v53 = vpop.f32.mrf.mxu0 }
 0x22a   : > { %v7639_v35 = vadd.f32 %v5536_v26, %v7416_v59 }
 0x22b   : > { %v5538_v45 = vpop.f32.mrf.mxu0 }
 0x22c   : > { %v5539_v42 = vadd.f32 %v5538_v45, %v5537_v53 }
 0x22d   : > { %v5540_v37 = vpop.f32.mrf.mxu0  ;;  %3563 = vmatmul.mubr.bf16.gmra.mxu0 %v6448_v19 }
 0x22e   : > { %v7644_v52 = vadd.f32 %v5539_v42, %v7420_v24  ;;  %v7656_v24 = vpop.f32.mrf.mxu1 }
 0x22f   : > { %v5541_v46 = vpop.f32.mrf.mxu0 }
 0x230   : > { %8340 = vst [vmem:[#allocation5_spill] sm:$0xff] %v7644_v52  ;;  %v5542_v1 = vadd.f32 %v5541_v46, %v5540_v37 }
 0x231   : > { %v5543_v16 = vpop.f32.mrf.mxu0 }
 0x232   : > { %v7649_v56 = vadd.f32 %v5542_v1, %v7425_v43  ;;  %v7661_v43 = vpop.f32.mrf.mxu1 }
 0x233   : > { %v5544_v8 = vpop.f32.mrf.mxu0 }
 0x234   : > { %8341 = vst [vmem:[#allocation6_spill] sm:$0xff] %v7649_v56  ;;  %v5545_v59 = vadd.f32 %v5544_v8, %v5543_v16 }
 0x235   : > { %v5546_v26 = vpop.f32.mrf.mxu0 }
 0x236   : > { %v7654_v53 = vadd.f32 %v5545_v59, %v7429_v18  ;;  %v7666_v18 = vpop.f32.mrf.mxu1 }
 0x237   : > { %v5547_v19 = vpop.f32.mrf.mxu0 }
 0x238   : > { %8342 = vst [vmem:[#allocation7_spill] sm:$0xff] %v7654_v53  ;;  %v5548_v45 = vadd.f32 %v5547_v19, %v5546_v26 }
 0x239   : > { %v5549_v42 = vpop.f32.mrf.mxu0 }
 0x23a   : > { %v7659_v37 = vadd.f32 %v5548_v45, %v7437_v13  ;;  %v7671_v13 = vpop.f32.mrf.mxu1 }
 0x23b   : > { %v5550_v46 = vpop.f32.mrf.mxu0 }
 0x23c   : > { %8343 = vst [vmem:[#allocation8_spill] sm:$0xff] %v7659_v37  ;;  %v5551_v52 = vadd.f32 %v5550_v46, %v5549_v42 }
 0x23d   : > { %v5552_v1 = vpop.f32.mrf.mxu0 }
 0x23e   : > { %v7664_v16 = vadd.f32 %v5551_v52, %v7441_v63  ;;  %v7676_v63 = vpop.f32.mrf.mxu1 }
 0x23f   : > { %v5553_v8 = vpop.f32.mrf.mxu0 }
 0x240   : > { %8344 = vst [vmem:[#allocation9_spill] sm:$0xff] %v7664_v16  ;;  %v5554_v56 = vadd.f32 %v5553_v8, %v5552_v1 }
 0x241   : > { %v5555_v59 = vpop.f32.mrf.mxu0 }
 0x242   : > { %v7669_v26 = vadd.f32 %v5554_v56, %v7449_v48  ;;  %v7681_v48 = vpop.f32.mrf.mxu1 }
 0x243   : > { %v5556_v19 = vpop.f32.mrf.mxu0 }
 0x244   : > { %8345 = vst [vmem:[#allocation10_spill] sm:$0xff] %v7669_v26  ;;  %v5557_v53 = vadd.f32 %v5556_v19, %v5555_v59 }
 0x245   : > { %v5558_v45 = vpop.f32.mrf.mxu0 }
 0x246   : > { %v7674_v42 = vadd.f32 %v5557_v53, %v7453_v0  ;;  %v7686_v0 = vpop.f32.mrf.mxu1 }
 0x247   : > { %v5559_v46 = vpop.f32.mrf.mxu0 }
 0x248   : > { %8346 = vst [vmem:[#allocation11_spill] sm:$0xff] %v7674_v42  ;;  %v5560_v37 = vadd.f32 %v5559_v46, %v5558_v45 }
 0x249   : > { %v5561_v52 = vpop.f32.mrf.mxu0 }
 0x24a   : > { %v7679_v1 = vadd.f32 %v5560_v37, %v7461_v20  ;;  %v7691_v20 = vpop.f32.mrf.mxu1 }
 0x24b   : > { %v5562_v8 = vpop.f32.mrf.mxu0 }
 0x24c   : > { %8347 = vst [vmem:[#allocation12_spill] sm:$0xff] %v7679_v1  ;;  %v5563_v16 = vadd.f32 %v5562_v8, %v5561_v52 }
 0x24d   : > { %v5564_v56 = vpop.f32.mrf.mxu0 }
 0x24e   : > { %v7684_v59 = vadd.f32 %v5563_v16, %v7465_v33  ;;  %v7696_v33 = vpop.f32.mrf.mxu1 }
 0x24f   : > { %v5565_v19 = vpop.f32.mrf.mxu0 }
 0x250   : > { %8348 = vst [vmem:[#allocation13_spill] sm:$0xff] %v7684_v59  ;;  %v5566_v26 = vadd.f32 %v5565_v19, %v5564_v56 }
 0x251   : > { %v5567_v53 = vpop.f32.mrf.mxu0 }
 0x252   : > { %v7689_v45 = vadd.f32 %v5566_v26, %v7473_v44  ;;  %v7701_v44 = vpop.f32.mrf.mxu1 }
 0x253   : > { %v5568_v46 = vpop.f32.mrf.mxu0 }
 0x254   : > { %8349 = vst [vmem:[#allocation14_spill] sm:$0xff] %v7689_v45  ;;  %v5569_v42 = vadd.f32 %v5568_v46, %v5567_v53 }
 0x255   : > { %v5570_v37 = vpop.f32.mrf.mxu0 }
 0x256   : > { %v7694_v52 = vadd.f32 %v5569_v42, %v7477_v55  ;;  %v7706_v55 = vpop.f32.mrf.mxu1 }
 0x257   : > { %v5571_v8 = vpop.f32.mrf.mxu0 }
 0x258   : > { %8350 = vst [vmem:[#allocation15_spill] sm:$0xff] %v7694_v52  ;;  %v5572_v1 = vadd.f32 %v5571_v8, %v5570_v37 }
 0x259   : > { %v5573_v16 = vpop.f32.mrf.mxu0 }
 0x25a   : > { %v7699_v56 = vadd.f32 %v5572_v1, %v7485_v6  ;;  %v7711_v6 = vpop.f32.mrf.mxu1 }
 0x25b   : > { %v5574_v19 = vpop.f32.mrf.mxu0 }
 0x25c   : > { %8351 = vst [vmem:[#allocation16_spill] sm:$0xff] %v7699_v56  ;;  %v5575_v59 = vadd.f32 %v5574_v19, %v5573_v16 }
 0x25d   : > { %v5576_v26 = vpop.f32.mrf.mxu0 }
 0x25e   : > { %v7704_v53 = vadd.f32 %v5575_v59, %v7489_v39  ;;  %v7716_v39 = vpop.f32.mrf.mxu1 }
 0x25f   : > { %v5577_v46 = vpop.f32.mrf.mxu0 }
 0x260   : > { %8352 = vst [vmem:[#allocation17_spill] sm:$0xff] %v7704_v53  ;;  %v5578_v45 = vadd.f32 %v5577_v46, %v5576_v26 }
 0x261   : > { %v5579_v42 = vpop.f32.mrf.mxu0 }
 0x262   : > { %v7709_v37 = vadd.f32 %v5578_v45, %v7497_v28  ;;  %v7721_v28 = vpop.f32.mrf.mxu1 }
 0x263   : > { %v5580_v8 = vpop.f32.mrf.mxu0 }
 0x264   : > { %v5581_v52 = vadd.f32 %v5580_v8, %v5579_v42 }
 0x265   : > { %v5582_v1 = vpop.f32.mrf.mxu0 }
 0x266   : > { %v7714_v16 = vadd.f32 %v5581_v52, %v7501_v12  ;;  %v5612_v12 = vadd.f32 %v7544_v21, %v7536_v22 }
 0x267   : > { %v5583_v19 = vpop.f32.mrf.mxu0 }
 0x268   : > { %8353 = vst [vmem:[#allocation18_spill] sm:$0xff] %v7714_v16  ;;  %v5584_v56 = vadd.f32 %v5583_v19, %v5582_v1  ;;  %v7728_v1 = vpop.f32.mrf.mxu1 }
 0x269   : > { %v5585_v59 = vpop.f32.mrf.mxu0 }
 0x26a   : > { %v7719_v26 = vadd.f32 %v5584_v56, %v7509_v31  ;;  %v5615_v56 = vadd.f32 %v7559_v2, %v7553_v38 }
 0x26b   : > { %v5586_v46 = vpop.f32.mrf.mxu0 }
 0x26c   : > { %v5587_v53 = vadd.f32 %v5586_v46, %v5585_v59  ;;  %v3284_v46 = vadd.f32 %v5612_v12, %v7551_v34  ;;  %v3287_v38 = vadd.f32 %v5615_v56, %v7565_v58  ;;  %v5624_v56 = vadd.f32 %v7596_v47, %v7590_v40 }
 0x26d   : > { %v5588_v45 = vpop.f32.mrf.mxu0 }
 0x26e   : > { %v7724_v42 = vadd.f32 %v5587_v53, %v7519_v50  ;;  %v7736_v50 = vpop.f32.mrf.mxu1  ;;  %v3300_v40 = vadd.f32 %v5624_v56, %v7587_v23 }
 0x26f   : > { %v5589_v8 = vpop.f32.mrf.mxu0 }
 0x270   : > { %8354 = vst [vmem:[#allocation19_spill] sm:$0xff] %v7724_v42  ;;  %v5590_v52 = vadd.f32 %v5589_v8, %v5588_v45  ;;  %v7748_v2 = vpop.f32.mrf.mxu1 }
 0x271   : > { %v5591_v19 = vpop.f32.mrf.mxu0 }
 0x272   : > { %v7731_v16 = vadd.f32 %v5590_v52, %v7530_v7  ;;  %v5618_v7 = vadd.f32 %v7570_v62, %v7567_v51  ;;  %v7757_v62 = vpop.f32.mrf.mxu1 }
 0x273   : > { %v5592_v31 = vpop.f32.mrf.mxu0 }
 0x274   : > { %v5593_v59 = vadd.f32 %v5592_v31, %v5591_v19  ;;  %v3292_v51 = vadd.f32 %v5618_v7, %v7574_v17 }
 0x275   : > { %v3444_v53 = vpop.f32.mrf.mxu0 }
 0x276   : > { %v7739_v42 = vadd.f32 %v5593_v59, %v7542_v25  ;;  %v7741_v22 = vadd.f32 %v3444_v53, %v3284_v46  ;;  %v5621_v25 = vadd.f32 %v7583_v30, %v7577_v11  ;;  %v7766_v30 = vpop.f32.mrf.mxu1 }
 0x277   : > { %v3446_v21 = vpop.f32.mrf.mxu0 }
 0x278   : > { %v3571_v45 = vmul.f32 %v7741_v22, %v7741_v22  ;;  %v3295_v11 = vadd.f32 %v5621_v25, %v7580_v29  ;;  %v5627_v21 = vadd.f32 %v7609_v41, %v7603_v10  ;;  %v7775_v47 = vpop.f32.mrf.mxu1 }
 0x279   : > { %v3447_v34 = vpop.f32.mrf.mxu0 }
 0x27a   : > { %v7750_v8 = vadd.f32 %v3447_v34, %v3287_v38  ;;  %5834 = vmatprep.mubr.f32.mxu1 %v3571_v45  ;;  %v5630_v34 = vadd.f32 %v7622_v15, %v7616_v54  ;;  %v3303_v10 = vadd.f32 %v5627_v21, %v7593_v9  ;;  %v7784_v41 = vpop.f32.mrf.mxu1  ;;  %v5639_v21 = vadd.f32 %v7656_v24, %v7651_v61 }
 0x27b   : > { %v3449_v12 = vpop.f32.mrf.mxu0 }
 0x27c   : > { %v3572_v52 = vmul.f32 %v7750_v8, %v7750_v8  ;;  %v3308_v54 = vadd.f32 %v5630_v34, %v7600_v49  ;;  %v7793_v15 = vpop.f32.mrf.mxu1  ;;  %v3319_v61 = vadd.f32 %v5639_v21, %v7619_v36  ;;  %v5654_v21 = vadd.f32 %v7706_v55, %v7701_v44 }
 0x27d   : > { %v3452_v19 = vpop.f32.mrf.mxu0 }
 0x27e   : > { %v7759_v31 = vadd.f32 %v3452_v19, %v3292_v51  ;;  %5835 = vmatmul.mubr.f32.vlgmr.msra.gmra.mxu1 %v3572_v52  ;;  %v5633_v51 = vadd.f32 %v7635_v27, %v7629_v4  ;;  %v7802_v27 = vpop.f32.mrf.mxu1 }
 0x27f   : > { %v3454_v58 = vpop.f32.mrf.mxu0 }
 0x280   : > { %v3573_v59 = vmul.f32 %v7759_v31, %v7759_v31  ;;  %v3311_v4 = vadd.f32 %v5633_v51, %v7606_v3 }
 0x281   : > { %v3455_v46 = vpop.f32.mrf.mxu0 }
 0x282   : > { %v7768_v53 = vadd.f32 %v3455_v46, %v3295_v11  ;;  %5837 = vmatprep.mubr.f32.mxu1 %v3573_v59  ;;  %v5636_v59 = vadd.f32 %v7646_v60, %v7641_v32  ;;  %v7811_v60 = vpop.f32.mrf.mxu1 }
 0x283   : > { %v3457_v17 = vpop.f32.mrf.mxu0 }
 0x284   : > { %v3574_v7 = vmul.f32 %v7768_v53, %v7768_v53  ;;  %v3316_v32 = vadd.f32 %v5636_v59, %v7613_v5  ;;  %v7820_v24 = vpop.f32.mrf.mxu1 }
 0x285   : > { %v3460_v45 = vpop.f32.mrf.mxu0 }
 0x286   : > { %v7777_v38 = vadd.f32 %v3460_v45, %v3300_v40  ;;  %5838 = vmatmul.mubr.f32.gmra.mxu1 %v3574_v7 }
 0x287   : > { %v3462_v29 = vpop.f32.mrf.mxu0 }
 0x288   : > { %v3575_v12 = vmul.f32 %v7777_v38, %v7777_v38  ;;  %v5642_v29 = vadd.f32 %v7666_v18, %v7661_v43  ;;  %v7829_v18 = vpop.f32.mrf.mxu1 }
 0x289   : > { %v3463_v25 = vpop.f32.mrf.mxu0 }
 0x28a   : > { %v7786_v52 = vadd.f32 %v3463_v25, %v3303_v10  ;;  %5840 = vmatprep.mubr.f32.mxu1 %v3575_v12  ;;  %v5645_v25 = vadd.f32 %v7676_v63, %v7671_v13  ;;  %v3324_v43 = vadd.f32 %v5642_v29, %v7626_v57  ;;  %v7838_v63 = vpop.f32.mrf.mxu1  ;;  %v5657_v29 = vadd.f32 %v7716_v39, %v7711_v6 }
 0x28b   : > { %v3465_v23 = vpop.f32.mrf.mxu0 }
 0x28c   : > { %v3576_v19 = vmul.f32 %v7786_v52, %v7786_v52  ;;  %v3327_v13 = vadd.f32 %v5645_v25, %v7632_v14 }
 0x28d   : > { %v3468_v58 = vpop.f32.mrf.mxu0 }
 0x28e   : > { %v7795_v56 = vadd.f32 %v3468_v58, %v3308_v54  ;;  %5841 = vmatmul.mubr.f32.gmra.mxu1 %v3576_v19  ;;  %v5648_v54 = vadd.f32 %v7686_v0, %v7681_v48  ;;  %v7847_v0 = vpop.f32.mrf.mxu1 }
 0x28f   : > { %v3470_v9 = vpop.f32.mrf.mxu0 }
 0x290   : > { %v3577_v11 = vmul.f32 %v7795_v56, %v7795_v56  ;;  %v3332_v48 = vadd.f32 %v5648_v54, %v7639_v35 }
 0x291   : > { %v3471_v46 = vpop.f32.mrf.mxu0 }
 0x292   : > { %v7804_v17 = vadd.f32 %v3471_v46, %v3311_v4  ;;  %5843 = vmatprep.mubr.f32.mxu1 %v3577_v11  ;;  %v5651_v11 = vadd.f32 %v7696_v33, %v7691_v20  ;;  %v7856_v33 = vpop.f32.mrf.mxu1 }
 0x293   : > { %v3473_v49 = vpop.f32.mrf.mxu0 }
 0x294   : > { %v3578_v7 = vmul.f32 %v7804_v17, %v7804_v17  ;;  %v7865_v55 = vpop.f32.mrf.mxu1 }
 0x295   : > { %v3476_v40 = vpop.f32.mrf.mxu0 }
 0x296   : > { %v7813_v45 = vadd.f32 %v3476_v40, %v3316_v32  ;;  %5844 = vmatmul.mubr.f32.gmra.mxu1 %v3578_v7  ;;  %v8355_v32 = vld [vmem:[#allocation5_spill] sm:$0xff]  ;;  %v5683_v39 = vpop.f32.mrf.mxu1 }
 0x297   : > { %v3478_v3 = vpop.f32.mrf.mxu0  ;;  %v3335_v20 = vadd.f32 %v5651_v11, %v8355_v32 }
 0x298   : > { %v3579_v34 = vmul.f32 %v7813_v45, %v7813_v45 }
 0x299   : > { %v3479_v12 = vpop.f32.mrf.mxu0 }
 0x29a   : > { %v7822_v10 = vadd.f32 %v3479_v12, %v3319_v61  ;;  %5846 = vmatprep.mubr.f32.mxu1 %v3579_v34  ;;  %v8356_v61 = vld [vmem:[#allocation6_spill] sm:$0xff] }
 0x29b   : > { %v3481_v5 = vpop.f32.mrf.mxu0  ;;  %v3340_v44 = vadd.f32 %v5654_v21, %v8356_v61  ;;  %v8359_v21 = vld [vmem:[#allocation9_spill] sm:$0xff] }
 0x29c   : > { %v3580_v23 = vmul.f32 %v7822_v10, %v7822_v10 }
 0x29d   : > { %v3484_v51 = vpop.f32.mrf.mxu0 }
 0x29e   : > { %v7831_v19 = vadd.f32 %v3484_v51, %v3324_v43  ;;  %5847 = vmatmul.mubr.f32.gmra.mxu1 %v3580_v23  ;;  %v5660_v23 = vadd.f32 %v7728_v1, %v7721_v28  ;;  %v8357_v51 = vld [vmem:[#allocation7_spill] sm:$0xff]  ;;  %v5685_v28 = vpop.f32.mrf.mxu1 }
 0x29f   : > { %v3486_v36 = vpop.f32.mrf.mxu0  ;;  %v3343_v6 = vadd.f32 %v5657_v29, %v8357_v51  ;;  %v8360_v29 = vld [vmem:[#allocation10_spill] sm:$0xff] }
 0x2a0   : > { %v3581_v58 = vmul.f32 %v7831_v19, %v7831_v19 }
 0x2a1   : > { %v3487_v9 = vpop.f32.mrf.mxu0 }
 0x2a2   : > { %v7840_v59 = vadd.f32 %v3487_v9, %v3327_v13  ;;  %5849 = vmatprep.mubr.f32.mxu1 %v3581_v58  ;;  %v5663_v13 = vadd.f32 %v7748_v2, %v7736_v50  ;;  %v5686_v50 = vpop.f32.mrf.mxu1 }
 0x2a3   : > { %v3489_v57 = vpop.f32.mrf.mxu0 }
 0x2a4   : > { %v3582_v4 = vmul.f32 %v7840_v59, %v7840_v59  ;;  %v8358_v57 = vld [vmem:[#allocation8_spill] sm:$0xff] }
 0x2a5   : > { %v3492_v46 = vpop.f32.mrf.mxu0  ;;  %v3348_v11 = vadd.f32 %v5660_v23, %v8358_v57  ;;  %v8361_v23 = vld [vmem:[#allocation11_spill] sm:$0xff] }
 0x2a6   : > { %v7849_v49 = vadd.f32 %v3492_v46, %v3332_v48  ;;  %5850 = vmatmul.mubr.f32.gmra.mxu1 %v3582_v4  ;;  %v5666_v46 = vadd.f32 %v7766_v30, %v7757_v62  ;;  %v5688_v62 = vpop.f32.mrf.mxu1 }
 0x2a7   : > { %v3494_v14 = vpop.f32.mrf.mxu0 }
 0x2a8   : > { %v3583_v7 = vmul.f32 %v7849_v49, %v7849_v49 }
 0x2a9   : > { %v3495_v40 = vpop.f32.mrf.mxu0 }
 0x2aa   : > { %v7858_v3 = vadd.f32 %v3495_v40, %v3335_v20  ;;  %5852 = vmatprep.mubr.f32.mxu1 %v3583_v7  ;;  %v3351_v7 = vadd.f32 %v5663_v13, %v8359_v21  ;;  %v5669_v40 = vadd.f32 %v7784_v41, %v7775_v47  ;;  %v5689_v47 = vpop.f32.mrf.mxu1  ;;  %v8362_v13 = vld [vmem:[#allocation12_spill] sm:$0xff] }
 0x2ab   : > { %v3497_v35 = vpop.f32.mrf.mxu0 }
 0x2ac   : > { %v3584_v34 = vmul.f32 %v7858_v3, %v7858_v3 }
 0x2ad   : > { %v3500_v12 = vpop.f32.mrf.mxu0 }
 0x2ae   : > { %v7867_v5 = vadd.f32 %v3500_v12, %v3340_v44  ;;  %5853 = vmatmul.mubr.f32.gmra.mxu1 %v3584_v34  ;;  %v3356_v34 = vadd.f32 %v5666_v46, %v8360_v29  ;;  %v5672_v12 = vadd.f32 %v7802_v27, %v7793_v15  ;;  %v5691_v15 = vpop.f32.mrf.mxu1  ;;  %v8363_v46 = vld [vmem:[#allocation13_spill] sm:$0xff] }
 0x2af   : > { %v3502_v25 = vpop.f32.mrf.mxu0 }
 0x2b0   : > { %v3585_v43 = vmul.f32 %v7867_v5, %v7867_v5 }
 0x2b1   : > { %v3503_v36 = vpop.f32.mrf.mxu0 }
 0x2b2   : > { %v7874_v54 = vadd.f32 %v3503_v36, %v3343_v6  ;;  %5855 = vmatprep.mubr.f32.mxu1 %v3585_v43  ;;  %v3359_v43 = vadd.f32 %v5669_v40, %v8361_v23  ;;  %v5675_v36 = vadd.f32 %v7820_v24, %v7811_v60  ;;  %v5692_v60 = vpop.f32.mrf.mxu1  ;;  %v8364_v40 = vld [vmem:[#allocation14_spill] sm:$0xff] }
 0x2b3   : > { %v3505_v58 = vpop.f32.mrf.mxu0 }
 0x2b4   : > { %v3586_v9 = vmul.f32 %v7874_v54, %v7874_v54 }
 0x2b5   : > { %v3508_v1 = vpop.f32.mrf.mxu0 }
 0x2b6   : > { %v7881_v4 = vadd.f32 %v3508_v1, %v3348_v11  ;;  %5856 = vmatmul.mubr.f32.gmra.mxu1 %v3586_v9  ;;  %v3364_v9 = vadd.f32 %v5672_v12, %v8362_v13  ;;  %v5678_v1 = vadd.f32 %v7838_v63, %v7829_v18  ;;  %v5694_v18 = vpop.f32.mrf.mxu1  ;;  %v8365_v12 = vld [vmem:[#allocation15_spill] sm:$0xff] }
 0x2b7   : > { %v3510_v48 = vpop.f32.mrf.mxu0 }
 0x2b8   : > { %v3587_v14 = vmul.f32 %v7881_v4, %v7881_v4  ;;  %v5695_v23 = vpop.f32.mrf.mxu1 }
 0x2b9   : > { %v3511_v2 = vpop.f32.mrf.mxu0 }
 0x2ba   : > { %v7888_v32 = vadd.f32 %v3511_v2, %v3351_v7  ;;  %5858 = vmatprep.mubr.f32.mxu1 %v3587_v14  ;;  %v3367_v14 = vadd.f32 %v5675_v36, %v8363_v46  ;;  %v5681_v2 = vadd.f32 %v7856_v33, %v7847_v0  ;;  %v8366_v36 = vld [vmem:[#allocation16_spill] sm:$0xff]  ;;  %v4273_v46 = vld [vmem:[%s8336_s3 + $0x68] sm:$0xff] }
 0x2bb   : > { %v3513_v20 = vpop.f32.mrf.mxu0 }
 0x2bc   : > { %v3588_v35 = vmul.f32 %v7888_v32, %v7888_v32 }
 0x2bd   : > { %v3516_v30 = vpop.f32.mrf.mxu0 }
 0x2be   : > { %v7895_v61 = vadd.f32 %v3516_v30, %v3356_v34  ;;  %5859 = vmatmul.mubr.f32.gmra.mxu1 %v3588_v35  ;;  %v3372_v35 = vadd.f32 %v5678_v1, %v8364_v40  ;;  %v5684_v30 = vadd.f32 %v5683_v39, %v7865_v55  ;;  %v4275_v55 = vld [vmem:[%s8336_s3 + $0x78] sm:$0xff]  ;;  %v5697_v39 = vpop.f32.mrf.mxu1  ;;  %v8367_v1 = vld [vmem:[#allocation17_spill] sm:$0xff] }
 0x2bf   : > { %v3518_v44 = vpop.f32.mrf.mxu0  ;;  %5882 = vmatprep.subr.mxu1 %v4275_v55 }
 0x2c0   : > { %v3589_v25 = vmul.f32 %v7895_v61, %v7895_v61  ;;  %5883 = vmatpush3.msra.mxu1 %v4275_v55 }
 0x2c1   : > { %v3519_v41 = vpop.f32.mrf.mxu0 }
 0x2c2   : > { %v7902_v51 = vadd.f32 %v3519_v41, %v3359_v43  ;;  %5861 = vmatprep.mubr.f32.mxu1 %v3589_v25  ;;  %v3375_v25 = vadd.f32 %v5681_v2, %v8365_v12  ;;  %v5687_v41 = vadd.f32 %v5686_v50, %v5685_v28  ;;  %v5690_v50 = vadd.f32 %v5689_v47, %v5688_v62  ;;  %v4272_v62 = vld [vmem:[%s8336_s3 + $0x60] sm:$0xff]  ;;  %v8368_v12 = vld [vmem:[#allocation18_spill] sm:$0xff] }
 0x2c3   : > { %v3521_v6 = vpop.f32.mrf.mxu0  ;;  %v5693_v2 = vadd.f32 %v5692_v60, %v5691_v15  ;;  %v4270_v15 = vld [vmem:[%s8336_s3 + $0x50] sm:$0xff] }
 0x2c4   : > { %v3590_v58 = vmul.f32 %v7902_v51, %v7902_v51  ;;  %v3388_v40 = vadd.f32 %v5690_v50, %v7709_v37 }
 0x2c5   : > { %v3524_v27 = vpop.f32.mrf.mxu0 }
 0x2c6   : > { %v7909_v57 = vadd.f32 %v3524_v27, %v3364_v9  ;;  %5862 = vmatmul.mubr.f32.gmra.mxu1 %v3590_v58  ;;  %v3380_v58 = vadd.f32 %v5684_v30, %v8366_v36  ;;  %v4274_v27 = vld [vmem:[%s8336_s3 + $0x70] sm:$0xff] }
 0x2c7   : > { %v3526_v11 = vpop.f32.mrf.mxu0  ;;  %5884 = vmatprep.subr.mxu1 %v4274_v27 }
 0x2c8   : > { %v3591_v48 = vmul.f32 %v7909_v57, %v7909_v57  ;;  %5885 = vmatpush3.msra.mxu1 %v4274_v27 }
 0x2c9   : > { %v3527_v24 = vpop.f32.mrf.mxu0  ;;  %5886 = vmatprep.subr.mxu1 %v4273_v46 }
 0x2ca   : > { %v7916_v21 = vadd.f32 %v3527_v24, %v3367_v14  ;;  %5864 = vmatprep.mubr.f32.mxu1 %v3591_v48  ;;  %v3383_v48 = vadd.f32 %v5687_v41, %v8367_v1  ;;  %v5698_v14 = vpop.f32.mrf.mxu1  ;;  %5887 = vmatpush3.msra.mxu1 %v4273_v46 }
 0x2cb   : > { %v3529_v7 = vpop.f32.mrf.mxu0  ;;  %5888 = vmatprep.subr.mxu1 %v4272_v62  ;;  %v5699_v36 = vadd.f32 %v5698_v14, %v5697_v39  ;;  %v4266_v39 = vld [vmem:[%s8336_s3 + $0x30] sm:$0xff]  ;;  %v4265_v14 = vld [vmem:[%s8336_s3 + $0x28] sm:$0xff] }
 0x2cc   : > { %v3592_v20 = vmul.f32 %v7916_v21, %v7916_v21  ;;  %5889 = vmatpush3.msra.mxu1 %v4272_v62 }
 0x2cd   : > { %v3532_v63 = vpop.f32.mrf.mxu0 }
 0x2ce   : > { %v7923_v29 = vadd.f32 %v3532_v63, %v3372_v35  ;;  %5865 = vmatmul.mubr.f32.gmra.mxu1 %v3592_v20  ;;  %v4271_v35 = vld [vmem:[%s8336_s3 + $0x58] sm:$0xff]  ;;  %v5700_v63 = vpop.f32.mrf.mxu1 }
 0x2cf   : > { %v3534_v34 = vpop.f32.mrf.mxu0  ;;  %5890 = vmatprep.subr.mxu1 %v4271_v35 }
 0x2d0   : > { %v3593_v44 = vmul.f32 %v7923_v29, %v7923_v29  ;;  %5891 = vmatpush3.msra.mxu1 %v4271_v35 }
 0x2d1   : > { %v3535_v0 = vpop.f32.mrf.mxu0  ;;  %5892 = vmatprep.subr.mxu1 %v4270_v15 }
 0x2d2   : > { %v7929_v33 = vadd.f32 %v3535_v0, %v3375_v25  ;;  %5867 = vmatprep.mubr.f32.mxu1 %v3593_v44  ;;  %v5696_v44 = vadd.f32 %v5695_v23, %v5694_v18  ;;  %v3391_v25 = vadd.f32 %v5693_v2, %v8368_v12  ;;  %v4269_v0 = vld [vmem:[%s8336_s3 + $0x48] sm:$0xff]  ;;  %5893 = vmatpush3.msra.mxu1 %v4270_v15  ;;  %v4268_v18 = vld [vmem:[%s8336_s3 + $0x40] sm:$0xff] }
 0x2d3   : > { %v3537_v43 = vpop.f32.mrf.mxu0  ;;  %5894 = vmatprep.subr.mxu1 %v4269_v0  ;;  %v4264_v2 = vld [vmem:[%s8336_s3 + $0x20] sm:$0xff] }
 0x2d4   : > { %v3594_v6 = vmul.f32 %v7929_v33, %v7929_v33  ;;  %v5701_v43 = vpop.f32.mrf.mxu1  ;;  %5895 = vmatpush3.msra.mxu1 %v4269_v0  ;;  %v3396_v55 = vadd.f32 %v5696_v44, %v7719_v26  ;;  %v4262_v44 = vld [vmem:[%s8336_s3 + $0x10] sm:$0xff] }
 0x2d5   : > { %v3540_v13 = vpop.f32.mrf.mxu0  ;;  %5896 = vmatprep.subr.mxu1 %v4268_v18  ;;  %v5702_v1 = vadd.f32 %v5701_v43, %v5700_v63 }
 0x2d6   : > { %v7937_v9 = vadd.f32 %v3540_v13, %v3380_v58  ;;  %5868 = vmatmul.mubr.f32.gmra.mxu1 %v3594_v6  ;;  %v4267_v13 = vld [vmem:[%s8336_s3 + $0x38] sm:$0xff]  ;;  %v5703_v27 = vpop.f32.mrf.mxu1 }
 0x2d7   : > { %v3542_v28 = vpop.f32.mrf.mxu0  ;;  %5897 = vmatpush3.msra.mxu1 %v4268_v18  ;;  %v3404_v63 = vadd.f32 %v5702_v1, %v7731_v16 }
 0x2d8   : > { %v3595_v11 = vmul.f32 %v7937_v9, %v7937_v9  ;;  %5898 = vmatprep.subr.mxu1 %v4267_v13 }
 0x2d9   : > { %v3543_v24 = vpop.f32.mrf.mxu0  ;;  %5899 = vmatpush3.msra.mxu1 %v4267_v13 }
 0x2da   : > { %v7948_v7 = vadd.f32 %v3543_v24, %v3383_v48  ;;  %5870 = vmatprep.mubr.f32.mxu1 %v3595_v11  ;;  %v8369_v48 = vld [vmem:[#allocation19_spill] sm:$0xff]  ;;  %5900 = vmatprep.subr.mxu1 %v4266_v39  ;;  %v5704_v24 = vpop.f32.mrf.mxu1 }
 0x2db   : > { %v3545_v47 = vpop.f32.mrf.mxu0  ;;  %v3399_v46 = vadd.f32 %v5699_v36, %v8369_v48  ;;  %5901 = vmatpush3.msra.mxu1 %v4266_v39 }
 0x2dc   : > { %v3596_v20 = vmul.f32 %v7948_v7, %v7948_v7  ;;  %5902 = vmatprep.subr.mxu1 %v4265_v14 }
 0x2dd   : > { %v3548_v34 = vpop.f32.mrf.mxu0  ;;  %5903 = vmatpush3.msra.mxu1 %v4265_v14 }
 0x2de   : > { %v7959_v30 = vadd.f32 %v3548_v34, %v3388_v40  ;;  %5871 = vmatmul.mubr.f32.gmra.mxu1 %v3596_v20  ;;  %v5705_v40 = vadd.f32 %v5704_v24, %v5703_v27  ;;  %5904 = vmatprep.subr.mxu1 %v4264_v2  ;;  %v4263_v34 = vld [vmem:[%s8336_s3 + $0x18] sm:$0xff] }
 0x2df   : > { %v3550_v60 = vpop.f32.mrf.mxu0  ;;  %5905 = vmatpush3.msra.mxu1 %v4264_v2 }
 0x2e0   : > { %v3597_v37 = vmul.f32 %v7959_v30, %v7959_v30  ;;  %5906 = vmatprep.subr.mxu1 %v4263_v34  ;;  %v3407_v12 = vadd.f32 %v5705_v40, %v7739_v42 }
 0x2e1   : > { %v3551_v41 = vpop.f32.mrf.mxu0  ;;  %5907 = vmatpush3.msra.mxu1 %v4263_v34 }
 0x2e2   : > { %v7970_v6 = vadd.f32 %v3551_v41, %v3391_v25  ;;  %5873 = vmatprep.mubr.f32.mxu1 %v3597_v37  ;;  %5908 = vmatprep.subr.mxu1 %v4262_v44  ;;  %v4261_v25 = vld [vmem:[%s8336_s3 + $0x8] sm:$0xff]  ;;  %v4260_v41 = vld [vmem:[%s8336_s3] sm:$0xff] }
 0x2e3   : > { %v3553_v23 = vpop.f32.mrf.mxu0  ;;  %5909 = vmatpush3.msra.mxu1 %v4262_v44 }
 0x2e4   : > { %v3598_v58 = vmul.f32 %v7970_v6, %v7970_v6  ;;  %5910 = vmatprep.subr.mxu1 %v4261_v25 }
 0x2e5   : > { %v3556_v28 = vpop.f32.mrf.mxu0  ;;  %5911 = vmatpush3.msra.mxu1 %v4261_v25 }
 0x2e6   : > { %v7981_v50 = vadd.f32 %v3556_v28, %v3396_v55  ;;  %5874 = vmatmul.mubr.f32.gmra.mxu1 %v3598_v58  ;;  %5912 = vmatprep.subr.mxu1 %v4260_v41 }
 0x2e7   : > { %v3558_v11 = vpop.f32.mrf.mxu0  ;;  %5913 = vmatpush3.msra.mxu1 %v4260_v41 }
 0x2e8   : > { %v3599_v26 = vmul.f32 %v7981_v50, %v7981_v50 }
 0x2e9   : > { %v3559_v62 = vpop.f32.mrf.mxu0 }
 0x2ea   : > { %v7992_v47 = vadd.f32 %v3559_v62, %v3399_v46  ;;  %5876 = vmatprep.mubr.f32.mxu1 %v3599_v26 }
 0x2eb   : > { %v3561_v20 = vpop.f32.mrf.mxu0 }
 0x2ec   : > { %v3600_v35 = vmul.f32 %v7992_v47, %v7992_v47 }
 0x2ed   : > { %v3564_v15 = vpop.f32.mrf.mxu0 }
 0x2ee   : > { %v8003_v60 = vadd.f32 %v3564_v15, %v3404_v63  ;;  %5877 = vmatmul.mubr.f32.gmra.mxu1 %v3600_v35 }
 0x2ef   : > { %v3566_v37 = vpop.f32.mrf.mxu0 }
 0x2f0   : > { %v3601_v16 = vmul.f32 %v8003_v60, %v8003_v60 }
 0x2f1   : > { %v3567_v0 = vpop.f32.mrf.mxu0 }
 0x2f2   : > { %v8014_v43 = vadd.f32 %v3567_v0, %v3407_v12  ;;  %5879 = vmatprep.mubr.f32.mxu1 %v3601_v16 }
 0x2f3   : > { %v3569_v18 = vpop.f32.mrf.mxu0 }
 0x2f4   : > { %v3602_v42 = vmul.f32 %v8014_v43, %v8014_v43 }
 0x2f6   : > { %5880 = vmatmul.mubr.f32.gmra.mxu1 %v3602_v42 }
 0x33e   : > { %v5836_v23 = vpop.f32.mrf.mxu1 }
 0x33f   : > { %6449 = vrsqrt.f32 %v5836_v23  ;;  %vm3853_vm1 = vcmp.eq.f32.partialorder %v5836_v23, inf  ;;  %v3856_v39 = vand.u32 2147483648, %v5836_v23  ;;  %vm3855_vm2 = vcmp.eq.f32.partialorder %v5836_v23, 0.0 }
 0x340   : > { %v3685_v36 = vpop.f32.mrf.mxu1 }
 0x341   : > { %6451 = vrsqrt.f32 %v3685_v36  ;;  %vm3846_vm3 = vcmp.eq.f32.partialorder %v3685_v36, inf  ;;  %v3849_v46 = vand.u32 2147483648, %v3685_v36  ;;  %vm3848_vm4 = vcmp.eq.f32.partialorder %v3685_v36, 0.0 }
 0x346   : > { %v5839_v58 = vpop.f32.mrf.mxu1 }
 0x347   : > { %6453 = vrsqrt.f32 %v5839_v58  ;;  %vm3867_vm5 = vcmp.eq.f32.partialorder %v5839_v58, inf  ;;  %v3870_v34 = vand.u32 2147483648, %v5839_v58  ;;  %vm3869_vm6 = vcmp.eq.f32.partialorder %v5839_v58, 0.0 }
 0x348   : > { %v3695_v55 = vpop.f32.mrf.mxu1 }
 0x349   : > { %6455 = vrsqrt.f32 %v3695_v55  ;;  %vm3860_vm7 = vcmp.eq.f32.partialorder %v3695_v55, inf  ;;  %v3863_v12 = vand.u32 2147483648, %v3695_v55  ;;  %vm3862_vm8 = vcmp.eq.f32.partialorder %v3695_v55, 0.0 }
 0x34c   : > { %v6450_v13 = vpop.eup %6449 }
 0x34d   : > { %v3852_v27 = vmul.f32 %v6450_v13, %v5836_v23 }
 0x34e   : > { %v6452_v28 = vpop.eup %6451  ;;  %v5842_v11 = vpop.f32.mrf.mxu1 }
 0x34f   : > { %v3854_v1 = vsel %vm3853_vm1, %v5836_v23, %v3852_v27  ;;  %v3845_v26 = vmul.f32 %v6452_v28, %v3685_v36  ;;  %6457 = vrsqrt.f32 %v5842_v11  ;;  %vm3881_vm9 = vcmp.eq.f32.partialorder %v5842_v11, inf }
 0x350   : > { %v3857_v48 = vsel %vm3855_vm2, %v3856_v39, %v3854_v1  ;;  %v3705_v14 = vpop.f32.mrf.mxu1  ;;  %v3884_v27 = vand.u32 2147483648, %v5842_v11  ;;  %vm3883_vm10 = vcmp.eq.f32.partialorder %v5842_v11, 0.0 }
 0x351   : > { %v4997_v24 = vmul.f32 -1.442695, %v3857_v48  ;;  %v3847_v62 = vsel %vm3846_vm3, %v3685_v36, %v3845_v26  ;;  %6459 = vrsqrt.f32 %v3705_v14  ;;  %vm3874_vm11 = vcmp.eq.f32.partialorder %v3705_v14, inf }
 0x352   : > { %v3850_v2 = vsel %vm3848_vm4, %v3849_v46, %v3847_v62  ;;  %vm3876_vm12 = vcmp.eq.f32.partialorder %v3705_v14, 0.0 }
 0x353   : > { %6461 = vpow2.f32 %v4997_v24  ;;  %v4996_v20 = vmul.f32 -1.442695, %v3850_v2 }
 0x354   : > { %v6454_v40 = vpop.eup %6453 }
 0x355   : > { %6463 = vpow2.f32 %v4996_v20  ;;  %v3866_v35 = vmul.f32 %v6454_v40, %v5839_v58 }
 0x356   : > { %v6456_v63 = vpop.eup %6455  ;;  %v5845_v15 = vpop.f32.mrf.mxu1 }
 0x357   : > { %v3868_v44 = vsel %vm3867_vm5, %v5839_v58, %v3866_v35  ;;  %v3859_v37 = vmul.f32 %v6456_v63, %v3695_v55  ;;  %6465 = vrsqrt.f32 %v5845_v15  ;;  %vm3895_vm13 = vcmp.eq.f32.partialorder %v5845_v15, inf }
 0x358   : > { %v3871_v16 = vsel %vm3869_vm6, %v3870_v34, %v3868_v44  ;;  %v3715_v25 = vpop.f32.mrf.mxu1  ;;  %v3898_v44 = vand.u32 2147483648, %v5845_v15  ;;  %vm3897_vm14 = vcmp.eq.f32.partialorder %v5845_v15, 0.0 }
 0x359   : > { %v4999_v0 = vmul.f32 -1.442695, %v3871_v16  ;;  %v3861_v41 = vsel %vm3860_vm7, %v3695_v55, %v3859_v37  ;;  %6467 = vrsqrt.f32 %v3715_v25  ;;  %v3877_v55 = vand.u32 2147483648, %v3705_v14 }
 0x35a   : > { %v3864_v18 = vsel %vm3862_vm8, %v3863_v12, %v3861_v41  ;;  %vm3888_vm15 = vcmp.eq.f32.partialorder %v3715_v25, inf  ;;  %vm3890_vm0 = vcmp.eq.f32.partialorder %v3715_v25, 0.0  ;;  %v3891_v41 = vand.u32 2147483648, %v3715_v25 }
 0x35b   : > { %6469 = vpow2.f32 %v4999_v0  ;;  %v4998_v42 = vmul.f32 -1.442695, %v3864_v18 }
 0x35c   : > { %v6458_v23 = vpop.eup %6457 }
 0x35d   : > { %6471 = vpow2.f32 %v4998_v42  ;;  %v3880_v36 = vmul.f32 %v6458_v23, %v5842_v11 }
 0x35e   : > { %v6460_v13 = vpop.eup %6459  ;;  %v8021_v58 = vpop.f32.mrf.mxu1 }
 0x35f   : > { %v3882_v28 = vsel %vm3881_vm9, %v5842_v11, %v3880_v36  ;;  %v3873_v39 = vmul.f32 %v6460_v13, %v3705_v14  ;;  %6473 = vrsqrt.f32 %v8021_v58  ;;  %vm3909_vm1 = vcmp.eq.f32.partialorder %v8021_v58, inf }
 0x360   : > { %v6462_v1 = vpop.eup %6461  ;;  %v3885_v26 = vsel %vm3883_vm10, %v3884_v27, %v3882_v28  ;;  %v8024_v48 = vpop.f32.mrf.mxu1  ;;  %vm3911_vm2 = vcmp.eq.f32.partialorder %v8021_v58, 0.0 }
 0x361   : > { %v4165_v46 = vadd.f32 1.0, %v6462_v1  ;;  %v5001_v24 = vmul.f32 -1.442695, %v3885_v26  ;;  %v3875_v62 = vsel %vm3874_vm11, %v3705_v14, %v3873_v39  ;;  %6475 = vrsqrt.f32 %v8024_v48 }
 0x362   : > { %v6464_v2 = vpop.eup %6463  ;;  %v3878_v20 = vsel %vm3876_vm12, %v3877_v55, %v3875_v62  ;;  %v3912_v55 = vand.u32 2147483648, %v8021_v58  ;;  %vm3902_vm3 = vcmp.eq.f32.partialorder %v8024_v48, inf  ;;  %vm3904_vm4 = vcmp.eq.f32.partialorder %v8024_v48, 0.0 }
 0x363   : > { %6477 = vrcp.f32 %v4165_v46  ;;  %v4164_v40 = vadd.f32 1.0, %v6464_v2  ;;  %v5000_v11 = vmul.f32 -1.442695, %v3878_v20  ;;  %v3905_v20 = vand.u32 2147483648, %v8024_v48 }
 0x364   : > { %v6466_v35 = vpop.eup %6465  ;;  %6479 = vpow2.f32 %v5001_v24 }
 0x365   : > { %6481 = vrcp.f32 %v4164_v40  ;;  %v3894_v63 = vmul.f32 %v6466_v35, %v5845_v15 }
 0x366   : > { %v6468_v34 = vpop.eup %6467  ;;  %6483 = vpow2.f32 %v5000_v11  ;;  %v8027_v37 = vpop.f32.mrf.mxu1 }
 0x367   : > { %v3896_v16 = vsel %vm3895_vm13, %v5845_v15, %v3894_v63  ;;  %v3887_v14 = vmul.f32 %v6468_v34, %v3715_v25  ;;  %6485 = vrsqrt.f32 %v8027_v37  ;;  %vm3923_vm5 = vcmp.eq.f32.partialorder %v8027_v37, inf }
 0x368   : > { %v6470_v12 = vpop.eup %6469  ;;  %v3899_v0 = vsel %vm3897_vm14, %v3898_v44, %v3896_v16  ;;  %v8030_v18 = vpop.f32.mrf.mxu1  ;;  %vm3925_vm6 = vcmp.eq.f32.partialorder %v8027_v37, 0.0 }
 0x369   : > { %v4167_v42 = vadd.f32 1.0, %v6470_v12  ;;  %v5003_v23 = vmul.f32 -1.442695, %v3899_v0  ;;  %v3889_v36 = vsel %vm3888_vm15, %v3715_v25, %v3887_v14  ;;  %6487 = vrsqrt.f32 %v8030_v18 }
 0x36a   : > { %v6472_v13 = vpop.eup %6471  ;;  %v3892_v27 = vsel %vm3890_vm0, %v3891_v41, %v3889_v36  ;;  %vm3916_vm7 = vcmp.eq.f32.partialorder %v8030_v18, inf  ;;  %vm3918_vm8 = vcmp.eq.f32.partialorder %v8030_v18, 0.0 }
 0x36b   : > { %6489 = vrcp.f32 %v4167_v42  ;;  %v4166_v28 = vadd.f32 1.0, %v6472_v13  ;;  %v5002_v15 = vmul.f32 -1.442695, %v3892_v27 }
 0x36c   : > { %v6474_v39 = vpop.eup %6473  ;;  %6491 = vpow2.f32 %v5003_v23 }
 0x36d   : > { %6493 = vrcp.f32 %v4166_v28  ;;  %v3908_v1 = vmul.f32 %v6474_v39, %v8021_v58 }
 0x36e   : > { %v6476_v26 = vpop.eup %6475  ;;  %6495 = vpow2.f32 %v5002_v15  ;;  %v8036_v46 = vpop.f32.mrf.mxu1  ;;  %v3919_v15 = vand.u32 2147483648, %v8030_v18 }
 0x36f   : > { %v3910_v25 = vsel %vm3909_vm1, %v8021_v58, %v3908_v1  ;;  %v3901_v24 = vmul.f32 %v6476_v26, %v8024_v48  ;;  %6497 = vrsqrt.f32 %v8036_v46  ;;  %vm3937_vm9 = vcmp.eq.f32.partialorder %v8036_v46, inf }
 0x370   : > { %v6478_v62 = vpop.eup %6477  ;;  %v3913_v2 = vsel %vm3911_vm2, %v3912_v55, %v3910_v25  ;;  %v8044_v40 = vpop.f32.mrf.mxu1  ;;  %vm3939_vm10 = vcmp.eq.f32.partialorder %v8036_v46, 0.0 }
 0x371   : > { %v6480_v11 = vpop.eup %6479  ;;  %v5005_v35 = vmul.f32 -1.442695, %v3913_v2  ;;  %v3903_v63 = vsel %vm3902_vm3, %v8024_v48, %v3901_v24  ;;  %6499 = vrsqrt.f32 %v8044_v40  ;;  %v3926_v48 = vand.u32 2147483648, %v8027_v37 }
 0x372   : > { %v6482_v58 = vpop.eup %6481  ;;  %v4169_v34 = vadd.f32 1.0, %v6480_v11  ;;  %v3906_v44 = vsel %vm3904_vm4, %v3905_v20, %v3903_v63  ;;  %vm3930_vm11 = vcmp.eq.f32.partialorder %v8044_v40, inf  ;;  %vm3932_vm12 = vcmp.eq.f32.partialorder %v8044_v40, 0.0 }
 0x373   : > { %v6484_v16 = vpop.eup %6483  ;;  %6501 = vpow2.f32 %v5005_v35  ;;  %v5004_v14 = vmul.f32 -1.442695, %v3906_v44  ;;  %5914 = vmatprep.mubr.f32.mxu1 %v6482_v58 }
 0x374   : > { %v6486_v12 = vpop.eup %6485  ;;  %6503 = vrcp.f32 %v4169_v34  ;;  %v4168_v0 = vadd.f32 1.0, %v6484_v16  ;;  %5915 = vmatmul.mubr.f32.vlgmr.msra.gmra.mxu1 %v6478_v62 }
 0x375   : > { %6505 = vpow2.f32 %v5004_v14  ;;  %v3922_v41 = vmul.f32 %v6486_v12, %v8027_v37  ;;  %v3933_v12 = vand.u32 2147483648, %v8044_v40 }
 0x376   : > { %v6488_v42 = vpop.eup %6487  ;;  %6507 = vrcp.f32 %v4168_v0  ;;  %v8052_v23 = vpop.f32.mrf.mxu1 }
 0x377   : > { %v3924_v36 = vsel %vm3923_vm5, %v8027_v37, %v3922_v41  ;;  %v3915_v13 = vmul.f32 %v6488_v42, %v8030_v18  ;;  %6509 = vrsqrt.f32 %v8052_v23  ;;  %vm3951_vm13 = vcmp.eq.f32.partialorder %v8052_v23, inf }
 0x378   : > { %v6490_v27 = vpop.eup %6489  ;;  %v3927_v28 = vsel %vm3925_vm6, %v3926_v48, %v3924_v36  ;;  %v8060_v39 = vpop.f32.mrf.mxu1  ;;  %vm3953_vm14 = vcmp.eq.f32.partialorder %v8052_v23, 0.0 }
 0x379   : > { %v6492_v1 = vpop.eup %6491  ;;  %v5007_v26 = vmul.f32 -1.442695, %v3927_v28  ;;  %v3917_v55 = vsel %vm3916_vm7, %v8030_v18, %v3915_v13  ;;  %6511 = vrsqrt.f32 %v8060_v39  ;;  %v3940_v18 = vand.u32 2147483648, %v8036_v46 }
 0x37a   : > { %v6494_v37 = vpop.eup %6493  ;;  %v4171_v25 = vadd.f32 1.0, %v6492_v1  ;;  %v3920_v24 = vsel %vm3918_vm8, %v3919_v15, %v3917_v55  ;;  %vm3944_vm15 = vcmp.eq.f32.partialorder %v8060_v39, inf  ;;  %vm3946_vm0 = vcmp.eq.f32.partialorder %v8060_v39, 0.0 }
 0x37b   : > { %v6496_v62 = vpop.eup %6495  ;;  %6513 = vpow2.f32 %v5007_v26  ;;  %v5006_v2 = vmul.f32 -1.442695, %v3920_v24  ;;  %5917 = vmatprep.mubr.f32.mxu1 %v6494_v37 }
 0x37c   : > { %v6498_v20 = vpop.eup %6497  ;;  %6515 = vrcp.f32 %v4171_v25  ;;  %v4170_v11 = vadd.f32 1.0, %v6496_v62  ;;  %5918 = vmatmul.mubr.f32.gmra.mxu1 %v6490_v27 }
 0x37d   : > { %6517 = vpow2.f32 %v5006_v2  ;;  %v3936_v35 = vmul.f32 %v6498_v20, %v8036_v46  ;;  %v3947_v20 = vand.u32 2147483648, %v8060_v39 }
 0x37e   : > { %v6500_v63 = vpop.eup %6499  ;;  %6519 = vrcp.f32 %v4170_v11  ;;  %v8068_v58 = vpop.f32.mrf.mxu1 }
 0x37f   : > { %v3938_v34 = vsel %vm3937_vm9, %v8036_v46, %v3936_v35  ;;  %v3929_v44 = vmul.f32 %v6500_v63, %v8044_v40  ;;  %6521 = vrsqrt.f32 %v8068_v58  ;;  %vm3965_vm1 = vcmp.eq.f32.partialorder %v8068_v58, inf }
 0x380   : > { %v6502_v16 = vpop.eup %6501  ;;  %v3941_v14 = vsel %vm3939_vm10, %v3940_v18, %v3938_v34  ;;  %v8077_v0 = vpop.f32.mrf.mxu1  ;;  %vm3967_vm2 = vcmp.eq.f32.partialorder %v8068_v58, 0.0 }
 0x381   : > { %v6504_v41 = vpop.eup %6503  ;;  %v4173_v42 = vadd.f32 1.0, %v6502_v16  ;;  %v5009_v48 = vmul.f32 -1.442695, %v3941_v14  ;;  %v3931_v36 = vsel %vm3930_vm11, %v8044_v40, %v3929_v44  ;;  %6523 = vrsqrt.f32 %v8077_v0 }
 0x382   : > { %v6506_v46 = vpop.eup %6505  ;;  %v3934_v13 = vsel %vm3932_vm12, %v3933_v12, %v3931_v36  ;;  %v3954_v40 = vand.u32 2147483648, %v8052_v23  ;;  %vm3958_vm3 = vcmp.eq.f32.partialorder %v8077_v0, inf  ;;  %vm3960_vm4 = vcmp.eq.f32.partialorder %v8077_v0, 0.0 }
 0x383   : > { %v6508_v27 = vpop.eup %6507  ;;  %6525 = vrcp.f32 %v4173_v42  ;;  %v4172_v28 = vadd.f32 1.0, %v6506_v46  ;;  %v5008_v15 = vmul.f32 -1.442695, %v3934_v13 }
 0x384   : > { %v6510_v1 = vpop.eup %6509  ;;  %6527 = vpow2.f32 %v5009_v48  ;;  %5920 = vmatprep.mubr.f32.mxu1 %v6508_v27 }
 0x385   : > { %6529 = vrcp.f32 %v4172_v28  ;;  %v3950_v26 = vmul.f32 %v6510_v1, %v8052_v23  ;;  %5921 = vmatmul.mubr.f32.gmra.mxu1 %v6504_v41 }
 0x386   : > { %v6512_v55 = vpop.eup %6511  ;;  %6531 = vpow2.f32 %v5008_v15  ;;  %v8084_v37 = vpop.f32.mrf.mxu1  ;;  %v3961_v15 = vand.u32 2147483648, %v8077_v0 }
 0x387   : > { %v3952_v25 = vsel %vm3951_vm13, %v8052_v23, %v3950_v26  ;;  %v3943_v24 = vmul.f32 %v6512_v55, %v8060_v39  ;;  %6533 = vrsqrt.f32 %v8084_v37  ;;  %vm3979_vm5 = vcmp.eq.f32.partialorder %v8084_v37, inf }
 0x388   : > { %v6514_v62 = vpop.eup %6513  ;;  %v3955_v2 = vsel %vm3953_vm14, %v3954_v40, %v3952_v25  ;;  %v8093_v11 = vpop.f32.mrf.mxu1  ;;  %vm3981_vm6 = vcmp.eq.f32.partialorder %v8084_v37, 0.0 }
 0x389   : > { %v6516_v35 = vpop.eup %6515  ;;  %v4175_v63 = vadd.f32 1.0, %v6514_v62  ;;  %v5011_v18 = vmul.f32 -1.442695, %v3955_v2  ;;  %v3945_v34 = vsel %vm3944_vm15, %v8060_v39, %v3943_v24  ;;  %6535 = vrsqrt.f32 %v8093_v11 }
 0x38a   : > { %v6518_v23 = vpop.eup %6517  ;;  %v3948_v44 = vsel %vm3946_vm0, %v3947_v20, %v3945_v34  ;;  %v3968_v39 = vand.u32 2147483648, %v8068_v58  ;;  %vm3972_vm7 = vcmp.eq.f32.partialorder %v8093_v11, inf  ;;  %vm3974_vm8 = vcmp.eq.f32.partialorder %v8093_v11, 0.0 }
 0x38b   : > { %v6520_v16 = vpop.eup %6519  ;;  %6537 = vrcp.f32 %v4175_v63  ;;  %v4174_v14 = vadd.f32 1.0, %v6518_v23  ;;  %v5010_v12 = vmul.f32 -1.442695, %v3948_v44 }
 0x38c   : > { %v6522_v41 = vpop.eup %6521  ;;  %6539 = vpow2.f32 %v5011_v18  ;;  %5923 = vmatprep.mubr.f32.mxu1 %v6520_v16 }
 0x38d   : > { %6541 = vrcp.f32 %v4174_v14  ;;  %v3964_v42 = vmul.f32 %v6522_v41, %v8068_v58  ;;  %5924 = vmatmul.mubr.f32.gmra.mxu1 %v6516_v35 }
 0x38e   : > { %v6524_v48 = vpop.eup %6523  ;;  %6543 = vpow2.f32 %v5010_v12  ;;  %v8100_v36 = vpop.f32.mrf.mxu1  ;;  %v3975_v12 = vand.u32 2147483648, %v8093_v11 }
 0x38f   : > { %v3966_v46 = vsel %vm3965_vm1, %v8068_v58, %v3964_v42  ;;  %v3957_v13 = vmul.f32 %v6524_v48, %v8077_v0  ;;  %6545 = vrsqrt.f32 %v8100_v36  ;;  %vm3993_vm9 = vcmp.eq.f32.partialorder %v8100_v36, inf }
 0x390   : > { %v6526_v27 = vpop.eup %6525  ;;  %v3969_v28 = vsel %vm3967_vm2, %v3968_v39, %v3966_v46  ;;  %v8108_v1 = vpop.f32.mrf.mxu1  ;;  %vm3995_vm10 = vcmp.eq.f32.partialorder %v8100_v36, 0.0 }
 0x391   : > { %v6528_v26 = vpop.eup %6527  ;;  %v5013_v55 = vmul.f32 -1.442695, %v3969_v28  ;;  %v3959_v40 = vsel %vm3958_vm3, %v8077_v0, %v3957_v13  ;;  %6547 = vrsqrt.f32 %v8108_v1  ;;  %v3982_v0 = vand.u32 2147483648, %v8084_v37 }
 0x392   : > { %v6530_v58 = vpop.eup %6529  ;;  %v4177_v25 = vadd.f32 1.0, %v6528_v26  ;;  %v3962_v24 = vsel %vm3960_vm4, %v3961_v15, %v3959_v40  ;;  %vm3986_vm11 = vcmp.eq.f32.partialorder %v8108_v1, inf  ;;  %vm3988_vm12 = vcmp.eq.f32.partialorder %v8108_v1, 0.0 }
 0x393   : > { %v6532_v62 = vpop.eup %6531  ;;  %6549 = vpow2.f32 %v5013_v55  ;;  %v5012_v2 = vmul.f32 -1.442695, %v3962_v24  ;;  %5926 = vmatprep.mubr.f32.mxu1 %v6530_v58 }
 0x394   : > { %v6534_v20 = vpop.eup %6533  ;;  %6551 = vrcp.f32 %v4177_v25  ;;  %v4176_v35 = vadd.f32 1.0, %v6532_v62  ;;  %5927 = vmatmul.mubr.f32.gmra.mxu1 %v6526_v27 }
 0x395   : > { %6553 = vpow2.f32 %v5012_v2  ;;  %v3978_v63 = vmul.f32 %v6534_v20, %v8084_v37  ;;  %v3989_v20 = vand.u32 2147483648, %v8108_v1 }
 0x396   : > { %v6536_v18 = vpop.eup %6535  ;;  %6555 = vrcp.f32 %v4176_v35  ;;  %v8116_v34 = vpop.f32.mrf.mxu1 }
 0x397   : > { %v3980_v23 = vsel %vm3979_vm5, %v8084_v37, %v3978_v63  ;;  %v3971_v44 = vmul.f32 %v6536_v18, %v8093_v11  ;;  %6557 = vrsqrt.f32 %v8116_v34  ;;  %vm4007_vm13 = vcmp.eq.f32.partialorder %v8116_v34, inf }
 0x398   : > { %v6538_v16 = vpop.eup %6537  ;;  %v3983_v14 = vsel %vm3981_vm6, %v3982_v0, %v3980_v23  ;;  %v8124_v41 = vpop.f32.mrf.mxu1  ;;  %vm4009_vm14 = vcmp.eq.f32.partialorder %v8116_v34, 0.0 }
 0x399   : > { %v6540_v42 = vpop.eup %6539  ;;  %v5015_v48 = vmul.f32 -1.442695, %v3983_v14  ;;  %v3973_v39 = vsel %vm3972_vm7, %v8093_v11, %v3971_v44  ;;  %6559 = vrsqrt.f32 %v8124_v41  ;;  %v3996_v11 = vand.u32 2147483648, %v8100_v36 }
 0x39a   : > { %v6542_v37 = vpop.eup %6541  ;;  %v4179_v46 = vadd.f32 1.0, %v6540_v42  ;;  %v3976_v13 = vsel %vm3974_vm8, %v3975_v12, %v3973_v39  ;;  %vm4000_vm15 = vcmp.eq.f32.partialorder %v8124_v41, inf  ;;  %vm4002_vm0 = vcmp.eq.f32.partialorder %v8124_v41, 0.0 }
 0x39b   : > { %v6544_v27 = vpop.eup %6543  ;;  %6561 = vpow2.f32 %v5015_v48  ;;  %v5014_v28 = vmul.f32 -1.442695, %v3976_v13  ;;  %5929 = vmatprep.mubr.f32.mxu1 %v6542_v37 }
 0x39c   : > { %v6546_v15 = vpop.eup %6545  ;;  %6563 = vrcp.f32 %v4179_v46  ;;  %v4178_v26 = vadd.f32 1.0, %v6544_v27  ;;  %5930 = vmatmul.mubr.f32.gmra.mxu1 %v6538_v16 }
 0x39d   : > { %6565 = vpow2.f32 %v5014_v28  ;;  %v3992_v55 = vmul.f32 %v6546_v15, %v8100_v36  ;;  %v4003_v15 = vand.u32 2147483648, %v8124_v41 }
 0x39e   : > { %v6548_v40 = vpop.eup %6547  ;;  %6567 = vrcp.f32 %v4178_v26  ;;  %v8132_v58 = vpop.f32.mrf.mxu1 }
 0x39f   : > { %v3994_v25 = vsel %vm3993_vm9, %v8100_v36, %v3992_v55  ;;  %v3985_v24 = vmul.f32 %v6548_v40, %v8108_v1  ;;  %6569 = vrsqrt.f32 %v8132_v58  ;;  %vm4021_vm1 = vcmp.eq.f32.partialorder %v8132_v58, inf }
 0x3a0   : > { %v6550_v62 = vpop.eup %6549  ;;  %v3997_v2 = vsel %vm3995_vm10, %v3996_v11, %v3994_v25  ;;  %v8141_v35 = vpop.f32.mrf.mxu1  ;;  %vm4023_vm2 = vcmp.eq.f32.partialorder %v8132_v58, 0.0 }
 0x3a1   : > { %v6552_v63 = vpop.eup %6551  ;;  %v4181_v18 = vadd.f32 1.0, %v6550_v62  ;;  %v5017_v0 = vmul.f32 -1.442695, %v3997_v2  ;;  %v3987_v23 = vsel %vm3986_vm11, %v8108_v1, %v3985_v24  ;;  %6571 = vrsqrt.f32 %v8141_v35 }
 0x3a2   : > { %v6554_v36 = vpop.eup %6553  ;;  %v3990_v44 = vsel %vm3988_vm12, %v3989_v20, %v3987_v23  ;;  %v4010_v1 = vand.u32 2147483648, %v8116_v34  ;;  %vm4014_vm3 = vcmp.eq.f32.partialorder %v8141_v35, inf  ;;  %vm4016_vm4 = vcmp.eq.f32.partialorder %v8141_v35, 0.0 }
 0x3a3   : > { %v6556_v16 = vpop.eup %6555  ;;  %6573 = vrcp.f32 %v4181_v18  ;;  %v4180_v14 = vadd.f32 1.0, %v6554_v36  ;;  %v5016_v12 = vmul.f32 -1.442695, %v3990_v44 }
 0x3a4   : > { %v6558_v42 = vpop.eup %6557  ;;  %6575 = vpow2.f32 %v5017_v0  ;;  %5932 = vmatprep.mubr.f32.mxu1 %v6556_v16 }
 0x3a5   : > { %6577 = vrcp.f32 %v4180_v14  ;;  %v4006_v48 = vmul.f32 %v6558_v42, %v8116_v34  ;;  %5933 = vmatmul.mubr.f32.gmra.mxu1 %v6552_v63 }
 0x3a6   : > { %v6560_v39 = vpop.eup %6559  ;;  %6579 = vpow2.f32 %v5016_v12  ;;  %v8148_v37 = vpop.f32.mrf.mxu1  ;;  %v4017_v12 = vand.u32 2147483648, %v8141_v35 }
 0x3a7   : > { %v4008_v46 = vsel %vm4007_vm13, %v8116_v34, %v4006_v48  ;;  %v3999_v13 = vmul.f32 %v6560_v39, %v8124_v41  ;;  %6581 = vrsqrt.f32 %v8148_v37  ;;  %vm4035_vm5 = vcmp.eq.f32.partialorder %v8148_v37, inf }
 0x3a8   : > { %v6562_v27 = vpop.eup %6561  ;;  %v4011_v28 = vsel %vm4009_vm14, %v4010_v1, %v4008_v46  ;;  %v8157_v26 = vpop.f32.mrf.mxu1  ;;  %vm4037_vm6 = vcmp.eq.f32.partialorder %v8148_v37, 0.0 }
 0x3a9   : > { %v6564_v55 = vpop.eup %6563  ;;  %v4183_v40 = vadd.f32 1.0, %v6562_v27  ;;  %v5019_v11 = vmul.f32 -1.442695, %v4011_v28  ;;  %v4001_v25 = vsel %vm4000_vm15, %v8124_v41, %v3999_v13  ;;  %6583 = vrsqrt.f32 %v8157_v26 }
 0x3aa   : > { %v6566_v34 = vpop.eup %6565  ;;  %v4004_v24 = vsel %vm4002_vm0, %v4003_v15, %v4001_v25  ;;  %v4024_v41 = vand.u32 2147483648, %v8132_v58  ;;  %vm4028_vm7 = vcmp.eq.f32.partialorder %v8157_v26, inf  ;;  %vm4030_vm8 = vcmp.eq.f32.partialorder %v8157_v26, 0.0 }
 0x3ab   : > { %v6568_v62 = vpop.eup %6567  ;;  %6585 = vrcp.f32 %v4183_v40  ;;  %v4182_v2 = vadd.f32 1.0, %v6566_v34  ;;  %v5018_v20 = vmul.f32 -1.442695, %v4004_v24 }
 0x3ac   : > { %v6570_v63 = vpop.eup %6569  ;;  %6587 = vpow2.f32 %v5019_v11  ;;  %5935 = vmatprep.mubr.f32.mxu1 %v6568_v62 }
 0x3ad   : > { %6589 = vrcp.f32 %v4182_v2  ;;  %v4020_v18 = vmul.f32 %v6570_v63, %v8132_v58  ;;  %5936 = vmatmul.mubr.f32.gmra.mxu1 %v6564_v55 }
 0x3ae   : > { %v6572_v0 = vpop.eup %6571  ;;  %6591 = vpow2.f32 %v5018_v20  ;;  %v8164_v23 = vpop.f32.mrf.mxu1  ;;  %v4031_v20 = vand.u32 2147483648, %v8157_v26 }
 0x3af   : > { %v4022_v36 = vsel %vm4021_vm1, %v8132_v58, %v4020_v18  ;;  %v4013_v44 = vmul.f32 %v6572_v0, %v8141_v35  ;;  %6593 = vrsqrt.f32 %v8164_v23  ;;  %vm4049_vm9 = vcmp.eq.f32.partialorder %v8164_v23, inf }
 0x3b0   : > { %v6574_v16 = vpop.eup %6573  ;;  %v4025_v14 = vsel %vm4023_vm2, %v4024_v41, %v4022_v36  ;;  %v8172_v42 = vpop.f32.mrf.mxu1  ;;  %vm4051_vm10 = vcmp.eq.f32.partialorder %v8164_v23, 0.0 }
 0x3b1   : > { %v6576_v48 = vpop.eup %6575  ;;  %v5021_v39 = vmul.f32 -1.442695, %v4025_v14  ;;  %v4015_v1 = vsel %vm4014_vm3, %v8141_v35, %v4013_v44  ;;  %6595 = vrsqrt.f32 %v8172_v42  ;;  %v4038_v35 = vand.u32 2147483648, %v8148_v37 }
 0x3b2   : > { %v6578_v58 = vpop.eup %6577  ;;  %v4185_v46 = vadd.f32 1.0, %v6576_v48  ;;  %v4018_v13 = vsel %vm4016_vm4, %v4017_v12, %v4015_v1  ;;  %vm4042_vm11 = vcmp.eq.f32.partialorder %v8172_v42, inf  ;;  %vm4044_vm12 = vcmp.eq.f32.partialorder %v8172_v42, 0.0 }
 0x3b3   : > { %v6580_v27 = vpop.eup %6579  ;;  %6597 = vpow2.f32 %v5021_v39  ;;  %v5020_v28 = vmul.f32 -1.442695, %v4018_v13  ;;  %5938 = vmatprep.mubr.f32.mxu1 %v6578_v58 }
 0x3b4   : > { %v6582_v15 = vpop.eup %6581  ;;  %6599 = vrcp.f32 %v4185_v46  ;;  %v4184_v55 = vadd.f32 1.0, %v6580_v27  ;;  %5939 = vmatmul.mubr.f32.gmra.mxu1 %v6574_v16 }
 0x3b5   : > { %6601 = vpow2.f32 %v5020_v28  ;;  %v4034_v40 = vmul.f32 %v6582_v15, %v8148_v37  ;;  %v4045_v28 = vand.u32 2147483648, %v8172_v42 }
 0x3b6   : > { %v6584_v11 = vpop.eup %6583  ;;  %6603 = vrcp.f32 %v4184_v55  ;;  %v8180_v25 = vpop.f32.mrf.mxu1 }
 0x3b7   : > { %v4036_v34 = vsel %vm4035_vm5, %v8148_v37, %v4034_v40  ;;  %v4027_v24 = vmul.f32 %v6584_v11, %v8157_v26  ;;  %6605 = vrsqrt.f32 %v8180_v25  ;;  %vm4063_vm13 = vcmp.eq.f32.partialorder %v8180_v25, inf }
 0x3b8   : > { %v6586_v62 = vpop.eup %6585  ;;  %v4039_v2 = vsel %vm4037_vm6, %v4038_v35, %v4036_v34  ;;  %v8188_v63 = vpop.f32.mrf.mxu1  ;;  %vm4065_vm14 = vcmp.eq.f32.partialorder %v8180_v25, 0.0 }
 0x3b9   : > { %v6588_v18 = vpop.eup %6587  ;;  %v5023_v0 = vmul.f32 -1.442695, %v4039_v2  ;;  %v4029_v41 = vsel %vm4028_vm7, %v8157_v26, %v4027_v24  ;;  %6607 = vrsqrt.f32 %v8188_v63  ;;  %v4052_v26 = vand.u32 2147483648, %v8164_v23 }
 0x3ba   : > { %v6590_v37 = vpop.eup %6589  ;;  %v4032_v36 = vsel %vm4030_vm8, %v4031_v20, %v4029_v41  ;;  %v4187_v16 = vadd.f32 1.0, %v6588_v18  ;;  %vm4056_vm15 = vcmp.eq.f32.partialorder %v8188_v63, inf  ;;  %vm4058_vm0 = vcmp.eq.f32.partialorder %v8188_v63, 0.0 }
 0x3bb   : > { %v6592_v44 = vpop.eup %6591  ;;  %6609 = vpow2.f32 %v5023_v0  ;;  %v5022_v14 = vmul.f32 -1.442695, %v4032_v36  ;;  %5941 = vmatprep.mubr.f32.mxu1 %v6590_v37  ;;  %v4066_v0 = vand.u32 2147483648, %v8180_v25 }
 0x3bc   : > { %v6594_v12 = vpop.eup %6593  ;;  %v4186_v48 = vadd.f32 1.0, %v6592_v44  ;;  %5942 = vmatmul.mubr.f32.gmra.mxu1 %v6586_v62  ;;  %v4059_v44 = vand.u32 2147483648, %v8188_v63 }
 0x3bd   : > { %6611 = vpow2.f32 %v5022_v14  ;;  %v4048_v39 = vmul.f32 %v6594_v12, %v8164_v23 }
 0x3be   : > { %v6596_v1 = vpop.eup %6595  ;;  %6613 = vrcp.f32 %v4186_v48 }
 0x3bf   : > { %6615 = vrcp.f32 %v4187_v16  ;;  %v4050_v58 = vsel %vm4049_vm9, %v8164_v23, %v4048_v39  ;;  %v4041_v46 = vmul.f32 %v6596_v1, %v8172_v42 }
 0x3c0   : > { %v6598_v13 = vpop.eup %6597  ;;  %v4053_v27 = vsel %vm4051_vm10, %v4052_v26, %v4050_v58 }
 0x3c1   : > { %v6600_v15 = vpop.eup %6599  ;;  %v4189_v55 = vadd.f32 1.0, %v6598_v13  ;;  %v5025_v40 = vmul.f32 -1.442695, %v4053_v27  ;;  %v4043_v11 = vsel %vm4042_vm11, %v8172_v42, %v4041_v46 }
 0x3c2   : > { %v6602_v35 = vpop.eup %6601  ;;  %v4046_v34 = vsel %vm4044_vm12, %v4045_v28, %v4043_v11 }
 0x3c3   : > { %v6604_v24 = vpop.eup %6603  ;;  %6617 = vrcp.f32 %v4189_v55  ;;  %v4188_v23 = vadd.f32 1.0, %v6602_v35  ;;  %v5024_v62 = vmul.f32 -1.442695, %v4046_v34 }
 0x3c4   : > { %v6606_v2 = vpop.eup %6605  ;;  %6619 = vpow2.f32 %v5025_v40  ;;  %5944 = vmatprep.mubr.f32.mxu1 %v6604_v24 }
 0x3c5   : > { %6621 = vrcp.f32 %v4188_v23  ;;  %v4062_v20 = vmul.f32 %v6606_v2, %v8180_v25  ;;  %5945 = vmatmul.mubr.f32.gmra.mxu1 %v6600_v15 }
 0x3c6   : > { %v6608_v18 = vpop.eup %6607  ;;  %6623 = vpow2.f32 %v5024_v62 }
 0x3c7   : > { %v4064_v42 = vsel %vm4063_vm13, %v8180_v25, %v4062_v20  ;;  %v4055_v41 = vmul.f32 %v6608_v18, %v8188_v63 }
 0x3c8   : > { %v6610_v37 = vpop.eup %6609  ;;  %v4067_v36 = vsel %vm4065_vm14, %v4066_v0, %v4064_v42 }
 0x3c9   : > { %v4191_v16 = vadd.f32 1.0, %v6610_v37  ;;  %v5027_v14 = vmul.f32 -1.442695, %v4067_v36  ;;  %v4057_v12 = vsel %vm4056_vm15, %v8188_v63, %v4055_v41 }
 0x3ca   : > { %v6612_v48 = vpop.eup %6611  ;;  %v4060_v39 = vsel %vm4058_vm0, %v4059_v44, %v4057_v12 }
 0x3cb   : > { %v6614_v1 = vpop.eup %6613  ;;  %6625 = vrcp.f32 %v4191_v16  ;;  %v4190_v26 = vadd.f32 1.0, %v6612_v48  ;;  %v5026_v25 = vmul.f32 -1.442695, %v4060_v39 }
 0x3cc   : > { %v6616_v58 = vpop.eup %6615  ;;  %6627 = vpow2.f32 %v5027_v14  ;;  %5947 = vmatprep.mubr.f32.mxu1 %v6614_v1 }
 0x3cd   : > { %6629 = vrcp.f32 %v4190_v26  ;;  %5948 = vmatmul.mubr.f32.gmra.mxu1 %v6616_v58 }
 0x3ce   : > { %6631 = vpow2.f32 %v5026_v25 }
 0x3d0   : > { %v6618_v46 = vpop.eup %6617 }
 0x3d1   : > { %v6620_v13 = vpop.eup %6619 }
 0x3d2   : > { %v6622_v27 = vpop.eup %6621  ;;  %v4193_v15 = vadd.f32 1.0, %v6620_v13 }
 0x3d3   : > { %v6624_v28 = vpop.eup %6623  ;;  %5950 = vmatprep.mubr.f32.mxu1 %v6622_v27 }
 0x3d4   : > { %v4192_v55 = vadd.f32 1.0, %v6624_v28  ;;  %5951 = vmatmul.mubr.f32.gmra.mxu1 %v6618_v46 }
 0x3d6   : > { %6633 = vrcp.f32 %v4192_v55 }
 0x3d7   : > { %6635 = vrcp.f32 %v4193_v15 }
 0x3d8   : > { %v6626_v63 = vpop.eup %6625 }
 0x3d9   : > { %v6628_v40 = vpop.eup %6627 }
 0x3da   : > { %v6630_v11 = vpop.eup %6629  ;;  %v4195_v34 = vadd.f32 1.0, %v6628_v40 }
 0x3db   : > { %v6632_v35 = vpop.eup %6631  ;;  %5953 = vmatprep.mubr.f32.mxu1 %v6630_v11 }
 0x3dc   : > { %v4194_v24 = vadd.f32 1.0, %v6632_v35  ;;  %5954 = vmatmul.mubr.f32.gmra.mxu1 %v6626_v63 }
 0x3de   : > { %6637 = vrcp.f32 %v4194_v24 }
 0x3df   : > { %6639 = vrcp.f32 %v4195_v34 }
 0x3e3   : > { %v6634_v23 = vpop.eup %6633 }
 0x3e4   : > { %v6636_v62 = vpop.eup %6635  ;;  %5956 = vmatprep.mubr.f32.mxu1 %v6634_v23 }
 0x3e5   : > { %5957 = vmatmul.mubr.f32.gmra.mxu1 %v6636_v62 }
 0x3eb   : > { %v6638_v2 = vpop.eup %6637 }
 0x3ec   : > { %v6640_v20 = vpop.eup %6639  ;;  %5959 = vmatprep.mubr.f32.mxu1 %v6638_v2 }
 0x3ed   : > { %5960 = vmatmul.mubr.f32.gmra.mxu1 %v6640_v20 }
 0x434   : > { %v5916_v18 = vpop.f32.mrf.mxu1 }
 0x435   : > { %v4502_v0 = vmul.f32 %v5916_v18, %v7750_v8 }
 0x436   : > { %v4342_v42 = vpop.f32.mrf.mxu1 }
 0x437   : > { %4534 = vst [vmem:[%s8217_s20 + $0x8] sm:$0xff] %v4502_v0  ;;  %v4501_v41 = vmul.f32 %v4342_v42, %v7741_v22 }
 0x439   : > { %4533 = vst [vmem:[%s8217_s20] sm:$0xff] %v4501_v41 }
 0x43c   : > { %v5919_v37 = vpop.f32.mrf.mxu1 }
 0x43d   : > { %v4504_v36 = vmul.f32 %v5919_v37, %v7768_v53 }
 0x43e   : > { %v4352_v44 = vpop.f32.mrf.mxu1 }
 0x43f   : > { %4536 = vst [vmem:[%s8217_s20 + $0x18] sm:$0xff] %v4504_v36  ;;  %v4503_v8 = vmul.f32 %v4352_v44, %v7759_v31 }
 0x441   : > { %4535 = vst [vmem:[%s8217_s20 + $0x10] sm:$0xff] %v4503_v8 }
 0x445   : > { %v5922_v16 = vpop.f32.mrf.mxu1 }
 0x446   : > { %v4506_v14 = vmul.f32 %v5922_v16, %v7786_v52 }
 0x447   : > { %v4362_v12 = vpop.f32.mrf.mxu1 }
 0x448   : > { %4538 = vst [vmem:[%s8217_s20 + $0x28] sm:$0xff] %v4506_v14  ;;  %v4505_v22 = vmul.f32 %v4362_v12, %v7777_v38 }
 0x44a   : > { %4537 = vst [vmem:[%s8217_s20 + $0x20] sm:$0xff] %v4505_v22 }
 0x44d   : > { %v5925_v48 = vpop.f32.mrf.mxu1 }
 0x44e   : > { %v4508_v53 = vmul.f32 %v5925_v48, %v7804_v17 }
 0x44f   : > { %v4372_v39 = vpop.f32.mrf.mxu1 }
 0x450   : > { %4540 = vst [vmem:[%s8217_s20 + $0x38] sm:$0xff] %v4508_v53  ;;  %v4507_v31 = vmul.f32 %v4372_v39, %v7795_v56 }
 0x452   : > { %4539 = vst [vmem:[%s8217_s20 + $0x30] sm:$0xff] %v4507_v31 }
 0x454   : > { %v5928_v1 = vpop.f32.mrf.mxu1 }
 0x455   : > { %v4510_v52 = vmul.f32 %v5928_v1, %v7822_v10 }
 0x456   : > { %v4382_v26 = vpop.f32.mrf.mxu1 }
 0x457   : > { %4542 = vst [vmem:[%s8217_s20 + $0x48] sm:$0xff] %v4510_v52  ;;  %v4509_v38 = vmul.f32 %v4382_v26, %v7813_v45 }
 0x459   : > { %4541 = vst [vmem:[%s8217_s20 + $0x40] sm:$0xff] %v4509_v38 }
 0x45c   : > { %v5931_v25 = vpop.f32.mrf.mxu1 }
 0x45d   : > { %v4512_v17 = vmul.f32 %v5931_v25, %v7840_v59 }
 0x45e   : > { %v4392_v58 = vpop.f32.mrf.mxu1 }
 0x45f   : > { %4544 = vst [vmem:[%s8217_s20 + $0x58] sm:$0xff] %v4512_v17  ;;  %v4511_v56 = vmul.f32 %v4392_v58, %v7831_v19 }
 0x461   : > { %4543 = vst [vmem:[%s8217_s20 + $0x50] sm:$0xff] %v4511_v56 }
 0x465   : > { %v5934_v46 = vpop.f32.mrf.mxu1 }
 0x466   : > { %v4514_v10 = vmul.f32 %v5934_v46, %v7858_v3 }
 0x467   : > { %v4402_v13 = vpop.f32.mrf.mxu1 }
 0x468   : > { %4546 = vst [vmem:[%s8217_s20 + $0x68] sm:$0xff] %v4514_v10  ;;  %v4513_v45 = vmul.f32 %v4402_v13, %v7849_v49 }
 0x46a   : > { %4545 = vst [vmem:[%s8217_s20 + $0x60] sm:$0xff] %v4513_v45 }
 0x46d   : > { %v5937_v27 = vpop.f32.mrf.mxu1 }
 0x46e   : > { %v4516_v59 = vmul.f32 %v5937_v27, %v7874_v54 }
 0x46f   : > { %v4412_v28 = vpop.f32.mrf.mxu1 }
 0x470   : > { %4548 = vst [vmem:[%s8217_s20 + $0x78] sm:$0xff] %v4516_v59  ;;  %v4515_v19 = vmul.f32 %v4412_v28, %v7867_v5 }
 0x472   : > { %4547 = vst [vmem:[%s8217_s20 + $0x70] sm:$0xff] %v4515_v19 }
 0x474   : > { %v5940_v15 = vpop.f32.mrf.mxu1 }
 0x475   : > { %v4518_v3 = vmul.f32 %v5940_v15, %v7888_v32 }
 0x476   : > { %v4422_v55 = vpop.f32.mrf.mxu1 }
 0x477   : > { %4550 = vst [vmem:[%s8217_s20 + $0x88] sm:$0xff] %v4518_v3  ;;  %v4517_v49 = vmul.f32 %v4422_v55, %v7881_v4 }
 0x479   : > { %4549 = vst [vmem:[%s8217_s20 + $0x80] sm:$0xff] %v4517_v49 }
 0x47c   : > { %v5943_v63 = vpop.f32.mrf.mxu1 }
 0x47d   : > { %v4520_v54 = vmul.f32 %v5943_v63, %v7902_v51 }
 0x47e   : > { %v4432_v40 = vpop.f32.mrf.mxu1 }
 0x47f   : > { %4552 = vst [vmem:[%s8217_s20 + $0x98] sm:$0xff] %v4520_v54  ;;  %v4519_v5 = vmul.f32 %v4432_v40, %v7895_v61 }
 0x481   : > { %4551 = vst [vmem:[%s8217_s20 + $0x90] sm:$0xff] %v4519_v5 }
 0x485   : > { %v5946_v11 = vpop.f32.mrf.mxu1 }
 0x486   : > { %v4522_v32 = vmul.f32 %v5946_v11, %v7916_v21 }
 0x487   : > { %v4442_v35 = vpop.f32.mrf.mxu1 }
 0x488   : > { %4554 = vst [vmem:[%s8217_s20 + $0xa8] sm:$0xff] %v4522_v32  ;;  %v4521_v4 = vmul.f32 %v4442_v35, %v7909_v57 }
 0x48a   : > { %4553 = vst [vmem:[%s8217_s20 + $0xa0] sm:$0xff] %v4521_v4 }
 0x48d   : > { %v5949_v34 = vpop.f32.mrf.mxu1 }
 0x48e   : > { %v4524_v51 = vmul.f32 %v5949_v34, %v7929_v33 }
 0x48f   : > { %v4452_v24 = vpop.f32.mrf.mxu1 }
 0x490   : > { %4556 = vst [vmem:[%s8217_s20 + $0xb8] sm:$0xff] %v4524_v51  ;;  %v4523_v61 = vmul.f32 %v4452_v24, %v7923_v29 }
 0x492   : > { %4555 = vst [vmem:[%s8217_s20 + $0xb0] sm:$0xff] %v4523_v61 }
 0x494   : > { %v5952_v23 = vpop.f32.mrf.mxu1 }
 0x495   : > { %v4526_v21 = vmul.f32 %v5952_v23, %v7948_v7 }
 0x496   : > { %v4462_v62 = vpop.f32.mrf.mxu1 }
 0x497   : > { %4558 = vst [vmem:[%s8217_s20 + $0xc8] sm:$0xff] %v4526_v21  ;;  %v4525_v57 = vmul.f32 %v4462_v62, %v7937_v9 }
 0x499   : > { %4557 = vst [vmem:[%s8217_s20 + $0xc0] sm:$0xff] %v4525_v57 }
 0x49c   : > { %v5955_v2 = vpop.f32.mrf.mxu1 }
 0x49d   : > { %v4528_v33 = vmul.f32 %v5955_v2, %v7970_v6 }
 0x49e   : > { %v4472_v20 = vpop.f32.mrf.mxu1 }
 0x49f   : > { %4560 = vst [vmem:[%s8217_s20 + $0xd8] sm:$0xff] %v4528_v33  ;;  %v4527_v29 = vmul.f32 %v4472_v20, %v7959_v30 }
 0x4a1   : > { %4559 = vst [vmem:[%s8217_s20 + $0xd0] sm:$0xff] %v4527_v29 }
 0x4a5   : > { %v5958_v18 = vpop.f32.mrf.mxu1 }
 0x4a6   : > { %v4530_v7 = vmul.f32 %v5958_v18, %v7992_v47 }
 0x4a7   : > { %v4482_v0 = vpop.f32.mrf.mxu1 }
 0x4a8   : > { %4562 = vst [vmem:[%s8217_s20 + $0xe8] sm:$0xff] %v4530_v7  ;;  %v4529_v9 = vmul.f32 %v4482_v0, %v7981_v50 }
 0x4aa   : > { %4561 = vst [vmem:[%s8217_s20 + $0xe0] sm:$0xff] %v4529_v9 }
 0x4ad   : > { %v5961_v6 = vpop.f32.mrf.mxu1 }
 0x4ae   : > { %v4532_v42 = vmul.f32 %v5961_v6, %v8014_v43 }
 0x4af   : > { %v4492_v41 = vpop.f32.mrf.mxu1 }
 0x4b0   : > { %4564 = vst [vmem:[%s8217_s20 + $0xf8] sm:$0xff] %v4532_v42  ;;  %v4531_v30 = vmul.f32 %v4492_v41, %v8003_v60 }
 0x4b2   : > { %4563 = vst [vmem:[%s8217_s20 + $0xf0] sm:$0xff] %v4531_v30 }
 0x4b3   : > { %6654 = shalt.err (!%p6651_p3)
}
 0x4b4   : > { %s6655_s30 = scalar_lea.hbm %s8284_s22, 4096  ;;  %s6659_s7 = scalar_lea.hbm %s8337_s4, 16384 }
 0x4b5   : > { %p6656_p4 = scmp.ne.s32.totalorder %s8284_s22, %s6655_s30  ;;  %p6660_p9 = scmp.lt.s32.totalorder %s8284_s22, %s8337_s4 }
 0x4b6   : > { %p6661_p10 = scmp.lt.s32.totalorder %s6659_s7, %s6655_s30 }
 0x4b7   : > { %p6657_p7 = pnand %p6656_p4, %p6770_p5 }
 0x4b8   : > { %p6662_p11 = por %p6661_p10, %p6660_p9 }
 0x4b9   : > { %p6658_p8 = pneg %p6657_p7 }
 0x4bb   : > { %p6663_p12 = pnand %p6662_p11, %p6658_p8 }
 0x4bd   : > { %6666 = shalt.err (!%p6663_p12)
}
 0x4be   : > { %s6705_s10 = smov 128   ;;  %s6706_s20 = smov 8  }
 0x4bf   : > { %5963 = dma.vmem_to_hbm [thread:$0]  (%p6770_p5), %s8286_s12, 4096, %s8284_s22, %s8293_s19, %s6705_s10, %s6705_s10, %s6706_s20  }
 0x4c0 PF: > { %p5969_p13 = scmp.ge.s32.totalorder %s6701_s18, 2  ;;  %s4594_s11 = sand.u32 1, %s6689_s15  }
 0x4c1   : > { %s4595_s14 = scalar_lea.sflag [#allocation3], %s4594_s11 }
 0x4c2   : > { %p5966_p0 = pnand %p5969_p13, %p6774_p6 }
 0x4c4   : > { %p5967_p1 = pneg %p5966_p0 }
 0x4c6   : > { %6684 = dma.done.wait (%p5967_p1), %s4595_s14, 4096  }
 0x4c7   : > { %6686 = vsyncadd (%p5967_p1), %s4595_s14, 4294963200  ;;  %p14_p2 = scmp.ge.s32.totalorder %s6757_s21, 6   ;;  %s8370_s15 = smov %s6693_s16 }
 0x4c8   : > { %s8371_s16 = smov %s6697_s17  ;;  %s8372_s17 = smov %s6768_s24 }
 0x4c9   : > { %s8373_s18 = smov %s6757_s21  ;;  %16 = sbr.rel (!%p14_p2) target bundleno = 3 (0x3), region = 71 }
 0x4ce   :  { %4600 = vsyncpa [#allocation3], 1 }
 0x4cf   :  { %4602 = vsyncpa [#allocation3 + $0x1], 1 }

</bundles_post_ra>
